<compile_context>
chip_gen: v7x
topology: tpu7x:2x2x1
jax: 0.10.0
libtpu: 0.0.40
codegen_flags: <defaults>
</compile_context>

<pallas_src>
import jax
import jax.numpy as jnp
from jax import lax
from jax.experimental import pallas as pl
from jax.experimental.pallas import tpu as pltpu

WIDTH = 32       # MLP hidden width
DEPTH = 2        # Linear(4,W), ReLU, (DEPTH-1)x[Linear(W,W), ReLU], Linear(W,3)
TN_MAX = 8192    # max points (lanes) per grid step; multiple of 128


def _mac_outer(w, v, n_terms):
    """sum_k w[:, k:k+1] * v[k:k+1, :]  (exact f32 outer-product MAC on the VPU)."""
    acc = w[:, 0:1] * v[0:1, :]
    for k in range(1, n_terms):
        acc = acc + w[:, k:k+1] * v[k:k+1, :]
    return acc


def beam_bender_kernel(x_ref, w0_ref, b0_ref, w1h_ref, w1l_ref, b1_ref,
                       w2_ref, b2_ref, o_ref):
    # x: (4, TN) feature-major tile. The t*10 scale is already folded into w0,
    # so x is used directly both as the matmul input and the xyz residual.
    x = x_ref[...]

    # --- Layer 0: (4 -> W) on the VPU, exact f32 (K=4 would waste the MXU). ---
    h = _mac_outer(w0_ref[...], x, 4) + b0_ref[...]          # (W, TN)
    h = jnp.maximum(h, 0.0)

    # --- Layer 1: (W -> W) on the MXU, 3-pass bf16 hi/lo split (== HIGH). -----
    h_hi = h.astype(jnp.bfloat16)
    h_lo = (h - h_hi.astype(jnp.float32)).astype(jnp.bfloat16)
    h1 = jnp.dot(w1h_ref[...], h_hi, preferred_element_type=jnp.float32)
    h1 = h1 + jnp.dot(w1h_ref[...], h_lo, preferred_element_type=jnp.float32)
    h1 = h1 + jnp.dot(w1l_ref[...], h_hi, preferred_element_type=jnp.float32)
    h1 = jnp.maximum(h1 + b1_ref[...], 0.0)                   # (W, TN)

    # --- Layer 2: (W -> 3) on the VPU, exact f32 (M=3 would waste the MXU). ---
    uvw = _mac_outer(w2_ref[...], h1, WIDTH) + b2_ref[...]    # (3, TN)

    # xyz - uvw  (xyz = the unscaled first 3 feature rows); lane-dense store.
    o_ref[...] = x[:3, :] - uvw


def _pick_tile(n):
    """Large lane tile (amortize ~0.35us/grid-step), but keep >= 2 grid steps
    whenever possible so both v7x TensorCores get work."""
    if n <= 128:
        return 128
    half = -(-((n + 1) // 2) // 128) * 128   # ceil(ceil(n/2)/128) * 128
    return min(TN_MAX, half)


@jax.jit
def beam_bender(xyzt, params):
    """xyzt: (N, 4) float32. params: torch-layout weights (out,in) / biases (out,1)."""
    N, F = xyzt.shape
    assert F == 4

    # Fold the in-place `xyzt[..., -1] *= 10` into the first layer's weights:
    # the xyz residual uses the unscaled columns, so only the MLP sees t*10.
    w0 = params["w0"].at[:, 3].multiply(10.0)       # (W, 4)
    b0 = params["b0"]                               # (W, 1)
    w1 = params["w1"]                               # (W, W)
    b1 = params["b1"]                               # (W, 1)
    w2 = params["w2"]                               # (3, W)
    b2 = params["b2"]                               # (3, 1)

    # hi/lo bf16 split of w1 for the 3-pass f32 emulation (done once, host side).
    w1_hi = w1.astype(jnp.bfloat16)
    w1_lo = (w1 - w1_hi.astype(jnp.float32)).astype(jnp.bfloat16)

    # Feature-major, lane-dense layout: (4, N) in, (3, N) out.
    tn = _pick_tile(N)
    n_pad = pl.cdiv(N, tn) * tn
    x = xyzt.T                                      # (4, N)
    if n_pad != N:
        x = jnp.pad(x, ((0, 0), (0, n_pad - N)))    # masked tail via wrapper padding

    const = lambda i: (0, 0)   # weights/biases: whole array, fetched once

    out = pl.pallas_call(
        beam_bender_kernel,
        out_shape=jax.ShapeDtypeStruct((3, n_pad), jnp.float32),
        grid_spec=pltpu.PrefetchScalarGridSpec(
            num_scalar_prefetch=0,
            grid=(n_pad // tn,),
            in_specs=[
                pl.BlockSpec((4, tn), lambda i: (0, i)),   # lane-dense point tile
                pl.BlockSpec(w0.shape, const),
                pl.BlockSpec(b0.shape, const),
                pl.BlockSpec(w1_hi.shape, const),
                pl.BlockSpec(w1_lo.shape, const),
                pl.BlockSpec(b1.shape, const),
                pl.BlockSpec(w2.shape, const),
                pl.BlockSpec(b2.shape, const),
            ],
            out_specs=pl.BlockSpec((3, tn), lambda i: (0, i)),
        ),
        compiler_params=pltpu.CompilerParams(
            dimension_semantics=("parallel",)),   # lets v7x split steps across its 2 TCs
    )(x, w0, b0, w1_hi, w1_lo, b1, w2, b2)

    return out[:, :N].T                            # (N, 3)


def init_params(key, width=WIDTH):
    """Deterministic synthetic init mimicking the torch module:
    weights ~ U(-0.2, 0.2); biases ~ U(-1/sqrt(fan_in), 1/sqrt(fan_in)).
    Weights stored in torch layout (out_features, in_features); biases (out, 1)."""
    ks = jax.random.split(key, 6)

    def lin(kw, kb, fan_in, fan_out):
        w = jax.random.uniform(kw, (fan_out, fan_in), jnp.float32, -0.2, 0.2)
        bound = 1.0 / jnp.sqrt(jnp.float32(fan_in))
        b = jax.random.uniform(kb, (fan_out, 1), jnp.float32, -bound, bound)
        return w, b

    w0, b0 = lin(ks[0], ks[1], 4, width)
    w1, b1 = lin(ks[2], ks[3], width, width)
    w2, b2 = lin(ks[4], ks[5], width, 3)
    return {"w0": w0, "b0": b0, "w1": w1, "b1": b1, "w2": w2, "b2": b2}


def beam_bender_ref(xyzt, params):
    """Pure-JAX reference of the torch forward pass (full f32 precision)."""
    hp = lax.Precision.HIGHEST
    xs = xyzt.at[..., -1].multiply(10.0)
    xyz = xyzt[..., :3]
    h = jnp.maximum(jnp.dot(xs, params["w0"].T, precision=hp) + params["b0"].T, 0.0)
    h = jnp.maximum(jnp.dot(h, params["w1"].T, precision=hp) + params["b1"].T, 0.0)
    uvw = jnp.dot(h, params["w2"].T, precision=hp) + params["b2"].T
    return xyz - uvw


if __name__ == "__main__":
    key = jax.random.PRNGKey(0)
    kx, kp = jax.random.split(key)

    # N deliberately NOT a multiple of 128 to exercise the padded tail; the
    # tile picker gives tn=4096 -> pads to 8192 -> a 2-step grid (>=2 for v7x).
    N = 8000  # beam sample points
    xyzt = jax.random.uniform(kx, (N, 4), jnp.float32, -1.0, 1.0)
    params = init_params(kp)

    out = beam_bender(xyzt, params)
    out = jax.block_until_ready(out)

    ref = beam_bender_ref(xyzt, params)
    assert out.shape == (N, 3)
    assert jnp.allclose(out, ref, atol=1e-4, rtol=1e-5)

    print("KERNEL_OK")
</pallas_src>

<mosaic_0001>
module attributes {stable_mosaic.version = 11 : i64} {
  func.func @beam_bender_kernel(%arg0: i32, %arg1: memref<4x4096xf32, #tpu.memory_space<vmem>>, %arg2: memref<32x4xf32, #tpu.memory_space<vmem>>, %arg3: memref<32x1xf32, #tpu.memory_space<vmem>>, %arg4: memref<32x32xbf16, #tpu.memory_space<vmem>>, %arg5: memref<32x32xbf16, #tpu.memory_space<vmem>>, %arg6: memref<32x1xf32, #tpu.memory_space<vmem>>, %arg7: memref<3x32xf32, #tpu.memory_space<vmem>>, %arg8: memref<3x1xf32, #tpu.memory_space<vmem>>, %arg9: memref<3x4096xf32, #tpu.memory_space<vmem>>) attributes {dimension_semantics = [#tpu.dimension_semantics<parallel>], iteration_bounds = array<i64: 2>, scalar_prefetch = 0 : i64, scratch_operands = 0 : i64, tpu.core_type = #tpu.core_type<tc>, window_params = [{transform_indices = @transform_0, window_bounds = array<i64: 4, 4096>}, {pipeline_mode = #tpu.pipeline_mode<synchronous>, transform_indices = @transform_1, window_bounds = array<i64: 32, 4>}, {pipeline_mode = #tpu.pipeline_mode<synchronous>, transform_indices = @transform_2, window_bounds = array<i64: 32, 1>}, {pipeline_mode = #tpu.pipeline_mode<synchronous>, transform_indices = @transform_3, window_bounds = array<i64: 32, 32>}, {pipeline_mode = #tpu.pipeline_mode<synchronous>, transform_indices = @transform_4, window_bounds = array<i64: 32, 32>}, {pipeline_mode = #tpu.pipeline_mode<synchronous>, transform_indices = @transform_5, window_bounds = array<i64: 32, 1>}, {pipeline_mode = #tpu.pipeline_mode<synchronous>, transform_indices = @transform_6, window_bounds = array<i64: 3, 32>}, {pipeline_mode = #tpu.pipeline_mode<synchronous>, transform_indices = @transform_7, window_bounds = array<i64: 3, 1>}, {transform_indices = @transform_8, window_bounds = array<i64: 3, 4096>}]} {
    %c0 = arith.constant 0 : index
    %c0_0 = arith.constant 0 : index
    %0 = vector.load %arg1[%c0, %c0_0] : memref<4x4096xf32, #tpu.memory_space<vmem>>, vector<4x4096xf32>
    %c0_1 = arith.constant 0 : index
    %c0_2 = arith.constant 0 : index
    %1 = vector.load %arg2[%c0_1, %c0_2] : memref<32x4xf32, #tpu.memory_space<vmem>>, vector<32x4xf32>
    %2 = vector.extract_strided_slice %1 {offsets = [0, 0], sizes = [32, 1], strides = [1, 1]} : vector<32x4xf32> to vector<32x1xf32>
    %3 = vector.extract_strided_slice %0 {offsets = [0, 0], sizes = [1, 4096], strides = [1, 1]} : vector<4x4096xf32> to vector<1x4096xf32>
    %4 = vector.broadcast %2 : vector<32x1xf32> to vector<32x4096xf32>
    %5 = vector.broadcast %3 : vector<1x4096xf32> to vector<32x4096xf32>
    %6 = arith.mulf %4, %5 : vector<32x4096xf32>
    %7 = vector.extract_strided_slice %1 {offsets = [0, 1], sizes = [32, 1], strides = [1, 1]} : vector<32x4xf32> to vector<32x1xf32>
    %8 = vector.extract_strided_slice %0 {offsets = [1, 0], sizes = [1, 4096], strides = [1, 1]} : vector<4x4096xf32> to vector<1x4096xf32>
    %9 = vector.broadcast %7 : vector<32x1xf32> to vector<32x4096xf32>
    %10 = vector.broadcast %8 : vector<1x4096xf32> to vector<32x4096xf32>
    %11 = arith.mulf %9, %10 : vector<32x4096xf32>
    %12 = arith.addf %6, %11 : vector<32x4096xf32>
    %13 = vector.extract_strided_slice %1 {offsets = [0, 2], sizes = [32, 1], strides = [1, 1]} : vector<32x4xf32> to vector<32x1xf32>
    %14 = vector.extract_strided_slice %0 {offsets = [2, 0], sizes = [1, 4096], strides = [1, 1]} : vector<4x4096xf32> to vector<1x4096xf32>
    %15 = vector.broadcast %13 : vector<32x1xf32> to vector<32x4096xf32>
    %16 = vector.broadcast %14 : vector<1x4096xf32> to vector<32x4096xf32>
    %17 = arith.mulf %15, %16 : vector<32x4096xf32>
    %18 = arith.addf %12, %17 : vector<32x4096xf32>
    %19 = vector.extract_strided_slice %1 {offsets = [0, 3], sizes = [32, 1], strides = [1, 1]} : vector<32x4xf32> to vector<32x1xf32>
    %20 = vector.extract_strided_slice %0 {offsets = [3, 0], sizes = [1, 4096], strides = [1, 1]} : vector<4x4096xf32> to vector<1x4096xf32>
    %21 = vector.broadcast %19 : vector<32x1xf32> to vector<32x4096xf32>
    %22 = vector.broadcast %20 : vector<1x4096xf32> to vector<32x4096xf32>
    %23 = arith.mulf %21, %22 : vector<32x4096xf32>
    %24 = arith.addf %18, %23 : vector<32x4096xf32>
    %c0_3 = arith.constant 0 : index
    %c0_4 = arith.constant 0 : index
    %25 = vector.load %arg3[%c0_3, %c0_4] : memref<32x1xf32, #tpu.memory_space<vmem>>, vector<32x1xf32>
    %26 = vector.broadcast %25 : vector<32x1xf32> to vector<32x4096xf32>
    %27 = arith.addf %24, %26 : vector<32x4096xf32>
    %cst = arith.constant 0.000000e+00 : f32
    %28 = vector.broadcast %cst : f32 to vector<32x4096xf32>
    %29 = arith.maximumf %27, %28 : vector<32x4096xf32>
    %30 = arith.truncf %29 : vector<32x4096xf32> to vector<32x4096xbf16>
    %31 = arith.extf %30 : vector<32x4096xbf16> to vector<32x4096xf32>
    %32 = arith.subf %29, %31 : vector<32x4096xf32>
    %33 = arith.truncf %32 : vector<32x4096xf32> to vector<32x4096xbf16>
    %c0_5 = arith.constant 0 : index
    %c0_6 = arith.constant 0 : index
    %34 = vector.load %arg4[%c0_5, %c0_6] : memref<32x32xbf16, #tpu.memory_space<vmem>>, vector<32x32xbf16>
    %cst_7 = arith.constant dense<0.000000e+00> : vector<32x4096xf32>
    %35 = tpu.matmul %34, %30, %cst_7 {dimension_numbers = #tpu.dot_dimension_numbers<[1], [0], [0], [1], [0, 0, 1, 1], [], []>} : vector<32x32xbf16>, vector<32x4096xbf16>, vector<32x4096xf32> -> vector<32x4096xf32>
    %c0_8 = arith.constant 0 : index
    %c0_9 = arith.constant 0 : index
    %36 = vector.load %arg4[%c0_8, %c0_9] : memref<32x32xbf16, #tpu.memory_space<vmem>>, vector<32x32xbf16>
    %cst_10 = arith.constant dense<0.000000e+00> : vector<32x4096xf32>
    %37 = tpu.matmul %36, %33, %cst_10 {dimension_numbers = #tpu.dot_dimension_numbers<[1], [0], [0], [1], [0, 0, 1, 1], [], []>} : vector<32x32xbf16>, vector<32x4096xbf16>, vector<32x4096xf32> -> vector<32x4096xf32>
    %38 = arith.addf %35, %37 : vector<32x4096xf32>
    %c0_11 = arith.constant 0 : index
    %c0_12 = arith.constant 0 : index
    %39 = vector.load %arg5[%c0_11, %c0_12] : memref<32x32xbf16, #tpu.memory_space<vmem>>, vector<32x32xbf16>
    %cst_13 = arith.constant dense<0.000000e+00> : vector<32x4096xf32>
    %40 = tpu.matmul %39, %30, %cst_13 {dimension_numbers = #tpu.dot_dimension_numbers<[1], [0], [0], [1], [0, 0, 1, 1], [], []>} : vector<32x32xbf16>, vector<32x4096xbf16>, vector<32x4096xf32> -> vector<32x4096xf32>
    %41 = arith.addf %38, %40 : vector<32x4096xf32>
    %c0_14 = arith.constant 0 : index
    %c0_15 = arith.constant 0 : index
    %42 = vector.load %arg6[%c0_14, %c0_15] : memref<32x1xf32, #tpu.memory_space<vmem>>, vector<32x1xf32>
    %43 = vector.broadcast %42 : vector<32x1xf32> to vector<32x4096xf32>
    %44 = arith.addf %41, %43 : vector<32x4096xf32>
    %cst_16 = arith.constant 0.000000e+00 : f32
    %45 = vector.broadcast %cst_16 : f32 to vector<32x4096xf32>
    %46 = arith.maximumf %44, %45 : vector<32x4096xf32>
    %c0_17 = arith.constant 0 : index
    %c0_18 = arith.constant 0 : index
    %47 = vector.load %arg7[%c0_17, %c0_18] : memref<3x32xf32, #tpu.memory_space<vmem>>, vector<3x32xf32>
    %48 = vector.extract_strided_slice %47 {offsets = [0, 0], sizes = [3, 1], strides = [1, 1]} : vector<3x32xf32> to vector<3x1xf32>
    %49 = vector.extract_strided_slice %46 {offsets = [0, 0], sizes = [1, 4096], strides = [1, 1]} : vector<32x4096xf32> to vector<1x4096xf32>
    %50 = vector.broadcast %48 : vector<3x1xf32> to vector<3x4096xf32>
    %51 = vector.broadcast %49 : vector<1x4096xf32> to vector<3x4096xf32>
    %52 = arith.mulf %50, %51 : vector<3x4096xf32>
    %53 = vector.extract_strided_slice %47 {offsets = [0, 1], sizes = [3, 1], strides = [1, 1]} : vector<3x32xf32> to vector<3x1xf32>
    %54 = vector.extract_strided_slice %46 {offsets = [1, 0], sizes = [1, 4096], strides = [1, 1]} : vector<32x4096xf32> to vector<1x4096xf32>
    %55 = vector.broadcast %53 : vector<3x1xf32> to vector<3x4096xf32>
    %56 = vector.broadcast %54 : vector<1x4096xf32> to vector<3x4096xf32>
    %57 = arith.mulf %55, %56 : vector<3x4096xf32>
    %58 = arith.addf %52, %57 : vector<3x4096xf32>
    %59 = vector.extract_strided_slice %47 {offsets = [0, 2], sizes = [3, 1], strides = [1, 1]} : vector<3x32xf32> to vector<3x1xf32>
    %60 = vector.extract_strided_slice %46 {offsets = [2, 0], sizes = [1, 4096], strides = [1, 1]} : vector<32x4096xf32> to vector<1x4096xf32>
    %61 = vector.broadcast %59 : vector<3x1xf32> to vector<3x4096xf32>
    %62 = vector.broadcast %60 : vector<1x4096xf32> to vector<3x4096xf32>
    %63 = arith.mulf %61, %62 : vector<3x4096xf32>
    %64 = arith.addf %58, %63 : vector<3x4096xf32>
    %65 = vector.extract_strided_slice %47 {offsets = [0, 3], sizes = [3, 1], strides = [1, 1]} : vector<3x32xf32> to vector<3x1xf32>
    %66 = vector.extract_strided_slice %46 {offsets = [3, 0], sizes = [1, 4096], strides = [1, 1]} : vector<32x4096xf32> to vector<1x4096xf32>
    %67 = vector.broadcast %65 : vector<3x1xf32> to vector<3x4096xf32>
    %68 = vector.broadcast %66 : vector<1x4096xf32> to vector<3x4096xf32>
    %69 = arith.mulf %67, %68 : vector<3x4096xf32>
    %70 = arith.addf %64, %69 : vector<3x4096xf32>
    %71 = vector.extract_strided_slice %47 {offsets = [0, 4], sizes = [3, 1], strides = [1, 1]} : vector<3x32xf32> to vector<3x1xf32>
    %72 = vector.extract_strided_slice %46 {offsets = [4, 0], sizes = [1, 4096], strides = [1, 1]} : vector<32x4096xf32> to vector<1x4096xf32>
    %73 = vector.broadcast %71 : vector<3x1xf32> to vector<3x4096xf32>
    %74 = vector.broadcast %72 : vector<1x4096xf32> to vector<3x4096xf32>
    %75 = arith.mulf %73, %74 : vector<3x4096xf32>
    %76 = arith.addf %70, %75 : vector<3x4096xf32>
    %77 = vector.extract_strided_slice %47 {offsets = [0, 5], sizes = [3, 1], strides = [1, 1]} : vector<3x32xf32> to vector<3x1xf32>
    %78 = vector.extract_strided_slice %46 {offsets = [5, 0], sizes = [1, 4096], strides = [1, 1]} : vector<32x4096xf32> to vector<1x4096xf32>
    %79 = vector.broadcast %77 : vector<3x1xf32> to vector<3x4096xf32>
    %80 = vector.broadcast %78 : vector<1x4096xf32> to vector<3x4096xf32>
    %81 = arith.mulf %79, %80 : vector<3x4096xf32>
    %82 = arith.addf %76, %81 : vector<3x4096xf32>
    %83 = vector.extract_strided_slice %47 {offsets = [0, 6], sizes = [3, 1], strides = [1, 1]} : vector<3x32xf32> to vector<3x1xf32>
    %84 = vector.extract_strided_slice %46 {offsets = [6, 0], sizes = [1, 4096], strides = [1, 1]} : vector<32x4096xf32> to vector<1x4096xf32>
    %85 = vector.broadcast %83 : vector<3x1xf32> to vector<3x4096xf32>
    %86 = vector.broadcast %84 : vector<1x4096xf32> to vector<3x4096xf32>
    %87 = arith.mulf %85, %86 : vector<3x4096xf32>
    %88 = arith.addf %82, %87 : vector<3x4096xf32>
    %89 = vector.extract_strided_slice %47 {offsets = [0, 7], sizes = [3, 1], strides = [1, 1]} : vector<3x32xf32> to vector<3x1xf32>
    %90 = vector.extract_strided_slice %46 {offsets = [7, 0], sizes = [1, 4096], strides = [1, 1]} : vector<32x4096xf32> to vector<1x4096xf32>
    %91 = vector.broadcast %89 : vector<3x1xf32> to vector<3x4096xf32>
    %92 = vector.broadcast %90 : vector<1x4096xf32> to vector<3x4096xf32>
    %93 = arith.mulf %91, %92 : vector<3x4096xf32>
    %94 = arith.addf %88, %93 : vector<3x4096xf32>
    %95 = vector.extract_strided_slice %47 {offsets = [0, 8], sizes = [3, 1], strides = [1, 1]} : vector<3x32xf32> to vector<3x1xf32>
    %96 = vector.extract_strided_slice %46 {offsets = [8, 0], sizes = [1, 4096], strides = [1, 1]} : vector<32x4096xf32> to vector<1x4096xf32>
    %97 = vector.broadcast %95 : vector<3x1xf32> to vector<3x4096xf32>
    %98 = vector.broadcast %96 : vector<1x4096xf32> to vector<3x4096xf32>
    %99 = arith.mulf %97, %98 : vector<3x4096xf32>
    %100 = arith.addf %94, %99 : vector<3x4096xf32>
    %101 = vector.extract_strided_slice %47 {offsets = [0, 9], sizes = [3, 1], strides = [1, 1]} : vector<3x32xf32> to vector<3x1xf32>
    %102 = vector.extract_strided_slice %46 {offsets = [9, 0], sizes = [1, 4096], strides = [1, 1]} : vector<32x4096xf32> to vector<1x4096xf32>
    %103 = vector.broadcast %101 : vector<3x1xf32> to vector<3x4096xf32>
    %104 = vector.broadcast %102 : vector<1x4096xf32> to vector<3x4096xf32>
    %105 = arith.mulf %103, %104 : vector<3x4096xf32>
    %106 = arith.addf %100, %105 : vector<3x4096xf32>
    %107 = vector.extract_strided_slice %47 {offsets = [0, 10], sizes = [3, 1], strides = [1, 1]} : vector<3x32xf32> to vector<3x1xf32>
    %108 = vector.extract_strided_slice %46 {offsets = [10, 0], sizes = [1, 4096], strides = [1, 1]} : vector<32x4096xf32> to vector<1x4096xf32>
    %109 = vector.broadcast %107 : vector<3x1xf32> to vector<3x4096xf32>
    %110 = vector.broadcast %108 : vector<1x4096xf32> to vector<3x4096xf32>
    %111 = arith.mulf %109, %110 : vector<3x4096xf32>
    %112 = arith.addf %106, %111 : vector<3x4096xf32>
    %113 = vector.extract_strided_slice %47 {offsets = [0, 11], sizes = [3, 1], strides = [1, 1]} : vector<3x32xf32> to vector<3x1xf32>
    %114 = vector.extract_strided_slice %46 {offsets = [11, 0], sizes = [1, 4096], strides = [1, 1]} : vector<32x4096xf32> to vector<1x4096xf32>
    %115 = vector.broadcast %113 : vector<3x1xf32> to vector<3x4096xf32>
    %116 = vector.broadcast %114 : vector<1x4096xf32> to vector<3x4096xf32>
    %117 = arith.mulf %115, %116 : vector<3x4096xf32>
    %118 = arith.addf %112, %117 : vector<3x4096xf32>
    %119 = vector.extract_strided_slice %47 {offsets = [0, 12], sizes = [3, 1], strides = [1, 1]} : vector<3x32xf32> to vector<3x1xf32>
    %120 = vector.extract_strided_slice %46 {offsets = [12, 0], sizes = [1, 4096], strides = [1, 1]} : vector<32x4096xf32> to vector<1x4096xf32>
    %121 = vector.broadcast %119 : vector<3x1xf32> to vector<3x4096xf32>
    %122 = vector.broadcast %120 : vector<1x4096xf32> to vector<3x4096xf32>
    %123 = arith.mulf %121, %122 : vector<3x4096xf32>
    %124 = arith.addf %118, %123 : vector<3x4096xf32>
    %125 = vector.extract_strided_slice %47 {offsets = [0, 13], sizes = [3, 1], strides = [1, 1]} : vector<3x32xf32> to vector<3x1xf32>
    %126 = vector.extract_strided_slice %46 {offsets = [13, 0], sizes = [1, 4096], strides = [1, 1]} : vector<32x4096xf32> to vector<1x4096xf32>
    %127 = vector.broadcast %125 : vector<3x1xf32> to vector<3x4096xf32>
    %128 = vector.broadcast %126 : vector<1x4096xf32> to vector<3x4096xf32>
    %129 = arith.mulf %127, %128 : vector<3x4096xf32>
    %130 = arith.addf %124, %129 : vector<3x4096xf32>
    %131 = vector.extract_strided_slice %47 {offsets = [0, 14], sizes = [3, 1], strides = [1, 1]} : vector<3x32xf32> to vector<3x1xf32>
    %132 = vector.extract_strided_slice %46 {offsets = [14, 0], sizes = [1, 4096], strides = [1, 1]} : vector<32x4096xf32> to vector<1x4096xf32>
    %133 = vector.broadcast %131 : vector<3x1xf32> to vector<3x4096xf32>
    %134 = vector.broadcast %132 : vector<1x4096xf32> to vector<3x4096xf32>
    %135 = arith.mulf %133, %134 : vector<3x4096xf32>
    %136 = arith.addf %130, %135 : vector<3x4096xf32>
    %137 = vector.extract_strided_slice %47 {offsets = [0, 15], sizes = [3, 1], strides = [1, 1]} : vector<3x32xf32> to vector<3x1xf32>
    %138 = vector.extract_strided_slice %46 {offsets = [15, 0], sizes = [1, 4096], strides = [1, 1]} : vector<32x4096xf32> to vector<1x4096xf32>
    %139 = vector.broadcast %137 : vector<3x1xf32> to vector<3x4096xf32>
    %140 = vector.broadcast %138 : vector<1x4096xf32> to vector<3x4096xf32>
    %141 = arith.mulf %139, %140 : vector<3x4096xf32>
    %142 = arith.addf %136, %141 : vector<3x4096xf32>
    %143 = vector.extract_strided_slice %47 {offsets = [0, 16], sizes = [3, 1], strides = [1, 1]} : vector<3x32xf32> to vector<3x1xf32>
    %144 = vector.extract_strided_slice %46 {offsets = [16, 0], sizes = [1, 4096], strides = [1, 1]} : vector<32x4096xf32> to vector<1x4096xf32>
    %145 = vector.broadcast %143 : vector<3x1xf32> to vector<3x4096xf32>
    %146 = vector.broadcast %144 : vector<1x4096xf32> to vector<3x4096xf32>
    %147 = arith.mulf %145, %146 : vector<3x4096xf32>
    %148 = arith.addf %142, %147 : vector<3x4096xf32>
    %149 = vector.extract_strided_slice %47 {offsets = [0, 17], sizes = [3, 1], strides = [1, 1]} : vector<3x32xf32> to vector<3x1xf32>
    %150 = vector.extract_strided_slice %46 {offsets = [17, 0], sizes = [1, 4096], strides = [1, 1]} : vector<32x4096xf32> to vector<1x4096xf32>
    %151 = vector.broadcast %149 : vector<3x1xf32> to vector<3x4096xf32>
    %152 = vector.broadcast %150 : vector<1x4096xf32> to vector<3x4096xf32>
    %153 = arith.mulf %151, %152 : vector<3x4096xf32>
    %154 = arith.addf %148, %153 : vector<3x4096xf32>
    %155 = vector.extract_strided_slice %47 {offsets = [0, 18], sizes = [3, 1], strides = [1, 1]} : vector<3x32xf32> to vector<3x1xf32>
    %156 = vector.extract_strided_slice %46 {offsets = [18, 0], sizes = [1, 4096], strides = [1, 1]} : vector<32x4096xf32> to vector<1x4096xf32>
    %157 = vector.broadcast %155 : vector<3x1xf32> to vector<3x4096xf32>
    %158 = vector.broadcast %156 : vector<1x4096xf32> to vector<3x4096xf32>
    %159 = arith.mulf %157, %158 : vector<3x4096xf32>
    %160 = arith.addf %154, %159 : vector<3x4096xf32>
    %161 = vector.extract_strided_slice %47 {offsets = [0, 19], sizes = [3, 1], strides = [1, 1]} : vector<3x32xf32> to vector<3x1xf32>
    %162 = vector.extract_strided_slice %46 {offsets = [19, 0], sizes = [1, 4096], strides = [1, 1]} : vector<32x4096xf32> to vector<1x4096xf32>
    %163 = vector.broadcast %161 : vector<3x1xf32> to vector<3x4096xf32>
    %164 = vector.broadcast %162 : vector<1x4096xf32> to vector<3x4096xf32>
    %165 = arith.mulf %163, %164 : vector<3x4096xf32>
    %166 = arith.addf %160, %165 : vector<3x4096xf32>
    %167 = vector.extract_strided_slice %47 {offsets = [0, 20], sizes = [3, 1], strides = [1, 1]} : vector<3x32xf32> to vector<3x1xf32>
    %168 = vector.extract_strided_slice %46 {offsets = [20, 0], sizes = [1, 4096], strides = [1, 1]} : vector<32x4096xf32> to vector<1x4096xf32>
    %169 = vector.broadcast %167 : vector<3x1xf32> to vector<3x4096xf32>
    %170 = vector.broadcast %168 : vector<1x4096xf32> to vector<3x4096xf32>
    %171 = arith.mulf %169, %170 : vector<3x4096xf32>
    %172 = arith.addf %166, %171 : vector<3x4096xf32>
    %173 = vector.extract_strided_slice %47 {offsets = [0, 21], sizes = [3, 1], strides = [1, 1]} : vector<3x32xf32> to vector<3x1xf32>
    %174 = vector.extract_strided_slice %46 {offsets = [21, 0], sizes = [1, 4096], strides = [1, 1]} : vector<32x4096xf32> to vector<1x4096xf32>
    %175 = vector.broadcast %173 : vector<3x1xf32> to vector<3x4096xf32>
    %176 = vector.broadcast %174 : vector<1x4096xf32> to vector<3x4096xf32>
    %177 = arith.mulf %175, %176 : vector<3x4096xf32>
    %178 = arith.addf %172, %177 : vector<3x4096xf32>
    %179 = vector.extract_strided_slice %47 {offsets = [0, 22], sizes = [3, 1], strides = [1, 1]} : vector<3x32xf32> to vector<3x1xf32>
    %180 = vector.extract_strided_slice %46 {offsets = [22, 0], sizes = [1, 4096], strides = [1, 1]} : vector<32x4096xf32> to vector<1x4096xf32>
    %181 = vector.broadcast %179 : vector<3x1xf32> to vector<3x4096xf32>
    %182 = vector.broadcast %180 : vector<1x4096xf32> to vector<3x4096xf32>
    %183 = arith.mulf %181, %182 : vector<3x4096xf32>
    %184 = arith.addf %178, %183 : vector<3x4096xf32>
    %185 = vector.extract_strided_slice %47 {offsets = [0, 23], sizes = [3, 1], strides = [1, 1]} : vector<3x32xf32> to vector<3x1xf32>
    %186 = vector.extract_strided_slice %46 {offsets = [23, 0], sizes = [1, 4096], strides = [1, 1]} : vector<32x4096xf32> to vector<1x4096xf32>
    %187 = vector.broadcast %185 : vector<3x1xf32> to vector<3x4096xf32>
    %188 = vector.broadcast %186 : vector<1x4096xf32> to vector<3x4096xf32>
    %189 = arith.mulf %187, %188 : vector<3x4096xf32>
    %190 = arith.addf %184, %189 : vector<3x4096xf32>
    %191 = vector.extract_strided_slice %47 {offsets = [0, 24], sizes = [3, 1], strides = [1, 1]} : vector<3x32xf32> to vector<3x1xf32>
    %192 = vector.extract_strided_slice %46 {offsets = [24, 0], sizes = [1, 4096], strides = [1, 1]} : vector<32x4096xf32> to vector<1x4096xf32>
    %193 = vector.broadcast %191 : vector<3x1xf32> to vector<3x4096xf32>
    %194 = vector.broadcast %192 : vector<1x4096xf32> to vector<3x4096xf32>
    %195 = arith.mulf %193, %194 : vector<3x4096xf32>
    %196 = arith.addf %190, %195 : vector<3x4096xf32>
    %197 = vector.extract_strided_slice %47 {offsets = [0, 25], sizes = [3, 1], strides = [1, 1]} : vector<3x32xf32> to vector<3x1xf32>
    %198 = vector.extract_strided_slice %46 {offsets = [25, 0], sizes = [1, 4096], strides = [1, 1]} : vector<32x4096xf32> to vector<1x4096xf32>
    %199 = vector.broadcast %197 : vector<3x1xf32> to vector<3x4096xf32>
    %200 = vector.broadcast %198 : vector<1x4096xf32> to vector<3x4096xf32>
    %201 = arith.mulf %199, %200 : vector<3x4096xf32>
    %202 = arith.addf %196, %201 : vector<3x4096xf32>
    %203 = vector.extract_strided_slice %47 {offsets = [0, 26], sizes = [3, 1], strides = [1, 1]} : vector<3x32xf32> to vector<3x1xf32>
    %204 = vector.extract_strided_slice %46 {offsets = [26, 0], sizes = [1, 4096], strides = [1, 1]} : vector<32x4096xf32> to vector<1x4096xf32>
    %205 = vector.broadcast %203 : vector<3x1xf32> to vector<3x4096xf32>
    %206 = vector.broadcast %204 : vector<1x4096xf32> to vector<3x4096xf32>
    %207 = arith.mulf %205, %206 : vector<3x4096xf32>
    %208 = arith.addf %202, %207 : vector<3x4096xf32>
    %209 = vector.extract_strided_slice %47 {offsets = [0, 27], sizes = [3, 1], strides = [1, 1]} : vector<3x32xf32> to vector<3x1xf32>
    %210 = vector.extract_strided_slice %46 {offsets = [27, 0], sizes = [1, 4096], strides = [1, 1]} : vector<32x4096xf32> to vector<1x4096xf32>
    %211 = vector.broadcast %209 : vector<3x1xf32> to vector<3x4096xf32>
    %212 = vector.broadcast %210 : vector<1x4096xf32> to vector<3x4096xf32>
    %213 = arith.mulf %211, %212 : vector<3x4096xf32>
    %214 = arith.addf %208, %213 : vector<3x4096xf32>
    %215 = vector.extract_strided_slice %47 {offsets = [0, 28], sizes = [3, 1], strides = [1, 1]} : vector<3x32xf32> to vector<3x1xf32>
    %216 = vector.extract_strided_slice %46 {offsets = [28, 0], sizes = [1, 4096], strides = [1, 1]} : vector<32x4096xf32> to vector<1x4096xf32>
    %217 = vector.broadcast %215 : vector<3x1xf32> to vector<3x4096xf32>
    %218 = vector.broadcast %216 : vector<1x4096xf32> to vector<3x4096xf32>
    %219 = arith.mulf %217, %218 : vector<3x4096xf32>
    %220 = arith.addf %214, %219 : vector<3x4096xf32>
    %221 = vector.extract_strided_slice %47 {offsets = [0, 29], sizes = [3, 1], strides = [1, 1]} : vector<3x32xf32> to vector<3x1xf32>
    %222 = vector.extract_strided_slice %46 {offsets = [29, 0], sizes = [1, 4096], strides = [1, 1]} : vector<32x4096xf32> to vector<1x4096xf32>
    %223 = vector.broadcast %221 : vector<3x1xf32> to vector<3x4096xf32>
    %224 = vector.broadcast %222 : vector<1x4096xf32> to vector<3x4096xf32>
    %225 = arith.mulf %223, %224 : vector<3x4096xf32>
    %226 = arith.addf %220, %225 : vector<3x4096xf32>
    %227 = vector.extract_strided_slice %47 {offsets = [0, 30], sizes = [3, 1], strides = [1, 1]} : vector<3x32xf32> to vector<3x1xf32>
    %228 = vector.extract_strided_slice %46 {offsets = [30, 0], sizes = [1, 4096], strides = [1, 1]} : vector<32x4096xf32> to vector<1x4096xf32>
    %229 = vector.broadcast %227 : vector<3x1xf32> to vector<3x4096xf32>
    %230 = vector.broadcast %228 : vector<1x4096xf32> to vector<3x4096xf32>
    %231 = arith.mulf %229, %230 : vector<3x4096xf32>
    %232 = arith.addf %226, %231 : vector<3x4096xf32>
    %233 = vector.extract_strided_slice %47 {offsets = [0, 31], sizes = [3, 1], strides = [1, 1]} : vector<3x32xf32> to vector<3x1xf32>
    %234 = vector.extract_strided_slice %46 {offsets = [31, 0], sizes = [1, 4096], strides = [1, 1]} : vector<32x4096xf32> to vector<1x4096xf32>
    %235 = vector.broadcast %233 : vector<3x1xf32> to vector<3x4096xf32>
    %236 = vector.broadcast %234 : vector<1x4096xf32> to vector<3x4096xf32>
    %237 = arith.mulf %235, %236 : vector<3x4096xf32>
    %238 = arith.addf %232, %237 : vector<3x4096xf32>
    %c0_19 = arith.constant 0 : index
    %c0_20 = arith.constant 0 : index
    %239 = vector.load %arg8[%c0_19, %c0_20] : memref<3x1xf32, #tpu.memory_space<vmem>>, vector<3x1xf32>
    %240 = vector.broadcast %239 : vector<3x1xf32> to vector<3x4096xf32>
    %241 = arith.addf %238, %240 : vector<3x4096xf32>
    %242 = vector.extract_strided_slice %0 {offsets = [0, 0], sizes = [3, 4096], strides = [1, 1]} : vector<4x4096xf32> to vector<3x4096xf32>
    %243 = arith.subf %242, %241 : vector<3x4096xf32>
    %c0_21 = arith.constant 0 : index
    %c0_22 = arith.constant 0 : index
    %244 = vector.load %arg9[%c0_21, %c0_22] : memref<3x4096xf32, #tpu.memory_space<vmem>>, vector<3x4096xf32>
    tpu.vector_store %arg9[%c0_21, %c0_22], %243 {strides = array<i32>} : memref<3x4096xf32, #tpu.memory_space<vmem>>, vector<3x4096xf32>,
    return
  }
  func.func @transform_0(%arg0: i32) -> (i32, i32) {
    %c0_i32 = arith.constant 0 : i32
    %c0_i32_0 = arith.constant 0 : i32
    return %c0_i32, %arg0 : i32, i32
  }
  func.func @transform_1(%arg0: i32) -> (i32, i32) {
    %c0_i32 = arith.constant 0 : i32
    %c0_i32_0 = arith.constant 0 : i32
    %c0_i32_1 = arith.constant 0 : i32
    return %c0_i32, %c0_i32_0 : i32, i32
  }
  func.func @transform_2(%arg0: i32) -> (i32, i32) {
    %c0_i32 = arith.constant 0 : i32
    %c0_i32_0 = arith.constant 0 : i32
    %c0_i32_1 = arith.constant 0 : i32
    return %c0_i32, %c0_i32_0 : i32, i32
  }
  func.func @transform_3(%arg0: i32) -> (i32, i32) {
    %c0_i32 = arith.constant 0 : i32
    %c0_i32_0 = arith.constant 0 : i32
    %c0_i32_1 = arith.constant 0 : i32
    return %c0_i32, %c0_i32_0 : i32, i32
  }
  func.func @transform_4(%arg0: i32) -> (i32, i32) {
    %c0_i32 = arith.constant 0 : i32
    %c0_i32_0 = arith.constant 0 : i32
    %c0_i32_1 = arith.constant 0 : i32
    return %c0_i32, %c0_i32_0 : i32, i32
  }
  func.func @transform_5(%arg0: i32) -> (i32, i32) {
    %c0_i32 = arith.constant 0 : i32
    %c0_i32_0 = arith.constant 0 : i32
    %c0_i32_1 = arith.constant 0 : i32
    return %c0_i32, %c0_i32_0 : i32, i32
  }
  func.func @transform_6(%arg0: i32) -> (i32, i32) {
    %c0_i32 = arith.constant 0 : i32
    %c0_i32_0 = arith.constant 0 : i32
    %c0_i32_1 = arith.constant 0 : i32
    return %c0_i32, %c0_i32_0 : i32, i32
  }
  func.func @transform_7(%arg0: i32) -> (i32, i32) {
    %c0_i32 = arith.constant 0 : i32
    %c0_i32_0 = arith.constant 0 : i32
    %c0_i32_1 = arith.constant 0 : i32
    return %c0_i32, %c0_i32_0 : i32, i32
  }
  func.func @transform_8(%arg0: i32) -> (i32, i32) {
    %c0_i32 = arith.constant 0 : i32
    %c0_i32_0 = arith.constant 0 : i32
    return %c0_i32, %arg0 : i32, i32
  }
}

</mosaic_0001>

<bundles_post_ra>
// kernel: beam_bender.1
= control target key start
LH: loop header
LB: loop body
LE: loop exit
PB: predicated region body
PF: predicated region fallthrough
CT: control target
= control target key end

     0   :  { %s13113_s27 = smov 0   ;;  %s19379_s0 = inlined_call_operand.vmem [shape: f32[4,8192], index: 0, kind: input, shape index: {}]   ;;  %s19380_s1 = inlined_call_operand.vmem [shape: f32[32,4], index: 1, kind: input, shape index: {}]   ;;  %s19381_s2 = inlined_call_operand.vmem [shape: f32[32,1], index: 2, kind: input, shape index: {}]   ;;  %s19382_s3 = inlined_call_operand.vmem [shape: bf16[32,32], index: 3, kind: input, shape index: {}]   ;;  %s19383_s4 = inlined_call_operand.vmem [shape: bf16[32,32], index: 4, kind: input, shape index: {}]   ;;  %s19384_s5 = inlined_call_operand.vmem [shape: f32[32,1], index: 5, kind: input, shape index: {}]   ;;  %s19385_s6 = inlined_call_operand.vmem [shape: f32[3,32], index: 6, kind: input, shape index: {}]   ;;  %s19386_s7 = inlined_call_operand.vmem [shape: f32[3,1], index: 7, kind: input, shape index: {}]   ;;  %s19387_s8 = inlined_call_operand.vmem [shape: f32[3,8192], index: 8, kind: output, shape index: {}]  }
   0x1 LB: > { %s12551_s28 = sadd.s32 4294967295, %s13034_s27   ;;  %p12555_p0 = scmp.ge.s32.totalorder %s13034_s27, 1  ;;  %s13034_s27 = sphi %s13113_s27, %s18_s27  }
   0x2   : > { %p263_p1 = scmp.lt.s32.totalorder %s13034_s27, 3 }
   0x4   : > { %p264_p2 = pnand %p12555_p0, %p263_p1 }
   0x6   : > { %267 = sbr.rel (%p264_p2) target bundleno = 1796 (0x704), region = 52 }
   0xd   : > { %v326_v0 = vld [vmem:[%s19380_s1] sm:$0xff]  ;;  %v13036_v1 = vmov 3   ;;  %v13037_v2 = vmov 1   ;;  %v327_v3 = vld [vmem:[%s19380_s1 + $0x8] sm:$0xff]  ;;  %v19388_v4 = vmov 0   ;;  %v13039_v5 = vmov 2  }
   0xe   : > { %12962 = vset.pattern.permute.xlu0 %v13036_v1  ;;  %12958 = vset.pattern.permute.xlu1 %v13037_v2  ;;  %v329_v6 = vld [vmem:[%s19380_s1 + $0x18] sm:$0xff]  ;;  %v328_v7 = vld [vmem:[%s19380_s1 + $0x10] sm:$0xff]  ;;  %v2462_v8 = vld [vmem:[%s19381_s2] sm:$0xff]  ;;  %s12556_s13 = sshll.u32 %s12551_s28, 5  ;;  %v366_v17 = vlaneseq  ;;  %vm3140_vm0 = vcmask 261120  }
   0xf   : > { %1903 = vperm.xlu0 %12962, %v326_v0   ;;  %783 = vperm.xlu1 %12958, %v326_v0   ;;  %v2465_v9 = vld [vmem:[%s19381_s2 + $0x18] sm:$0xff]  ;;  %v5840_v10 = vld [vmem:[%s19384_s5 + $0x8] sm:$0xff]  ;;  %v6119_v12 = vld [vmem:[%s19385_s6] sm:$0x7]  ;;  %p298_p3 = scmp.lt.s32.totalorder %s12556_s13, 63 }
  0x10   : > { %3179 = vmatprep.mubr.bf16.mxu0 %v19388_v4  ;;  %3232 = vmatprep.mubr.bf16.mxu1 %v19388_v4  ;;  %v5842_v11 = vld [vmem:[%s19384_s5 + $0x18] sm:$0xff]  ;;  %v2463_v13 = vld [vmem:[%s19381_s2 + $0x8] sm:$0xff]  ;;  %v2464_v14 = vld [vmem:[%s19381_s2 + $0x10] sm:$0xff]  ;;  %v367_v18 = vshrl.u32 %v366_v17, 7 }
  0x11   : > { %v5839_v15 = vld [vmem:[%s19384_s5] sm:$0xff]  ;;  %v5841_v16 = vld [vmem:[%s19384_s5 + $0x10] sm:$0xff]  ;;  %s20487_s13 = smov (!%p298_p3, %s12556_s13), 63 }
  0x12   : > { %s12557_s14 = sshll.u32 %s20487_s13, 2  ;;  %v13177_v19 = vsub.s32 5, %v367_v18  ;;  %v13180_v21 = vsub.s32 6, %v367_v18  ;;  %v13182_v22 = vsub.s32 1, %v367_v18  ;;  %v13184_v23 = vsub.s32 2, %v367_v18 }
  0x13   : > { %12963 = vset.pattern.permute.xlu0 %v13039_v5  ;;  %787 = vperm.xlu1 %12958, %v327_v3   ;;  %s13175_s17 = scalar_lea.vmem %s19379_s0, %s12557_s14  ;;  %v13187_v25 = vsub.s32 0, %v367_v18  ;;  %v13189_v26 = vsub.s32 4, %v367_v18  ;;  %v13193_v29 = vsub.s32 7, %v367_v18  ;;  %v13195_v30 = vsub.s32 3, %v367_v18  ;;  %s17942_s21 = scalar_lea.vmem %s19387_s8, %s12557_s14 }
  0x14   : > { %1343 = vperm.xlu0 %12963, %v326_v0   ;;  %19752 = vst [vmem:[#allocation2_spill] sm:$0xff] %v13177_v19  ;;  %v310_v20 = vld [vmem:[%s13175_s17] sm:$0xff]  ;;  %19753 = vst [vmem:[#allocation3_spill] sm:$0xff] %v13180_v21  ;;  %v311_v24 = vld [vmem:[%s13175_s17 + $0x8] sm:$0xff] }
  0x15   : > { %19754 = vst [vmem:[#allocation4_spill] sm:$0xff] %v13182_v22  ;;  %19755 = vst [vmem:[#allocation5_spill] sm:$0xff] %v13184_v23  ;;  %v805_v27 = vrot.slane %v310_v20, %v13177_v19  ;;  %v1365_v28 = vrot.slane %v310_v20, %v13180_v21  ;;  %v813_v31 = vrot.slane %v311_v24, %v13177_v19  ;;  %v312_v43 = vld [vmem:[%s13175_s17 + $0x10] sm:$0xff]  ;;  %v313_v48 = vld [vmem:[%s13175_s17 + $0x18] sm:$0xff] }
  0x16   : > { %19756 = vst [vmem:[#allocation6_spill] sm:$0xff] %v13187_v25  ;;  %19757 = vst [vmem:[#allocation7_spill] sm:$0xff] %v13189_v26  ;;  %v1373_v32 = vrot.slane %v311_v24, %v13180_v21  ;;  %v801_v33 = vrot.slane %v310_v20, %v13182_v22  ;;  %v1361_v34 = vrot.slane %v310_v20, %v13184_v23 }
  0x17   : > { %12959 = vset.pattern.permute.xlu1 %v13039_v5  ;;  %19758 = vst [vmem:[#allocation8_spill] sm:$0xff] %v13193_v29  ;;  %19759 = vst [vmem:[#allocation9_spill] sm:$0xff] %v13195_v30  ;;  %v373_v35 = vrot.slane %v310_v20, %v13189_v26  ;;  %v13203_v36 = vrot.slane %v805_v27, %v13182_v22  ;;  %v381_v37 = vrot.slane %v311_v24, %v13189_v26 }
  0x18   : > { %1355 = vperm.xlu0 %12963, %v329_v6   ;;  %1347 = vperm.xlu1 %12959, %v327_v3   ;;  %v369_v38 = vrot.slane %v310_v20, %v13187_v25  ;;  %v13208_v39 = vrot.slane %v1365_v28, %v13184_v23  ;;  %v1925_v40 = vrot.slane %v310_v20, %v13193_v29 }
  0x19   : > { %v377_v41 = vrot.slane %v311_v24, %v13187_v25  ;;  %v809_v42 = vrot.slane %v311_v24, %v13182_v22  ;;  %v13215_v44 = vrot.slane %v813_v31, %v13182_v22  ;;  %v1933_v45 = vrot.slane %v311_v24, %v13193_v29  ;;  %v315_v31 = vld [vmem:[%s13175_s17 + $0x28] sm:$0xff] }
  0x1a   : > { %v1921_v46 = vrot.slane %v310_v20, %v13195_v30  ;;  %v1369_v47 = vrot.slane %v311_v24, %v13184_v23  ;;  %v13222_v49 = vrot.slane %v1373_v32, %v13184_v23  ;;  %v13225_v50 = vrot.slane %v801_v33, %v13182_v22 }
  0x1b   : > { %v13228_v51 = vrot.slane %v1361_v34, %v13184_v23  ;;  %v1929_v52 = vrot.slane %v311_v24, %v13195_v30  ;;  %v13232_v53 = vrot.slane %v373_v35, %v13187_v25  ;;  %v13235_v54 = vrot.slane %v381_v37, %v13187_v25 }
  0x1c   : > { %12966 = vset.pattern.permute.xlu0 %v19388_v4  ;;  %12960 = vset.pattern.permute.xlu1 %v19388_v4  ;;  %v13238_v55 = vrot.slane %v369_v38, %v13187_v25  ;;  %v821_v56 = vrot.slane %v312_v43, %v13177_v19  ;;  %v13242_v57 = vrot.slane %v1925_v40, %v13195_v30 }
  0x1d   : > { %332 = vperm.xlu0 %12966, %v326_v0   ;;  %342 = vperm.xlu1 %12960, %v328_v7   ;;  %v13245_v58 = vrot.slane %v377_v41, %v13187_v25  ;;  %v13248_v59 = vrot.slane %v809_v42, %v13182_v22  ;;  %v829_v60 = vrot.slane %v313_v48, %v13177_v19 }
  0x1e   : > { %v13252_v61 = vrot.slane %v1933_v45, %v13195_v30  ;;  %v13255_v62 = vrot.slane %v1921_v46, %v13195_v30  ;;  %v13258_v63 = vrot.slane %v1369_v47, %v13184_v23  ;;  %v817_v0 = vrot.slane %v312_v43, %v13182_v22 }
  0x1f   : > { %v393_v17 = vrot.slane %v313_v48, %v13187_v25  ;;  %v1385_v18 = vrot.slane %v313_v48, %v13184_v23  ;;  %v1945_v28 = vrot.slane %v313_v48, %v13195_v30  ;;  %v845_v46 = vrot.slane %v315_v31, %v13177_v19 }
  0x21   : > { %337 = vperm.xlu0 %12966, %v327_v3   ;;  %12961 = vset.pattern.permute.xlu1 %v13037_v2  ;;  %v13320_v42 = vrot.slane %v393_v17, %v13187_v25  ;;  %v13328_v47 = vrot.slane %v1945_v28, %v13195_v30  ;;  %v1401_v17 = vrot.slane %v315_v31, %v13184_v23 }
  0x22   : > { %791 = vperm.xlu1 %12961, %v328_v7  }
  0x23   : > { %19769 = vst [vmem:[#allocation19_spill] sm:$0xff] %v13320_v42  ;;  %19771 = vst [vmem:[#allocation21_spill] sm:$0xff] %v13328_v47 }
  0x25   : > { %347 = vperm.xlu0 %12966, %v329_v6  }
  0x26   : > { %795 = vperm.xlu1 %12961, %v329_v6  }
  0x29   : > { %2468 = vperm.xlu0 %12966, %v2462_v8   ;;  %v1389_v8 = vrot.slane %v313_v48, %v13180_v21 }
  0x2a   : > { %12964 = vset.pattern.permute.xlu1 %v13036_v1 }
  0x2b   : > { %1907 = vperm.xlu1 %12964, %v327_v3   ;;  %v1381_v3 = vrot.slane %v312_v43, %v13180_v21  ;;  %v13301_v33 = vrot.slane %v1389_v8, %v13184_v23  ;;  %v409_v8 = vrot.slane %v315_v31, %v13187_v25 }
  0x2d   : > { %2483 = vperm.xlu0 %12966, %v2465_v9   ;;  %v825_v9 = vrot.slane %v313_v48, %v13182_v22  ;;  %v13290_v24 = vrot.slane %v1381_v3, %v13184_v23  ;;  %19764 = vst [vmem:[#allocation14_spill] sm:$0xff] %v13301_v33 }
  0x2f   : > { %12965 = vset.pattern.permute.xlu1 %v13039_v5  ;;  %19763 = vst [vmem:[#allocation13_spill] sm:$0xff] %v13290_v24  ;;  %v13304_v34 = vrot.slane %v825_v9, %v13182_v22  ;;  %v841_v9 = vrot.slane %v315_v31, %v13182_v22 }
  0x30   : > { %1351 = vperm.xlu1 %12965, %v328_v7  }
  0x31   : > { %5850 = vperm.xlu0 %12966, %v5840_v10   ;;  %v1949_v10 = vrot.slane %v313_v48, %v13193_v29  ;;  %19765 = vst [vmem:[#allocation15_spill] sm:$0xff] %v13304_v34 }
  0x33   : > { %v13308_v37 = vrot.slane %v1949_v10, %v13195_v30  ;;  %v316_v10 = vld [vmem:[%s13175_s17 + $0x30] sm:$0xff] }
  0x34   : > { %12967 = vset.pattern.permute.xlu1 %v13036_v1 }
  0x35   : > { %5860 = vperm.xlu0 %12966, %v5842_v11   ;;  %1911 = vperm.xlu1 %12967, %v328_v7   ;;  %v1941_v7 = vrot.slane %v312_v43, %v13193_v29  ;;  %v385_v11 = vrot.slane %v312_v43, %v13187_v25  ;;  %19766 = vst [vmem:[#allocation16_spill] sm:$0xff] %v13308_v37 }
  0x37   : > { %v13298_v32 = vrot.slane %v1941_v7, %v13195_v30  ;;  %v13311_v38 = vrot.slane %v385_v11, %v13187_v25 }
  0x39   : > { %1915 = vperm.xlu1 %12967, %v329_v6   ;;  %12969 = vset.pattern.permute.xlu0 %v13037_v2  ;;  %v389_v2 = vrot.slane %v312_v43, %v13189_v26  ;;  %v13268_v6 = vrot.slane %v821_v56, %v13182_v22 }
  0x3a   : > { %6286 = vperm.xlu0 %12969, %v6119_v12  }
  0x3b   : > { %19760 = vst [vmem:[#allocation10_spill] sm:$0xff] %v13268_v6  ;;  %v13287_v20 = vrot.slane %v389_v2, %v13187_v25  ;;  %v413_v2 = vrot.slane %v315_v31, %v13189_v26 }
  0x3d   : > { %12968 = vset.pattern.permute.xlu1 %v19388_v4  ;;  %v1961_v4 = vrot.slane %v315_v31, %v13195_v30 }
  0x3e   : > { %2473 = vperm.xlu1 %12968, %v2463_v13   ;;  %v1937_v13 = vrot.slane %v312_v43, %v13195_v30 }
  0x40   : > { %v13317_v41 = vrot.slane %v1937_v13, %v13195_v30 }
  0x42   : > { %2478 = vperm.xlu1 %12968, %v2464_v14   ;;  %v314_v14 = vld [vmem:[%s13175_s17 + $0x20] sm:$0xff]  ;;  %19768 = vst [vmem:[#allocation18_spill] sm:$0xff] %v13317_v41 }
  0x43   : > { %v837_v35 = vrot.slane %v314_v14, %v13177_v19  ;;  %v405_v45 = vrot.slane %v314_v14, %v13189_v26  ;;  %v833_v56 = vrot.slane %v314_v14, %v13182_v22  ;;  %v401_v3 = vrot.slane %v314_v14, %v13187_v25 }
  0x44   : > { %v1393_v7 = vrot.slane %v314_v14, %v13184_v23  ;;  %v1953_v13 = vrot.slane %v314_v14, %v13195_v30 }
  0x45   : > { %v13345_v11 = vrot.slane %v405_v45, %v13187_v25 }
  0x46   : > { %5845 = vperm.xlu1 %12968, %v5839_v15   ;;  %v13279_v15 = vrot.slane %v829_v60, %v13182_v22  ;;  %v13334_v60 = vrot.slane %v837_v35, %v13182_v22  ;;  %v13359_v35 = vrot.slane %v833_v56, %v13182_v22  ;;  %v13379_v56 = vrot.slane %v409_v8, %v13187_v25 }
  0x47   : > { %19773 = vst [vmem:[#allocation23_spill] sm:$0xff] %v13345_v11 }
  0x48   : > { %19761 = vst [vmem:[#allocation11_spill] sm:$0xff] %v13279_v15  ;;  %19772 = vst [vmem:[#allocation22_spill] sm:$0xff] %v13334_v60 }
  0x49   : > { %19777 = vst [vmem:[#allocation27_spill] sm:$0xff] %v13359_v35  ;;  %19783 = vst [vmem:[#allocation33_spill] sm:$0xff] %v13379_v56 }
  0x4a   : > { %5855 = vperm.xlu1 %12968, %v5841_v16   ;;  %v13282_v16 = vrot.slane %v817_v0, %v13182_v22  ;;  %v1957_v0 = vrot.slane %v314_v14, %v13193_v29 }
  0x4c   : > { %19762 = vst [vmem:[#allocation12_spill] sm:$0xff] %v13282_v16  ;;  %v13363_v45 = vrot.slane %v1957_v0, %v13195_v30 }
  0x4e   : > { %6122 = vperm.xlu1 %12968, %v6119_v12   ;;  %19778 = vst [vmem:[#allocation28_spill] sm:$0xff] %v13363_v45 }
  0x52   : > { %12970 = vset.pattern.permute.xlu1 %v13039_v5  ;;  %v397_v5 = vrot.slane %v313_v48, %v13189_v26  ;;  %v1397_v48 = vrot.slane %v314_v14, %v13180_v21  ;;  %v13369_v14 = vrot.slane %v401_v3, %v13187_v25  ;;  %v13389_v3 = vrot.slane %v1953_v13, %v13195_v30 }
  0x53   : > { %6482 = vperm.xlu1 %12970, %v6119_v12  }
  0x54   : > { %v13293_v27 = vrot.slane %v397_v5, %v13187_v25  ;;  %v1965_v5 = vrot.slane %v315_v31, %v13193_v29  ;;  %19780 = vst [vmem:[#allocation30_spill] sm:$0xff] %v13369_v14  ;;  %19787 = vst [vmem:[#allocation37_spill] sm:$0xff] %v13389_v3 }
  0x56   : > { %v13373_v29 = vrot.slane %v1965_v5, %v13195_v30  ;;  %v13395_v5 = vrot.slane %v1961_v4, %v13195_v30 }
  0x57   : > { %12971 = vset.pattern.permute.xlu1 %v13036_v1  ;;  %v13262_v1 = vrot.slane %v1929_v52, %v13195_v30  ;;  %v1405_v52 = vrot.slane %v315_v31, %v13180_v21  ;;  %v13382_v31 = vrot.slane %v841_v9, %v13182_v22 }
  0x58   : > { %6678 = vperm.xlu1 %12971, %v6119_v12   ;;  %v1377_v12 = vrot.slane %v312_v43, %v13184_v23  ;;  %v13323_v43 = vrot.slane %v1385_v18, %v13184_v23  ;;  %v13353_v18 = vrot.slane %v1397_v48, %v13184_v23  ;;  %v853_v48 = vrot.slane %v316_v10, %v13177_v19 }
  0x59   : > { %v13356_v28 = vrot.slane %v1405_v52, %v13184_v23  ;;  %19781 = vst [vmem:[#allocation31_spill] sm:$0xff] %v13373_v29  ;;  %v13376_v52 = vrot.slane %v1393_v7, %v13184_v23  ;;  %19784 = vst [vmem:[#allocation34_spill] sm:$0xff] %v13382_v31  ;;  %v13392_v10 = vrot.slane %v1401_v17, %v13184_v23 }
  0x5a   : > { %v13314_v40 = vrot.slane %v1377_v12, %v13184_v23  ;;  %19770 = vst [vmem:[#allocation20_spill] sm:$0xff] %v13323_v43  ;;  %v13348_v12 = vrot.slane %v845_v46, %v13182_v22  ;;  %19775 = vst [vmem:[#allocation25_spill] sm:$0xff] %v13353_v18  ;;  %v13366_v46 = vrot.slane %v413_v2, %v13187_v25 }
  0x5b   : > { %19776 = vst [vmem:[#allocation26_spill] sm:$0xff] %v13356_v28  ;;  %19782 = vst [vmem:[#allocation32_spill] sm:$0xff] %v13376_v52  ;;  %v13398_v7 = vrot.slane %v853_v48, %v13182_v22 }
  0x5c   : > { %19767 = vst [vmem:[#allocation17_spill] sm:$0xff] %v13314_v40  ;;  %19774 = vst [vmem:[#allocation24_spill] sm:$0xff] %v13348_v12 }
  0x5d   : > { %19779 = vst [vmem:[#allocation29_spill] sm:$0xff] %v13366_v46  ;;  %19788 = vst [vmem:[#allocation38_spill] sm:$0xff] %v13392_v10 }
  0x5e   : > { %19789 = vst [vmem:[#allocation39_spill] sm:$0xff] %v13395_v5  ;;  %19790 = vst [vmem:[#allocation40_spill] sm:$0xff] %v13398_v7 }
  0x8e   : > { %v13384_v0 = vpop.permute.xlu1 %783  ;;  %v13386_v2 = vpop.permute.xlu0 %1903 }
  0x8f   : > { %19785 = vst [vmem:[#allocation35_spill] sm:$0xff] %v13384_v0  ;;  %19786 = vst [vmem:[#allocation36_spill] sm:$0xff] %v13386_v2  ;;  %v13402_v8 = vmul.f32 %v13203_v36, %v13384_v0  ;;  %v13406_v9 = vmul.f32 %v13242_v57, %v13386_v2  ;;  %v13410_v13 = vmul.f32 %v13215_v44, %v13384_v0 }
  0x90   : > { %v13414_v17 = vmul.f32 %v13252_v61, %v13386_v2  ;;  %v13418_v4 = vmul.f32 %v13225_v50, %v13384_v0  ;;  %v13422_v48 = vmul.f32 %v13255_v62, %v13386_v2  ;;  %v13426_v22 = vmul.f32 %v13248_v59, %v13384_v0 }
  0x91   : > { %v13430_v19 = vmul.f32 %v13262_v1, %v13386_v2  ;;  %v13434_v30 = vmul.f32 %v13268_v6, %v13384_v0  ;;  %v13438_v23 = vmul.f32 %v13298_v32, %v13386_v2  ;;  %v13442_v21 = vmul.f32 %v13279_v15, %v13384_v0 }
  0x92   : > { %v13446_v25 = vmul.f32 %v13308_v37, %v13386_v2  ;;  %v13448_v7 = vpop.permute.xlu1 %787  ;;  %v13452_v26 = vmul.f32 %v13282_v16, %v13384_v0  ;;  %v13456_v5 = vmul.f32 %v13317_v41, %v13386_v2  ;;  %v13460_v10 = vmul.f32 %v13304_v34, %v13384_v0 }
  0x93   : > { %19791 = vst [vmem:[#allocation41_spill] sm:$0xff] %v13438_v23  ;;  %19792 = vst [vmem:[#allocation42_spill] sm:$0xff] %v13442_v21  ;;  %v13464_v31 = vmul.f32 %v13328_v47, %v13386_v2  ;;  %v13466_v56 = vpop.permute.xlu0 %1343  ;;  %v13470_v3 = vmul.f32 %v13203_v36, %v13448_v7  ;;  %v13474_v52 = vmul.f32 %v13215_v44, %v13448_v7 }
  0x94   : > { %19793 = vst [vmem:[#allocation43_spill] sm:$0xff] %v13446_v25  ;;  %19794 = vst [vmem:[#allocation44_spill] sm:$0xff] %v13448_v7  ;;  %v13478_v35 = vmul.f32 %v13225_v50, %v13448_v7  ;;  %v13482_v14 = vmul.f32 %v13248_v59, %v13448_v7  ;;  %v1647_v29 = vmul.f32 %v13208_v39, %v13466_v56 }
  0x95   : > { %19795 = vst [vmem:[#allocation45_spill] sm:$0xff] %v13452_v26  ;;  %19796 = vst [vmem:[#allocation46_spill] sm:$0xff] %v13456_v5  ;;  %v1649_v46 = vmul.f32 %v13222_v49, %v13466_v56  ;;  %v1646_v11 = vmul.f32 %v13228_v51, %v13466_v56  ;;  %v13494_v47 = vmul.f32 %v13268_v6, %v13448_v7 }
  0x96   : > { %19797 = vst [vmem:[#allocation47_spill] sm:$0xff] %v13460_v10  ;;  %19798 = vst [vmem:[#allocation48_spill] sm:$0xff] %v13464_v31  ;;  %v1648_v31 = vmul.f32 %v13258_v63, %v13466_v56  ;;  %v13498_v10 = vmul.f32 %v13290_v24, %v13466_v56  ;;  %v13502_v5 = vmul.f32 %v13279_v15, %v13448_v7 }
  0x97   : > { %19799 = vst [vmem:[#allocation49_spill] sm:$0xff] %v13466_v56  ;;  %19800 = vst [vmem:[#allocation50_spill] sm:$0xff] %v13494_v47  ;;  %v13506_v41 = vmul.f32 %v13301_v33, %v13466_v56  ;;  %v13510_v26 = vmul.f32 %v13282_v16, %v13448_v7  ;;  %v13514_v6 = vmul.f32 %v13314_v40, %v13466_v56  ;;  %v13524_v37 = vpop.permute.xlu1 %1347 }
  0x98   : > { %19801 = vst [vmem:[#allocation51_spill] sm:$0xff] %v13498_v10  ;;  %19802 = vst [vmem:[#allocation52_spill] sm:$0xff] %v13502_v5  ;;  %v13518_v25 = vmul.f32 %v13304_v34, %v13448_v7  ;;  %v13522_v15 = vmul.f32 %v13323_v43, %v13466_v56  ;;  %v13526_v5 = vpop.permute.xlu0 %1355  ;;  %v13530_v16 = vmul.f32 %v13334_v60, %v13384_v0 }
  0x99   : > { %19803 = vst [vmem:[#allocation53_spill] sm:$0xff] %v13506_v41  ;;  %19804 = vst [vmem:[#allocation54_spill] sm:$0xff] %v13510_v26  ;;  %v13534_v26 = vmul.f32 %v13334_v60, %v13448_v7  ;;  %v13538_v34 = vmul.f32 %v13353_v18, %v13466_v56  ;;  %v1680_v60 = vmul.f32 %v13258_v63, %v13524_v37 }
  0x9a   : > { %19805 = vst [vmem:[#allocation55_spill] sm:$0xff] %v13514_v6  ;;  %19806 = vst [vmem:[#allocation56_spill] sm:$0xff] %v13518_v25  ;;  %v13542_v25 = vmul.f32 %v13363_v45, %v13386_v2  ;;  %v1681_v6 = vmul.f32 %v13222_v49, %v13524_v37  ;;  %v13558_v2 = vmul.f32 %v13222_v49, %v13526_v5 }
  0x9b   : > { %19807 = vst [vmem:[#allocation57_spill] sm:$0xff] %v13522_v15  ;;  %19808 = vst [vmem:[#allocation58_spill] sm:$0xff] %v13524_v37  ;;  %v1679_v15 = vmul.f32 %v13208_v39, %v13524_v37  ;;  %v13570_v45 = vmul.f32 %v13290_v24, %v13524_v37  ;;  %v13574_v41 = vmul.f32 %v13301_v33, %v13524_v37 }
  0x9c   : > { %19809 = vst [vmem:[#allocation59_spill] sm:$0xff] %v13526_v5  ;;  %19810 = vst [vmem:[#allocation60_spill] sm:$0xff] %v13530_v16  ;;  %v1678_v16 = vmul.f32 %v13228_v51, %v13524_v37  ;;  %v13578_v21 = vmul.f32 %v13314_v40, %v13524_v37  ;;  %v13582_v23 = vmul.f32 %v13323_v43, %v13524_v37  ;;  %v13602_v47 = vpop.permute.xlu1 %342 }
  0x9d   : > { %19811 = vst [vmem:[#allocation61_spill] sm:$0xff] %v13534_v26  ;;  %19812 = vst [vmem:[#allocation62_spill] sm:$0xff] %v13538_v34  ;;  %v13554_v26 = vmul.f32 %v13208_v39, %v13526_v5  ;;  %v13566_v34 = vmul.f32 %v13258_v63, %v13526_v5  ;;  %v13586_v10 = vmul.f32 %v13290_v24, %v13526_v5 }
  0x9e   : > { %19813 = vst [vmem:[#allocation63_spill] sm:$0xff] %v13542_v25  ;;  %v13562_v25 = vmul.f32 %v13228_v51, %v13526_v5  ;;  %19815 = vst [vmem:[#allocation65_spill] sm:$0xff] %v13570_v45  ;;  %v13594_v45 = vmul.f32 %v13314_v40, %v13526_v5  ;;  %v13606_v24 = vmul.f32 %v13353_v18, %v13524_v37 }
  0x9f   : > { %19814 = vst [vmem:[#allocation64_spill] sm:$0xff] %v13566_v34  ;;  %19816 = vst [vmem:[#allocation66_spill] sm:$0xff] %v13574_v41  ;;  %v13590_v34 = vmul.f32 %v13301_v33, %v13526_v5  ;;  %v13598_v41 = vmul.f32 %v13323_v43, %v13526_v5  ;;  %v13614_v40 = vmul.f32 %v13348_v12, %v13448_v7 }
  0xa0   : > { %19817 = vst [vmem:[#allocation67_spill] sm:$0xff] %v13578_v21  ;;  %19818 = vst [vmem:[#allocation68_spill] sm:$0xff] %v13582_v23  ;;  %v13600_v21 = vpop.permute.xlu0 %332  ;;  %v13618_v5 = vmul.f32 %v13356_v28, %v13466_v56  ;;  %v721_v7 = vmul.f32 %v13235_v54, %v13602_v47  ;;  %v718_v56 = vmul.f32 %v13238_v55, %v13602_v47 }
  0xa1   : > { %19819 = vst [vmem:[#allocation69_spill] sm:$0xff] %v13586_v10  ;;  %19820 = vst [vmem:[#allocation70_spill] sm:$0xff] %v13590_v34  ;;  %v13610_v10 = vmul.f32 %v13348_v12, %v13384_v0  ;;  %v657_v43 = vmul.f32 %v13235_v54, %v13600_v21  ;;  %v654_v18 = vmul.f32 %v13238_v55, %v13600_v21 }
  0xa2   : > { %19821 = vst [vmem:[#allocation71_spill] sm:$0xff] %v13594_v45  ;;  %19822 = vst [vmem:[#allocation72_spill] sm:$0xff] %v13598_v41  ;;  %v655_v41 = vmul.f32 %v13232_v53, %v13600_v21  ;;  %v656_v0 = vmul.f32 %v13245_v58, %v13600_v21  ;;  %v719_v12 = vmul.f32 %v13232_v53, %v13602_v47 }
  0xa3   : > { %19823 = vst [vmem:[#allocation73_spill] sm:$0xff] %v13600_v21  ;;  %19824 = vst [vmem:[#allocation74_spill] sm:$0xff] %v13602_v47  ;;  %v1217_v37 = vadd.f32 %v13410_v13, %v657_v43  ;;  %v13646_v45 = vmul.f32 %v13287_v20, %v13600_v21  ;;  %v13650_v34 = vmul.f32 %v13293_v27, %v13600_v21  ;;  %v13660_v43 = vpop.permute.xlu1 %791 }
  0xa4   : > { %19825 = vst [vmem:[#allocation75_spill] sm:$0xff] %v13606_v24  ;;  %19826 = vst [vmem:[#allocation76_spill] sm:$0xff] %v13610_v10  ;;  %v1215_v28 = vadd.f32 %v13402_v8, %v655_v41  ;;  %v1216_v24 = vadd.f32 %v13426_v22, %v656_v0  ;;  %v13642_v10 = vpop.permute.xlu0 %337  ;;  %v13654_v33 = vmul.f32 %v13311_v38, %v13600_v21 }
  0xa5   : > { %19827 = vst [vmem:[#allocation77_spill] sm:$0xff] %v13614_v40  ;;  %19828 = vst [vmem:[#allocation78_spill] sm:$0xff] %v13618_v5  ;;  %v13636_v5 = vmul.f32 %v13245_v58, %v13602_v47  ;;  %v1214_v40 = vadd.f32 %v13418_v4, %v654_v18  ;;  %v13658_v41 = vmul.f32 %v13320_v42, %v13600_v21 }
  0xa6   : > { %19829 = vst [vmem:[#allocation79_spill] sm:$0xff] %v13642_v10  ;;  %19830 = vst [vmem:[#allocation80_spill] sm:$0xff] %v13654_v33  ;;  %v687_v22 = vmul.f32 %v13232_v53, %v13642_v10  ;;  %v1775_v18 = vadd.f32 %v1647_v29, %v1215_v28  ;;  %v689_v0 = vmul.f32 %v13235_v54, %v13642_v10 }
  0xa7   : > { %19831 = vst [vmem:[#allocation81_spill] sm:$0xff] %v13658_v41  ;;  %v1777_v8 = vadd.f32 %v1649_v46, %v1217_v37  ;;  %v686_v13 = vmul.f32 %v13238_v55, %v13642_v10  ;;  %v1774_v4 = vadd.f32 %v1646_v11, %v1214_v40  ;;  %v688_v47 = vmul.f32 %v13245_v58, %v13642_v10  ;;  %v13680_v33 = vpop.permute.xlu1 %795 }
  0xa8   : > { %v1776_v23 = vadd.f32 %v1648_v31, %v1216_v24  ;;  %v1247_v21 = vadd.f32 %v13470_v3, %v687_v22  ;;  %v2335_v41 = vadd.f32 %v13406_v9, %v1775_v18  ;;  %v1249_v42 = vadd.f32 %v13474_v52, %v689_v0  ;;  %v13674_v28 = vpop.permute.xlu0 %347 }
  0xa9   : > { %v2337_v29 = vadd.f32 %v13414_v17, %v1777_v8  ;;  %v1246_v37 = vadd.f32 %v13478_v35, %v686_v13  ;;  %v2334_v46 = vadd.f32 %v13422_v48, %v1774_v4  ;;  %v1248_v40 = vadd.f32 %v13482_v14, %v688_v47 }
  0xaa   : > { %v2336_v11 = vadd.f32 %v13430_v19, %v1776_v23  ;;  %v1807_v24 = vadd.f32 %v1679_v15, %v1247_v21  ;;  %v1809_v31 = vadd.f32 %v1681_v6, %v1249_v42  ;;  %v751_v3 = vmul.f32 %v13232_v53, %v13674_v28 }
  0xab   : > { %v1151_v52 = vmul.f32 %v13203_v36, %v13660_v43  ;;  %v1806_v9 = vadd.f32 %v1678_v16, %v1246_v37  ;;  %v1808_v17 = vadd.f32 %v1680_v60, %v1248_v40  ;;  %v1183_v35 = vmul.f32 %v13203_v36, %v13680_v33  ;;  %v13716_v60 = vpop.permute.xlu1 %1907 }
  0xac   : > { %v753_v47 = vmul.f32 %v13235_v54, %v13674_v28  ;;  %v1153_v19 = vmul.f32 %v13215_v44, %v13660_v43  ;;  %v1185_v21 = vmul.f32 %v13215_v44, %v13680_v33  ;;  %v750_v23 = vmul.f32 %v13238_v55, %v13674_v28  ;;  %v13696_v53 = vpop.permute.xlu0 %2468 }
  0xad   : > { %v1279_v14 = vadd.f32 %v1151_v52, %v719_v12  ;;  %v1311_v6 = vadd.f32 %v1183_v35, %v751_v3  ;;  %v1150_v15 = vmul.f32 %v13225_v50, %v13660_v43  ;;  %v1182_v36 = vmul.f32 %v13225_v50, %v13680_v33 }
  0xae   : > { %v752_v54 = vmul.f32 %v13245_v58, %v13674_v28  ;;  %v13705_v16 = vadd.f32 %v13696_v53, %v2335_v41  ;;  %v13708_v44 = vadd.f32 %v13696_v53, %v2337_v29  ;;  %v13711_v55 = vadd.f32 %v13696_v53, %v2334_v46 }
  0xaf   : > { %v13714_v42 = vadd.f32 %v13696_v53, %v2336_v11  ;;  %v13719_v12 = vadd.f32 %v13554_v26, %v1311_v6  ;;  %v1281_v50 = vadd.f32 %v1153_v19, %v721_v7  ;;  %v1313_v48 = vadd.f32 %v1185_v21, %v753_v47  ;;  %v13746_v52 = vpop.permute.xlu1 %1351  ;;  %v19832_v21 = vld [vmem:[#allocation50_spill] sm:$0xff] }
  0xb0   : > { %v1278_v58 = vadd.f32 %v1150_v15, %v718_v56  ;;  %v2239_v41 = vmul.f32 %v13242_v57, %v13716_v60  ;;  %v2615_v22 = vmax.f32 %v13705_v16, 0.0  ;;  %v2241_v18 = vmul.f32 %v13252_v61, %v13716_v60 }
  0xb1   : > { %v2617_v0 = vmax.f32 %v13708_v44, 0.0  ;;  %v2238_v8 = vmul.f32 %v13255_v62, %v13716_v60  ;;  %v2614_v13 = vmax.f32 %v13711_v55, 0.0  ;;  %v2240_v26 = vmul.f32 %v13262_v1, %v13716_v60 }
  0xb2   : > { %v2616_v56 = vmax.f32 %v13714_v42, 0.0  ;;  %v13733_v7 = vadd.f32 %v2239_v41, %v1807_v24  ;;  %v13735_v4 = vadd.f32 %v2241_v18, %v1809_v31  ;;  %v1873_v29 = vadd.f32 %v13558_v2, %v1313_v48  ;;  %v19834_v48 = vld [vmem:[#allocation64_spill] sm:$0xff] }
  0xb3   : > { %v1310_v37 = vadd.f32 %v1182_v36, %v750_v23  ;;  %v13738_v46 = vadd.f32 %v2238_v8, %v1806_v9  ;;  %v13740_v40 = vadd.f32 %v2240_v26, %v1808_v17  ;;  %v1152_v11 = vmul.f32 %v13248_v59, %v13660_v43 }
  0xb4   : > { %v1184_v3 = vmul.f32 %v13248_v59, %v13680_v33  ;;  %v691_v31 = vmul.f32 %v13287_v20, %v13642_v10  ;;  %v1219_v2 = vadd.f32 %v13434_v30, %v13646_v45  ;;  %v2243_v9 = vmul.f32 %v13298_v32, %v13716_v60  ;;  %v19833_v45 = vld [vmem:[#allocation51_spill] sm:$0xff]  ;;  %v13771_v8 = vpop.permute.xlu1 %1911 }
  0xb5   : > { %v1870_v24 = vadd.f32 %v13562_v25, %v1310_v37  ;;  %v1711_v17 = vmul.f32 %v13208_v39, %v13746_v52  ;;  %v1713_v35 = vmul.f32 %v13222_v49, %v13746_v52  ;;  %v1710_v59 = vmul.f32 %v13228_v51, %v13746_v52  ;;  %v19835_v51 = vld [vmem:[#allocation65_spill] sm:$0xff]  ;;  %v19838_v37 = vld [vmem:[#allocation52_spill] sm:$0xff] }
  0xb6   : > { %v1280_v25 = vadd.f32 %v1152_v11, %v13636_v5  ;;  %v1312_v47 = vadd.f32 %v1184_v3, %v752_v54  ;;  %v1712_v19 = vmul.f32 %v13258_v63, %v13746_v52  ;;  %v1251_v30 = vadd.f32 %v19832_v21, %v691_v31  ;;  %v19836_v5 = vld [vmem:[#allocation41_spill] sm:$0xff]  ;;  %v19837_v63 = vld [vmem:[#allocation42_spill] sm:$0xff] }
  0xb7   : > { %v1779_v23 = vadd.f32 %v19833_v45, %v1219_v2  ;;  %v1839_v6 = vadd.f32 %v1711_v17, %v1279_v14  ;;  %v1841_v15 = vadd.f32 %v1713_v35, %v1281_v50  ;;  %v1838_v36 = vadd.f32 %v1710_v59, %v1278_v58  ;;  %v19839_v14 = vld [vmem:[#allocation16_spill] sm:$0xff]  ;;  %v19840_v59 = vld [vmem:[#allocation53_spill] sm:$0xff] }
  0xb8   : > { %v693_v39 = vmul.f32 %v13293_v27, %v13642_v10  ;;  %v1840_v49 = vadd.f32 %v1712_v19, %v1280_v25  ;;  %v1872_v41 = vadd.f32 %v19834_v48, %v1312_v47  ;;  %v1811_v18 = vadd.f32 %v19835_v51, %v1251_v30  ;;  %v19841_v47 = vld [vmem:[#allocation66_spill] sm:$0xff]  ;;  %v19842_v51 = vld [vmem:[#allocation43_spill] sm:$0xff] }
  0xb9   : > { %v2339_v54 = vadd.f32 %v19836_v5, %v1779_v23  ;;  %v1221_v26 = vadd.f32 %v19837_v63, %v13650_v34  ;;  %v2245_v50 = vmul.f32 %v19839_v14, %v13716_v60  ;;  %v690_v58 = vmul.f32 %v13311_v38, %v13642_v10 }
  0xba   : > { %v1253_v11 = vadd.f32 %v19838_v37, %v693_v39  ;;  %v2271_v3 = vmul.f32 %v13242_v57, %v13771_v8  ;;  %v2273_v31 = vmul.f32 %v13252_v61, %v13771_v8  ;;  %v2270_v2 = vmul.f32 %v13255_v62, %v13771_v8  ;;  %v13793_v39 = vpop.permute.xlu1 %1915  ;;  %v19843_v37 = vld [vmem:[#allocation80_spill] sm:$0xff] }
  0xbb   : > { %v2272_v34 = vmul.f32 %v13262_v1, %v13771_v8  ;;  %v2371_v17 = vadd.f32 %v2243_v9, %v1811_v18  ;;  %v13789_v35 = vadd.f32 %v13696_v53, %v2339_v54  ;;  %v1781_v25 = vadd.f32 %v19840_v59, %v1221_v26  ;;  %v19844_v9 = vld [vmem:[#allocation45_spill] sm:$0xff] }
  0xbc   : > { %v1813_v19 = vadd.f32 %v19841_v47, %v1253_v11  ;;  %v2399_v21 = vadd.f32 %v2271_v3, %v1839_v6  ;;  %v2401_v30 = vadd.f32 %v2273_v31, %v1841_v15  ;;  %v2398_v45 = vadd.f32 %v2270_v2, %v1838_v36  ;;  %v19847_v31 = vld [vmem:[#allocation18_spill] sm:$0xff] }
  0xbd   : > { %v2400_v23 = vadd.f32 %v2272_v34, %v1840_v49  ;;  %v2341_v5 = vadd.f32 %v19842_v51, %v1781_v25  ;;  %v1218_v18 = vadd.f32 %v19844_v9, %v19843_v37  ;;  %v2303_v54 = vmul.f32 %v13242_v57, %v13793_v39  ;;  %v19845_v49 = vld [vmem:[#allocation54_spill] sm:$0xff]  ;;  %v13815_v25 = vpop.permute.xlu0 %2483 }
  0xbe   : > { %v2373_v63 = vadd.f32 %v2245_v50, %v1813_v19  ;;  %v2305_v26 = vmul.f32 %v13252_v61, %v13793_v39  ;;  %v2302_v6 = vmul.f32 %v13255_v62, %v13793_v39  ;;  %v2304_v15 = vmul.f32 %v13262_v1, %v13793_v39  ;;  %v19846_v50 = vld [vmem:[#allocation55_spill] sm:$0xff]  ;;  %v19849_v19 = vld [vmem:[#allocation46_spill] sm:$0xff]  ;;  %v13824_v37 = vpop.permute.xlu1 %2473 }
  0xbf   : > { %v13808_v36 = vadd.f32 %v13696_v53, %v2341_v5  ;;  %v1250_v11 = vadd.f32 %v19845_v49, %v690_v58  ;;  %v1778_v3 = vadd.f32 %v19846_v50, %v1218_v18  ;;  %v2242_v2 = vmul.f32 %v19847_v31, %v13716_v60  ;;  %v19848_v1 = vld [vmem:[#allocation67_spill] sm:$0xff] }
  0xc0   : > { %v2431_v57 = vadd.f32 %v2303_v54, %v13719_v12  ;;  %v2433_v34 = vadd.f32 %v2305_v26, %v1873_v29  ;;  %v2430_v61 = vadd.f32 %v2302_v6, %v1870_v24  ;;  %v2432_v59 = vadd.f32 %v2304_v15, %v1872_v41  ;;  %v19850_v58 = vld [vmem:[#allocation19_spill] sm:$0xff] }
  0xc1   : > { %v1810_v47 = vadd.f32 %v19848_v1, %v1250_v11  ;;  %v2338_v51 = vadd.f32 %v19849_v19, %v1778_v3  ;;  %v13822_v5 = vmul.f32 %v19850_v58, %v13642_v10  ;;  %v2519_v41 = vadd.f32 %v13824_v37, %v13733_v7 }
  0xc2   : > { %v13827_v9 = vadd.f32 %v13815_v25, %v2431_v57  ;;  %v13830_v12 = vadd.f32 %v13815_v25, %v2433_v34  ;;  %v13833_v29 = vadd.f32 %v13815_v25, %v2430_v61  ;;  %v13836_v24 = vadd.f32 %v13815_v25, %v2432_v59  ;;  %v13850_v34 = vpop.permute.xlu1 %2478 }
  0xc3   : > { %v2521_v18 = vadd.f32 %v13824_v37, %v13735_v4  ;;  %v2518_v54 = vadd.f32 %v13824_v37, %v13738_v46  ;;  %v2520_v26 = vadd.f32 %v13824_v37, %v13740_v40  ;;  %v2647_v50 = vmax.f32 %v2519_v41, 0.0 }
  0xc4   : > { %v13853_v4 = vadd.f32 %v13824_v37, %v2371_v17  ;;  %v13856_v46 = vadd.f32 %v13824_v37, %v2373_v63  ;;  %v2370_v40 = vadd.f32 %v2242_v2, %v1810_v47  ;;  %v13859_v61 = vadd.f32 %v13696_v53, %v2338_v51 }
  0xc5   : > { %v2649_v3 = vmax.f32 %v2521_v18, 0.0  ;;  %v2646_v7 = vmax.f32 %v2518_v54, 0.0  ;;  %v2648_v57 = vmax.f32 %v2520_v26, 0.0  ;;  %v13863_v59 = vpack.c.bf16 %v2647_v50, %v2615_v22 }
  0xc6   : > { %v2551_v63 = vadd.f32 %v13850_v34, %v2399_v21  ;;  %v2553_v2 = vadd.f32 %v13850_v34, %v2401_v30  ;;  %v2550_v47 = vadd.f32 %v13850_v34, %v2398_v45  ;;  %v2552_v51 = vadd.f32 %v13850_v34, %v2400_v23 }
  0xc7   : > { %19851 = vst [vmem:[#allocation50_spill] sm:$0xff] %v13863_v59  ;;  %v13867_v1 = vpack.c.bf16 %v2649_v3, %v2617_v0  ;;  %v13871_v19 = vpack.c.bf16 %v2646_v7, %v2614_v13  ;;  %v13875_v17 = vpack.c.bf16 %v2648_v57, %v2616_v56  ;;  %v2807_v41 = vunpack.c.l.bf16 %v13863_v59 }
  0xc8   : > { %v2839_v18 = vunpack.c.h.bf16 %v13863_v59  ;;  %v2679_v58 = vmax.f32 %v2551_v63, 0.0  ;;  %v19855_v44 = vmax.f32 %v13827_v9, 0.0  ;;  %v19857_v55 = vmax.f32 %v13830_v12, 0.0 }
  0xc9   : > { %19852 = vst [vmem:[#allocation51_spill] sm:$0xff] %v13867_v1  ;;  %19853 = vst [vmem:[#allocation64_spill] sm:$0xff] %v13871_v19  ;;  %v2809_v54 = vunpack.c.l.bf16 %v13867_v1  ;;  %v2841_v26 = vunpack.c.h.bf16 %v13867_v1  ;;  %v2806_v62 = vunpack.c.l.bf16 %v13871_v19  ;;  %v2838_v48 = vunpack.c.h.bf16 %v13871_v19 }
  0xca   : > { %19854 = vst [vmem:[#allocation65_spill] sm:$0xff] %v13875_v17  ;;  %v2808_v21 = vunpack.c.l.bf16 %v13875_v17  ;;  %v2840_v30 = vunpack.c.h.bf16 %v13875_v17  ;;  %v2935_v45 = vsub.f32 %v2615_v22, %v2807_v41  ;;  %v2967_v23 = vsub.f32 %v2647_v50, %v2839_v18 }
  0xcb   : > { %v2937_v11 = vsub.f32 %v2617_v0, %v2809_v54  ;;  %v2969_v49 = vsub.f32 %v2649_v3, %v2841_v26  ;;  %v2934_v15 = vsub.f32 %v2614_v13, %v2806_v62  ;;  %v2966_v6 = vsub.f32 %v2646_v7, %v2838_v48 }
  0xcc   : > { %v2936_v1 = vsub.f32 %v2616_v56, %v2808_v21  ;;  %v2968_v19 = vsub.f32 %v2648_v57, %v2840_v30  ;;  %v3063_v59 = vpack.c.bf16 %v2967_v23, %v2935_v45  ;;  %v2681_v17 = vmax.f32 %v2553_v2, 0.0 }
  0xcd   : > { %v3065_v10 = vpack.c.bf16 %v2969_v49, %v2937_v11  ;;  %v3062_v31 = vpack.c.bf16 %v2966_v6, %v2934_v15  ;;  %v2678_v22 = vmax.f32 %v2550_v47, 0.0  ;;  %v2680_v50 = vmax.f32 %v2552_v51, 0.0 }
  0xce   : > { %v3064_v16 = vpack.c.bf16 %v2968_v19, %v2936_v1  ;;  %3147 = vmatprep.subr.bf16.mxu0 %v3063_v59  ;;  %v13899_v0 = vpack.c.bf16 %v19855_v44, %v2679_v58  ;;  %v13903_v13 = vpack.c.bf16 %v19857_v55, %v2681_v17  ;;  %v2651_v42 = vmax.f32 %v13853_v4, 0.0 }
  0xcf   : > { %3200 = vmatprep.subr.bf16.mxu1 %v3065_v10  ;;  %v2653_v56 = vmax.f32 %v13856_v46, 0.0  ;;  %3148 = vmatpush1.bf16.msra.mxu0 %v3062_v31  ;;  %v19859_v48 = vmax.f32 %v13833_v29, 0.0  ;;  %v19861_v10 = vmax.f32 %v13836_v24, 0.0  ;;  %v2522_v15 = vadd.f32 %v13824_v37, %v2370_v40  ;;  %v19872_v29 = vld [vmem:[#allocation47_spill] sm:$0xff] }
  0xd0   : > { %19856 = vst [vmem:[#allocation41_spill] sm:$0xff] %v13899_v0  ;;  %19858 = vst [vmem:[#allocation42_spill] sm:$0xff] %v13903_v13  ;;  %3201 = vmatpush1.bf16.msra.mxu1 %v3064_v16  ;;  %v2618_v49 = vmax.f32 %v13859_v61, 0.0  ;;  %v2871_v11 = vunpack.c.l.bf16 %v13899_v0  ;;  %v2903_v3 = vunpack.c.h.bf16 %v13899_v0  ;;  %v2873_v7 = vunpack.c.l.bf16 %v13903_v13 }
  0xd1   : > { %v13909_v62 = vpack.c.bf16 %v19859_v48, %v2678_v22  ;;  %v13913_v6 = vpack.c.bf16 %v19861_v10, %v2680_v50  ;;  %v2905_v31 = vunpack.c.h.bf16 %v13903_v13  ;;  %v19863_v40 = vmov %v19855_v44 }
  0xd2   : > { %v2999_v1 = vsub.f32 %v2679_v58, %v2871_v11  ;;  %v3031_v61 = vsub.f32 %v19863_v40, %v2903_v3  ;;  %v3001_v19 = vsub.f32 %v2681_v17, %v2873_v7  ;;  %v19864_v63 = vmov %v19857_v55  ;;  %v19874_v11 = vld [vmem:[#allocation56_spill] sm:$0xff]  ;;  %v19875_v7 = vld [vmem:[#allocation57_spill] sm:$0xff] }
  0xd3   : > { %19860 = vst [vmem:[#allocation52_spill] sm:$0xff] %v13909_v62  ;;  %19862 = vst [vmem:[#allocation16_spill] sm:$0xff] %v13913_v6  ;;  %v2870_v57 = vunpack.c.l.bf16 %v13909_v62  ;;  %v2902_v4 = vunpack.c.h.bf16 %v13909_v62  ;;  %v2872_v46 = vunpack.c.l.bf16 %v13913_v6  ;;  %v2904_v59 = vunpack.c.h.bf16 %v13913_v6 }
  0xd4   : > { %v3033_v2 = vsub.f32 %v19864_v63, %v2905_v31  ;;  %v19865_v51 = vmov %v19859_v48  ;;  %v19866_v54 = vmov %v19861_v10  ;;  %v3095_v21 = vpack.c.bf16 %v3031_v61, %v2999_v1  ;;  %v13950_v10 = vld [vmem:[%s19382_s3] sm:$0xff]   ;;  %v19878_v63 = vld [vmem:[#allocation68_spill] sm:$0xff] }
  0xd5   : > { %v2998_v47 = vsub.f32 %v2678_v22, %v2870_v57  ;;  %v3030_v41 = vsub.f32 %v19865_v51, %v2902_v4  ;;  %v3000_v18 = vsub.f32 %v2680_v50, %v2872_v46  ;;  %v3032_v26 = vsub.f32 %v19866_v54, %v2904_v59  ;;  %v19871_v22 = vld [vmem:[#allocation81_spill] sm:$0xff]  ;;  %v19881_v54 = vld [vmem:[#allocation74_spill] sm:$0xff] }
  0xd6   : > { %v3097_v30 = vpack.c.bf16 %v3033_v2, %v3001_v19  ;;  %v19867_v45 = vmax.f32 %v13789_v35, 0.0  ;;  %v19869_v9 = vmax.f32 %v13808_v36, 0.0  ;;  %v2650_v16 = vmax.f32 %v2522_v15, 0.0  ;;  %3149 = vmatprep.subr.bf16.mxu0 %v3095_v21  ;;  %v19880_v35 = vld [vmem:[#allocation48_spill] sm:$0xff] }
  0xd7   : > { %v3094_v12 = vpack.c.bf16 %v3030_v41, %v2998_v47  ;;  %v3096_v23 = vpack.c.bf16 %v3032_v26, %v3000_v18  ;;  %v1220_v44 = vadd.f32 %v19872_v29, %v19871_v22  ;;  %v1252_v3 = vadd.f32 %v19874_v11, %v13822_v5  ;;  %v19879_v47 = vld [vmem:[#allocation21_spill] sm:$0xff] }
  0xd8   : > { %v13935_v58 = vpack.c.bf16 %v2651_v42, %v19867_v45  ;;  %v13939_v17 = vpack.c.bf16 %v2653_v56, %v19869_v9  ;;  %3202 = vmatprep.subr.bf16.mxu1 %v3097_v30  ;;  %v13952_v15 = vpack.c.bf16 %v2650_v16, %v2618_v49  ;;  %v19876_v57 = vmov %v19867_v45  ;;  %v19884_v22 = vld [vmem:[#allocation13_spill] sm:$0xff] }
  0xd9   : > { %3150 = vmatpush1.bf16.msra.mxu0 %v3094_v12  ;;  %3203 = vmatpush1.bf16.msra.mxu1 %v3096_v23  ;;  %v1780_v31 = vadd.f32 %v19875_v7, %v1220_v44  ;;  %v19877_v59 = vmov %v19869_v9  ;;  %v1812_v2 = vadd.f32 %v19878_v63, %v1252_v3  ;;  %v2244_v51 = vmul.f32 %v19879_v47, %v13716_v60  ;;  %v19883_v9 = vld [vmem:[#allocation10_spill] sm:$0xff] }
  0xda   : > { %19868 = vst [vmem:[#allocation53_spill] sm:$0xff] %v13935_v58  ;;  %19870 = vst [vmem:[#allocation66_spill] sm:$0xff] %v13939_v17  ;;  %v2811_v24 = vunpack.c.l.bf16 %v13935_v58  ;;  %v2843_v50 = vunpack.c.h.bf16 %v13935_v58  ;;  %v2813_v55 = vunpack.c.l.bf16 %v13939_v17  ;;  %v2845_v48 = vunpack.c.h.bf16 %v13939_v17  ;;  %v19930_v17 = vld [vmem:[#allocation38_spill] sm:$0xff] }
  0xdb   : > { %19873 = vst [vmem:[#allocation43_spill] sm:$0xff] %v13952_v15  ;;  %v2810_v61 = vunpack.c.l.bf16 %v13952_v15  ;;  %v2842_v19 = vunpack.c.h.bf16 %v13952_v15  ;;  %v2340_v36 = vadd.f32 %v19880_v35, %v1780_v31  ;;  %v2372_v18 = vadd.f32 %v2244_v51, %v1812_v2 }
  0xdc   : > { %v2939_v4 = vsub.f32 %v19876_v57, %v2811_v24  ;;  %v2971_v46 = vsub.f32 %v2651_v42, %v2843_v50  ;;  %v2941_v1 = vsub.f32 %v19877_v59, %v2813_v55  ;;  %v2973_v40 = vsub.f32 %v2653_v56, %v2845_v48  ;;  %12562 = vmatmul.mubr.msk.bf16.vlgmr.msra.gmra.mrb[0].mxu0 %vm3140_vm0, %v13950_v10  ;;  %v13992_v55 = vld [vmem:[%s19382_s3 + $0x8] sm:$0xff]  }
  0xdd   : > { %12564 = vmatmul.mubr.msk.bf16.vlgmr.msra.gmra.mrb[0].mxu1 %vm3140_vm0, %v13950_v10  ;;  %v2938_v42 = vsub.f32 %v2618_v49, %v2810_v61  ;;  %v2970_v56 = vsub.f32 %v2650_v16, %v2842_v19  ;;  %v723_v26 = vmul.f32 %v13287_v20, %v19881_v54  ;;  %v19882_v21 = vmov 0   ;;  %v19885_v57 = vld [vmem:[#allocation11_spill] sm:$0xff] }
  0xde   : > { %v3067_v5 = vpack.c.bf16 %v2971_v46, %v2939_v4  ;;  %v3069_v41 = vpack.c.bf16 %v2973_v40, %v2941_v1  ;;  %3189 = vmatprep.mubr.bf16.mxu0 %v19882_v21  ;;  %v2492_v30 = vadd.f32 %v13696_v53, %v2340_v36  ;;  %v755_v45 = vmul.f32 %v13287_v20, %v13674_v28  ;;  %v19886_v46 = vld [vmem:[#allocation14_spill] sm:$0xff]  ;;  %v19888_v40 = vld [vmem:[#allocation69_spill] sm:$0xff] }
  0xdf   : > { %v1155_v12 = vmul.f32 %v19883_v9, %v13660_v43  ;;  %v3066_v23 = vpack.c.bf16 %v2970_v56, %v2938_v42  ;;  %v2524_v49 = vadd.f32 %v13824_v37, %v2372_v18  ;;  %v1187_v16 = vmul.f32 %v19883_v9, %v13680_v33  ;;  %3242 = vmatprep.mubr.bf16.mxu1 %v19882_v21  ;;  %v19889_v18 = vld [vmem:[#allocation70_spill] sm:$0xff] }
  0xe0   : > { %3253 = vmatprep.subr.bf16.mxu0 %v3067_v5  ;;  %3306 = vmatprep.subr.bf16.mxu1 %v3069_v41  ;;  %v1715_v29 = vmul.f32 %v19884_v22, %v13746_v52  ;;  %v2620_v44 = vmax.f32 %v2492_v30, 0.0  ;;  %v2275_v50 = vmul.f32 %v13298_v32, %v13771_v8  ;;  %v2307_v20 = vmul.f32 %v13298_v32, %v13793_v39  ;;  %v19890_v30 = vld [vmem:[#allocation12_spill] sm:$0xff] }
  0xe1   : > { %v1283_v24 = vadd.f32 %v1155_v12, %v723_v26  ;;  %3254 = vmatpush1.bf16.msra.mxu0 %v3066_v23  ;;  %v2652_v48 = vmax.f32 %v2524_v49, 0.0  ;;  %v1315_v11 = vadd.f32 %v1187_v16, %v755_v45  ;;  %v725_v3 = vmul.f32 %v13293_v27, %v19881_v54 }
  0xe2   : > { %v757_v7 = vmul.f32 %v13293_v27, %v13674_v28  ;;  %v1157_v4 = vmul.f32 %v19885_v57, %v13660_v43  ;;  %v1189_v32 = vmul.f32 %v19885_v57, %v13680_v33  ;;  %v1717_v59 = vmul.f32 %v19886_v46, %v13746_v52  ;;  %v19894_v46 = vld [vmem:[#allocation71_spill] sm:$0xff] }
  0xe3   : > { %v1843_v31 = vadd.f32 %v1715_v29, %v1283_v24  ;;  %v14004_v1 = vpack.c.bf16 %v2652_v48, %v2620_v44  ;;  %v1875_v61 = vadd.f32 %v19888_v40, %v1315_v11  ;;  %v2277_v19 = vmul.f32 %v19839_v14, %v13771_v8  ;;  %v19891_v11 = vld [vmem:[#allocation17_spill] sm:$0xff]  ;;  %v19895_v40 = vld [vmem:[#allocation19_spill] sm:$0xff] }
  0xe4   : > { %v2309_v27 = vmul.f32 %v19839_v14, %v13793_v39  ;;  %v1285_v2 = vadd.f32 %v1157_v4, %v725_v3  ;;  %v1317_v51 = vadd.f32 %v1189_v32, %v757_v7  ;;  %v722_v5 = vmul.f32 %v13311_v38, %v19881_v54  ;;  %12563 = vmatmul.mubr.msk.bf16.gmra.mrb[4].mxu0 %vm3140_vm0, %v13992_v55 }
  0xe5   : > { %19887 = vst [vmem:[#allocation80_spill] sm:$0xff] %v14004_v1  ;;  %v2403_v63 = vadd.f32 %v2275_v50, %v1843_v31  ;;  %v2812_v41 = vunpack.c.l.bf16 %v14004_v1  ;;  %v2844_v35 = vunpack.c.h.bf16 %v14004_v1  ;;  %v2435_v36 = vadd.f32 %v2307_v20, %v1875_v61  ;;  %12565 = vmatmul.mubr.msk.bf16.gmra.mrb[4].mxu1 %vm3140_vm0, %v13992_v55  ;;  %3285 = vmatprep.mubr.bf16.mxu0 %v19882_v21 }
  0xe6   : > { %v754_v42 = vmul.f32 %v13311_v38, %v13674_v28  ;;  %v1845_v56 = vadd.f32 %v1717_v59, %v1285_v2  ;;  %v1877_v26 = vadd.f32 %v19889_v18, %v1317_v51  ;;  %v1154_v45 = vmul.f32 %v19890_v30, %v13660_v43  ;;  %3338 = vmatprep.mubr.bf16.mxu1 %v19882_v21  ;;  %v19896_v2 = vld [vmem:[#allocation15_spill] sm:$0xff]  ;;  %v19898_v18 = vld [vmem:[#allocation20_spill] sm:$0xff] }
  0xe7   : > { %v2555_v14 = vadd.f32 %v13850_v34, %v2403_v63  ;;  %v2940_v9 = vsub.f32 %v2620_v44, %v2812_v41  ;;  %v2972_v12 = vsub.f32 %v2652_v48, %v2844_v35  ;;  %v2587_v23 = vadd.f32 %v13815_v25, %v2435_v36  ;;  %v19892_v48 = vld [vmem:[#allocation18_spill] sm:$0xff] }
  0xe8   : > { %v1186_v38 = vmul.f32 %v19890_v30, %v13680_v33  ;;  %v2405_v16 = vadd.f32 %v2277_v19, %v1845_v56  ;;  %v2437_v22 = vadd.f32 %v2309_v27, %v1877_v26  ;;  %v1282_v29 = vadd.f32 %v1154_v45, %v722_v5 }
  0xe9   : > { %v2683_v49 = vmax.f32 %v2555_v14, 0.0  ;;  %v3068_v24 = vpack.c.bf16 %v2972_v12, %v2940_v9  ;;  %v2715_v50 = vmax.f32 %v2587_v23, 0.0  ;;  %v1714_v3 = vmul.f32 %v19891_v11, %v13746_v52 }
  0xea   : > { %v1314_v20 = vadd.f32 %v1186_v38, %v754_v42  ;;  %v2557_v7 = vadd.f32 %v13850_v34, %v2405_v16  ;;  %v2589_v44 = vadd.f32 %v13815_v25, %v2437_v22  ;;  %v2274_v31 = vmul.f32 %v19892_v48, %v13771_v8 }
  0xeb   : > { %v2306_v57 = vmul.f32 %v19892_v48, %v13793_v39  ;;  %3307 = vmatpush1.bf16.msra.mxu1 %v3068_v24  ;;  %v14038_v4 = vpack.c.bf16 %v2715_v50, %v2683_v49  ;;  %v1842_v32 = vadd.f32 %v1714_v3, %v1282_v29  ;;  %v724_v61 = vmul.f32 %v19895_v40, %v19881_v54 }
  0xec   : > { %v1874_v59 = vadd.f32 %v19894_v46, %v1314_v20  ;;  %v2685_v19 = vmax.f32 %v2557_v7, 0.0  ;;  %v2717_v27 = vmax.f32 %v2589_v44, 0.0  ;;  %v756_v63 = vmul.f32 %v19895_v40, %v13674_v28 }
  0xed   : > { %19893 = vst [vmem:[#allocation45_spill] sm:$0xff] %v14038_v4  ;;  %v1156_v51 = vmul.f32 %v19896_v2, %v13660_v43  ;;  %v2875_v5 = vunpack.c.l.bf16 %v14038_v4  ;;  %v2907_v41 = vunpack.c.h.bf16 %v14038_v4  ;;  %v2402_v35 = vadd.f32 %v2274_v31, %v1842_v32  ;;  %v19902_v32 = vld [vmem:[#allocation23_spill] sm:$0xff] }
  0xee   : > { %v2434_v36 = vadd.f32 %v2306_v57, %v1874_v59  ;;  %v14049_v42 = vpack.c.bf16 %v2717_v27, %v2685_v19  ;;  %v1188_v14 = vmul.f32 %v19896_v2, %v13680_v33  ;;  %v1716_v26 = vmul.f32 %v19898_v18, %v13746_v52  ;;  %v19901_v57 = vld [vmem:[#allocation73_spill] sm:$0xff]  ;;  %v19903_v59 = vld [vmem:[#allocation79_spill] sm:$0xff] }
  0xef   : > { %v1284_v56 = vadd.f32 %v1156_v51, %v724_v61  ;;  %v3003_v30 = vsub.f32 %v2683_v49, %v2875_v5  ;;  %v3035_v45 = vsub.f32 %v2715_v50, %v2907_v41  ;;  %v2554_v9 = vadd.f32 %v13850_v34, %v2402_v35  ;;  %v19899_v49 = vld [vmem:[#allocation72_spill] sm:$0xff]  ;;  %v19905_v2 = vld [vmem:[#allocation29_spill] sm:$0xff] }
  0xf0   : > { %19897 = vst [vmem:[#allocation54_spill] sm:$0xff] %v14049_v42  ;;  %v2586_v12 = vadd.f32 %v13815_v25, %v2434_v36  ;;  %v2877_v23 = vunpack.c.l.bf16 %v14049_v42  ;;  %v2909_v38 = vunpack.c.h.bf16 %v14049_v42  ;;  %v1316_v16 = vadd.f32 %v1188_v14, %v756_v63  ;;  %v19906_v35 = vld [vmem:[#allocation60_spill] sm:$0xff] }
  0xf1   : > { %v1844_v22 = vadd.f32 %v1716_v26, %v1284_v56  ;;  %v3099_v29 = vpack.c.bf16 %v3035_v45, %v3003_v30  ;;  %v2682_v24 = vmax.f32 %v2554_v9, 0.0  ;;  %v2276_v11 = vmul.f32 %v19879_v47, %v13771_v8  ;;  %v19907_v56 = vld [vmem:[#allocation61_spill] sm:$0xff]  ;;  %v19908_v30 = vld [vmem:[#allocation76_spill] sm:$0xff] }
  0xf2   : > { %v2714_v20 = vmax.f32 %v2586_v12, 0.0  ;;  %v3005_v3 = vsub.f32 %v2685_v19, %v2877_v23  ;;  %v3037_v7 = vsub.f32 %v2717_v27, %v2909_v38  ;;  %v1876_v50 = vadd.f32 %v19899_v49, %v1316_v16  ;;  %v19904_v19 = vld [vmem:[#allocation28_spill] sm:$0xff]  ;;  %v19909_v38 = vld [vmem:[#allocation62_spill] sm:$0xff] }
  0xf3   : > { %v2308_v44 = vmul.f32 %v19879_v47, %v13793_v39  ;;  %3255 = vmatprep.subr.bf16.mxu0 %v3099_v29  ;;  %v2404_v31 = vadd.f32 %v2276_v11, %v1844_v22  ;;  %v663_v46 = vmul.f32 %v19902_v32, %v19901_v57  ;;  %v695_v40 = vmul.f32 %v19902_v32, %v19903_v59  ;;  %v19910_v29 = vld [vmem:[#allocation75_spill] sm:$0xff]  ;;  %v19912_v49 = vld [vmem:[#allocation58_spill] sm:$0xff] }
  0xf4   : > { %v14064_v48 = vpack.c.bf16 %v2714_v20, %v2682_v24  ;;  %v3101_v61 = vpack.c.bf16 %v3037_v7, %v3005_v3  ;;  %v2247_v27 = vmul.f32 %v19904_v19, %v13716_v60  ;;  %v665_v51 = vmul.f32 %v19905_v2, %v19901_v57  ;;  %v19911_v3 = vld [vmem:[#allocation77_spill] sm:$0xff] }
  0xf5   : > { %v2436_v63 = vadd.f32 %v2308_v44, %v1876_v50  ;;  %v2556_v41 = vadd.f32 %v13850_v34, %v2404_v31  ;;  %v1223_v36 = vadd.f32 %v19906_v35, %v663_v46  ;;  %v1255_v18 = vadd.f32 %v19907_v56, %v695_v40  ;;  %v19913_v50 = vld [vmem:[#allocation26_spill] sm:$0xff]  ;;  %v19914_v46 = vld [vmem:[#allocation63_spill] sm:$0xff]  ;;  %v19916_v35 = vld [vmem:[#allocation36_spill] sm:$0xff] }
  0xf6   : > { %19900 = vst [vmem:[#allocation55_spill] sm:$0xff] %v14064_v48  ;;  %v2874_v47 = vunpack.c.l.bf16 %v14064_v48  ;;  %v2906_v5 = vunpack.c.h.bf16 %v14064_v48  ;;  %3308 = vmatprep.subr.bf16.mxu1 %v3101_v61  ;;  %v697_v26 = vmul.f32 %v19905_v2, %v19903_v59  ;;  %v1225_v45 = vadd.f32 %v19908_v30, %v665_v51  ;;  %v19915_v61 = vld [vmem:[#allocation78_spill] sm:$0xff]  ;;  %v19917_v51 = vld [vmem:[#allocation31_spill] sm:$0xff] }
  0xf7   : > { %v2588_v14 = vadd.f32 %v13815_v25, %v2436_v63  ;;  %v2684_v23 = vmax.f32 %v2556_v41, 0.0  ;;  %v1783_v16 = vadd.f32 %v19909_v38, %v1223_v36  ;;  %v1815_v11 = vadd.f32 %v19910_v29, %v1255_v18  ;;  %v19919_v56 = vld [vmem:[#allocation30_spill] sm:$0xff]  ;;  %v19921_v29 = vld [vmem:[#allocation27_spill] sm:$0xff] }
  0xf8   : > { %v3002_v9 = vsub.f32 %v2682_v24, %v2874_v47  ;;  %v3034_v12 = vsub.f32 %v2714_v20, %v2906_v5  ;;  %v1257_v7 = vadd.f32 %v19911_v3, %v697_v26  ;;  %v1689_v44 = vmul.f32 %v19913_v50, %v19912_v49  ;;  %v19922_v3 = vld [vmem:[#allocation44_spill] sm:$0xff] }
  0xf9   : > { %v2716_v22 = vmax.f32 %v2588_v14, 0.0  ;;  %v2343_v40 = vadd.f32 %v19914_v46, %v1783_v16  ;;  %v1785_v63 = vadd.f32 %v19915_v61, %v1225_v45  ;;  %v2217_v24 = vmul.f32 %v19917_v51, %v19916_v35  ;;  %v19920_v16 = vld [vmem:[#allocation35_spill] sm:$0xff] }
  0xfa   : > { %v3098_v31 = vpack.c.bf16 %v3034_v12, %v3002_v9  ;;  %v2375_v47 = vadd.f32 %v2247_v27, %v1815_v11  ;;  %v1817_v5 = vadd.f32 %v1689_v44, %v1257_v7  ;;  %v2249_v41 = vmul.f32 %v19917_v51, %v13716_v60 }
  0xfb   : > { %v14092_v20 = vpack.c.bf16 %v2716_v22, %v2684_v23  ;;  %v2495_v36 = vadd.f32 %v13696_v53, %v2343_v40  ;;  %v2345_v14 = vadd.f32 %v2217_v24, %v1785_v63  ;;  %v662_v18 = vmul.f32 %v19919_v56, %v19901_v57 }
  0xfc   : > { %3256 = vmatpush1.bf16.msra.mxu0 %v3098_v31  ;;  %v694_v26 = vmul.f32 %v19919_v56, %v19903_v59  ;;  %v2527_v27 = vadd.f32 %v13824_v37, %v2375_v47  ;;  %v2377_v9 = vadd.f32 %v2249_v41, %v1817_v5  ;;  %v1094_v11 = vmul.f32 %v19921_v29, %v19920_v16  ;;  %v19923_v47 = vld [vmem:[#allocation49_spill] sm:$0xff]  ;;  %v19924_v5 = vld [vmem:[#allocation32_spill] sm:$0xff] }
  0xfd   : > { %19918 = vst [vmem:[#allocation67_spill] sm:$0xff] %v14092_v20  ;;  %v2876_v30 = vunpack.c.l.bf16 %v14092_v20  ;;  %v2908_v45 = vunpack.c.h.bf16 %v14092_v20  ;;  %v2623_v12 = vmax.f32 %v2495_v36, 0.0  ;;  %v2497_v38 = vadd.f32 %v13696_v53, %v2345_v14 }
  0xfe   : > { %v1126_v7 = vmul.f32 %v19921_v29, %v19922_v3  ;;  %v2655_v46 = vmax.f32 %v2527_v27, 0.0  ;;  %v2529_v40 = vadd.f32 %v13824_v37, %v2377_v9  ;;  %v1222_v63 = vadd.f32 %v1094_v11, %v662_v18 }
  0xff   : > { %v3004_v44 = vsub.f32 %v2684_v23, %v2876_v30  ;;  %v3036_v31 = vsub.f32 %v2716_v22, %v2908_v45  ;;  %12566 = vmatmul.mubr.msk.bf16.vlgmr.msra.gmra.mrb[8].mxu0 %vm3140_vm0, %v13950_v10  ;;  %v2625_v61 = vmax.f32 %v2497_v38, 0.0  ;;  %v1654_v41 = vmul.f32 %v19924_v5, %v19923_v47  ;;  %v19926_v30 = vld [vmem:[#allocation37_spill] sm:$0xff] }
 0x100   : > { %v1254_v24 = vadd.f32 %v1126_v7, %v694_v26  ;;  %3295 = vmatprep.mubr.bf16.mxu0 %v19882_v21  ;;  %v14115_v14 = vpack.c.bf16 %v2655_v46, %v2623_v12  ;;  %v2657_v20 = vmax.f32 %v2529_v40, 0.0  ;;  %v1686_v23 = vmul.f32 %v19924_v5, %v19912_v49  ;;  %v19927_v26 = vld [vmem:[#allocation33_spill] sm:$0xff]  ;;  %v19929_v40 = vld [vmem:[#allocation34_spill] sm:$0xff] }
 0x101   : > { %v3100_v36 = vpack.c.bf16 %v3036_v31, %v3004_v44  ;;  %v1782_v22 = vadd.f32 %v1654_v41, %v1222_v63  ;;  %v2214_v45 = vmul.f32 %v19926_v30, %v19916_v35  ;;  %v2246_v18 = vmul.f32 %v19926_v30, %v13716_v60 }
 0x102   : > { %19925 = vst [vmem:[#allocation46_spill] sm:$0xff] %v14115_v14  ;;  %v664_v27 = vmul.f32 %v19927_v26, %v19901_v57  ;;  %v2815_v9 = vunpack.c.l.bf16 %v14115_v14  ;;  %v2847_v38 = vunpack.c.h.bf16 %v14115_v14  ;;  %v14127_v11 = vpack.c.bf16 %v2657_v20, %v2625_v61 }
 0x103   : > { %3309 = vmatpush1.bf16.msra.mxu1 %v3100_v36  ;;  %v1814_v7 = vadd.f32 %v1686_v23, %v1254_v24  ;;  %v2342_v44 = vadd.f32 %v2214_v45, %v1782_v22  ;;  %v696_v31 = vmul.f32 %v19927_v26, %v19903_v59  ;;  %v1096_v63 = vmul.f32 %v19929_v40, %v19920_v16 }
 0x104   : > { %19928 = vst [vmem:[#allocation81_spill] sm:$0xff] %v14127_v11  ;;  %v1128_v41 = vmul.f32 %v19929_v40, %v19922_v3  ;;  %v2943_v42 = vsub.f32 %v2623_v12, %v2815_v9  ;;  %v2975_v1 = vsub.f32 %v2655_v46, %v2847_v38  ;;  %v2817_v36 = vunpack.c.l.bf16 %v14127_v11 }
 0x105   : > { %v2849_v48 = vunpack.c.h.bf16 %v14127_v11  ;;  %v2374_v24 = vadd.f32 %v2246_v18, %v1814_v7  ;;  %v2494_v23 = vadd.f32 %v13696_v53, %v2342_v44  ;;  %v1224_v22 = vadd.f32 %v1096_v63, %v664_v27  ;;  %v19931_v18 = vld [vmem:[#allocation39_spill] sm:$0xff]  ;;  %v19932_v44 = vld [vmem:[#allocation22_spill] sm:$0xff] }
 0x106   : > { %12568 = vmatmul.mubr.msk.bf16.vlgmr.msra.gmra.mrb[8].mxu1 %vm3140_vm0, %v13950_v10  ;;  %v1256_v45 = vadd.f32 %v1128_v41, %v696_v31  ;;  %v3071_v14 = vpack.c.bf16 %v2975_v1, %v2943_v42  ;;  %v2945_v4 = vsub.f32 %v2625_v61, %v2817_v36  ;;  %v1656_v6 = vmul.f32 %v19930_v17, %v19923_v47  ;;  %v19934_v63 = vld [vmem:[#allocation59_spill] sm:$0xff] }
 0x107   : > { %v2977_v15 = vsub.f32 %v2657_v20, %v2849_v48  ;;  %3348 = vmatprep.mubr.bf16.mxu1 %v19882_v21  ;;  %v2526_v12 = vadd.f32 %v13824_v37, %v2374_v24  ;;  %v2622_v46 = vmax.f32 %v2494_v23, 0.0  ;;  %v1688_v9 = vmul.f32 %v19930_v17, %v19912_v49  ;;  %12567 = vmatmul.mubr.msk.bf16.gmra.mrb[12].mxu0 %vm3140_vm0, %v13992_v55 }
 0x108   : > { %v2216_v38 = vmul.f32 %v19931_v18, %v19916_v35  ;;  %3359 = vmatprep.subr.bf16.mxu0 %v3071_v14  ;;  %v1784_v42 = vadd.f32 %v1656_v6, %v1224_v22  ;;  %v2248_v48 = vmul.f32 %v19931_v18, %v13716_v60  ;;  %v727_v20 = vmul.f32 %v19902_v32, %v19881_v54 }
 0x109   : > { %v3073_v1 = vpack.c.bf16 %v2977_v15, %v2945_v4  ;;  %v2654_v61 = vmax.f32 %v2526_v12, 0.0  ;;  %v1816_v27 = vadd.f32 %v1688_v9, %v1256_v45  ;;  %v759_v7 = vmul.f32 %v19902_v32, %v13674_v28  ;;  %3391 = vmatprep.mubr.bf16.mxu0 %v19882_v21  ;;  %v19933_v15 = vld [vmem:[#allocation25_spill] sm:$0xff] }
 0x10a   : > { %v1159_v31 = vmul.f32 %v19932_v44, %v13660_v43  ;;  %v2344_v14 = vadd.f32 %v2216_v38, %v1784_v42  ;;  %v1191_v6 = vmul.f32 %v19932_v44, %v13680_v33  ;;  %v1719_v4 = vmul.f32 %v19933_v15, %v13746_v52 }
 0x10b   : > { %3412 = vmatprep.subr.bf16.mxu1 %v3073_v1  ;;  %v1751_v41 = vmul.f32 %v19933_v15, %v19934_v63  ;;  %v14165_v36 = vpack.c.bf16 %v2654_v61, %v2622_v46  ;;  %v2376_v24 = vadd.f32 %v2248_v48, %v1816_v27  ;;  %v2279_v23 = vmul.f32 %v19904_v19, %v13771_v8 }
 0x10c   : > { %v1287_v32 = vadd.f32 %v1159_v31, %v727_v20  ;;  %v2496_v22 = vadd.f32 %v13696_v53, %v2344_v14  ;;  %v1319_v45 = vadd.f32 %v1191_v6, %v759_v7  ;;  %v2311_v12 = vmul.f32 %v19904_v19, %v13793_v39  ;;  %v19936_v19 = vld [vmem:[#allocation24_spill] sm:$0xff] }
 0x10d   : > { %19935 = vst [vmem:[#allocation47_spill] sm:$0xff] %v14165_v36  ;;  %v729_v9 = vmul.f32 %v19905_v2, %v19881_v54  ;;  %v2814_v38 = vunpack.c.l.bf16 %v14165_v36  ;;  %v2846_v1 = vunpack.c.h.bf16 %v14165_v36  ;;  %v2528_v42 = vadd.f32 %v13824_v37, %v2376_v24 }
 0x10e   : > { %v1847_v48 = vadd.f32 %v1719_v4, %v1287_v32  ;;  %12569 = vmatmul.mubr.msk.bf16.gmra.mrb[12].mxu1 %vm3140_vm0, %v13992_v55  ;;  %v2624_v20 = vmax.f32 %v2496_v22, 0.0  ;;  %v1879_v27 = vadd.f32 %v1751_v41, %v1319_v45  ;;  %v761_v7 = vmul.f32 %v19905_v2, %v13674_v28 }
 0x10f   : > { %v1161_v44 = vmul.f32 %v19936_v19, %v13660_v43  ;;  %3444 = vmatprep.mubr.bf16.mxu1 %v19882_v21  ;;  %v2942_v31 = vsub.f32 %v2622_v46, %v2814_v38  ;;  %v2974_v14 = vsub.f32 %v2654_v61, %v2846_v1  ;;  %v2656_v6 = vmax.f32 %v2528_v42, 0.0 }
 0x110   : > { %v2407_v15 = vadd.f32 %v2279_v23, %v1847_v48  ;;  %v2439_v36 = vadd.f32 %v2311_v12, %v1879_v27  ;;  %v1193_v4 = vmul.f32 %v19936_v19, %v13680_v33  ;;  %v1721_v41 = vmul.f32 %v19913_v50, %v13746_v52 }
 0x111   : > { %v1289_v24 = vadd.f32 %v1161_v44, %v729_v9  ;;  %v3070_v32 = vpack.c.bf16 %v2974_v14, %v2942_v31  ;;  %v14188_v22 = vpack.c.bf16 %v2656_v6, %v2624_v20  ;;  %v1753_v45 = vmul.f32 %v19913_v50, %v19934_v63 }
 0x112   : > { %v2559_v2 = vadd.f32 %v13850_v34, %v2407_v15  ;;  %v2591_v46 = vadd.f32 %v13815_v25, %v2439_v36  ;;  %v1321_v61 = vadd.f32 %v1193_v4, %v761_v7  ;;  %v2281_v12 = vmul.f32 %v19917_v51, %v13771_v8 }
 0x113   : > { %19937 = vst [vmem:[#allocation56_spill] sm:$0xff] %v14188_v22  ;;  %v1849_v23 = vadd.f32 %v1721_v41, %v1289_v24  ;;  %3360 = vmatpush1.bf16.msra.mxu0 %v3070_v32  ;;  %v2816_v9 = vunpack.c.l.bf16 %v14188_v22  ;;  %v2848_v38 = vunpack.c.h.bf16 %v14188_v22  ;;  %v2313_v42 = vmul.f32 %v19917_v51, %v13793_v39 }
 0x114   : > { %v2687_v1 = vmax.f32 %v2559_v2, 0.0  ;;  %v2719_v48 = vmax.f32 %v2591_v46, 0.0  ;;  %v1881_v27 = vadd.f32 %v1753_v45, %v1321_v61  ;;  %v726_v50 = vmul.f32 %v19919_v56, %v19881_v54 }
 0x115   : > { %v2409_v19 = vadd.f32 %v2281_v12, %v1849_v23  ;;  %v2944_v36 = vsub.f32 %v2624_v20, %v2816_v9  ;;  %v2976_v7 = vsub.f32 %v2656_v6, %v2848_v38  ;;  %v758_v44 = vmul.f32 %v19919_v56, %v13674_v28 }
 0x116   : > { %v1158_v31 = vmul.f32 %v19921_v29, %v13660_v43  ;;  %v14206_v14 = vpack.c.bf16 %v2719_v48, %v2687_v1  ;;  %v2441_v15 = vadd.f32 %v2313_v42, %v1881_v27  ;;  %v1190_v51 = vmul.f32 %v19921_v29, %v13680_v33 }
 0x117   : > { %v2561_v4 = vadd.f32 %v13850_v34, %v2409_v19  ;;  %v3072_v24 = vpack.c.bf16 %v2976_v7, %v2944_v36  ;;  %v1718_v20 = vmul.f32 %v19924_v5, %v13746_v52  ;;  %v1750_v6 = vmul.f32 %v19924_v5, %v19934_v63 }
 0x118   : > { %19938 = vst [vmem:[#allocation57_spill] sm:$0xff] %v14206_v14  ;;  %v1286_v41 = vadd.f32 %v1158_v31, %v726_v50  ;;  %v2879_v56 = vunpack.c.l.bf16 %v14206_v14  ;;  %v2911_v32 = vunpack.c.h.bf16 %v14206_v14  ;;  %v2593_v2 = vadd.f32 %v13815_v25, %v2441_v15 }
 0x119   : > { %v2689_v45 = vmax.f32 %v2561_v4, 0.0  ;;  %3413 = vmatpush1.bf16.msra.mxu1 %v3072_v24  ;;  %v1318_v46 = vadd.f32 %v1190_v51, %v758_v44  ;;  %v2278_v29 = vmul.f32 %v19926_v30, %v13771_v8  ;;  %v2310_v23 = vmul.f32 %v19926_v30, %v13793_v39 }
 0x11a   : > { %v1846_v61 = vadd.f32 %v1718_v20, %v1286_v41  ;;  %v3007_v12 = vsub.f32 %v2687_v1, %v2879_v56  ;;  %v3039_v9 = vsub.f32 %v2719_v48, %v2911_v32  ;;  %v2721_v38 = vmax.f32 %v2593_v2, 0.0  ;;  %v14245_v2 = vld [vmem:[%s13175_s17 + $0x30] sm:$0xff] }
 0x11b   : > { %v728_v5 = vmul.f32 %v19927_v26, %v19881_v54  ;;  %v1878_v42 = vadd.f32 %v1750_v6, %v1318_v46  ;;  %v760_v19 = vmul.f32 %v19927_v26, %v13674_v28  ;;  %v1160_v50 = vmul.f32 %v19929_v40, %v13660_v43  ;;  %v19940_v46 = vld [vmem:[#allocation7_spill] sm:$0xff] }
 0x11c   : > { %v2406_v27 = vadd.f32 %v2278_v29, %v1846_v61  ;;  %v3103_v36 = vpack.c.bf16 %v3039_v9, %v3007_v12  ;;  %v14228_v7 = vpack.c.bf16 %v2721_v38, %v2689_v45  ;;  %v1192_v30 = vmul.f32 %v19929_v40, %v13680_v33  ;;  %v19941_v12 = vld [vmem:[#allocation40_spill] sm:$0xff] }
 0x11d   : > { %v1720_v1 = vmul.f32 %v19930_v17, %v13746_v52  ;;  %v2438_v48 = vadd.f32 %v2310_v23, %v1878_v42  ;;  %v1288_v31 = vadd.f32 %v1160_v50, %v728_v5  ;;  %v1752_v26 = vmul.f32 %v19930_v17, %v19934_v63  ;;  %v14259_v50 = vld [vmem:[%s13175_s17 + $0x38] sm:$0xff] }
 0x11e   : > { %19939 = vst [vmem:[#allocation68_spill] sm:$0xff] %v14228_v7  ;;  %v2558_v44 = vadd.f32 %v13850_v34, %v2406_v27  ;;  %3361 = vmatprep.subr.bf16.mxu0 %v3103_v36  ;;  %v2881_v15 = vunpack.c.l.bf16 %v14228_v7  ;;  %v2913_v4 = vunpack.c.h.bf16 %v14228_v7  ;;  %v1320_v51 = vadd.f32 %v1192_v30, %v760_v19  ;;  %v19942_v19 = vld [vmem:[#allocation6_spill] sm:$0xff] }
 0x11f   : > { %v2280_v40 = vmul.f32 %v19931_v18, %v13771_v8  ;;  %v2590_v24 = vadd.f32 %v13815_v25, %v2438_v48  ;;  %v1848_v20 = vadd.f32 %v1720_v1, %v1288_v31  ;;  %v2312_v6 = vmul.f32 %v19931_v18, %v13793_v39  ;;  %v19945_v1 = vld [vmem:[#allocation8_spill] sm:$0xff] }
 0x120   : > { %v2686_v41 = vmax.f32 %v2558_v44, 0.0  ;;  %v3009_v56 = vsub.f32 %v2689_v45, %v2881_v15  ;;  %v3041_v32 = vsub.f32 %v2721_v38, %v2913_v4  ;;  %v1880_v17 = vadd.f32 %v1752_v26, %v1320_v51  ;;  %v19943_v45 = vld [vmem:[#allocation3_spill] sm:$0xff]  ;;  %v19946_v4 = vld [vmem:[#allocation5_spill] sm:$0xff] }
 0x121   : > { %v421_v61 = vrot.slane %v14245_v2, %v19940_v46  ;;  %v2718_v29 = vmax.f32 %v2590_v24, 0.0  ;;  %v2408_v23 = vadd.f32 %v2280_v40, %v1848_v20  ;;  %v1099_v9 = vmul.f32 %v19941_v12, %v19920_v16 }
 0x122   : > { %v1131_v5 = vmul.f32 %v19941_v12, %v19922_v3  ;;  %v3105_v42 = vpack.c.bf16 %v3041_v32, %v3009_v56  ;;  %v2440_v27 = vadd.f32 %v2312_v6, %v1880_v17  ;;  %v1413_v38 = vrot.slane %v14245_v2, %v19943_v45  ;;  %v19947_v6 = vld [vmem:[#allocation9_spill] sm:$0xff] }
 0x123   : > { %v14254_v18 = vrot.slane %v421_v61, %v19942_v19  ;;  %v14261_v36 = vpack.c.bf16 %v2718_v29, %v2686_v41  ;;  %v2560_v30 = vadd.f32 %v13850_v34, %v2408_v23  ;;  %v1973_v48 = vrot.slane %v14245_v2, %v19945_v1 }
 0x124   : > { %v429_v44 = vrot.slane %v14259_v50, %v19940_v46  ;;  %3414 = vmatprep.subr.bf16.mxu1 %v3105_v42  ;;  %v2592_v31 = vadd.f32 %v13815_v25, %v2440_v27  ;;  %v14274_v51 = vrot.slane %v1413_v38, %v19946_v4  ;;  %v425_v11 = vrot.slane %v14259_v50, %v19942_v19 }
 0x125   : > { %19944 = vst [vmem:[#allocation21_spill] sm:$0xff] %v14261_v36  ;;  %v667_v26 = vmul.f32 %v14254_v18, %v19901_v57  ;;  %v699_v15 = vmul.f32 %v14254_v18, %v19903_v59  ;;  %v2878_v40 = vunpack.c.l.bf16 %v14261_v36  ;;  %v2910_v24 = vunpack.c.h.bf16 %v14261_v36 }
 0x126   : > { %v2688_v20 = vmax.f32 %v2560_v30, 0.0  ;;  %v14279_v56 = vrot.slane %v1973_v48, %v19947_v6  ;;  %v2720_v32 = vmax.f32 %v2592_v31, 0.0  ;;  %v1659_v23 = vmul.f32 %v14274_v51, %v19923_v47 }
 0x127   : > { %v1227_v17 = vadd.f32 %v1099_v9, %v667_v26  ;;  %v1259_v61 = vadd.f32 %v1131_v5, %v699_v15  ;;  %v3006_v42 = vsub.f32 %v2686_v41, %v2878_v40  ;;  %v3038_v27 = vsub.f32 %v2718_v29, %v2910_v24  ;;  %v19949_v26 = vld [vmem:[#allocation2_spill] sm:$0xff] }
 0x128   : > { %v1691_v38 = vmul.f32 %v14274_v51, %v19912_v49  ;;  %v2219_v7 = vmul.f32 %v14279_v56, %v19916_v35  ;;  %v14287_v22 = vpack.c.bf16 %v2720_v32, %v2688_v20  ;;  %v2251_v48 = vmul.f32 %v14279_v56, %v13716_v60 }
 0x129   : > { %v1787_v30 = vadd.f32 %v1659_v23, %v1227_v17  ;;  %v14292_v9 = vrot.slane %v429_v44, %v19942_v19  ;;  %v3102_v5 = vpack.c.bf16 %v3038_v27, %v3006_v42  ;;  %v861_v41 = vrot.slane %v14259_v50, %v19949_v26 }
 0x12a   : > { %19948 = vst [vmem:[#allocation48_spill] sm:$0xff] %v14287_v22  ;;  %v1819_v31 = vadd.f32 %v1691_v38, %v1259_v61  ;;  %v1421_v29 = vrot.slane %v14259_v50, %v19943_v45  ;;  %v2880_v15 = vunpack.c.l.bf16 %v14287_v22  ;;  %v2912_v40 = vunpack.c.h.bf16 %v14287_v22  ;;  %v19950_v61 = vld [vmem:[#allocation4_spill] sm:$0xff] }
 0x12b   : > { %v2347_v24 = vadd.f32 %v2219_v7, %v1787_v30  ;;  %v669_v17 = vmul.f32 %v14292_v9, %v19901_v57  ;;  %3362 = vmatpush1.bf16.msra.mxu0 %v3102_v5  ;;  %v701_v44 = vmul.f32 %v14292_v9, %v19903_v59  ;;  %v14305_v42 = vrot.slane %v861_v41, %v19950_v61 }
 0x12c   : > { %v2379_v23 = vadd.f32 %v2251_v48, %v1819_v31  ;;  %v14308_v27 = vrot.slane %v1421_v29, %v19946_v4  ;;  %v3008_v38 = vsub.f32 %v2688_v20, %v2880_v15  ;;  %v3040_v36 = vsub.f32 %v2720_v32, %v2912_v40 }
 0x12d   : > { %v2499_v14 = vadd.f32 %v13696_v53, %v2347_v24  ;;  %v1981_v7 = vrot.slane %v14259_v50, %v19945_v1  ;;  %v1101_v48 = vmul.f32 %v14305_v42, %v19920_v16  ;;  %v1133_v5 = vmul.f32 %v14305_v42, %v19922_v3 }
 0x12e   : > { %v2531_v30 = vadd.f32 %v13824_v37, %v2379_v23  ;;  %v1661_v31 = vmul.f32 %v14308_v27, %v19923_v47  ;;  %v3104_v41 = vpack.c.bf16 %v3040_v36, %v3008_v38  ;;  %v1693_v20 = vmul.f32 %v14308_v27, %v19912_v49  ;;  %12570 = vmatmul.mubr.msk.bf16.vlgmr.msra.gmra.mrb[16].mxu0 %vm3140_vm0, %v13950_v10 }
 0x12f   : > { %v2627_v29 = vmax.f32 %v2499_v14, 0.0  ;;  %v14323_v32 = vrot.slane %v1981_v7, %v19947_v6  ;;  %v1229_v40 = vadd.f32 %v1101_v48, %v669_v17  ;;  %v1261_v24 = vadd.f32 %v1133_v5, %v701_v44  ;;  %3401 = vmatprep.mubr.bf16.mxu0 %v19882_v21 }
 0x130   : > { %v2659_v15 = vmax.f32 %v2531_v30, 0.0  ;;  %v417_v23 = vrot.slane %v14245_v2, %v19942_v19  ;;  %3415 = vmatpush1.bf16.msra.mxu1 %v3104_v41  ;;  %v849_v38 = vrot.slane %v14245_v2, %v19950_v61  ;;  %v1409_v7 = vrot.slane %v14245_v2, %v19946_v4 }
 0x131   : > { %v2221_v14 = vmul.f32 %v14323_v32, %v19916_v35  ;;  %v2253_v36 = vmul.f32 %v14323_v32, %v13716_v60  ;;  %v1789_v44 = vadd.f32 %v1661_v31, %v1229_v40  ;;  %v1821_v30 = vadd.f32 %v1693_v20, %v1261_v24 }
 0x132   : > { %v14338_v17 = vpack.c.bf16 %v2659_v15, %v2627_v29  ;;  %v14341_v48 = vrot.slane %v417_v23, %v19942_v19  ;;  %v14344_v5 = vrot.slane %v849_v38, %v19950_v61  ;;  %v14347_v41 = vrot.slane %v1409_v7, %v19946_v4 }
 0x133   : > { %v1969_v22 = vrot.slane %v14245_v2, %v19947_v6  ;;  %v2349_v20 = vadd.f32 %v2221_v14, %v1789_v44  ;;  %v2381_v40 = vadd.f32 %v2253_v36, %v1821_v30  ;;  %12572 = vmatmul.mubr.msk.bf16.vlgmr.msra.gmra.mrb[16].mxu1 %vm3140_vm0, %v13950_v10 }
 0x134   : > { %19951 = vst [vmem:[#allocation74_spill] sm:$0xff] %v14338_v17  ;;  %v2819_v13 = vunpack.c.l.bf16 %v14338_v17  ;;  %v2851_v31 = vunpack.c.h.bf16 %v14338_v17  ;;  %v666_v24 = vmul.f32 %v14341_v48, %v19901_v57  ;;  %v698_v23 = vmul.f32 %v14341_v48, %v19903_v59  ;;  %3454 = vmatprep.mubr.bf16.mxu1 %v19882_v21 }
 0x135   : > { %v1098_v2 = vmul.f32 %v14344_v5, %v19920_v16  ;;  %v1130_v38 = vmul.f32 %v14344_v5, %v19922_v3  ;;  %v2501_v36 = vadd.f32 %v13696_v53, %v2349_v20  ;;  %v2533_v10 = vadd.f32 %v13824_v37, %v2381_v40 }
 0x136   : > { %v2947_v7 = vsub.f32 %v2627_v29, %v2819_v13  ;;  %v2979_v14 = vsub.f32 %v2659_v15, %v2851_v31  ;;  %v1658_v17 = vmul.f32 %v14347_v41, %v19923_v47  ;;  %v1690_v58 = vmul.f32 %v14347_v41, %v19912_v49  ;;  %12571 = vmatmul.mubr.msk.bf16.gmra.mrb[20].mxu0 %vm3140_vm0, %v13992_v55 }
 0x137   : > { %v1226_v44 = vadd.f32 %v1098_v2, %v666_v24  ;;  %v1258_v30 = vadd.f32 %v1130_v38, %v698_v23  ;;  %v2629_v0 = vmax.f32 %v2501_v36, 0.0  ;;  %v2661_v1 = vmax.f32 %v2533_v10, 0.0  ;;  %3497 = vmatprep.mubr.bf16.mxu0 %v19882_v21 }
 0x138   : > { %v3075_v62 = vpack.c.bf16 %v2979_v14, %v2947_v7  ;;  %v14375_v13 = vrot.slane %v1969_v22, %v19947_v6  ;;  %v14379_v31 = vrot.slane %v425_v11, %v19942_v19  ;;  %v857_v20 = vrot.slane %v14259_v50, %v19950_v61 }
 0x139   : > { %v1786_v29 = vadd.f32 %v1658_v17, %v1226_v44  ;;  %v1818_v15 = vadd.f32 %v1690_v58, %v1258_v30  ;;  %v14383_v40 = vpack.c.bf16 %v2661_v1, %v2629_v0  ;;  %v1417_v23 = vrot.slane %v14259_v50, %v19946_v4 }
 0x13a   : > { %3465 = vmatprep.subr.bf16.mxu0 %v3075_v62  ;;  %v2218_v24 = vmul.f32 %v14375_v13, %v19916_v35  ;;  %v2250_v22 = vmul.f32 %v14375_v13, %v13716_v60  ;;  %v668_v58 = vmul.f32 %v14379_v31, %v19901_v57  ;;  %v700_v11 = vmul.f32 %v14379_v31, %v19903_v59 }
 0x13b   : > { %19952 = vst [vmem:[#allocation10_spill] sm:$0xff] %v14383_v40  ;;  %v14396_v17 = vrot.slane %v857_v20, %v19950_v61  ;;  %v1977_v62 = vrot.slane %v14259_v50, %v19947_v6  ;;  %v2821_v2 = vunpack.c.l.bf16 %v14383_v40  ;;  %v2853_v38 = vunpack.c.h.bf16 %v14383_v40  ;;  %12573 = vmatmul.mubr.msk.bf16.gmra.mrb[20].mxu1 %vm3140_vm0, %v13992_v55 }
 0x13c   : > { %v2346_v7 = vadd.f32 %v2218_v24, %v1786_v29  ;;  %v2378_v14 = vadd.f32 %v2250_v22, %v1818_v15  ;;  %v14409_v44 = vrot.slane %v1417_v23, %v19946_v4  ;;  %3550 = vmatprep.mubr.bf16.mxu1 %v19882_v21 }
 0x13d   : > { %v1100_v36 = vmul.f32 %v14396_v17, %v19920_v16  ;;  %v1132_v10 = vmul.f32 %v14396_v17, %v19922_v3  ;;  %v14412_v50 = vrot.slane %v1977_v62, %v19947_v6  ;;  %v2949_v30 = vsub.f32 %v2629_v0, %v2821_v2 }
 0x13e   : > { %v2981_v29 = vsub.f32 %v2661_v1, %v2853_v38  ;;  %v2498_v15 = vadd.f32 %v13696_v53, %v2346_v7  ;;  %v2530_v55 = vadd.f32 %v13824_v37, %v2378_v14  ;;  %v1660_v22 = vmul.f32 %v14409_v44, %v19923_v47 }
 0x13f   : > { %v1228_v20 = vadd.f32 %v1100_v36, %v668_v58  ;;  %v1260_v24 = vadd.f32 %v1132_v10, %v700_v11  ;;  %v1692_v23 = vmul.f32 %v14409_v44, %v19912_v49  ;;  %v2220_v21 = vmul.f32 %v14412_v50, %v19916_v35 }
 0x140   : > { %v3077_v40 = vpack.c.bf16 %v2981_v29, %v2949_v30  ;;  %v2626_v4 = vmax.f32 %v2498_v15, 0.0  ;;  %v2658_v62 = vmax.f32 %v2530_v55, 0.0  ;;  %v2252_v2 = vmul.f32 %v14412_v50, %v13716_v60 }
 0x141   : > { %v1788_v0 = vadd.f32 %v1660_v22, %v1228_v20  ;;  %v1820_v1 = vadd.f32 %v1692_v23, %v1260_v24  ;;  %v731_v58 = vmul.f32 %v14254_v18, %v19881_v54  ;;  %v763_v38 = vmul.f32 %v14254_v18, %v13674_v28 }
 0x142   : > { %3518 = vmatprep.subr.bf16.mxu1 %v3077_v40  ;;  %v14427_v11 = vpack.c.bf16 %v2658_v62, %v2626_v4  ;;  %v1163_v7 = vmul.f32 %v19941_v12, %v13660_v43  ;;  %v1195_v14 = vmul.f32 %v19941_v12, %v13680_v33  ;;  %v1723_v30 = vmul.f32 %v14274_v51, %v13746_v52 }
 0x143   : > { %v2348_v36 = vadd.f32 %v2220_v21, %v1788_v0  ;;  %v2380_v10 = vadd.f32 %v2252_v2, %v1820_v1  ;;  %v1755_v29 = vmul.f32 %v14274_v51, %v19934_v63  ;;  %v2283_v21 = vmul.f32 %v14279_v56, %v13771_v8 }
 0x144   : > { %19953 = vst [vmem:[#allocation13_spill] sm:$0xff] %v14427_v11  ;;  %v2818_v40 = vunpack.c.l.bf16 %v14427_v11  ;;  %v2850_v15 = vunpack.c.h.bf16 %v14427_v11  ;;  %v1291_v55 = vadd.f32 %v1163_v7, %v731_v58  ;;  %v1323_v18 = vadd.f32 %v1195_v14, %v763_v38 }
 0x145   : > { %v2500_v20 = vadd.f32 %v13696_v53, %v2348_v36  ;;  %v2532_v24 = vadd.f32 %v13824_v37, %v2380_v10  ;;  %v2315_v12 = vmul.f32 %v14279_v56, %v13793_v39  ;;  %v733_v58 = vmul.f32 %v14292_v9, %v19881_v54 }
 0x146   : > { %v2946_v22 = vsub.f32 %v2626_v4, %v2818_v40  ;;  %v2978_v23 = vsub.f32 %v2658_v62, %v2850_v15  ;;  %v1851_v0 = vadd.f32 %v1723_v30, %v1291_v55  ;;  %v1883_v51 = vadd.f32 %v1755_v29, %v1323_v18 }
 0x147   : > { %v2628_v1 = vmax.f32 %v2500_v20, 0.0  ;;  %v2660_v2 = vmax.f32 %v2532_v24, 0.0  ;;  %v765_v38 = vmul.f32 %v14292_v9, %v13674_v28  ;;  %v1165_v10 = vmul.f32 %v14305_v42, %v13660_v43 }
 0x148   : > { %v3074_v7 = vpack.c.bf16 %v2978_v23, %v2946_v22  ;;  %v2411_v14 = vadd.f32 %v2283_v21, %v1851_v0  ;;  %v2443_v36 = vadd.f32 %v2315_v12, %v1883_v51  ;;  %v1197_v4 = vmul.f32 %v14305_v42, %v13680_v33 }
 0x149   : > { %v14453_v11 = vpack.c.bf16 %v2660_v2, %v2628_v1  ;;  %v1725_v56 = vmul.f32 %v14308_v27, %v13746_v52  ;;  %v1757_v62 = vmul.f32 %v14308_v27, %v19934_v63  ;;  %v1293_v29 = vadd.f32 %v1165_v10, %v733_v58 }
 0x14a   : > { %3466 = vmatpush1.bf16.msra.mxu0 %v3074_v7  ;;  %v2563_v9 = vadd.f32 %v13850_v34, %v2411_v14  ;;  %v2595_v30 = vadd.f32 %v13815_v25, %v2443_v36  ;;  %v2285_v40 = vmul.f32 %v14323_v32, %v13771_v8  ;;  %v1325_v42 = vadd.f32 %v1197_v4, %v765_v38 }
 0x14b   : > { %19954 = vst [vmem:[#allocation11_spill] sm:$0xff] %v14453_v11  ;;  %v2820_v15 = vunpack.c.l.bf16 %v14453_v11  ;;  %v2852_v55 = vunpack.c.h.bf16 %v14453_v11  ;;  %v2317_v18 = vmul.f32 %v14323_v32, %v13793_v39  ;;  %v1853_v27 = vadd.f32 %v1725_v56, %v1293_v29 }
 0x14c   : > { %v2691_v20 = vmax.f32 %v2563_v9, 0.0  ;;  %v2723_v24 = vmax.f32 %v2595_v30, 0.0  ;;  %v730_v21 = vmul.f32 %v14341_v48, %v19881_v54  ;;  %v1885_v23 = vadd.f32 %v1757_v62, %v1325_v42 }
 0x14d   : > { %v2948_v12 = vsub.f32 %v2628_v1, %v2820_v15  ;;  %v2980_v22 = vsub.f32 %v2660_v2, %v2852_v55  ;;  %v762_v0 = vmul.f32 %v14341_v48, %v13674_v28  ;;  %v2413_v58 = vadd.f32 %v2285_v40, %v1853_v27 }
 0x14e   : > { %v14473_v51 = vpack.c.bf16 %v2723_v24, %v2691_v20  ;;  %v1162_v38 = vmul.f32 %v14344_v5, %v13660_v43  ;;  %v1194_v32 = vmul.f32 %v14344_v5, %v13680_v33  ;;  %v2445_v14 = vadd.f32 %v2317_v18, %v1885_v23 }
 0x14f   : > { %v3076_v7 = vpack.c.bf16 %v2980_v22, %v2948_v12  ;;  %v1722_v36 = vmul.f32 %v14347_v41, %v13746_v52  ;;  %v1754_v1 = vmul.f32 %v14347_v41, %v19934_v63  ;;  %v2565_v10 = vadd.f32 %v13850_v34, %v2413_v58 }
 0x150   : > { %19955 = vst [vmem:[#allocation14_spill] sm:$0xff] %v14473_v51  ;;  %v2883_v2 = vunpack.c.l.bf16 %v14473_v51  ;;  %v2915_v48 = vunpack.c.h.bf16 %v14473_v51  ;;  %v1290_v4 = vadd.f32 %v1162_v38, %v730_v21  ;;  %v2597_v56 = vadd.f32 %v13815_v25, %v2445_v14 }
 0x151   : > { %3519 = vmatpush1.bf16.msra.mxu1 %v3076_v7  ;;  %v1322_v62 = vadd.f32 %v1194_v32, %v762_v0  ;;  %v2282_v5 = vmul.f32 %v14375_v13, %v13771_v8  ;;  %v2314_v9 = vmul.f32 %v14375_v13, %v13793_v39  ;;  %v2693_v41 = vmax.f32 %v2565_v10, 0.0  ;;  %v14509_v32 = vld [vmem:[%s13175_s17 + $0x40] sm:$0xff] }
 0x152   : > { %v3011_v30 = vsub.f32 %v2691_v20, %v2883_v2  ;;  %v3043_v29 = vsub.f32 %v2723_v24, %v2915_v48  ;;  %v1850_v40 = vadd.f32 %v1722_v36, %v1290_v4  ;;  %v2725_v15 = vmax.f32 %v2597_v56, 0.0 }
 0x153   : > { %v1882_v55 = vadd.f32 %v1754_v1, %v1322_v62  ;;  %v732_v42 = vmul.f32 %v14379_v31, %v19881_v54  ;;  %v764_v18 = vmul.f32 %v14379_v31, %v13674_v28  ;;  %v1164_v12 = vmul.f32 %v14396_v17, %v13660_v43 }
 0x154   : > { %v3107_v27 = vpack.c.bf16 %v3043_v29, %v3011_v30  ;;  %v2410_v21 = vadd.f32 %v2282_v5, %v1850_v40  ;;  %v1196_v13 = vmul.f32 %v14396_v17, %v13680_v33  ;;  %v14499_v20 = vpack.c.bf16 %v2725_v15, %v2693_v41 }
 0x155   : > { %v2442_v24 = vadd.f32 %v2314_v9, %v1882_v55  ;;  %v1724_v22 = vmul.f32 %v14409_v44, %v13746_v52  ;;  %v1756_v23 = vmul.f32 %v14409_v44, %v19934_v63  ;;  %v1292_v0 = vadd.f32 %v1164_v12, %v732_v42 }
 0x156   : > { %19956 = vst [vmem:[#allocation69_spill] sm:$0xff] %v14499_v20  ;;  %3467 = vmatprep.subr.bf16.mxu0 %v3107_v27  ;;  %v2562_v31 = vadd.f32 %v13850_v34, %v2410_v21  ;;  %v1324_v58 = vadd.f32 %v1196_v13, %v764_v18  ;;  %v2284_v38 = vmul.f32 %v14412_v50, %v13771_v8  ;;  %v2885_v17 = vunpack.c.l.bf16 %v14499_v20 }
 0x157   : > { %v2917_v7 = vunpack.c.h.bf16 %v14499_v20  ;;  %v2594_v14 = vadd.f32 %v13815_v25, %v2442_v24  ;;  %v2316_v36 = vmul.f32 %v14412_v50, %v13793_v39  ;;  %v1852_v1 = vadd.f32 %v1724_v22, %v1292_v0  ;;  %v19959_v0 = vld [vmem:[#allocation5_spill] sm:$0xff] }
 0x158   : > { %v2690_v44 = vmax.f32 %v2562_v31, 0.0  ;;  %v1884_v2 = vadd.f32 %v1756_v23, %v1324_v58  ;;  %v437_v48 = vrot.slane %v14509_v32, %v19940_v46  ;;  %v3013_v10 = vsub.f32 %v2693_v41, %v2885_v17  ;;  %v19958_v41 = vld [vmem:[#allocation8_spill] sm:$0xff]  ;;  %v14551_v17 = vld [vmem:[%s13175_s17 + $0x48] sm:$0xff] }
 0x159   : > { %v3045_v4 = vsub.f32 %v2725_v15, %v2917_v7  ;;  %v2722_v56 = vmax.f32 %v2594_v14, 0.0  ;;  %v869_v62 = vrot.slane %v14509_v32, %v19949_v26  ;;  %v2412_v5 = vadd.f32 %v2284_v38, %v1852_v1 }
 0x15a   : > { %v2444_v9 = vadd.f32 %v2316_v36, %v1884_v2  ;;  %v14521_v30 = vrot.slane %v437_v48, %v19942_v19  ;;  %v1429_v50 = vrot.slane %v14509_v32, %v19943_v45  ;;  %v1989_v15 = vrot.slane %v14509_v32, %v19958_v41 }
 0x15b   : > { %v3109_v29 = vpack.c.bf16 %v3045_v4, %v3013_v10  ;;  %v14525_v40 = vpack.c.bf16 %v2722_v56, %v2690_v44  ;;  %v14528_v55 = vrot.slane %v869_v62, %v19950_v61  ;;  %v2564_v42 = vadd.f32 %v13850_v34, %v2412_v5 }
 0x15c   : > { %v2596_v18 = vadd.f32 %v13815_v25, %v2444_v9  ;;  %v671_v27 = vmul.f32 %v14521_v30, %v19901_v57  ;;  %v703_v21 = vmul.f32 %v14521_v30, %v19903_v59  ;;  %v14545_v58 = vrot.slane %v1429_v50, %v19959_v0 }
 0x15d   : > { %19957 = vst [vmem:[#allocation70_spill] sm:$0xff] %v14525_v40  ;;  %3520 = vmatprep.subr.bf16.mxu1 %v3109_v29  ;;  %v2882_v12 = vunpack.c.l.bf16 %v14525_v40  ;;  %v2914_v13 = vunpack.c.h.bf16 %v14525_v40  ;;  %v1103_v24 = vmul.f32 %v14528_v55, %v19920_v16  ;;  %v1135_v22 = vmul.f32 %v14528_v55, %v19922_v3 }
 0x15e   : > { %v2692_v23 = vmax.f32 %v2564_v42, 0.0  ;;  %v2724_v31 = vmax.f32 %v2596_v18, 0.0  ;;  %v14548_v38 = vrot.slane %v1989_v15, %v19947_v6  ;;  %v1663_v48 = vmul.f32 %v14545_v58, %v19923_v47 }
 0x15f   : > { %v3010_v7 = vsub.f32 %v2690_v44, %v2882_v12  ;;  %v3042_v14 = vsub.f32 %v2722_v56, %v2914_v13  ;;  %v1231_v36 = vadd.f32 %v1103_v24, %v671_v27  ;;  %v1263_v1 = vadd.f32 %v1135_v22, %v703_v21 }
 0x160   : > { %v14553_v2 = vpack.c.bf16 %v2724_v31, %v2692_v23  ;;  %v1695_v10 = vmul.f32 %v14545_v58, %v19912_v49  ;;  %v2223_v4 = vmul.f32 %v14548_v38, %v19916_v35  ;;  %v2255_v5 = vmul.f32 %v14548_v38, %v13716_v60 }
 0x161   : > { %v3106_v62 = vpack.c.bf16 %v3042_v14, %v3010_v7  ;;  %v445_v44 = vrot.slane %v14551_v17, %v19940_v46  ;;  %v877_v56 = vrot.slane %v14551_v17, %v19949_v26  ;;  %v1791_v29 = vadd.f32 %v1663_v48, %v1231_v36 }
 0x162   : > { %19960 = vst [vmem:[#allocation12_spill] sm:$0xff] %v14553_v2  ;;  %v2884_v9 = vunpack.c.l.bf16 %v14553_v2  ;;  %v2916_v50 = vunpack.c.h.bf16 %v14553_v2  ;;  %v1823_v15 = vadd.f32 %v1695_v10, %v1263_v1  ;;  %v1437_v27 = vrot.slane %v14551_v17, %v19943_v45 }
 0x163   : > { %3468 = vmatpush1.bf16.msra.mxu0 %v3106_v62  ;;  %v14570_v42 = vrot.slane %v445_v44, %v19942_v19  ;;  %v14573_v18 = vrot.slane %v877_v56, %v19950_v61  ;;  %v1997_v21 = vrot.slane %v14551_v17, %v19958_v41  ;;  %v2351_v24 = vadd.f32 %v2223_v4, %v1791_v29  ;;  %v14595_v4 = vld [vmem:[%s19382_s3] sm:$0xff]  }
 0x164   : > { %v3012_v12 = vsub.f32 %v2692_v23, %v2884_v9  ;;  %v3044_v13 = vsub.f32 %v2724_v31, %v2916_v50  ;;  %v2383_v22 = vadd.f32 %v2255_v5, %v1823_v15  ;;  %v14590_v31 = vrot.slane %v1437_v27, %v19959_v0  ;;  %19961 = vst [vmem:[#allocation17_spill] sm:$0xff] %v14595_v4 }
 0x165   : > { %v673_v7 = vmul.f32 %v14570_v42, %v19901_v57  ;;  %v705_v14 = vmul.f32 %v14570_v42, %v19903_v59  ;;  %v1105_v36 = vmul.f32 %v14573_v18, %v19920_v16  ;;  %v1137_v1 = vmul.f32 %v14573_v18, %v19922_v3 }
 0x166   : > { %v3108_v48 = vpack.c.bf16 %v3044_v13, %v3012_v12  ;;  %v2503_v10 = vadd.f32 %v13696_v53, %v2351_v24  ;;  %v2535_v23 = vadd.f32 %v13824_v37, %v2383_v22  ;;  %12574 = vmatmul.mubr.msk.bf16.vlgmr.msra.gmra.mrb[24].mxu0 %vm3140_vm0, %v14595_v4  ;;  %v14600_v44 = vrot.slane %v1997_v21, %v19947_v6 }
 0x167   : > { %v1233_v62 = vadd.f32 %v1105_v36, %v673_v7  ;;  %v1265_v5 = vadd.f32 %v1137_v1, %v705_v14  ;;  %v433_v56 = vrot.slane %v14509_v32, %v19942_v19  ;;  %v19962_v9 = vmov 0  }
 0x168   : > { %3507 = vmatprep.mubr.bf16.mxu0 %v19962_v9  ;;  %3521 = vmatpush1.bf16.msra.mxu1 %v3108_v48  ;;  %v2631_v50 = vmax.f32 %v2503_v10, 0.0  ;;  %v2663_v29 = vmax.f32 %v2535_v23, 0.0  ;;  %v1665_v15 = vmul.f32 %v14590_v31, %v19923_v47  ;;  %v1697_v27 = vmul.f32 %v14590_v31, %v19912_v49 }
 0x169   : > { %v2225_v12 = vmul.f32 %v14600_v44, %v19916_v35  ;;  %v2257_v21 = vmul.f32 %v14600_v44, %v13716_v60  ;;  %v14614_v13 = vrot.slane %v433_v56, %v19942_v19  ;;  %v865_v24 = vrot.slane %v14509_v32, %v19950_v61 }
 0x16a   : > { %v14618_v22 = vpack.c.bf16 %v2663_v29, %v2631_v50  ;;  %v1793_v7 = vadd.f32 %v1665_v15, %v1233_v62  ;;  %v1825_v14 = vadd.f32 %v1697_v27, %v1265_v5  ;;  %v1425_v36 = vrot.slane %v14509_v32, %v19959_v0 }
 0x16b   : > { %12576 = vmatmul.mubr.msk.bf16.vlgmr.msra.gmra.mrb[24].mxu1 %vm3140_vm0, %v14595_v4  ;;  %v670_v1 = vmul.f32 %v14614_v13, %v19901_v57  ;;  %v702_v48 = vmul.f32 %v14614_v13, %v19903_v59  ;;  %v14629_v10 = vrot.slane %v865_v24, %v19950_v61  ;;  %v1985_v23 = vrot.slane %v14509_v32, %v19947_v6 }
 0x16c   : > { %19963 = vst [vmem:[#allocation18_spill] sm:$0xff] %v14618_v22  ;;  %v2823_v62 = vunpack.c.l.bf16 %v14618_v22  ;;  %v2855_v5 = vunpack.c.h.bf16 %v14618_v22  ;;  %v2353_v56 = vadd.f32 %v2225_v12, %v1793_v7  ;;  %v2385_v15 = vadd.f32 %v2257_v21, %v1825_v14  ;;  %3560 = vmatprep.mubr.bf16.mxu1 %v19962_v9  ;;  %v14651_v21 = vld [vmem:[%s19382_s3 + $0x8] sm:$0xff]  }
 0x16d   : > { %v1102_v27 = vmul.f32 %v14629_v10, %v19920_v16  ;;  %v1134_v2 = vmul.f32 %v14629_v10, %v19922_v3  ;;  %v14641_v24 = vrot.slane %v1425_v36, %v19959_v0  ;;  %v14644_v20 = vrot.slane %v1985_v23, %v19947_v6  ;;  %19964 = vst [vmem:[#allocation71_spill] sm:$0xff] %v14651_v21 }
 0x16e   : > { %v2951_v32 = vsub.f32 %v2631_v50, %v2823_v62  ;;  %v2983_v11 = vsub.f32 %v2663_v29, %v2855_v5  ;;  %v2505_v22 = vadd.f32 %v13696_v53, %v2353_v56  ;;  %v2537_v12 = vadd.f32 %v13824_v37, %v2385_v15  ;;  %12575 = vmatmul.mubr.msk.bf16.gmra.mrb[28].mxu0 %vm3140_vm0, %v14651_v21 }
 0x16f   : > { %v1230_v7 = vadd.f32 %v1102_v27, %v670_v1  ;;  %v1262_v14 = vadd.f32 %v1134_v2, %v702_v48  ;;  %v1662_v36 = vmul.f32 %v14641_v24, %v19923_v47  ;;  %v1694_v50 = vmul.f32 %v14641_v24, %v19912_v49  ;;  %3603 = vmatprep.mubr.bf16.mxu0 %v19962_v9 }
 0x170   : > { %v3079_v29 = vpack.c.bf16 %v2983_v11, %v2951_v32  ;;  %v2633_v23 = vmax.f32 %v2505_v22, 0.0  ;;  %v2665_v62 = vmax.f32 %v2537_v12, 0.0  ;;  %v2222_v5 = vmul.f32 %v14644_v20, %v19916_v35 }
 0x171   : > { %v1790_v56 = vadd.f32 %v1662_v36, %v1230_v7  ;;  %v1822_v15 = vadd.f32 %v1694_v50, %v1262_v14  ;;  %v2254_v1 = vmul.f32 %v14644_v20, %v13716_v60  ;;  %v441_v2 = vrot.slane %v14551_v17, %v19942_v19 }
 0x172   : > { %3571 = vmatprep.subr.bf16.mxu0 %v3079_v29  ;;  %v14666_v48 = vpack.c.bf16 %v2665_v62, %v2633_v23  ;;  %v873_v27 = vrot.slane %v14551_v17, %v19950_v61  ;;  %v1433_v11 = vrot.slane %v14551_v17, %v19959_v0  ;;  %v1993_v22 = vrot.slane %v14551_v17, %v19947_v6 }
 0x173   : > { %v2350_v32 = vadd.f32 %v2222_v5, %v1790_v56  ;;  %v2382_v12 = vadd.f32 %v2254_v1, %v1822_v15  ;;  %v14675_v7 = vrot.slane %v441_v2, %v19942_v19  ;;  %v735_v14 = vmul.f32 %v14521_v30, %v19881_v54  ;;  %12577 = vmatmul.mubr.msk.bf16.gmra.mrb[28].mxu1 %vm3140_vm0, %v14651_v21 }
 0x174   : > { %19965 = vst [vmem:[#allocation19_spill] sm:$0xff] %v14666_v48  ;;  %v2825_v36 = vunpack.c.l.bf16 %v14666_v48  ;;  %v2857_v50 = vunpack.c.h.bf16 %v14666_v48  ;;  %v14684_v29 = vrot.slane %v873_v27, %v19950_v61  ;;  %v14687_v17 = vrot.slane %v1433_v11, %v19959_v0  ;;  %3656 = vmatprep.mubr.bf16.mxu1 %v19962_v9 }
 0x175   : > { %v2502_v5 = vadd.f32 %v13696_v53, %v2350_v32  ;;  %v2534_v56 = vadd.f32 %v13824_v37, %v2382_v12  ;;  %v672_v15 = vmul.f32 %v14675_v7, %v19901_v57  ;;  %v704_v1 = vmul.f32 %v14675_v7, %v19903_v59 }
 0x176   : > { %v2953_v2 = vsub.f32 %v2633_v23, %v2825_v36  ;;  %v2985_v48 = vsub.f32 %v2665_v62, %v2857_v50  ;;  %v1104_v27 = vmul.f32 %v14684_v29, %v19920_v16  ;;  %v1136_v11 = vmul.f32 %v14684_v29, %v19922_v3 }
 0x177   : > { %v2630_v40 = vmax.f32 %v2502_v5, 0.0  ;;  %v2662_v51 = vmax.f32 %v2534_v56, 0.0  ;;  %v1664_v32 = vmul.f32 %v14687_v17, %v19923_v47  ;;  %v1696_v12 = vmul.f32 %v14687_v17, %v19912_v49 }
 0x178   : > { %v3081_v21 = vpack.c.bf16 %v2985_v48, %v2953_v2  ;;  %v1232_v9 = vadd.f32 %v1104_v27, %v672_v15  ;;  %v1264_v4 = vadd.f32 %v1136_v11, %v704_v1  ;;  %v14705_v23 = vrot.slane %v1993_v22, %v19947_v6 }
 0x179   : > { %v14707_v62 = vpack.c.bf16 %v2662_v51, %v2630_v40  ;;  %v767_v36 = vmul.f32 %v14521_v30, %v13674_v28  ;;  %v1167_v50 = vmul.f32 %v14528_v55, %v13660_v43  ;;  %v1199_v5 = vmul.f32 %v14528_v55, %v13680_v33 }
 0x17a   : > { %3624 = vmatprep.subr.bf16.mxu1 %v3081_v21  ;;  %v1792_v56 = vadd.f32 %v1664_v32, %v1232_v9  ;;  %v1824_v49 = vadd.f32 %v1696_v12, %v1264_v4  ;;  %v2224_v48 = vmul.f32 %v14705_v23, %v19916_v35  ;;  %v2256_v22 = vmul.f32 %v14705_v23, %v13716_v60 }
 0x17b   : > { %19966 = vst [vmem:[#allocation15_spill] sm:$0xff] %v14707_v62  ;;  %v2822_v15 = vunpack.c.l.bf16 %v14707_v62  ;;  %v2854_v1 = vunpack.c.h.bf16 %v14707_v62  ;;  %v1295_v30 = vadd.f32 %v1167_v50, %v735_v14  ;;  %v1327_v2 = vadd.f32 %v1199_v5, %v767_v36 }
 0x17c   : > { %v2352_v27 = vadd.f32 %v2224_v48, %v1792_v56  ;;  %v2384_v11 = vadd.f32 %v2256_v22, %v1824_v49  ;;  %v1727_v55 = vmul.f32 %v14545_v58, %v13746_v52  ;;  %v1759_v4 = vmul.f32 %v14545_v58, %v19934_v63 }
 0x17d   : > { %v2950_v9 = vsub.f32 %v2630_v40, %v2822_v15  ;;  %v2982_v21 = vsub.f32 %v2662_v51, %v2854_v1  ;;  %v2287_v32 = vmul.f32 %v14548_v38, %v13771_v8  ;;  %v2319_v12 = vmul.f32 %v14548_v38, %v13793_v39 }
 0x17e   : > { %v2504_v62 = vadd.f32 %v13696_v53, %v2352_v27  ;;  %v2536_v14 = vadd.f32 %v13824_v37, %v2384_v11  ;;  %v1855_v36 = vadd.f32 %v1727_v55, %v1295_v30  ;;  %v1887_v49 = vadd.f32 %v1759_v4, %v1327_v2 }
 0x17f   : > { %v3078_v50 = vpack.c.bf16 %v2982_v21, %v2950_v9  ;;  %v737_v5 = vmul.f32 %v14570_v42, %v19881_v54  ;;  %v769_v40 = vmul.f32 %v14570_v42, %v13674_v28  ;;  %v1169_v51 = vmul.f32 %v14573_v18, %v13660_v43 }
 0x180   : > { %v2632_v58 = vmax.f32 %v2504_v62, 0.0  ;;  %v2664_v56 = vmax.f32 %v2536_v14, 0.0  ;;  %v2415_v48 = vadd.f32 %v2287_v32, %v1855_v36  ;;  %v2447_v38 = vadd.f32 %v2319_v12, %v1887_v49 }
 0x181   : > { %3572 = vmatpush1.bf16.msra.mxu0 %v3078_v50  ;;  %v1201_v22 = vmul.f32 %v14573_v18, %v13680_v33  ;;  %v1297_v15 = vadd.f32 %v1169_v51, %v737_v5  ;;  %v1729_v1 = vmul.f32 %v14590_v31, %v13746_v52  ;;  %v1761_v30 = vmul.f32 %v14590_v31, %v19934_v63 }
 0x182   : > { %v14743_v2 = vpack.c.bf16 %v2664_v56, %v2632_v58  ;;  %v2567_v42 = vadd.f32 %v13850_v34, %v2415_v48  ;;  %v2599_v62 = vadd.f32 %v13815_v25, %v2447_v38  ;;  %v2289_v27 = vmul.f32 %v14600_v44, %v13771_v8 }
 0x183   : > { %v1329_v11 = vadd.f32 %v1201_v22, %v769_v40  ;;  %v1857_v55 = vadd.f32 %v1729_v1, %v1297_v15  ;;  %v2321_v18 = vmul.f32 %v14600_v44, %v13793_v39  ;;  %v734_v4 = vmul.f32 %v14614_v13, %v19881_v54 }
 0x184   : > { %19967 = vst [vmem:[#allocation20_spill] sm:$0xff] %v14743_v2  ;;  %v2824_v9 = vunpack.c.l.bf16 %v14743_v2  ;;  %v2856_v31 = vunpack.c.h.bf16 %v14743_v2  ;;  %v2695_v21 = vmax.f32 %v2567_v42, 0.0  ;;  %v2727_v32 = vmax.f32 %v2599_v62, 0.0 }
 0x185   : > { %v1889_v12 = vadd.f32 %v1761_v30, %v1329_v11  ;;  %v2417_v14 = vadd.f32 %v2289_v27, %v1857_v55  ;;  %v766_v36 = vmul.f32 %v14614_v13, %v13674_v28  ;;  %v1166_v49 = vmul.f32 %v14629_v10, %v13660_v43 }
 0x186   : > { %v2952_v50 = vsub.f32 %v2632_v58, %v2824_v9  ;;  %v2984_v5 = vsub.f32 %v2664_v56, %v2856_v31  ;;  %v14759_v44 = vpack.c.bf16 %v2727_v32, %v2695_v21  ;;  %v1198_v40 = vmul.f32 %v14629_v10, %v13680_v33 }
 0x187   : > { %v2449_v51 = vadd.f32 %v2321_v18, %v1889_v12  ;;  %v2569_v48 = vadd.f32 %v13850_v34, %v2417_v14  ;;  %v1294_v38 = vadd.f32 %v1166_v49, %v734_v4  ;;  %v1726_v22 = vmul.f32 %v14641_v24, %v13746_v52 }
 0x188   : > { %19968 = vst [vmem:[#allocation72_spill] sm:$0xff] %v14759_v44  ;;  %v3080_v15 = vpack.c.bf16 %v2984_v5, %v2952_v50  ;;  %v2887_v13 = vunpack.c.l.bf16 %v14759_v44  ;;  %v2919_v1 = vunpack.c.h.bf16 %v14759_v44  ;;  %v1326_v30 = vadd.f32 %v1198_v40, %v766_v36 }
 0x189   : > { %v2601_v58 = vadd.f32 %v13815_v25, %v2449_v51  ;;  %v2697_v56 = vmax.f32 %v2569_v48, 0.0  ;;  %v1758_v42 = vmul.f32 %v14641_v24, %v19934_v63  ;;  %v1854_v10 = vadd.f32 %v1726_v22, %v1294_v38  ;;  %v14793_v51 = vld [vmem:[%s13175_s17 + $0x50] sm:$0xff] }
 0x18a   : > { %3625 = vmatpush1.bf16.msra.mxu1 %v3080_v15  ;;  %v3015_v62 = vsub.f32 %v2695_v21, %v2887_v13  ;;  %v3047_v27 = vsub.f32 %v2727_v32, %v2919_v1  ;;  %v2286_v11 = vmul.f32 %v14644_v20, %v13771_v8  ;;  %v2318_v55 = vmul.f32 %v14644_v20, %v13793_v39 }
 0x18b   : > { %v2729_v18 = vmax.f32 %v2601_v58, 0.0  ;;  %v1886_v4 = vadd.f32 %v1758_v42, %v1326_v30  ;;  %v736_v9 = vmul.f32 %v14675_v7, %v19881_v54  ;;  %v768_v31 = vmul.f32 %v14675_v7, %v13674_v28 }
 0x18c   : > { %v3111_v24 = vpack.c.bf16 %v3047_v27, %v3015_v62  ;;  %v2414_v12 = vadd.f32 %v2286_v11, %v1854_v10  ;;  %v1168_v21 = vmul.f32 %v14684_v29, %v13660_v43  ;;  %v1200_v32 = vmul.f32 %v14684_v29, %v13680_v33 }
 0x18d   : > { %v14783_v14 = vpack.c.bf16 %v2729_v18, %v2697_v56  ;;  %v2446_v20 = vadd.f32 %v2318_v55, %v1886_v4  ;;  %v1728_v36 = vmul.f32 %v14687_v17, %v13746_v52  ;;  %v1760_v49 = vmul.f32 %v14687_v17, %v19934_v63 }
 0x18e   : > { %3573 = vmatprep.subr.bf16.mxu0 %v3111_v24  ;;  %v2566_v7 = vadd.f32 %v13850_v34, %v2414_v12  ;;  %v1296_v50 = vadd.f32 %v1168_v21, %v736_v9  ;;  %v1328_v5 = vadd.f32 %v1200_v32, %v768_v31  ;;  %v2288_v40 = vmul.f32 %v14705_v23, %v13771_v8 }
 0x18f   : > { %19969 = vst [vmem:[#allocation73_spill] sm:$0xff] %v14783_v14  ;;  %v2889_v29 = vunpack.c.l.bf16 %v14783_v14  ;;  %v2921_v48 = vunpack.c.h.bf16 %v14783_v14  ;;  %v2598_v38 = vadd.f32 %v13815_v25, %v2446_v20  ;;  %v2320_v22 = vmul.f32 %v14705_v23, %v13793_v39 }
 0x190   : > { %v2694_v17 = vmax.f32 %v2566_v7, 0.0  ;;  %v1856_v15 = vadd.f32 %v1728_v36, %v1296_v50  ;;  %v1888_v13 = vadd.f32 %v1760_v49, %v1328_v5  ;;  %v453_v1 = vrot.slane %v14793_v51, %v19940_v46 }
 0x191   : > { %v3017_v30 = vsub.f32 %v2697_v56, %v2889_v29  ;;  %v3049_v58 = vsub.f32 %v2729_v18, %v2921_v48  ;;  %v2726_v42 = vmax.f32 %v2598_v38, 0.0  ;;  %v885_v10 = vrot.slane %v14793_v51, %v19949_v26 }
 0x192   : > { %v2416_v62 = vadd.f32 %v2288_v40, %v1856_v15  ;;  %v2448_v27 = vadd.f32 %v2320_v22, %v1888_v13  ;;  %v14805_v11 = vrot.slane %v453_v1, %v19942_v19  ;;  %v1445_v23 = vrot.slane %v14793_v51, %v19943_v45  ;;  %v14835_v40 = vld [vmem:[%s13175_s17 + $0x58] sm:$0xff]  ;;  %v19972_v1 = vld [vmem:[#allocation58_spill] sm:$0xff] }
 0x193   : > { %v3113_v55 = vpack.c.bf16 %v3049_v58, %v3017_v30  ;;  %v14809_v4 = vpack.c.bf16 %v2726_v42, %v2694_v17  ;;  %v14812_v9 = vrot.slane %v885_v10, %v19950_v61  ;;  %v2005_v56 = vrot.slane %v14793_v51, %v19958_v41 }
 0x194   : > { %v2568_v18 = vadd.f32 %v13850_v34, %v2416_v62  ;;  %v2600_v31 = vadd.f32 %v13815_v25, %v2448_v27  ;;  %v675_v24 = vmul.f32 %v14805_v11, %v19901_v57  ;;  %v707_v12 = vmul.f32 %v14805_v11, %v19903_v59 }
 0x195   : > { %19970 = vst [vmem:[#allocation23_spill] sm:$0xff] %v14809_v4  ;;  %3626 = vmatprep.subr.bf16.mxu1 %v3113_v55  ;;  %v2886_v21 = vunpack.c.l.bf16 %v14809_v4  ;;  %v2918_v32 = vunpack.c.h.bf16 %v14809_v4  ;;  %v1107_v20 = vmul.f32 %v14812_v9, %v19920_v16  ;;  %v1139_v36 = vmul.f32 %v14812_v9, %v19922_v3 }
 0x196   : > { %v2696_v49 = vmax.f32 %v2568_v18, 0.0  ;;  %v2728_v7 = vmax.f32 %v2600_v31, 0.0  ;;  %v14829_v50 = vrot.slane %v1445_v23, %v19959_v0  ;;  %v14832_v5 = vrot.slane %v2005_v56, %v19947_v6 }
 0x197   : > { %v3014_v29 = vsub.f32 %v2694_v17, %v2886_v21  ;;  %v3046_v48 = vsub.f32 %v2726_v42, %v2918_v32  ;;  %v1235_v38 = vadd.f32 %v1107_v20, %v675_v24  ;;  %v1267_v22 = vadd.f32 %v1139_v36, %v707_v12 }
 0x198   : > { %v14837_v15 = vpack.c.bf16 %v2728_v7, %v2696_v49  ;;  %v1667_v13 = vmul.f32 %v14829_v50, %v19923_v47  ;;  %v1699_v30 = vmul.f32 %v14829_v50, %v19972_v1  ;;  %v2227_v58 = vmul.f32 %v14832_v5, %v19916_v35 }
 0x199   : > { %v3110_v10 = vpack.c.bf16 %v3046_v48, %v3014_v29  ;;  %v2259_v62 = vmul.f32 %v14832_v5, %v13716_v60  ;;  %v461_v17 = vrot.slane %v14835_v40, %v19940_v46  ;;  %v893_v42 = vrot.slane %v14835_v40, %v19949_v26 }
 0x19a   : > { %19971 = vst [vmem:[#allocation79_spill] sm:$0xff] %v14837_v15  ;;  %v2888_v27 = vunpack.c.l.bf16 %v14837_v15  ;;  %v2920_v23 = vunpack.c.h.bf16 %v14837_v15  ;;  %v1795_v55 = vadd.f32 %v1667_v13, %v1235_v38  ;;  %v1827_v56 = vadd.f32 %v1699_v30, %v1267_v22 }
 0x19b   : > { %3574 = vmatpush1.bf16.msra.mxu0 %v3110_v10  ;;  %v14854_v18 = vrot.slane %v461_v17, %v19942_v19  ;;  %v14857_v31 = vrot.slane %v893_v42, %v19950_v61  ;;  %v1453_v24 = vrot.slane %v14835_v40, %v19943_v45  ;;  %v2013_v12 = vrot.slane %v14835_v40, %v19958_v41 }
 0x19c   : > { %v3016_v21 = vsub.f32 %v2696_v49, %v2888_v27  ;;  %v3048_v32 = vsub.f32 %v2728_v7, %v2920_v23  ;;  %v2355_v20 = vadd.f32 %v2227_v58, %v1795_v55  ;;  %v2387_v36 = vadd.f32 %v2259_v62, %v1827_v56  ;;  %v19973_v58 = vld [vmem:[#allocation17_spill] sm:$0xff] }
 0x19d   : > { %v677_v29 = vmul.f32 %v14854_v18, %v19901_v57  ;;  %v709_v48 = vmul.f32 %v14854_v18, %v19903_v59  ;;  %v1109_v38 = vmul.f32 %v14857_v31, %v19920_v16  ;;  %v1141_v22 = vmul.f32 %v14857_v31, %v19922_v3 }
 0x19e   : > { %v3112_v13 = vpack.c.bf16 %v3048_v32, %v3016_v21  ;;  %v2507_v30 = vadd.f32 %v13696_v53, %v2355_v20  ;;  %v2539_v49 = vadd.f32 %v13824_v37, %v2387_v36  ;;  %v14874_v7 = vrot.slane %v1453_v24, %v19959_v0  ;;  %12578 = vmatmul.mubr.msk.bf16.vlgmr.msra.gmra.mrb[32].mxu0 %vm3140_vm0, %v19973_v58 }
 0x19f   : > { %v1237_v10 = vadd.f32 %v1109_v38, %v677_v29  ;;  %v1269_v62 = vadd.f32 %v1141_v22, %v709_v48  ;;  %v14879_v17 = vrot.slane %v2013_v12, %v19947_v6  ;;  %v449_v42 = vrot.slane %v14793_v51, %v19942_v19 }
 0x1a0   : > { %v19974_v27 = vmov 0   ;;  %3627 = vmatpush1.bf16.msra.mxu1 %v3112_v13  ;;  %v2635_v23 = vmax.f32 %v2507_v30, 0.0  ;;  %v2667_v55 = vmax.f32 %v2539_v49, 0.0  ;;  %v1669_v56 = vmul.f32 %v14874_v7, %v19923_v47 }
 0x1a1   : > { %3613 = vmatprep.mubr.bf16.mxu0 %v19974_v27  ;;  %v1701_v24 = vmul.f32 %v14874_v7, %v19972_v1  ;;  %v2229_v21 = vmul.f32 %v14879_v17, %v19916_v35  ;;  %v2261_v12 = vmul.f32 %v14879_v17, %v13716_v60  ;;  %v14893_v32 = vrot.slane %v449_v42, %v19942_v19 }
 0x1a2   : > { %v881_v20 = vrot.slane %v14793_v51, %v19950_v61  ;;  %v14897_v36 = vpack.c.bf16 %v2667_v55, %v2635_v23  ;;  %v1797_v29 = vadd.f32 %v1669_v56, %v1237_v10  ;;  %v1441_v38 = vrot.slane %v14793_v51, %v19959_v0 }
 0x1a3   : > { %v1829_v48 = vadd.f32 %v1701_v24, %v1269_v62  ;;  %12580 = vmatmul.mubr.msk.bf16.vlgmr.msra.gmra.mrb[32].mxu1 %vm3140_vm0, %v19973_v58  ;;  %v674_v22 = vmul.f32 %v14893_v32, %v19901_v57  ;;  %v706_v13 = vmul.f32 %v14893_v32, %v19903_v59  ;;  %v2001_v49 = vrot.slane %v14793_v51, %v19947_v6 }
 0x1a4   : > { %19975 = vst [vmem:[#allocation28_spill] sm:$0xff] %v14897_v36  ;;  %v14908_v30 = vrot.slane %v881_v20, %v19950_v61  ;;  %v2827_v10 = vunpack.c.l.bf16 %v14897_v36  ;;  %v2859_v62 = vunpack.c.h.bf16 %v14897_v36  ;;  %v2357_v42 = vadd.f32 %v2229_v21, %v1797_v29  ;;  %3666 = vmatprep.mubr.bf16.mxu1 %v19974_v27 }
 0x1a5   : > { %v2389_v56 = vadd.f32 %v2261_v12, %v1829_v48  ;;  %v14920_v20 = vrot.slane %v1441_v38, %v19959_v0  ;;  %v14923_v14 = vrot.slane %v2001_v49, %v19947_v6  ;;  %v19976_v12 = vld [vmem:[#allocation71_spill] sm:$0xff] }
 0x1a6   : > { %v1106_v24 = vmul.f32 %v14908_v30, %v19920_v16  ;;  %v1138_v15 = vmul.f32 %v14908_v30, %v19922_v3  ;;  %v2955_v51 = vsub.f32 %v2635_v23, %v2827_v10  ;;  %v2987_v2 = vsub.f32 %v2667_v55, %v2859_v62  ;;  %12579 = vmatmul.mubr.msk.bf16.gmra.mrb[36].mxu0 %vm3140_vm0, %v19976_v12 }
 0x1a7   : > { %v2509_v36 = vadd.f32 %v13696_v53, %v2357_v42  ;;  %v2541_v21 = vadd.f32 %v13824_v37, %v2389_v56  ;;  %v1666_v4 = vmul.f32 %v14920_v20, %v19923_v47  ;;  %v1698_v38 = vmul.f32 %v14920_v20, %v19972_v1  ;;  %3709 = vmatprep.mubr.bf16.mxu0 %v19974_v27 }
 0x1a8   : > { %v1234_v29 = vadd.f32 %v1106_v24, %v674_v22  ;;  %v1266_v48 = vadd.f32 %v1138_v15, %v706_v13  ;;  %v3083_v49 = vpack.c.bf16 %v2987_v2, %v2955_v51  ;;  %v2226_v10 = vmul.f32 %v14923_v14, %v19916_v35 }
 0x1a9   : > { %v2637_v23 = vmax.f32 %v2509_v36, 0.0  ;;  %v2669_v55 = vmax.f32 %v2541_v21, 0.0  ;;  %v2258_v22 = vmul.f32 %v14923_v14, %v13716_v60  ;;  %v457_v15 = vrot.slane %v14835_v40, %v19942_v19 }
 0x1aa   : > { %v1794_v62 = vadd.f32 %v1666_v4, %v1234_v29  ;;  %v1826_v42 = vadd.f32 %v1698_v38, %v1266_v48  ;;  %3677 = vmatprep.subr.bf16.mxu0 %v3083_v49  ;;  %v889_v56 = vrot.slane %v14835_v40, %v19950_v61  ;;  %v1449_v2 = vrot.slane %v14835_v40, %v19959_v0 }
 0x1ab   : > { %v14940_v13 = vpack.c.bf16 %v2669_v55, %v2637_v23  ;;  %v2009_v36 = vrot.slane %v14835_v40, %v19947_v6  ;;  %v14949_v51 = vrot.slane %v457_v15, %v19942_v19  ;;  %v739_v21 = vmul.f32 %v14805_v11, %v19881_v54  ;;  %12581 = vmatmul.mubr.msk.bf16.gmra.mrb[36].mxu1 %vm3140_vm0, %v19976_v12 }
 0x1ac   : > { %v2354_v4 = vadd.f32 %v2226_v10, %v1794_v62  ;;  %v2386_v24 = vadd.f32 %v2258_v22, %v1826_v42  ;;  %v14958_v38 = vrot.slane %v889_v56, %v19950_v61  ;;  %v14961_v40 = vrot.slane %v1449_v2, %v19959_v0  ;;  %3762 = vmatprep.mubr.bf16.mxu1 %v19974_v27 }
 0x1ad   : > { %19977 = vst [vmem:[#allocation29_spill] sm:$0xff] %v14940_v13  ;;  %v2829_v29 = vunpack.c.l.bf16 %v14940_v13  ;;  %v2861_v48 = vunpack.c.h.bf16 %v14940_v13  ;;  %v676_v62 = vmul.f32 %v14949_v51, %v19901_v57  ;;  %v708_v42 = vmul.f32 %v14949_v51, %v19903_v59 }
 0x1ae   : > { %v2506_v49 = vadd.f32 %v13696_v53, %v2354_v4  ;;  %v2538_v10 = vadd.f32 %v13824_v37, %v2386_v24  ;;  %v1108_v56 = vmul.f32 %v14958_v38, %v19920_v16  ;;  %v1140_v2 = vmul.f32 %v14958_v38, %v19922_v3 }
 0x1af   : > { %v2957_v22 = vsub.f32 %v2637_v23, %v2829_v29  ;;  %v2989_v15 = vsub.f32 %v2669_v55, %v2861_v48  ;;  %v1668_v4 = vmul.f32 %v14961_v40, %v19923_v47  ;;  %v1700_v24 = vmul.f32 %v14961_v40, %v19972_v1 }
 0x1b0   : > { %v2634_v13 = vmax.f32 %v2506_v49, 0.0  ;;  %v2666_v44 = vmax.f32 %v2538_v10, 0.0  ;;  %v1236_v27 = vadd.f32 %v1108_v56, %v676_v62  ;;  %v1268_v58 = vadd.f32 %v1140_v2, %v708_v42 }
 0x1b1   : > { %v3085_v12 = vpack.c.bf16 %v2989_v15, %v2957_v22  ;;  %v14979_v23 = vrot.slane %v2009_v36, %v19947_v6  ;;  %v771_v29 = vmul.f32 %v14805_v11, %v13674_v28  ;;  %v1171_v48 = vmul.f32 %v14812_v9, %v13660_v43 }
 0x1b2   : > { %v14981_v55 = vpack.c.bf16 %v2666_v44, %v2634_v13  ;;  %v1203_v49 = vmul.f32 %v14812_v9, %v13680_v33  ;;  %v1796_v10 = vadd.f32 %v1668_v4, %v1236_v27  ;;  %v1828_v1 = vadd.f32 %v1700_v24, %v1268_v58 }
 0x1b3   : > { %3730 = vmatprep.subr.bf16.mxu1 %v3085_v12  ;;  %v2228_v62 = vmul.f32 %v14979_v23, %v19916_v35  ;;  %v2260_v36 = vmul.f32 %v14979_v23, %v13716_v60  ;;  %v1299_v11 = vadd.f32 %v1171_v48, %v739_v21  ;;  %v1731_v9 = vmul.f32 %v14829_v50, %v13746_v52 }
 0x1b4   : > { %19978 = vst [vmem:[#allocation60_spill] sm:$0xff] %v14981_v55  ;;  %v2826_v42 = vunpack.c.l.bf16 %v14981_v55  ;;  %v2858_v22 = vunpack.c.h.bf16 %v14981_v55  ;;  %v1331_v15 = vadd.f32 %v1203_v49, %v771_v29  ;;  %v1763_v58 = vmul.f32 %v14829_v50, %v19934_v63 }
 0x1b5   : > { %v2356_v56 = vadd.f32 %v2228_v62, %v1796_v10  ;;  %v2388_v2 = vadd.f32 %v2260_v36, %v1828_v1  ;;  %v2291_v4 = vmul.f32 %v14832_v5, %v13771_v8  ;;  %v2323_v24 = vmul.f32 %v14832_v5, %v13793_v39 }
 0x1b6   : > { %v2954_v27 = vsub.f32 %v2634_v13, %v2826_v42  ;;  %v2986_v12 = vsub.f32 %v2666_v44, %v2858_v22  ;;  %v1859_v29 = vadd.f32 %v1731_v9, %v1299_v11  ;;  %v1891_v1 = vadd.f32 %v1763_v58, %v1331_v15 }
 0x1b7   : > { %v2508_v55 = vadd.f32 %v13696_v53, %v2356_v56  ;;  %v2540_v21 = vadd.f32 %v13824_v37, %v2388_v2  ;;  %v741_v49 = vmul.f32 %v14854_v18, %v19881_v54  ;;  %v773_v50 = vmul.f32 %v14854_v18, %v13674_v28 }
 0x1b8   : > { %v3082_v48 = vpack.c.bf16 %v2986_v12, %v2954_v27  ;;  %v1173_v44 = vmul.f32 %v14857_v31, %v13660_v43  ;;  %v2419_v62 = vadd.f32 %v2291_v4, %v1859_v29  ;;  %v2451_v5 = vadd.f32 %v2323_v24, %v1891_v1 }
 0x1b9   : > { %v2636_v13 = vmax.f32 %v2508_v55, 0.0  ;;  %v2668_v10 = vmax.f32 %v2540_v21, 0.0  ;;  %v1205_v36 = vmul.f32 %v14857_v31, %v13680_v33  ;;  %v1733_v22 = vmul.f32 %v14874_v7, %v13746_v52 }
 0x1ba   : > { %3678 = vmatpush1.bf16.msra.mxu0 %v3082_v48  ;;  %v1301_v42 = vadd.f32 %v1173_v44, %v741_v49  ;;  %v1765_v11 = vmul.f32 %v14874_v7, %v19934_v63  ;;  %v2571_v18 = vadd.f32 %v13850_v34, %v2419_v62  ;;  %v2603_v55 = vadd.f32 %v13815_v25, %v2451_v5 }
 0x1bb   : > { %v15017_v15 = vpack.c.bf16 %v2668_v10, %v2636_v13  ;;  %v2293_v56 = vmul.f32 %v14879_v17, %v13771_v8  ;;  %v1333_v2 = vadd.f32 %v1205_v36, %v773_v50  ;;  %v2325_v31 = vmul.f32 %v14879_v17, %v13793_v39 }
 0x1bc   : > { %v1861_v9 = vadd.f32 %v1733_v22, %v1301_v42  ;;  %v738_v58 = vmul.f32 %v14893_v32, %v19881_v54  ;;  %v2699_v12 = vmax.f32 %v2571_v18, 0.0  ;;  %v2731_v4 = vmax.f32 %v2603_v55, 0.0 }
 0x1bd   : > { %19979 = vst [vmem:[#allocation61_spill] sm:$0xff] %v15017_v15  ;;  %v2828_v27 = vunpack.c.l.bf16 %v15017_v15  ;;  %v2860_v7 = vunpack.c.h.bf16 %v15017_v15  ;;  %v1893_v24 = vadd.f32 %v1765_v11, %v1333_v2  ;;  %v770_v29 = vmul.f32 %v14893_v32, %v13674_v28 }
 0x1be   : > { %v2421_v21 = vadd.f32 %v2293_v56, %v1861_v9  ;;  %v1170_v1 = vmul.f32 %v14908_v30, %v13660_v43  ;;  %v15033_v17 = vpack.c.bf16 %v2731_v4, %v2699_v12  ;;  %v1202_v50 = vmul.f32 %v14908_v30, %v13680_v33 }
 0x1bf   : > { %v2956_v48 = vsub.f32 %v2636_v13, %v2828_v27  ;;  %v2988_v49 = vsub.f32 %v2668_v10, %v2860_v7  ;;  %v2453_v44 = vadd.f32 %v2325_v31, %v1893_v24  ;;  %v1730_v36 = vmul.f32 %v14920_v20, %v13746_v52 }
 0x1c0   : > { %19980 = vst [vmem:[#allocation76_spill] sm:$0xff] %v15033_v17  ;;  %v2573_v62 = vadd.f32 %v13850_v34, %v2421_v21  ;;  %v1298_v5 = vadd.f32 %v1170_v1, %v738_v58  ;;  %v2891_v32 = vunpack.c.l.bf16 %v15033_v17  ;;  %v2923_v22 = vunpack.c.h.bf16 %v15033_v17 }
 0x1c1   : > { %v3084_v42 = vpack.c.bf16 %v2988_v49, %v2956_v48  ;;  %v1330_v11 = vadd.f32 %v1202_v50, %v770_v29  ;;  %v2605_v13 = vadd.f32 %v13815_v25, %v2453_v44  ;;  %v1762_v18 = vmul.f32 %v14920_v20, %v19934_v63  ;;  %v15067_v44 = vld [vmem:[%s13175_s17 + $0x60] sm:$0xff] }
 0x1c2   : > { %v2701_v10 = vmax.f32 %v2573_v62, 0.0  ;;  %v1858_v30 = vadd.f32 %v1730_v36, %v1298_v5  ;;  %v3019_v55 = vsub.f32 %v2699_v12, %v2891_v32  ;;  %v3051_v56 = vsub.f32 %v2731_v4, %v2923_v22 }
 0x1c3   : > { %3731 = vmatpush1.bf16.msra.mxu1 %v3084_v42  ;;  %v2290_v2 = vmul.f32 %v14923_v14, %v13771_v8  ;;  %v2322_v9 = vmul.f32 %v14923_v14, %v13793_v39  ;;  %v2733_v31 = vmax.f32 %v2605_v13, 0.0  ;;  %v1890_v58 = vadd.f32 %v1762_v18, %v1330_v11 }
 0x1c4   : > { %v740_v27 = vmul.f32 %v14949_v51, %v19881_v54  ;;  %v772_v7 = vmul.f32 %v14949_v51, %v13674_v28  ;;  %v3115_v20 = vpack.c.bf16 %v3051_v56, %v3019_v55  ;;  %v1172_v12 = vmul.f32 %v14958_v38, %v13660_v43 }
 0x1c5   : > { %v2418_v24 = vadd.f32 %v2290_v2, %v1858_v30  ;;  %v1204_v4 = vmul.f32 %v14958_v38, %v13680_v33  ;;  %v15057_v21 = vpack.c.bf16 %v2733_v31, %v2701_v10  ;;  %v2450_v14 = vadd.f32 %v2322_v9, %v1890_v58 }
 0x1c6   : > { %v1732_v29 = vmul.f32 %v14961_v40, %v13746_v52  ;;  %v1764_v1 = vmul.f32 %v14961_v40, %v19934_v63  ;;  %3679 = vmatprep.subr.bf16.mxu0 %v3115_v20  ;;  %v1300_v48 = vadd.f32 %v1172_v12, %v740_v27  ;;  %v2292_v50 = vmul.f32 %v14979_v23, %v13771_v8 }
 0x1c7   : > { %19981 = vst [vmem:[#allocation62_spill] sm:$0xff] %v15057_v21  ;;  %v2570_v51 = vadd.f32 %v13850_v34, %v2418_v24  ;;  %v1332_v49 = vadd.f32 %v1204_v4, %v772_v7  ;;  %v2893_v38 = vunpack.c.l.bf16 %v15057_v21  ;;  %v2925_v62 = vunpack.c.h.bf16 %v15057_v21 }
 0x1c8   : > { %v2602_v5 = vadd.f32 %v13815_v25, %v2450_v14  ;;  %v2324_v36 = vmul.f32 %v14979_v23, %v13793_v39  ;;  %v1860_v42 = vadd.f32 %v1732_v29, %v1300_v48  ;;  %v469_v22 = vrot.slane %v15067_v44, %v19940_v46 }
 0x1c9   : > { %v2698_v40 = vmax.f32 %v2570_v51, 0.0  ;;  %v1892_v32 = vadd.f32 %v1764_v1, %v1332_v49  ;;  %v3021_v11 = vsub.f32 %v2701_v10, %v2893_v38  ;;  %v3053_v13 = vsub.f32 %v2733_v31, %v2925_v62 }
 0x1ca   : > { %v2730_v18 = vmax.f32 %v2602_v5, 0.0  ;;  %v901_v30 = vrot.slane %v15067_v44, %v19949_v26  ;;  %v2420_v55 = vadd.f32 %v2292_v50, %v1860_v42  ;;  %v15079_v2 = vrot.slane %v469_v22, %v19942_v19  ;;  %v15109_v50 = vld [vmem:[%s13175_s17 + $0x68] sm:$0xff]  ;;  %v19984_v22 = vld [vmem:[#allocation58_spill] sm:$0xff] }
 0x1cb   : > { %v2452_v56 = vadd.f32 %v2324_v36, %v1892_v32  ;;  %v1461_v23 = vrot.slane %v15067_v44, %v19943_v45  ;;  %v3117_v9 = vpack.c.bf16 %v3053_v13, %v3021_v11  ;;  %v2021_v10 = vrot.slane %v15067_v44, %v19958_v41 }
 0x1cc   : > { %v15083_v58 = vpack.c.bf16 %v2730_v18, %v2698_v40  ;;  %v15086_v27 = vrot.slane %v901_v30, %v19950_v61  ;;  %v2572_v31 = vadd.f32 %v13850_v34, %v2420_v55  ;;  %v679_v20 = vmul.f32 %v15079_v2, %v19901_v57 }
 0x1cd   : > { %v2604_v7 = vadd.f32 %v13815_v25, %v2452_v56  ;;  %v711_v24 = vmul.f32 %v15079_v2, %v19903_v59  ;;  %3732 = vmatprep.subr.bf16.mxu1 %v3117_v9  ;;  %v15103_v48 = vrot.slane %v1461_v23, %v19959_v0  ;;  %v15106_v49 = vrot.slane %v2021_v10, %v19947_v6 }
 0x1ce   : > { %19982 = vst [vmem:[#allocation75_spill] sm:$0xff] %v15083_v58  ;;  %v2890_v12 = vunpack.c.l.bf16 %v15083_v58  ;;  %v2922_v4 = vunpack.c.h.bf16 %v15083_v58  ;;  %v1111_v14 = vmul.f32 %v15086_v27, %v19920_v16  ;;  %v1143_v29 = vmul.f32 %v15086_v27, %v19922_v3 }
 0x1cf   : > { %v2700_v1 = vmax.f32 %v2572_v31, 0.0  ;;  %v2732_v51 = vmax.f32 %v2604_v7, 0.0  ;;  %v1671_v32 = vmul.f32 %v15103_v48, %v19923_v47  ;;  %v1703_v11 = vmul.f32 %v15103_v48, %v19984_v22 }
 0x1d0   : > { %v3018_v38 = vsub.f32 %v2698_v40, %v2890_v12  ;;  %v3050_v62 = vsub.f32 %v2730_v18, %v2922_v4  ;;  %v1239_v5 = vadd.f32 %v1111_v14, %v679_v20  ;;  %v1271_v36 = vadd.f32 %v1143_v29, %v711_v24 }
 0x1d1   : > { %v15111_v42 = vpack.c.bf16 %v2732_v51, %v2700_v1  ;;  %v2231_v13 = vmul.f32 %v15106_v49, %v19916_v35  ;;  %v2263_v55 = vmul.f32 %v15106_v49, %v13716_v60  ;;  %v477_v40 = vrot.slane %v15109_v50, %v19940_v46 }
 0x1d2   : > { %v3114_v30 = vpack.c.bf16 %v3050_v62, %v3018_v38  ;;  %v909_v18 = vrot.slane %v15109_v50, %v19949_v26  ;;  %v1799_v9 = vadd.f32 %v1671_v32, %v1239_v5  ;;  %v1831_v10 = vadd.f32 %v1703_v11, %v1271_v36 }
 0x1d3   : > { %19983 = vst [vmem:[#allocation77_spill] sm:$0xff] %v15111_v42  ;;  %v2892_v56 = vunpack.c.l.bf16 %v15111_v42  ;;  %v2924_v23 = vunpack.c.h.bf16 %v15111_v42  ;;  %v15128_v31 = vrot.slane %v477_v40, %v19942_v19  ;;  %v1469_v20 = vrot.slane %v15109_v50, %v19943_v45 }
 0x1d4   : > { %3680 = vmatpush1.bf16.msra.mxu0 %v3114_v30  ;;  %v15131_v7 = vrot.slane %v909_v18, %v19950_v61  ;;  %v2029_v24 = vrot.slane %v15109_v50, %v19958_v41  ;;  %v2359_v14 = vadd.f32 %v2231_v13, %v1799_v9  ;;  %v2391_v29 = vadd.f32 %v2263_v55, %v1831_v10  ;;  %v19985_v13 = vld [vmem:[#allocation17_spill] sm:$0xff] }
 0x1d5   : > { %v3020_v12 = vsub.f32 %v2700_v1, %v2892_v56  ;;  %v3052_v4 = vsub.f32 %v2732_v51, %v2924_v23  ;;  %v681_v38 = vmul.f32 %v15128_v31, %v19901_v57  ;;  %v713_v62 = vmul.f32 %v15128_v31, %v19903_v59 }
 0x1d6   : > { %v1113_v5 = vmul.f32 %v15131_v7, %v19920_v16  ;;  %v1145_v36 = vmul.f32 %v15131_v7, %v19922_v3  ;;  %v2511_v11 = vadd.f32 %v13696_v53, %v2359_v14  ;;  %v2543_v1 = vadd.f32 %v13824_v37, %v2391_v29 }
 0x1d7   : > { %v3116_v32 = vpack.c.bf16 %v3052_v4, %v3020_v12  ;;  %v15148_v51 = vrot.slane %v1469_v20, %v19959_v0  ;;  %12582 = vmatmul.mubr.msk.bf16.vlgmr.msra.gmra.mrb[40].mxu0 %vm3140_vm0, %v19985_v13  ;;  %v15153_v40 = vrot.slane %v2029_v24, %v19947_v6  ;;  %v465_v18 = vrot.slane %v15067_v44, %v19942_v19 }
 0x1d8   : > { %v1241_v30 = vadd.f32 %v1113_v5, %v681_v38  ;;  %v1273_v55 = vadd.f32 %v1145_v36, %v713_v62  ;;  %v19986_v56 = vmov 0   ;;  %v2639_v23 = vmax.f32 %v2511_v11, 0.0 }
 0x1d9   : > { %3719 = vmatprep.mubr.bf16.mxu0 %v19986_v56  ;;  %3733 = vmatpush1.bf16.msra.mxu1 %v3116_v32  ;;  %v2671_v9 = vmax.f32 %v2543_v1, 0.0  ;;  %v1673_v10 = vmul.f32 %v15148_v51, %v19923_v47  ;;  %v1705_v20 = vmul.f32 %v15148_v51, %v19984_v22  ;;  %v2233_v12 = vmul.f32 %v15153_v40, %v19916_v35 }
 0x1da   : > { %v2265_v24 = vmul.f32 %v15153_v40, %v13716_v60  ;;  %v15167_v4 = vrot.slane %v465_v18, %v19942_v19  ;;  %v897_v14 = vrot.slane %v15067_v44, %v19950_v61  ;;  %v1457_v5 = vrot.slane %v15067_v44, %v19959_v0 }
 0x1db   : > { %v15171_v29 = vpack.c.bf16 %v2671_v9, %v2639_v23  ;;  %v1801_v38 = vadd.f32 %v1673_v10, %v1241_v30  ;;  %v1833_v62 = vadd.f32 %v1705_v20, %v1273_v55  ;;  %v2017_v1 = vrot.slane %v15067_v44, %v19947_v6 }
 0x1dc   : > { %12584 = vmatmul.mubr.msk.bf16.vlgmr.msra.gmra.mrb[40].mxu1 %vm3140_vm0, %v19985_v13  ;;  %v678_v36 = vmul.f32 %v15167_v4, %v19901_v57  ;;  %v710_v32 = vmul.f32 %v15167_v4, %v19903_v59  ;;  %v15182_v11 = vrot.slane %v897_v14, %v19950_v61  ;;  %v15194_v14 = vrot.slane %v1457_v5, %v19959_v0 }
 0x1dd   : > { %19987 = vst [vmem:[#allocation26_spill] sm:$0xff] %v15171_v29  ;;  %v2831_v30 = vunpack.c.l.bf16 %v15171_v29  ;;  %v2863_v55 = vunpack.c.h.bf16 %v15171_v29  ;;  %v2361_v18 = vadd.f32 %v2233_v12, %v1801_v38  ;;  %v2393_v10 = vadd.f32 %v2265_v24, %v1833_v62  ;;  %3772 = vmatprep.mubr.bf16.mxu1 %v19986_v56  ;;  %v19988_v24 = vld [vmem:[#allocation71_spill] sm:$0xff] }
 0x1de   : > { %v1110_v13 = vmul.f32 %v15182_v11, %v19920_v16  ;;  %v1142_v20 = vmul.f32 %v15182_v11, %v19922_v3  ;;  %v15197_v42 = vrot.slane %v2017_v1, %v19947_v6  ;;  %v1670_v15 = vmul.f32 %v15194_v14, %v19923_v47 }
 0x1df   : > { %v2959_v44 = vsub.f32 %v2639_v23, %v2831_v30  ;;  %v2991_v21 = vsub.f32 %v2671_v9, %v2863_v55  ;;  %v2513_v29 = vadd.f32 %v13696_v53, %v2361_v18  ;;  %v2545_v12 = vadd.f32 %v13824_v37, %v2393_v10  ;;  %12583 = vmatmul.mubr.msk.bf16.gmra.mrb[44].mxu0 %vm3140_vm0, %v19988_v24 }
 0x1e0   : > { %v1238_v38 = vadd.f32 %v1110_v13, %v678_v36  ;;  %v1270_v62 = vadd.f32 %v1142_v20, %v710_v32  ;;  %v1702_v5 = vmul.f32 %v15194_v14, %v19984_v22  ;;  %3815 = vmatprep.mubr.bf16.mxu0 %v19986_v56  ;;  %v2230_v30 = vmul.f32 %v15197_v42, %v19916_v35 }
 0x1e1   : > { %v3087_v1 = vpack.c.bf16 %v2991_v21, %v2959_v44  ;;  %v2641_v23 = vmax.f32 %v2513_v29, 0.0  ;;  %v2673_v9 = vmax.f32 %v2545_v12, 0.0  ;;  %v2262_v36 = vmul.f32 %v15197_v42, %v13716_v60 }
 0x1e2   : > { %v1798_v55 = vadd.f32 %v1670_v15, %v1238_v38  ;;  %v1830_v18 = vadd.f32 %v1702_v5, %v1270_v62  ;;  %v473_v32 = vrot.slane %v15109_v50, %v19942_v19  ;;  %v905_v13 = vrot.slane %v15109_v50, %v19950_v61 }
 0x1e3   : > { %3783 = vmatprep.subr.bf16.mxu0 %v3087_v1  ;;  %v15214_v10 = vpack.c.bf16 %v2673_v9, %v2641_v23  ;;  %v1465_v21 = vrot.slane %v15109_v50, %v19959_v0  ;;  %v2025_v29 = vrot.slane %v15109_v50, %v19947_v6  ;;  %v743_v12 = vmul.f32 %v15079_v2, %v19881_v54 }
 0x1e4   : > { %v2358_v15 = vadd.f32 %v2230_v30, %v1798_v55  ;;  %v2390_v20 = vadd.f32 %v2262_v36, %v1830_v18  ;;  %v15223_v44 = vrot.slane %v473_v32, %v19942_v19  ;;  %12585 = vmatmul.mubr.msk.bf16.gmra.mrb[44].mxu1 %vm3140_vm0, %v19988_v24  ;;  %v15232_v5 = vrot.slane %v905_v13, %v19950_v61 }
 0x1e5   : > { %19989 = vst [vmem:[#allocation63_spill] sm:$0xff] %v15214_v10  ;;  %v2833_v38 = vunpack.c.l.bf16 %v15214_v10  ;;  %v2865_v62 = vunpack.c.h.bf16 %v15214_v10  ;;  %v15235_v50 = vrot.slane %v1465_v21, %v19959_v0  ;;  %3868 = vmatprep.mubr.bf16.mxu1 %v19986_v56 }
 0x1e6   : > { %v2510_v1 = vadd.f32 %v13696_v53, %v2358_v15  ;;  %v2542_v30 = vadd.f32 %v13824_v37, %v2390_v20  ;;  %v680_v55 = vmul.f32 %v15223_v44, %v19901_v57  ;;  %v712_v24 = vmul.f32 %v15223_v44, %v19903_v59 }
 0x1e7   : > { %v2961_v18 = vsub.f32 %v2641_v23, %v2833_v38  ;;  %v2993_v36 = vsub.f32 %v2673_v9, %v2865_v62  ;;  %v1112_v32 = vmul.f32 %v15232_v5, %v19920_v16  ;;  %v1144_v13 = vmul.f32 %v15232_v5, %v19922_v3 }
 0x1e8   : > { %v2638_v21 = vmax.f32 %v2510_v1, 0.0  ;;  %v2670_v10 = vmax.f32 %v2542_v30, 0.0  ;;  %v1672_v15 = vmul.f32 %v15235_v50, %v19923_v47  ;;  %v1704_v20 = vmul.f32 %v15235_v50, %v19984_v22 }
 0x1e9   : > { %v3089_v58 = vpack.c.bf16 %v2993_v36, %v2961_v18  ;;  %v1240_v17 = vadd.f32 %v1112_v32, %v680_v55  ;;  %v1272_v56 = vadd.f32 %v1144_v13, %v712_v24  ;;  %v15253_v23 = vrot.slane %v2025_v29, %v19947_v6 }
 0x1ea   : > { %v15255_v9 = vpack.c.bf16 %v2670_v10, %v2638_v21  ;;  %v775_v38 = vmul.f32 %v15079_v2, %v13674_v28  ;;  %v1175_v62 = vmul.f32 %v15086_v27, %v13660_v43  ;;  %v1207_v1 = vmul.f32 %v15086_v27, %v13680_v33 }
 0x1eb   : > { %3836 = vmatprep.subr.bf16.mxu1 %v3089_v58  ;;  %v1800_v30 = vadd.f32 %v1672_v15, %v1240_v17  ;;  %v1832_v22 = vadd.f32 %v1704_v20, %v1272_v56  ;;  %v2232_v55 = vmul.f32 %v15253_v23, %v19916_v35  ;;  %v2264_v29 = vmul.f32 %v15253_v23, %v13716_v60 }
 0x1ec   : > { %19990 = vst [vmem:[#allocation78_spill] sm:$0xff] %v15255_v9  ;;  %v2830_v24 = vunpack.c.l.bf16 %v15255_v9  ;;  %v2862_v18 = vunpack.c.h.bf16 %v15255_v9  ;;  %v1303_v2 = vadd.f32 %v1175_v62, %v743_v12  ;;  %v1335_v36 = vadd.f32 %v1207_v1, %v775_v38 }
 0x1ed   : > { %v2360_v32 = vadd.f32 %v2232_v55, %v1800_v30  ;;  %v2392_v13 = vadd.f32 %v2264_v29, %v1832_v22  ;;  %v1735_v27 = vmul.f32 %v15103_v48, %v13746_v52  ;;  %v1767_v17 = vmul.f32 %v15103_v48, %v19934_v63 }
 0x1ee   : > { %v2958_v58 = vsub.f32 %v2638_v21, %v2830_v24  ;;  %v2990_v56 = vsub.f32 %v2670_v10, %v2862_v18  ;;  %v2295_v15 = vmul.f32 %v15106_v49, %v13771_v8  ;;  %v2327_v20 = vmul.f32 %v15106_v49, %v13793_v39 }
 0x1ef   : > { %v2512_v9 = vadd.f32 %v13696_v53, %v2360_v32  ;;  %v2544_v12 = vadd.f32 %v13824_v37, %v2392_v13  ;;  %v1863_v38 = vadd.f32 %v1735_v27, %v1303_v2  ;;  %v1895_v22 = vadd.f32 %v1767_v17, %v1335_v36 }
 0x1f0   : > { %v3086_v62 = vpack.c.bf16 %v2990_v56, %v2958_v58  ;;  %v745_v1 = vmul.f32 %v15128_v31, %v19881_v54  ;;  %v777_v48 = vmul.f32 %v15128_v31, %v13674_v28  ;;  %v1177_v10 = vmul.f32 %v15131_v7, %v13660_v43 }
 0x1f1   : > { %v2640_v21 = vmax.f32 %v2512_v9, 0.0  ;;  %v2672_v30 = vmax.f32 %v2544_v12, 0.0  ;;  %v2423_v55 = vadd.f32 %v2295_v15, %v1863_v38  ;;  %v2455_v49 = vadd.f32 %v2327_v20, %v1895_v22 }
 0x1f2   : > { %3784 = vmatpush1.bf16.msra.mxu0 %v3086_v62  ;;  %v1209_v29 = vmul.f32 %v15131_v7, %v13680_v33  ;;  %v1305_v24 = vadd.f32 %v1177_v10, %v745_v1  ;;  %v1737_v18 = vmul.f32 %v15148_v51, %v13746_v52  ;;  %v1769_v2 = vmul.f32 %v15148_v51, %v19934_v63 }
 0x1f3   : > { %v15291_v36 = vpack.c.bf16 %v2672_v30, %v2640_v21  ;;  %v2575_v31 = vadd.f32 %v13850_v34, %v2423_v55  ;;  %v2607_v9 = vadd.f32 %v13815_v25, %v2455_v49  ;;  %v2297_v32 = vmul.f32 %v15153_v40, %v13771_v8 }
 0x1f4   : > { %v1337_v13 = vadd.f32 %v1209_v29, %v777_v48  ;;  %v1865_v27 = vadd.f32 %v1737_v18, %v1305_v24  ;;  %v2329_v7 = vmul.f32 %v15153_v40, %v13793_v39  ;;  %v742_v17 = vmul.f32 %v15167_v4, %v19881_v54 }
 0x1f5   : > { %v2832_v58 = vunpack.c.l.bf16 %v15291_v36  ;;  %v2864_v51 = vunpack.c.h.bf16 %v15291_v36  ;;  %v2703_v56 = vmax.f32 %v2575_v31, 0.0  ;;  %v2735_v15 = vmax.f32 %v2607_v9, 0.0 }
 0x1f6   : > { %v1897_v20 = vadd.f32 %v1769_v2, %v1337_v13  ;;  %v2425_v12 = vadd.f32 %v2297_v32, %v1865_v27  ;;  %v774_v38 = vmul.f32 %v15167_v4, %v13674_v28  ;;  %v1174_v22 = vmul.f32 %v15182_v11, %v13660_v43 }
 0x1f7   : > { %v2960_v62 = vsub.f32 %v2640_v21, %v2832_v58  ;;  %v2992_v1 = vsub.f32 %v2672_v30, %v2864_v51  ;;  %v15307_v40 = vpack.c.bf16 %v2735_v15, %v2703_v56  ;;  %v1206_v48 = vmul.f32 %v15182_v11, %v13680_v33 }
 0x1f8   : > { %v2457_v10 = vadd.f32 %v2329_v7, %v1897_v20  ;;  %v2577_v55 = vadd.f32 %v13850_v34, %v2425_v12  ;;  %v1302_v49 = vadd.f32 %v1174_v22, %v742_v17  ;;  %v1734_v29 = vmul.f32 %v15194_v14, %v13746_v52 }
 0x1f9   : > { %v3088_v24 = vpack.c.bf16 %v2992_v1, %v2960_v62  ;;  %v2895_v4 = vunpack.c.l.bf16 %v15307_v40  ;;  %v2927_v18 = vunpack.c.h.bf16 %v15307_v40  ;;  %v1334_v2 = vadd.f32 %v1206_v48, %v774_v38 }
 0x1fa   : > { %v2609_v21 = vadd.f32 %v13815_v25, %v2457_v10  ;;  %v2705_v30 = vmax.f32 %v2577_v55, 0.0  ;;  %v1766_v31 = vmul.f32 %v15194_v14, %v19934_v63  ;;  %v1862_v11 = vadd.f32 %v1734_v29, %v1302_v49  ;;  %v15341_v10 = vld [vmem:[%s13175_s17 + $0x70] sm:$0xff] }
 0x1fb   : > { %3837 = vmatpush1.bf16.msra.mxu1 %v3088_v24  ;;  %v3023_v9 = vsub.f32 %v2703_v56, %v2895_v4  ;;  %v3055_v32 = vsub.f32 %v2735_v15, %v2927_v18  ;;  %v2294_v13 = vmul.f32 %v15197_v42, %v13771_v8  ;;  %v2326_v27 = vmul.f32 %v15197_v42, %v13793_v39 }
 0x1fc   : > { %v2737_v7 = vmax.f32 %v2609_v21, 0.0  ;;  %v1894_v17 = vadd.f32 %v1766_v31, %v1334_v2  ;;  %v744_v58 = vmul.f32 %v15223_v44, %v19881_v54  ;;  %v776_v51 = vmul.f32 %v15223_v44, %v13674_v28 }
 0x1fd   : > { %v3119_v14 = vpack.c.bf16 %v3055_v32, %v3023_v9  ;;  %v2422_v20 = vadd.f32 %v2294_v13, %v1862_v11  ;;  %v1176_v56 = vmul.f32 %v15232_v5, %v13660_v43  ;;  %v1208_v15 = vmul.f32 %v15232_v5, %v13680_v33 }
 0x1fe   : > { %v15331_v12 = vpack.c.bf16 %v2737_v7, %v2705_v30  ;;  %v2454_v42 = vadd.f32 %v2326_v27, %v1894_v17  ;;  %v1736_v38 = vmul.f32 %v15235_v50, %v13746_v52  ;;  %v1768_v22 = vmul.f32 %v15235_v50, %v19934_v63 }
 0x1ff   : > { %3785 = vmatprep.subr.bf16.mxu0 %v3119_v14  ;;  %v2574_v44 = vadd.f32 %v13850_v34, %v2422_v20  ;;  %v1304_v62 = vadd.f32 %v1176_v56, %v744_v58  ;;  %v1336_v1 = vadd.f32 %v1208_v15, %v776_v51  ;;  %v2296_v48 = vmul.f32 %v15253_v23, %v13771_v8 }
 0x200   : > { %19991 = vst [vmem:[#allocation36_spill] sm:$0xff] %v15331_v12  ;;  %v2897_v5 = vunpack.c.l.bf16 %v15331_v12  ;;  %v2929_v55 = vunpack.c.h.bf16 %v15331_v12  ;;  %v2606_v49 = vadd.f32 %v13815_v25, %v2454_v42  ;;  %v2328_v29 = vmul.f32 %v15253_v23, %v13793_v39 }
 0x201   : > { %v2702_v50 = vmax.f32 %v2574_v44, 0.0  ;;  %v1864_v24 = vadd.f32 %v1736_v38, %v1304_v62  ;;  %v1896_v4 = vadd.f32 %v1768_v22, %v1336_v1  ;;  %v485_v18 = vrot.slane %v15341_v10, %v19940_v46 }
 0x202   : > { %v3025_v2 = vsub.f32 %v2705_v30, %v2897_v5  ;;  %v3057_v21 = vsub.f32 %v2737_v7, %v2929_v55  ;;  %v2734_v31 = vmax.f32 %v2606_v49, 0.0  ;;  %v917_v11 = vrot.slane %v15341_v10, %v19949_v26 }
 0x203   : > { %v2424_v9 = vadd.f32 %v2296_v48, %v1864_v24  ;;  %v2456_v32 = vadd.f32 %v2328_v29, %v1896_v4  ;;  %v15353_v13 = vrot.slane %v485_v18, %v19942_v19  ;;  %v1477_v23 = vrot.slane %v15341_v10, %v19943_v45  ;;  %v15383_v48 = vld [vmem:[%s13175_s17 + $0x78] sm:$0xff]  ;;  %v19993_v18 = vld [vmem:[#allocation58_spill] sm:$0xff] }
 0x204   : > { %v3121_v27 = vpack.c.bf16 %v3057_v21, %v3025_v2  ;;  %v15357_v17 = vpack.c.bf16 %v2734_v31, %v2702_v50  ;;  %v15360_v58 = vrot.slane %v917_v11, %v19950_v61  ;;  %v2037_v30 = vrot.slane %v15341_v10, %v19958_v41 }
 0x205   : > { %v2576_v7 = vadd.f32 %v13850_v34, %v2424_v9  ;;  %v2608_v51 = vadd.f32 %v13815_v25, %v2456_v32  ;;  %v683_v14 = vmul.f32 %v15353_v13, %v19901_v57  ;;  %v715_v20 = vmul.f32 %v15353_v13, %v19903_v59 }
 0x206   : > { %3838 = vmatprep.subr.bf16.mxu1 %v3121_v27  ;;  %v2894_v56 = vunpack.c.l.bf16 %v15357_v17  ;;  %v2926_v15 = vunpack.c.h.bf16 %v15357_v17  ;;  %v1115_v42 = vmul.f32 %v15360_v58, %v19920_v16  ;;  %v1147_v38 = vmul.f32 %v15360_v58, %v19922_v3 }
 0x207   : > { %v2704_v22 = vmax.f32 %v2576_v7, 0.0  ;;  %v2736_v44 = vmax.f32 %v2608_v51, 0.0  ;;  %v15377_v62 = vrot.slane %v1477_v23, %v19959_v0  ;;  %v15380_v1 = vrot.slane %v2037_v30, %v19947_v6 }
 0x208   : > { %v3022_v5 = vsub.f32 %v2702_v50, %v2894_v56  ;;  %v3054_v55 = vsub.f32 %v2734_v31, %v2926_v15  ;;  %v1243_v49 = vadd.f32 %v1115_v42, %v683_v14  ;;  %v1275_v29 = vadd.f32 %v1147_v38, %v715_v20 }
 0x209   : > { %v15385_v24 = vpack.c.bf16 %v2736_v44, %v2704_v22  ;;  %v1675_v4 = vmul.f32 %v15377_v62, %v19923_v47  ;;  %v1707_v2 = vmul.f32 %v15377_v62, %v19993_v18  ;;  %v2235_v21 = vmul.f32 %v15380_v1, %v19916_v35 }
 0x20a   : > { %v3118_v11 = vpack.c.bf16 %v3054_v55, %v3022_v5  ;;  %v2267_v9 = vmul.f32 %v15380_v1, %v13716_v60  ;;  %v493_v50 = vrot.slane %v15383_v48, %v19940_v46  ;;  %v925_v31 = vrot.slane %v15383_v48, %v19949_v26 }
 0x20b   : > { %19992 = vst [vmem:[#allocation31_spill] sm:$0xff] %v15385_v24  ;;  %v2896_v32 = vunpack.c.l.bf16 %v15385_v24  ;;  %v2928_v23 = vunpack.c.h.bf16 %v15385_v24  ;;  %v1803_v27 = vadd.f32 %v1675_v4, %v1243_v49  ;;  %v1835_v30 = vadd.f32 %v1707_v2, %v1275_v29 }
 0x20c   : > { %3786 = vmatpush1.bf16.msra.mxu0 %v3118_v11  ;;  %v15402_v7 = vrot.slane %v493_v50, %v19942_v19  ;;  %v15405_v51 = vrot.slane %v925_v31, %v19950_v61  ;;  %v1485_v14 = vrot.slane %v15383_v48, %v19943_v45  ;;  %v2045_v20 = vrot.slane %v15383_v48, %v19958_v41 }
 0x20d   : > { %v3024_v56 = vsub.f32 %v2704_v22, %v2896_v32  ;;  %v3056_v15 = vsub.f32 %v2736_v44, %v2928_v23  ;;  %v2363_v42 = vadd.f32 %v2235_v21, %v1803_v27  ;;  %v2395_v38 = vadd.f32 %v2267_v9, %v1835_v30  ;;  %v15427_v21 = vld [vmem:[%s19382_s3] sm:$0xff]  }
 0x20e   : > { %v685_v5 = vmul.f32 %v15402_v7, %v19901_v57  ;;  %v717_v55 = vmul.f32 %v15402_v7, %v19903_v59  ;;  %v1117_v49 = vmul.f32 %v15405_v51, %v19920_v16  ;;  %v1149_v29 = vmul.f32 %v15405_v51, %v19922_v3 }
 0x20f   : > { %v3120_v4 = vpack.c.bf16 %v3056_v15, %v3024_v56  ;;  %v2515_v2 = vadd.f32 %v13696_v53, %v2363_v42  ;;  %v2547_v22 = vadd.f32 %v13824_v37, %v2395_v38  ;;  %v15422_v44 = vrot.slane %v1485_v14, %v19959_v0  ;;  %12586 = vmatmul.mubr.msk.bf16.vlgmr.msra.gmra.mrb[48].mxu0 %vm3140_vm0, %v15427_v21 }
 0x210   : > { %v1245_v11 = vadd.f32 %v1117_v49, %v685_v5  ;;  %v1277_v9 = vadd.f32 %v1149_v29, %v717_v55  ;;  %v15432_v50 = vrot.slane %v2045_v20, %v19947_v6  ;;  %v481_v31 = vrot.slane %v15341_v10, %v19942_v19 }
 0x211   : > { %v19994_v32 = vmov 0   ;;  %3839 = vmatpush1.bf16.msra.mxu1 %v3120_v4  ;;  %v2643_v23 = vmax.f32 %v2515_v2, 0.0  ;;  %v2675_v27 = vmax.f32 %v2547_v22, 0.0  ;;  %v1677_v30 = vmul.f32 %v15422_v44, %v19923_v47 }
 0x212   : > { %3825 = vmatprep.mubr.bf16.mxu0 %v19994_v32  ;;  %v1709_v14 = vmul.f32 %v15422_v44, %v19993_v18  ;;  %v2237_v56 = vmul.f32 %v15432_v50, %v19916_v35  ;;  %v2269_v20 = vmul.f32 %v15432_v50, %v13716_v60  ;;  %v15446_v15 = vrot.slane %v481_v31, %v19942_v19 }
 0x213   : > { %v913_v42 = vrot.slane %v15341_v10, %v19950_v61  ;;  %v15450_v38 = vpack.c.bf16 %v2675_v27, %v2643_v23  ;;  %v1805_v5 = vadd.f32 %v1677_v30, %v1245_v11  ;;  %v1473_v49 = vrot.slane %v15341_v10, %v19959_v0 }
 0x214   : > { %v1837_v55 = vadd.f32 %v1709_v14, %v1277_v9  ;;  %12588 = vmatmul.mubr.msk.bf16.vlgmr.msra.gmra.mrb[48].mxu1 %vm3140_vm0, %v15427_v21  ;;  %v682_v29 = vmul.f32 %v15446_v15, %v19901_v57  ;;  %v714_v4 = vmul.f32 %v15446_v15, %v19903_v59  ;;  %v2033_v22 = vrot.slane %v15341_v10, %v19947_v6 }
 0x215   : > { %v15461_v2 = vrot.slane %v913_v42, %v19950_v61  ;;  %v2835_v11 = vunpack.c.l.bf16 %v15450_v38  ;;  %v2867_v9 = vunpack.c.h.bf16 %v15450_v38  ;;  %v2365_v31 = vadd.f32 %v2237_v56, %v1805_v5  ;;  %3878 = vmatprep.mubr.bf16.mxu1 %v19994_v32 }
 0x216   : > { %v2397_v30 = vadd.f32 %v2269_v20, %v1837_v55  ;;  %v15473_v42 = vrot.slane %v1473_v49, %v19959_v0  ;;  %v15476_v45 = vrot.slane %v2033_v22, %v19947_v6  ;;  %v15483_v20 = vld [vmem:[%s19382_s3 + $0x8] sm:$0xff]  }
 0x217   : > { %v1114_v14 = vmul.f32 %v15461_v2, %v19920_v16  ;;  %v1146_v41 = vmul.f32 %v15461_v2, %v19922_v3  ;;  %v2963_v10 = vsub.f32 %v2643_v23, %v2835_v11  ;;  %v2995_v26 = vsub.f32 %v2675_v27, %v2867_v9  ;;  %12587 = vmatmul.mubr.msk.bf16.gmra.mrb[52].mxu0 %vm3140_vm0, %v15483_v20 }
 0x218   : > { %v2517_v46 = vadd.f32 %v13696_v53, %v2365_v31  ;;  %v2549_v56 = vadd.f32 %v13824_v37, %v2397_v30  ;;  %v1674_v49 = vmul.f32 %v15473_v42, %v19923_v47  ;;  %v1706_v23 = vmul.f32 %v15473_v42, %v19993_v18  ;;  %3921 = vmatprep.mubr.bf16.mxu0 %v19994_v32 }
 0x219   : > { %v1242_v5 = vadd.f32 %v1114_v14, %v682_v29  ;;  %v1274_v55 = vadd.f32 %v1146_v41, %v714_v4  ;;  %v3091_v27 = vpack.c.bf16 %v2995_v26, %v2963_v10  ;;  %v2234_v9 = vmul.f32 %v15476_v45, %v19916_v35 }
 0x21a   : > { %v2645_v22 = vmax.f32 %v2517_v46, 0.0  ;;  %v2677_v11 = vmax.f32 %v2549_v56, 0.0  ;;  %v2266_v29 = vmul.f32 %v15476_v45, %v13716_v60  ;;  %v489_v41 = vrot.slane %v15383_v48, %v19942_v19 }
 0x21b   : > { %v1802_v31 = vadd.f32 %v1674_v49, %v1242_v5  ;;  %v1834_v30 = vadd.f32 %v1706_v23, %v1274_v55  ;;  %3889 = vmatprep.subr.bf16.mxu0 %v3091_v27  ;;  %v921_v14 = vrot.slane %v15383_v48, %v19950_v61  ;;  %v1481_v46 = vrot.slane %v15383_v48, %v19959_v0 }
 0x21c   : > { %v15498_v4 = vpack.c.bf16 %v2677_v11, %v2645_v22  ;;  %v2041_v26 = vrot.slane %v15383_v48, %v19947_v6  ;;  %v15507_v5 = vrot.slane %v489_v41, %v19942_v19  ;;  %v747_v55 = vmul.f32 %v15353_v13, %v19881_v54  ;;  %12589 = vmatmul.mubr.msk.bf16.gmra.mrb[52].mxu1 %vm3140_vm0, %v15483_v20 }
 0x21d   : > { %v2362_v10 = vadd.f32 %v2234_v9, %v1802_v31  ;;  %v2394_v56 = vadd.f32 %v2266_v29, %v1834_v30  ;;  %v15516_v27 = vrot.slane %v921_v14, %v19950_v61  ;;  %v15519_v48 = vrot.slane %v1481_v46, %v19959_v0  ;;  %3974 = vmatprep.mubr.bf16.mxu1 %v19994_v32 }
 0x21e   : > { %19995 = vst [vmem:[#allocation30_spill] sm:$0xff] %v15498_v4  ;;  %v2837_v49 = vunpack.c.l.bf16 %v15498_v4  ;;  %v2869_v23 = vunpack.c.h.bf16 %v15498_v4  ;;  %v684_v30 = vmul.f32 %v15507_v5, %v19901_v57  ;;  %v716_v29 = vmul.f32 %v15507_v5, %v19903_v59 }
 0x21f   : > { %v2514_v9 = vadd.f32 %v13696_v53, %v2362_v10  ;;  %v2546_v31 = vadd.f32 %v13824_v37, %v2394_v56  ;;  %v1116_v14 = vmul.f32 %v15516_v27, %v19920_v16  ;;  %v1148_v46 = vmul.f32 %v15516_v27, %v19922_v3 }
 0x220   : > { %v2965_v41 = vsub.f32 %v2645_v22, %v2837_v49  ;;  %v2997_v19 = vsub.f32 %v2677_v11, %v2869_v23  ;;  %v1676_v10 = vmul.f32 %v15519_v48, %v19923_v47  ;;  %v1708_v56 = vmul.f32 %v15519_v48, %v19993_v18 }
 0x221   : > { %v2642_v0 = vmax.f32 %v2514_v9, 0.0  ;;  %v2674_v61 = vmax.f32 %v2546_v31, 0.0  ;;  %v1244_v4 = vadd.f32 %v1116_v14, %v684_v30  ;;  %v1276_v24 = vadd.f32 %v1148_v46, %v716_v29 }
 0x222   : > { %v3093_v57 = vpack.c.bf16 %v2997_v19, %v2965_v41  ;;  %v15537_v59 = vrot.slane %v2041_v26, %v19947_v6  ;;  %v779_v16 = vmul.f32 %v15353_v13, %v13674_v28  ;;  %v1179_v3 = vmul.f32 %v15360_v58, %v13660_v43  ;;  %v20042_v6 = vld [vmem:[#allocation26_spill] sm:$0xff] }
 0x223   : > { %v15539_v22 = vpack.c.bf16 %v2674_v61, %v2642_v0  ;;  %v1211_v47 = vmul.f32 %v15360_v58, %v13680_v33  ;;  %v1804_v11 = vadd.f32 %v1676_v10, %v1244_v4  ;;  %v1836_v18 = vadd.f32 %v1708_v56, %v1276_v24 }
 0x224   : > { %3942 = vmatprep.subr.bf16.mxu1 %v3093_v57  ;;  %v2236_v19 = vmul.f32 %v15537_v59, %v19916_v35  ;;  %v2268_v26 = vmul.f32 %v15537_v59, %v13716_v60  ;;  %v1307_v13 = vadd.f32 %v1179_v3, %v747_v55  ;;  %v1739_v58 = vmul.f32 %v15377_v62, %v13746_v52 }
 0x225   : > { %v2834_v49 = vunpack.c.l.bf16 %v15539_v22  ;;  %v2866_v23 = vunpack.c.h.bf16 %v15539_v22  ;;  %v1339_v9 = vadd.f32 %v1211_v47, %v779_v16  ;;  %v1771_v24 = vmul.f32 %v15377_v62, %v19934_v63 }
 0x226   : > { %v2364_v31 = vadd.f32 %v2236_v19, %v1804_v11  ;;  %v2396_v30 = vadd.f32 %v2268_v26, %v1836_v18  ;;  %v2299_v35 = vmul.f32 %v15380_v1, %v13771_v8  ;;  %v2331_v60 = vmul.f32 %v15380_v1, %v13793_v39 }
 0x227   : > { %v2962_v4 = vsub.f32 %v2642_v0, %v2834_v49  ;;  %v2994_v29 = vsub.f32 %v2674_v61, %v2866_v23  ;;  %v1867_v14 = vadd.f32 %v1739_v58, %v1307_v13  ;;  %v1899_v46 = vadd.f32 %v1771_v24, %v1339_v9 }
 0x228   : > { %v2516_v41 = vadd.f32 %v13696_v53, %v2364_v31  ;;  %v2548_v55 = vadd.f32 %v13824_v37, %v2396_v30  ;;  %v749_v56 = vmul.f32 %v15402_v7, %v19881_v54  ;;  %v781_v0 = vmul.f32 %v15402_v7, %v13674_v28 }
 0x229   : > { %v3090_v10 = vpack.c.bf16 %v2994_v29, %v2962_v4  ;;  %v1181_v61 = vmul.f32 %v15405_v51, %v13660_v43  ;;  %v2427_v16 = vadd.f32 %v2299_v35, %v1867_v14  ;;  %v2459_v1 = vadd.f32 %v2331_v60, %v1899_v46 }
 0x22a   : > { %v2644_v62 = vmax.f32 %v2516_v41, 0.0  ;;  %v2676_v57 = vmax.f32 %v2548_v55, 0.0  ;;  %v1213_v53 = vmul.f32 %v15405_v51, %v13680_v33  ;;  %v1741_v3 = vmul.f32 %v15422_v44, %v13746_v52 }
 0x22b   : > { %3890 = vmatpush1.bf16.msra.mxu0 %v3090_v10  ;;  %v1309_v37 = vadd.f32 %v1181_v61, %v749_v56  ;;  %v1773_v47 = vmul.f32 %v15422_v44, %v19934_v63  ;;  %v2579_v7 = vadd.f32 %v13850_v34, %v2427_v16  ;;  %v2611_v18 = vadd.f32 %v13815_v25, %v2459_v1 }
 0x22c   : > { %v15575_v11 = vpack.c.bf16 %v2676_v57, %v2644_v62  ;;  %v2301_v19 = vmul.f32 %v15432_v50, %v13771_v8  ;;  %v1341_v26 = vadd.f32 %v1213_v53, %v781_v0  ;;  %v2333_v51 = vmul.f32 %v15432_v50, %v13793_v39 }
 0x22d   : > { %v1869_v49 = vadd.f32 %v1741_v3, %v1309_v37  ;;  %v746_v23 = vmul.f32 %v15446_v15, %v19881_v54  ;;  %v2707_v9 = vmax.f32 %v2579_v7, 0.0  ;;  %v2739_v31 = vmax.f32 %v2611_v18, 0.0 }
 0x22e   : > { %v2836_v13 = vunpack.c.l.bf16 %v15575_v11  ;;  %v2868_v44 = vunpack.c.h.bf16 %v15575_v11  ;;  %v1901_v30 = vadd.f32 %v1773_v47, %v1341_v26  ;;  %v778_v24 = vmul.f32 %v15446_v15, %v13674_v28 }
 0x22f   : > { %v2429_v58 = vadd.f32 %v2301_v19, %v1869_v49  ;;  %v1178_v4 = vmul.f32 %v15461_v2, %v13660_v43  ;;  %v15591_v50 = vpack.c.bf16 %v2739_v31, %v2707_v9  ;;  %v1210_v60 = vmul.f32 %v15461_v2, %v13680_v33 }
 0x230   : > { %v2964_v29 = vsub.f32 %v2644_v62, %v2836_v13  ;;  %v2996_v35 = vsub.f32 %v2676_v57, %v2868_v44  ;;  %v2461_v41 = vadd.f32 %v2333_v51, %v1901_v30  ;;  %v1738_v46 = vmul.f32 %v15473_v42, %v13746_v52 }
 0x231   : > { %v2581_v55 = vadd.f32 %v13850_v34, %v2429_v58  ;;  %v1306_v14 = vadd.f32 %v1178_v4, %v746_v23  ;;  %v2899_v15 = vunpack.c.l.bf16 %v15591_v50  ;;  %v2931_v56 = vunpack.c.h.bf16 %v15591_v50 }
 0x232   : > { %v3092_v10 = vpack.c.bf16 %v2996_v35, %v2964_v29  ;;  %v1338_v0 = vadd.f32 %v1210_v60, %v778_v24  ;;  %v2613_v61 = vadd.f32 %v13815_v25, %v2461_v41  ;;  %v1770_v57 = vmul.f32 %v15473_v42, %v19934_v63 }
 0x233   : > { %v2709_v62 = vmax.f32 %v2581_v55, 0.0  ;;  %v1866_v2 = vadd.f32 %v1738_v46, %v1306_v14  ;;  %v3027_v16 = vsub.f32 %v2707_v9, %v2899_v15  ;;  %v3059_v1 = vsub.f32 %v2739_v31, %v2931_v56 }
 0x234   : > { %3943 = vmatpush1.bf16.msra.mxu1 %v3092_v10  ;;  %v2298_v53 = vmul.f32 %v15476_v45, %v13771_v8  ;;  %v2330_v37 = vmul.f32 %v15476_v45, %v13793_v39  ;;  %v2741_v3 = vmax.f32 %v2613_v61, 0.0  ;;  %v1898_v47 = vadd.f32 %v1770_v57, %v1338_v0  ;;  %v19997_v57 = vld [vmem:[#allocation64_spill] sm:$0xff] }
 0x235   : > { %v748_v7 = vmul.f32 %v15507_v5, %v19881_v54  ;;  %v780_v18 = vmul.f32 %v15507_v5, %v13674_v28  ;;  %v3123_v19 = vpack.c.bf16 %v3059_v1, %v3027_v16  ;;  %v1180_v26 = vmul.f32 %v15516_v27, %v13660_v43  ;;  %v19999_v16 = vld [vmem:[#allocation51_spill] sm:$0xff]  ;;  %v20000_v1 = vld [vmem:[#allocation52_spill] sm:$0xff] }
 0x236   : > { %v2426_v42 = vadd.f32 %v2298_v53, %v1866_v2  ;;  %v1212_v49 = vmul.f32 %v15516_v27, %v13680_v33  ;;  %v15615_v51 = vpack.c.bf16 %v2741_v3, %v2709_v62  ;;  %v2458_v23 = vadd.f32 %v2330_v37, %v1898_v47  ;;  %v19998_v2 = vld [vmem:[#allocation41_spill] sm:$0xff]  ;;  %v20004_v47 = vld [vmem:[#allocation16_spill] sm:$0xff] }
 0x237   : > { %v1740_v45 = vmul.f32 %v15519_v48, %v13746_v52  ;;  %v1772_v54 = vmul.f32 %v15519_v48, %v19934_v63  ;;  %3891 = vmatprep.subr.bf16.mxu0 %v3123_v19  ;;  %v1308_v5 = vadd.f32 %v1180_v26, %v748_v7  ;;  %v2300_v43 = vmul.f32 %v15537_v59, %v13771_v8  ;;  %v20001_v53 = vld [vmem:[#allocation65_spill] sm:$0xff]  ;;  %v20005_v7 = vld [vmem:[#allocation66_spill] sm:$0xff]  ;;  %v20009_v26 = vld [vmem:[#allocation80_spill] sm:$0xff] }
 0x238   : > { %v2578_v28 = vadd.f32 %v13850_v34, %v2426_v42  ;;  %v1340_v13 = vadd.f32 %v1212_v49, %v780_v18  ;;  %v2901_v44 = vunpack.c.l.bf16 %v15615_v51  ;;  %v2933_v33 = vunpack.c.h.bf16 %v15615_v51  ;;  %v20002_v37 = vld [vmem:[#allocation53_spill] sm:$0xff]  ;;  %v20006_v18 = vld [vmem:[#allocation43_spill] sm:$0xff]  ;;  %v20010_v49 = vld [vmem:[#allocation46_spill] sm:$0xff] }
 0x239   : > { %v2610_v27 = vadd.f32 %v13815_v25, %v2458_v23  ;;  %v2332_v52 = vmul.f32 %v15537_v59, %v13793_v39  ;;  %v1868_v31 = vadd.f32 %v1740_v45, %v1308_v5  ;;  %v20007_v19 = vld [vmem:[#allocation45_spill] sm:$0xff]  ;;  %v20008_v42 = vld [vmem:[#allocation55_spill] sm:$0xff]  ;;  %v20011_v23 = vld [vmem:[#allocation54_spill] sm:$0xff] }
 0x23a   : > { %v2706_v9 = vmax.f32 %v2578_v28, 0.0  ;;  %v1900_v63 = vadd.f32 %v1772_v54, %v1340_v13  ;;  %v3029_v48 = vsub.f32 %v2709_v62, %v2901_v44  ;;  %v3061_v30 = vsub.f32 %v2741_v3, %v2933_v33  ;;  %v20003_v3 = vld [vmem:[#allocation42_spill] sm:$0xff]  ;;  %v20012_v45 = vld [vmem:[#allocation67_spill] sm:$0xff]  ;;  %v20013_v54 = vld [vmem:[#allocation81_spill] sm:$0xff] }
 0x23b   : > { %v2738_v58 = vmax.f32 %v2610_v27, 0.0  ;;  %v2428_v24 = vadd.f32 %v2300_v43, %v1868_v31  ;;  %v13040_v28 = vmov 5   ;;  %v15684_v5 = vld [vmem:[%s19385_s6] sm:$0x7]  ;;  %v20014_v13 = vld [vmem:[#allocation47_spill] sm:$0xff]  ;;  %v20015_v43 = vld [vmem:[#allocation57_spill] sm:$0xff] }
 0x23c   : > { %v2460_v4 = vadd.f32 %v2332_v52, %v1900_v63  ;;  %v3125_v29 = vpack.c.bf16 %v3061_v30, %v3029_v48  ;;  %12973 = vset.pattern.permute.xlu1 %v13040_v28  ;;  %v20016_v44 = vld [vmem:[#allocation21_spill] sm:$0xff]  ;;  %v20017_v33 = vld [vmem:[#allocation56_spill] sm:$0xff]  ;;  %v20018_v27 = vld [vmem:[#allocation74_spill] sm:$0xff]  ;;  %v13042_v48 = vmov 8  }
 0x23d   : > { %v15629_v35 = vpack.c.bf16 %v2738_v58, %v2706_v9  ;;  %v2580_v8 = vadd.f32 %v13850_v34, %v2428_v24  ;;  %7070 = vperm.xlu1 %12973, %v15684_v5   ;;  %v20019_v52 = vld [vmem:[#allocation68_spill] sm:$0xff]  ;;  %v20021_v63 = vld [vmem:[#allocation10_spill] sm:$0xff]  ;;  %v20022_v30 = vld [vmem:[#allocation13_spill] sm:$0xff]  ;;  %v13043_v24 = vmov 9  }
 0x23e   : > { %v2612_v60 = vadd.f32 %v13815_v25, %v2460_v4  ;;  %3944 = vmatprep.subr.bf16.mxu1 %v3125_v29  ;;  %v19996_v25 = vld [vmem:[#allocation50_spill] sm:$0xff]  ;;  %v20020_v31 = vld [vmem:[#allocation48_spill] sm:$0xff]  ;;  %v20025_v29 = vld [vmem:[#allocation11_spill] sm:$0xff] }
 0x23f   : > { %v2898_v41 = vunpack.c.l.bf16 %v15629_v35  ;;  %v2930_v39 = vunpack.c.h.bf16 %v15629_v35  ;;  %v2708_v59 = vmax.f32 %v2580_v8, 0.0  ;;  %v20024_v4 = vld [vmem:[#allocation70_spill] sm:$0xff]  ;;  %v20036_v28 = vld [vmem:[#allocation79_spill] sm:$0xff] }
 0x240   : > { %v2740_v55 = vmax.f32 %v2612_v60, 0.0  ;;  %v20026_v8 = vld [vmem:[#allocation18_spill] sm:$0xff]  ;;  %v20027_v60 = vld [vmem:[#allocation69_spill] sm:$0xff] }
 0x241   : > { %v3026_v14 = vsub.f32 %v2706_v9, %v2898_v41  ;;  %v3058_v46 = vsub.f32 %v2738_v58, %v2930_v39  ;;  %v13041_v9 = vmov 6   ;;  %v20023_v58 = vld [vmem:[#allocation14_spill] sm:$0xff]  ;;  %v13044_v41 = vmov 11   ;;  %v20028_v39 = vld [vmem:[#allocation12_spill] sm:$0xff] }
 0x242   : > { %v15635_v10 = vpack.c.bf16 %v2740_v55, %v2708_v59  ;;  %12974 = vset.pattern.permute.xlu1 %v13041_v9  ;;  %v20037_v9 = vld [vmem:[#allocation29_spill] sm:$0xff] }
 0x243   : > { %v3122_v15 = vpack.c.bf16 %v3058_v46, %v3026_v14  ;;  %7266 = vperm.xlu1 %12974, %v15684_v5   ;;  %v20030_v14 = vld [vmem:[#allocation15_spill] sm:$0xff]  ;;  %v20031_v46 = vld [vmem:[#allocation72_spill] sm:$0xff] }
 0x244   : > { %v2900_v56 = vunpack.c.l.bf16 %v15635_v10  ;;  %v2932_v0 = vunpack.c.h.bf16 %v15635_v10 }
 0x245   : > { %3892 = vmatpush1.bf16.msra.mxu0 %v3122_v15  ;;  %v13046_v15 = vmov 14  }
 0x246   : > { %v3028_v34 = vsub.f32 %v2708_v59, %v2900_v56  ;;  %v3060_v61 = vsub.f32 %v2740_v55, %v2932_v0  ;;  %3995 = vmatprep.subr.bf16.mxu0 %v19996_v25  ;;  %v20029_v59 = vld [vmem:[#allocation19_spill] sm:$0xff]  ;;  %v13045_v55 = vmov 12   ;;  %v20033_v0 = vld [vmem:[#allocation20_spill] sm:$0xff] }
 0x247   : > { %12976 = vset.pattern.permute.xlu1 %v13042_v48  ;;  %v20032_v56 = vld [vmem:[#allocation23_spill] sm:$0xff]  ;;  %v13048_v48 = vmov 4  }
 0x248   : > { %v3124_v62 = vpack.c.bf16 %v3060_v61, %v3028_v34  ;;  %12590 = vmatmul.mubr.msk.bf16.vlgmr.msra.gmra.mrb[56].mxu0 %vm3140_vm0, %v15427_v21  ;;  %7658 = vperm.xlu1 %12976, %v15684_v5   ;;  %v20034_v34 = vld [vmem:[#allocation28_spill] sm:$0xff]  ;;  %v20035_v61 = vld [vmem:[#allocation73_spill] sm:$0xff] }
 0x249   : > { %3996 = vmatpush1.bf16.msra.mxu0 %v19997_v57  ;;  %3931 = vmatprep.mubr.bf16.mxu0 %v19994_v32 }
 0x24a   : > { %3945 = vmatpush1.bf16.msra.mxu1 %v3124_v62  ;;  %3997 = vmatprep.subr.bf16.mxu0 %v19998_v2  ;;  %v13047_v62 = vmov 15  }
 0x24b   : > { %4048 = vmatprep.subr.bf16.mxu1 %v19999_v16  ;;  %12972 = vset.pattern.permute.xlu0 %v13048_v48  ;;  %v20040_v48 = vld [vmem:[#allocation75_spill] sm:$0xff] }
 0x24c   : > { %12977 = vset.pattern.permute.xlu1 %v13043_v24  ;;  %v13049_v24 = vmov 17   ;;  %6874 = vperm.xlu0 %12972, %v15684_v5  }
 0x24d   : > { %12592 = vmatmul.mubr.msk.bf16.vlgmr.msra.gmra.mrb[56].mxu1 %vm3140_vm0, %v15427_v21  ;;  %3998 = vmatpush1.bf16.msra.mxu0 %v20000_v1 }
 0x24e   : > { %4049 = vmatpush1.bf16.msra.mxu1 %v20001_v53  ;;  %4101 = vmatprep.subr.bf16.mxu0 %v20002_v37 }
 0x24f   : > { %4050 = vmatprep.subr.bf16.mxu1 %v20003_v3  ;;  %3984 = vmatprep.mubr.bf16.mxu1 %v19994_v32 }
 0x250   : > { %12591 = vmatmul.mubr.msk.bf16.gmra.mrb[60].mxu0 %vm3140_vm0, %v15483_v20  ;;  %7854 = vperm.xlu1 %12977, %v15684_v5  }
 0x251   : > { %4027 = vmatprep.mubr.bf16.mxu0 %v19994_v32 }
 0x252   : > { %4051 = vmatpush1.bf16.msra.mxu1 %v20004_v47 }
 0x253   : > { %4154 = vmatprep.subr.bf16.mxu1 %v20005_v7 }
 0x254   : > { %12979 = vset.pattern.permute.xlu1 %v13044_v41  ;;  %v20038_v41 = vld [vmem:[#allocation60_spill] sm:$0xff] }
 0x255   : > { %12593 = vmatmul.mubr.msk.bf16.gmra.mrb[60].mxu1 %vm3140_vm0, %v15483_v20  ;;  %8246 = vperm.xlu1 %12979, %v15684_v5  }
 0x256   : > { %4080 = vmatprep.mubr.bf16.mxu1 %v19994_v32 }
 0x258   : > { %12594 = vmatmul.mubr.msk.bf16.vlgmr.msra.gmra.mrb[0].mxu0 %vm3140_vm0, %v15427_v21 }
 0x259   : > { %4102 = vmatpush1.bf16.msra.mxu0 %v20006_v18  ;;  %4037 = vmatprep.mubr.bf16.mxu0 %v19994_v32 }
 0x25a   : > { %4103 = vmatprep.subr.bf16.mxu0 %v20007_v19  ;;  %12980 = vset.pattern.permute.xlu1 %v13045_v55  ;;  %v20039_v55 = vld [vmem:[#allocation76_spill] sm:$0xff] }
 0x25b   : > { %8442 = vperm.xlu1 %12980, %v15684_v5  }
 0x25d   : > { %12596 = vmatmul.mubr.msk.bf16.vlgmr.msra.gmra.mrb[0].mxu1 %vm3140_vm0, %v15427_v21  ;;  %4104 = vmatpush1.bf16.msra.mxu0 %v20008_v42 }
 0x25e   : > { %4155 = vmatpush1.bf16.msra.mxu1 %v20009_v26  ;;  %4207 = vmatprep.subr.bf16.mxu0 %v20010_v49 }
 0x25f   : > { %4156 = vmatprep.subr.bf16.mxu1 %v20011_v23  ;;  %4090 = vmatprep.mubr.bf16.mxu1 %v19994_v32 }
 0x260   : > { %12595 = vmatmul.mubr.msk.bf16.gmra.mrb[4].mxu0 %vm3140_vm0, %v15483_v20  ;;  %12982 = vset.pattern.permute.xlu1 %v13046_v15  ;;  %v13050_v15 = vmov 7  }
 0x261   : > { %4133 = vmatprep.mubr.bf16.mxu0 %v19994_v32  ;;  %8834 = vperm.xlu1 %12982, %v15684_v5  }
 0x262   : > { %4157 = vmatpush1.bf16.msra.mxu1 %v20012_v45  ;;  %12975 = vset.pattern.permute.xlu0 %v13050_v15  ;;  %v13052_v15 = vmov 10  }
 0x263   : > { %4260 = vmatprep.subr.bf16.mxu1 %v20013_v54  ;;  %7462 = vperm.xlu0 %12975, %v15684_v5  }
 0x265   : > { %12597 = vmatmul.mubr.msk.bf16.gmra.mrb[4].mxu1 %vm3140_vm0, %v15483_v20  ;;  %12983 = vset.pattern.permute.xlu1 %v13047_v62  ;;  %v13051_v62 = vmov 18  }
 0x266   : > { %4186 = vmatprep.mubr.bf16.mxu1 %v19994_v32  ;;  %9030 = vperm.xlu1 %12983, %v15684_v5  }
 0x267   : > { %12978 = vset.pattern.permute.xlu0 %v13052_v15  ;;  %v13055_v15 = vmov 21  }
 0x268   : > { %12598 = vmatmul.mubr.msk.bf16.vlgmr.msra.gmra.mrb[8].mxu0 %vm3140_vm0, %v15427_v21  ;;  %8050 = vperm.xlu0 %12978, %v15684_v5  }
 0x269   : > { %4208 = vmatpush1.bf16.msra.mxu0 %v20014_v13  ;;  %4143 = vmatprep.mubr.bf16.mxu0 %v19994_v32 }
 0x26a   : > { %4209 = vmatprep.subr.bf16.mxu0 %v20015_v43  ;;  %12985 = vset.pattern.permute.xlu1 %v13049_v24  ;;  %v20041_v24 = vld [vmem:[#allocation61_spill] sm:$0xff] }
 0x26b   : > { %9422 = vperm.xlu1 %12985, %v15684_v5  }
 0x26d   : > { %12600 = vmatmul.mubr.msk.bf16.vlgmr.msra.gmra.mrb[8].mxu1 %vm3140_vm0, %v15427_v21  ;;  %4210 = vmatpush1.bf16.msra.mxu0 %v20016_v44 }
 0x26e   : > { %4261 = vmatpush1.bf16.msra.mxu1 %v20017_v33  ;;  %4313 = vmatprep.subr.bf16.mxu0 %v20018_v27 }
 0x26f   : > { %4262 = vmatprep.subr.bf16.mxu1 %v20019_v52  ;;  %4196 = vmatprep.mubr.bf16.mxu1 %v19994_v32 }
 0x270   : > { %12599 = vmatmul.mubr.msk.bf16.gmra.mrb[12].mxu0 %vm3140_vm0, %v15483_v20  ;;  %12986 = vset.pattern.permute.xlu1 %v13051_v62  ;;  %v13053_v62 = vmov 20  }
 0x271   : > { %4239 = vmatprep.mubr.bf16.mxu0 %v19994_v32  ;;  %9618 = vperm.xlu1 %12986, %v15684_v5  }
 0x272   : > { %4263 = vmatpush1.bf16.msra.mxu1 %v20020_v31 }
 0x273   : > { %4366 = vmatprep.subr.bf16.mxu1 %v20021_v63 }
 0x275   : > { %12601 = vmatmul.mubr.msk.bf16.gmra.mrb[12].mxu1 %vm3140_vm0, %v15483_v20  ;;  %12988 = vset.pattern.permute.xlu1 %v13053_v62  ;;  %v20046_v62 = vld [vmem:[#allocation78_spill] sm:$0xff] }
 0x276   : > { %4292 = vmatprep.mubr.bf16.mxu1 %v19994_v32  ;;  %10010 = vperm.xlu1 %12988, %v15684_v5  }
 0x278   : > { %12602 = vmatmul.mubr.msk.bf16.vlgmr.msra.gmra.mrb[16].mxu0 %vm3140_vm0, %v15427_v21 }
 0x279   : > { %4314 = vmatpush1.bf16.msra.mxu0 %v20022_v30  ;;  %4249 = vmatprep.mubr.bf16.mxu0 %v19994_v32 }
 0x27a   : > { %4315 = vmatprep.subr.bf16.mxu0 %v20023_v58  ;;  %12989 = vset.pattern.permute.xlu1 %v13055_v15  ;;  %v13059_v15 = vmov 24  }
 0x27b   : > { %10206 = vperm.xlu1 %12989, %v15684_v5  }
 0x27d   : > { %12604 = vmatmul.mubr.msk.bf16.vlgmr.msra.gmra.mrb[16].mxu1 %vm3140_vm0, %v15427_v21  ;;  %4316 = vmatpush1.bf16.msra.mxu0 %v20024_v4 }
 0x27e   : > { %4367 = vmatpush1.bf16.msra.mxu1 %v20025_v29  ;;  %4419 = vmatprep.subr.bf16.mxu0 %v20026_v8 }
 0x27f   : > { %4368 = vmatprep.subr.bf16.mxu1 %v20027_v60  ;;  %4302 = vmatprep.mubr.bf16.mxu1 %v19994_v32 }
 0x280   : > { %12603 = vmatmul.mubr.msk.bf16.gmra.mrb[20].mxu0 %vm3140_vm0, %v15483_v20 }
 0x281   : > { %4345 = vmatprep.mubr.bf16.mxu0 %v19994_v32 }
 0x282   : > { %4369 = vmatpush1.bf16.msra.mxu1 %v20028_v39 }
 0x283   : > { %4472 = vmatprep.subr.bf16.mxu1 %v20029_v59 }
 0x285   : > { %12605 = vmatmul.mubr.msk.bf16.gmra.mrb[20].mxu1 %vm3140_vm0, %v15483_v20 }
 0x286   : > { %4398 = vmatprep.mubr.bf16.mxu1 %v19994_v32 }
 0x288   : > { %12606 = vmatmul.mubr.msk.bf16.vlgmr.msra.gmra.mrb[24].mxu0 %vm3140_vm0, %v15427_v21 }
 0x289   : > { %4420 = vmatpush1.bf16.msra.mxu0 %v20030_v14  ;;  %4355 = vmatprep.mubr.bf16.mxu0 %v19994_v32 }
 0x28a   : > { %4421 = vmatprep.subr.bf16.mxu0 %v20031_v46 }
 0x28d   : > { %12608 = vmatmul.mubr.msk.bf16.vlgmr.msra.gmra.mrb[24].mxu1 %vm3140_vm0, %v15427_v21  ;;  %4422 = vmatpush1.bf16.msra.mxu0 %v20032_v56 }
 0x28e   : > { %4473 = vmatpush1.bf16.msra.mxu1 %v20033_v0  ;;  %4525 = vmatprep.subr.bf16.mxu0 %v20034_v34 }
 0x28f   : > { %4474 = vmatprep.subr.bf16.mxu1 %v20035_v61  ;;  %4408 = vmatprep.mubr.bf16.mxu1 %v19994_v32 }
 0x290   : > { %12607 = vmatmul.mubr.msk.bf16.gmra.mrb[28].mxu0 %vm3140_vm0, %v15483_v20 }
 0x291   : > { %4451 = vmatprep.mubr.bf16.mxu0 %v19994_v32 }
 0x292   : > { %4475 = vmatpush1.bf16.msra.mxu1 %v20036_v28 }
 0x293   : > { %4578 = vmatprep.subr.bf16.mxu1 %v20037_v9 }
 0x295   : > { %12609 = vmatmul.mubr.msk.bf16.gmra.mrb[28].mxu1 %vm3140_vm0, %v15483_v20 }
 0x296   : > { %4504 = vmatprep.mubr.bf16.mxu1 %v19994_v32 }
 0x298   : > { %12610 = vmatmul.mubr.msk.bf16.vlgmr.msra.gmra.mrb[32].mxu0 %vm3140_vm0, %v15427_v21 }
 0x299   : > { %4526 = vmatpush1.bf16.msra.mxu0 %v20038_v41  ;;  %4461 = vmatprep.mubr.bf16.mxu0 %v19994_v32  ;;  %v20043_v41 = vld [vmem:[#allocation62_spill] sm:$0xff] }
 0x29a   : > { %4527 = vmatprep.subr.bf16.mxu0 %v20039_v55  ;;  %v20044_v55 = vld [vmem:[#allocation77_spill] sm:$0xff] }
 0x29d   : > { %12612 = vmatmul.mubr.msk.bf16.vlgmr.msra.gmra.mrb[32].mxu1 %vm3140_vm0, %v15427_v21  ;;  %4528 = vmatpush1.bf16.msra.mxu0 %v20040_v48 }
 0x29e   : > { %4579 = vmatpush1.bf16.msra.mxu1 %v20041_v24  ;;  %4631 = vmatprep.subr.bf16.mxu0 %v20042_v6  ;;  %v20045_v24 = vld [vmem:[#allocation63_spill] sm:$0xff] }
 0x29f   : > { %4580 = vmatprep.subr.bf16.mxu1 %v20043_v41  ;;  %4514 = vmatprep.mubr.bf16.mxu1 %v19994_v32  ;;  %v13054_v41 = vmov 13  }
 0x2a0   : > { %12611 = vmatmul.mubr.msk.bf16.gmra.mrb[36].mxu0 %vm3140_vm0, %v15483_v20  ;;  %12981 = vset.pattern.permute.xlu0 %v13054_v41  ;;  %v13058_v41 = vmov 19  }
 0x2a1   : > { %4557 = vmatprep.mubr.bf16.mxu0 %v19994_v32  ;;  %8638 = vperm.xlu0 %12981, %v15684_v5  }
 0x2a2   : > { %4581 = vmatpush1.bf16.msra.mxu1 %v20044_v55  ;;  %v13057_v55 = vmov 23  }
 0x2a3   : > { %4684 = vmatprep.subr.bf16.mxu1 %v20045_v24  ;;  %v13056_v24 = vmov 16   ;;  %12991 = vset.pattern.permute.xlu1 %v13057_v55  ;;  %v20047_v55 = vld [vmem:[#allocation31_spill] sm:$0xff] }
 0x2a4   : > { %10598 = vperm.xlu1 %12991, %v15684_v5  }
 0x2a5   : > { %12613 = vmatmul.mubr.msk.bf16.gmra.mrb[36].mxu1 %vm3140_vm0, %v15483_v20  ;;  %12984 = vset.pattern.permute.xlu0 %v13056_v24  ;;  %v20048_v24 = vld [vmem:[#allocation30_spill] sm:$0xff] }
 0x2a6   : > { %4610 = vmatprep.mubr.bf16.mxu1 %v19994_v32  ;;  %9226 = vperm.xlu0 %12984, %v15684_v5  }
 0x2a8   : > { %12614 = vmatmul.mubr.msk.bf16.vlgmr.msra.gmra.mrb[40].mxu0 %vm3140_vm0, %v15427_v21  ;;  %12992 = vset.pattern.permute.xlu1 %v13059_v15  ;;  %v13062_v15 = vmov 25  }
 0x2a9   : > { %4632 = vmatpush1.bf16.msra.mxu0 %v20046_v62  ;;  %4567 = vmatprep.mubr.bf16.mxu0 %v19994_v32 }
 0x2aa   : > { %4633 = vmatprep.subr.bf16.mxu0 %v15307_v40  ;;  %12987 = vset.pattern.permute.xlu0 %v13058_v41  ;;  %v13061_v41 = vmov 26  }
 0x2ab   : > { %9814 = vperm.xlu0 %12987, %v15684_v5   ;;  %10794 = vperm.xlu1 %12992, %v15684_v5  }
 0x2ad   : > { %12616 = vmatmul.mubr.msk.bf16.vlgmr.msra.gmra.mrb[40].mxu1 %vm3140_vm0, %v15427_v21  ;;  %4634 = vmatpush1.bf16.msra.mxu0 %v15357_v17 }
 0x2ae   : > { %4685 = vmatpush1.bf16.msra.mxu1 %v15291_v36  ;;  %4737 = vmatprep.subr.bf16.mxu0 %v15450_v38 }
 0x2af   : > { %4686 = vmatprep.subr.bf16.mxu1 %v15331_v12  ;;  %4620 = vmatprep.mubr.bf16.mxu1 %v19994_v32  ;;  %v13060_v12 = vmov 22  }
 0x2b0   : > { %12615 = vmatmul.mubr.msk.bf16.gmra.mrb[44].mxu0 %vm3140_vm0, %v15483_v20  ;;  %12990 = vset.pattern.permute.xlu0 %v13060_v12  ;;  %v13063_v12 = vmov 27  }
 0x2b1   : > { %4663 = vmatprep.mubr.bf16.mxu0 %v19994_v32  ;;  %10402 = vperm.xlu0 %12990, %v15684_v5  }
 0x2b2   : > { %4687 = vmatpush1.bf16.msra.mxu1 %v20047_v55  ;;  %12994 = vset.pattern.permute.xlu1 %v13061_v41  ;;  %v13064_v41 = vmov 28  }
 0x2b3   : > { %4790 = vmatprep.subr.bf16.mxu1 %v20048_v24  ;;  %11186 = vperm.xlu1 %12994, %v15684_v5  }
 0x2b5   : > { %12617 = vmatmul.mubr.msk.bf16.gmra.mrb[44].mxu1 %vm3140_vm0, %v15483_v20  ;;  %12993 = vset.pattern.permute.xlu0 %v13062_v15  ;;  %v13066_v15 = vmov 31  }
 0x2b6   : > { %4716 = vmatprep.mubr.bf16.mxu1 %v19994_v32  ;;  %10990 = vperm.xlu0 %12993, %v15684_v5  }
 0x2b7   : > { %12995 = vset.pattern.permute.xlu1 %v13063_v12 }
 0x2b8   : > { %12618 = vmatmul.mubr.msk.bf16.vlgmr.msra.gmra.mrb[48].mxu0 %vm3140_vm0, %v15427_v21  ;;  %11382 = vperm.xlu1 %12995, %v15684_v5  }
 0x2b9   : > { %4738 = vmatpush1.bf16.msra.mxu0 %v15539_v22  ;;  %4673 = vmatprep.mubr.bf16.mxu0 %v19994_v32 }
 0x2ba   : > { %4739 = vmatprep.subr.bf16.mxu0 %v15591_v50  ;;  %12996 = vset.pattern.permute.xlu0 %v13064_v41 }
 0x2bb   : > { %11578 = vperm.xlu0 %12996, %v15684_v5  }
 0x2bd   : > { %12620 = vmatmul.mubr.msk.bf16.vlgmr.msra.gmra.mrb[48].mxu1 %vm3140_vm0, %v15427_v21  ;;  %4740 = vmatpush1.bf16.msra.mxu0 %v15629_v35 }
 0x2be   : > { %4791 = vmatpush1.bf16.msra.mxu1 %v15575_v11  ;;  %4863 = vmatprep.subr.bf16.mxu0 %v19996_v25  ;;  %v13065_v25 = vmov 29  }
 0x2bf   : > { %4792 = vmatprep.subr.bf16.mxu1 %v15615_v51  ;;  %4726 = vmatprep.mubr.bf16.mxu1 %v19994_v32 }
 0x2c0   : > { %12619 = vmatmul.mubr.msk.bf16.gmra.mrb[52].mxu0 %vm3140_vm0, %v15483_v20  ;;  %12997 = vset.pattern.permute.xlu1 %v13065_v25 }
 0x2c1   : > { %4769 = vmatprep.mubr.bf16.mxu0 %v19994_v32  ;;  %11774 = vperm.xlu1 %12997, %v15684_v5  }
 0x2c2   : > { %4793 = vmatpush1.bf16.msra.mxu1 %v15635_v10  ;;  %12999 = vset.pattern.permute.xlu0 %v13066_v15 }
 0x2c3   : > { %4916 = vmatprep.subr.bf16.mxu1 %v19999_v16  ;;  %12166 = vperm.xlu0 %12999, %v15684_v5   ;;  %v13067_v16 = vmov 30  }
 0x2c5   : > { %12621 = vmatmul.mubr.msk.bf16.gmra.mrb[52].mxu1 %vm3140_vm0, %v15483_v20  ;;  %12998 = vset.pattern.permute.xlu1 %v13067_v16 }
 0x2c6   : > { %4822 = vmatprep.mubr.bf16.mxu1 %v19994_v32  ;;  %11970 = vperm.xlu1 %12998, %v15684_v5  }
 0x2c7   : > { %13001 = vset.pattern.permute.xlu0 %v19994_v32 }
 0x2c8   : > { %12622 = vmatmul.mubr.msk.bf16.vlgmr.msra.gmra.mrb[56].mxu0 %vm3140_vm0, %v15427_v21 }
 0x2c9   : > { %4864 = vmatpush1.bf16.msra.mxu0 %v19997_v57  ;;  %4779 = vmatprep.mubr.bf16.mxu0 %v19994_v32  ;;  %v12361_v57 = vld [vmem:[%s19386_s7] sm:$0x7] }
 0x2ca   : > { %4865 = vmatprep.subr.bf16.mxu0 %v19998_v2  ;;  %13000 = vset.pattern.permute.xlu1 %v19994_v32  ;;  %v20049_v2 = vld [vmem:[#allocation60_spill] sm:$0xff] }
 0x2cb   : > { %12364 = vperm.xlu1 %13000, %v12361_v57  }
 0x2cd   : > { %12624 = vmatmul.mubr.msk.bf16.vlgmr.msra.gmra.mrb[56].mxu1 %vm3140_vm0, %v15427_v21  ;;  %4866 = vmatpush1.bf16.msra.mxu0 %v20000_v1  ;;  %v15856_v21 = vld [vmem:[%s19383_s4] sm:$0xff]   ;;  %v20050_v1 = vld [vmem:[#allocation76_spill] sm:$0xff] }
 0x2ce   : > { %4917 = vmatpush1.bf16.msra.mxu1 %v20001_v53  ;;  %4969 = vmatprep.subr.bf16.mxu0 %v20002_v37  ;;  %v20051_v53 = vld [vmem:[#allocation61_spill] sm:$0xff]  ;;  %v20052_v37 = vld [vmem:[#allocation62_spill] sm:$0xff] }
 0x2cf   : > { %4918 = vmatprep.subr.bf16.mxu1 %v20003_v3  ;;  %4832 = vmatprep.mubr.bf16.mxu1 %v19994_v32  ;;  %v20053_v3 = vld [vmem:[#allocation77_spill] sm:$0xff] }
 0x2d0   : > { %12623 = vmatmul.mubr.msk.bf16.gmra.mrb[60].mxu0 %vm3140_vm0, %v15483_v20 }
 0x2d1   : > { %4895 = vmatprep.mubr.bf16.mxu0 %v19994_v32 }
 0x2d2   : > { %4919 = vmatpush1.bf16.msra.mxu1 %v20004_v47  ;;  %v20054_v47 = vld [vmem:[#allocation63_spill] sm:$0xff] }
 0x2d3   : > { %5022 = vmatprep.subr.bf16.mxu1 %v20005_v7 }
 0x2d5   : > { %12625 = vmatmul.mubr.msk.bf16.gmra.mrb[60].mxu1 %vm3140_vm0, %v15483_v20  ;;  %v15872_v20 = vld [vmem:[%s19383_s4 + $0x8] sm:$0xff]  }
 0x2d6   : > { %4948 = vmatprep.mubr.bf16.mxu1 %v19994_v32 }
 0x2d8   : > { %12628 = vmatmul.mubr.msk.bf16.vlgmr.msra.gmra.mrb[0].mxu0 %vm3140_vm0, %v15856_v21 }
 0x2d9   : > { %4970 = vmatpush1.bf16.msra.mxu0 %v20006_v18  ;;  %4905 = vmatprep.mubr.bf16.mxu0 %v19994_v32 }
 0x2da   : > { %4971 = vmatprep.subr.bf16.mxu0 %v20007_v19 }
 0x2dd   : > { %12630 = vmatmul.mubr.msk.bf16.vlgmr.msra.gmra.mrb[0].mxu1 %vm3140_vm0, %v15856_v21  ;;  %4972 = vmatpush1.bf16.msra.mxu0 %v20008_v42 }
 0x2de   : > { %5023 = vmatpush1.bf16.msra.mxu1 %v20009_v26  ;;  %5075 = vmatprep.subr.bf16.mxu0 %v20010_v49 }
 0x2df   : > { %5024 = vmatprep.subr.bf16.mxu1 %v20011_v23  ;;  %4958 = vmatprep.mubr.bf16.mxu1 %v19994_v32 }
 0x2e0   : > { %12629 = vmatmul.mubr.msk.bf16.gmra.mrb[4].mxu0 %vm3140_vm0, %v15872_v20 }
 0x2e1   : > { %5001 = vmatprep.mubr.bf16.mxu0 %v19994_v32 }
 0x2e2   : > { %5025 = vmatpush1.bf16.msra.mxu1 %v20012_v45 }
 0x2e3   : > { %5128 = vmatprep.subr.bf16.mxu1 %v20013_v54 }
 0x2e5   : > { %12631 = vmatmul.mubr.msk.bf16.gmra.mrb[4].mxu1 %vm3140_vm0, %v15872_v20 }
 0x2e6   : > { %5054 = vmatprep.mubr.bf16.mxu1 %v19994_v32 }
 0x2e8   : > { %12632 = vmatmul.mubr.msk.bf16.vlgmr.msra.gmra.mrb[8].mxu0 %vm3140_vm0, %v15856_v21 }
 0x2e9   : > { %5076 = vmatpush1.bf16.msra.mxu0 %v20014_v13  ;;  %5011 = vmatprep.mubr.bf16.mxu0 %v19994_v32 }
 0x2ea   : > { %5077 = vmatprep.subr.bf16.mxu0 %v20015_v43 }
 0x2ed   : > { %12634 = vmatmul.mubr.msk.bf16.vlgmr.msra.gmra.mrb[8].mxu1 %vm3140_vm0, %v15856_v21  ;;  %5078 = vmatpush1.bf16.msra.mxu0 %v20016_v44  ;;  %v20069_v44 = vld [vmem:[#allocation6_spill] sm:$0xff] }
 0x2ee   : > { %5129 = vmatpush1.bf16.msra.mxu1 %v20017_v33  ;;  %5181 = vmatprep.subr.bf16.mxu0 %v20018_v27  ;;  %v20070_v27 = vld [vmem:[#allocation4_spill] sm:$0xff] }
 0x2ef   : > { %5130 = vmatprep.subr.bf16.mxu1 %v20019_v52  ;;  %5064 = vmatprep.mubr.bf16.mxu1 %v19994_v32 }
 0x2f0   : > { %12633 = vmatmul.mubr.msk.bf16.gmra.mrb[12].mxu0 %vm3140_vm0, %v15872_v20 }
 0x2f1   : > { %5107 = vmatprep.mubr.bf16.mxu0 %v19994_v32 }
 0x2f2   : > { %5131 = vmatpush1.bf16.msra.mxu1 %v20020_v31  ;;  %v20071_v31 = vld [vmem:[#allocation5_spill] sm:$0xff] }
 0x2f3   : > { %5234 = vmatprep.subr.bf16.mxu1 %v20021_v63 }
 0x2f5   : > { %12635 = vmatmul.mubr.msk.bf16.gmra.mrb[12].mxu1 %vm3140_vm0, %v15872_v20 }
 0x2f6   : > { %5160 = vmatprep.mubr.bf16.mxu1 %v19994_v32 }
 0x2f8   : > { %12636 = vmatmul.mubr.msk.bf16.vlgmr.msra.gmra.mrb[16].mxu0 %vm3140_vm0, %v15856_v21 }
 0x2f9   : > { %5182 = vmatpush1.bf16.msra.mxu0 %v20022_v30  ;;  %5117 = vmatprep.mubr.bf16.mxu0 %v19994_v32  ;;  %v20072_v30 = vld [vmem:[#allocation9_spill] sm:$0xff] }
 0x2fa   : > { %5183 = vmatprep.subr.bf16.mxu0 %v20023_v58 }
 0x2fd   : > { %12638 = vmatmul.mubr.msk.bf16.vlgmr.msra.gmra.mrb[16].mxu1 %vm3140_vm0, %v15856_v21  ;;  %5184 = vmatpush1.bf16.msra.mxu0 %v20024_v4 }
 0x2fe   : > { %5235 = vmatpush1.bf16.msra.mxu1 %v20025_v29  ;;  %5287 = vmatprep.subr.bf16.mxu0 %v20026_v8  ;;  %v20073_v29 = vld [vmem:[#allocation7_spill] sm:$0xff] }
 0x2ff   : > { %5236 = vmatprep.subr.bf16.mxu1 %v20027_v60  ;;  %5170 = vmatprep.mubr.bf16.mxu1 %v19994_v32  ;;  %v20074_v60 = vld [vmem:[#allocation2_spill] sm:$0xff] }
 0x300   : > { %12637 = vmatmul.mubr.msk.bf16.gmra.mrb[20].mxu0 %vm3140_vm0, %v15872_v20 }
 0x301   : > { %5213 = vmatprep.mubr.bf16.mxu0 %v19994_v32 }
 0x302   : > { %5237 = vmatpush1.bf16.msra.mxu1 %v20028_v39 }
 0x303   : > { %5340 = vmatprep.subr.bf16.mxu1 %v20029_v59  ;;  %v20075_v59 = vld [vmem:[#allocation3_spill] sm:$0xff] }
 0x305   : > { %12639 = vmatmul.mubr.msk.bf16.gmra.mrb[20].mxu1 %vm3140_vm0, %v15872_v20 }
 0x306   : > { %5266 = vmatprep.mubr.bf16.mxu1 %v19994_v32 }
 0x308   : > { %12640 = vmatmul.mubr.msk.bf16.vlgmr.msra.gmra.mrb[24].mxu0 %vm3140_vm0, %v15856_v21 }
 0x309   : > { %5288 = vmatpush1.bf16.msra.mxu0 %v20030_v14  ;;  %5223 = vmatprep.mubr.bf16.mxu0 %v19994_v32 }
 0x30a   : > { %5289 = vmatprep.subr.bf16.mxu0 %v20031_v46  ;;  %v20076_v46 = vld [vmem:[#allocation8_spill] sm:$0xff] }
 0x30d   : > { %12642 = vmatmul.mubr.msk.bf16.vlgmr.msra.gmra.mrb[24].mxu1 %vm3140_vm0, %v15856_v21  ;;  %5290 = vmatpush1.bf16.msra.mxu0 %v20032_v56 }
 0x30e   : > { %5341 = vmatpush1.bf16.msra.mxu1 %v20033_v0  ;;  %5393 = vmatprep.subr.bf16.mxu0 %v20034_v34 }
 0x30f   : > { %5342 = vmatprep.subr.bf16.mxu1 %v20035_v61  ;;  %5276 = vmatprep.mubr.bf16.mxu1 %v19994_v32 }
 0x310   : > { %12641 = vmatmul.mubr.msk.bf16.gmra.mrb[28].mxu0 %vm3140_vm0, %v15872_v20 }
 0x311   : > { %5319 = vmatprep.mubr.bf16.mxu0 %v19994_v32 }
 0x312   : > { %5343 = vmatpush1.bf16.msra.mxu1 %v20036_v28 }
 0x313   : > { %5446 = vmatprep.subr.bf16.mxu1 %v20037_v9 }
 0x315   : > { %12643 = vmatmul.mubr.msk.bf16.gmra.mrb[28].mxu1 %vm3140_vm0, %v15872_v20 }
 0x316   : > { %5372 = vmatprep.mubr.bf16.mxu1 %v19994_v32 }
 0x318   : > { %12644 = vmatmul.mubr.msk.bf16.vlgmr.msra.gmra.mrb[32].mxu0 %vm3140_vm0, %v15856_v21 }
 0x319   : > { %5394 = vmatpush1.bf16.msra.mxu0 %v20049_v2  ;;  %5329 = vmatprep.mubr.bf16.mxu0 %v19994_v32 }
 0x31a   : > { %5395 = vmatprep.subr.bf16.mxu0 %v20050_v1 }
 0x31d   : > { %12646 = vmatmul.mubr.msk.bf16.vlgmr.msra.gmra.mrb[32].mxu1 %vm3140_vm0, %v15856_v21  ;;  %5396 = vmatpush1.bf16.msra.mxu0 %v20040_v48 }
 0x31e   : > { %5447 = vmatpush1.bf16.msra.mxu1 %v20051_v53  ;;  %5499 = vmatprep.subr.bf16.mxu0 %v20042_v6  ;;  %v20055_v6 = vld [vmem:[#allocation36_spill] sm:$0xff] }
 0x31f   : > { %5448 = vmatprep.subr.bf16.mxu1 %v20052_v37  ;;  %5382 = vmatprep.mubr.bf16.mxu1 %v19994_v32 }
 0x320   : > { %12645 = vmatmul.mubr.msk.bf16.gmra.mrb[36].mxu0 %vm3140_vm0, %v15872_v20 }
 0x321   : > { %5425 = vmatprep.mubr.bf16.mxu0 %v19994_v32 }
 0x322   : > { %5449 = vmatpush1.bf16.msra.mxu1 %v20053_v3 }
 0x323   : > { %5552 = vmatprep.subr.bf16.mxu1 %v20054_v47 }
 0x325   : > { %12647 = vmatmul.mubr.msk.bf16.gmra.mrb[36].mxu1 %vm3140_vm0, %v15872_v20 }
 0x326   : > { %5478 = vmatprep.mubr.bf16.mxu1 %v19994_v32 }
 0x328   : > { %12648 = vmatmul.mubr.msk.bf16.vlgmr.msra.gmra.mrb[40].mxu0 %vm3140_vm0, %v15856_v21 }
 0x329   : > { %5500 = vmatpush1.bf16.msra.mxu0 %v20046_v62  ;;  %5435 = vmatprep.mubr.bf16.mxu0 %v19994_v32 }
 0x32a   : > { %5501 = vmatprep.subr.bf16.mxu0 %v15307_v40 }
 0x32d   : > { %12650 = vmatmul.mubr.msk.bf16.vlgmr.msra.gmra.mrb[40].mxu1 %vm3140_vm0, %v15856_v21  ;;  %5502 = vmatpush1.bf16.msra.mxu0 %v15357_v17 }
 0x32e   : > { %5553 = vmatpush1.bf16.msra.mxu1 %v15291_v36  ;;  %5605 = vmatprep.subr.bf16.mxu0 %v15450_v38  ;;  %v16017_v36 = vpop.permute.xlu1 %5845 }
 0x32f   : > { %5554 = vmatprep.subr.bf16.mxu1 %v20055_v6  ;;  %5488 = vmatprep.mubr.bf16.mxu1 %v19994_v32  ;;  %20056 = vst [vmem:[#allocation35_spill] sm:$0xff] %v16017_v36 }
 0x330   : > { %12649 = vmatmul.mubr.msk.bf16.gmra.mrb[44].mxu0 %vm3140_vm0, %v15872_v20 }
 0x331   : > { %5531 = vmatprep.mubr.bf16.mxu0 %v19994_v32 }
 0x332   : > { %5555 = vmatpush1.bf16.msra.mxu1 %v20047_v55  ;;  %v16019_v40 = vpop.permute.xlu1 %5855 }
 0x333   : > { %5658 = vmatprep.subr.bf16.mxu1 %v20048_v24  ;;  %20057 = vst [vmem:[#allocation27_spill] sm:$0xff] %v16019_v40 }
 0x335   : > { %12651 = vmatmul.mubr.msk.bf16.gmra.mrb[44].mxu1 %vm3140_vm0, %v15872_v20 }
 0x336   : > { %5584 = vmatprep.mubr.bf16.mxu1 %v19994_v32  ;;  %v16021_v17 = vpop.permute.xlu1 %6122 }
 0x337   : > { %20058 = vst [vmem:[#allocation44_spill] sm:$0xff] %v16021_v17 }
 0x338   : > { %12652 = vmatmul.mubr.msk.bf16.vlgmr.msra.gmra.mrb[48].mxu0 %vm3140_vm0, %v15856_v21 }
 0x339   : > { %5606 = vmatpush1.bf16.msra.mxu0 %v15539_v22  ;;  %5541 = vmatprep.mubr.bf16.mxu0 %v19994_v32 }
 0x33a   : > { %5607 = vmatprep.subr.bf16.mxu0 %v15591_v50  ;;  %v16023_v38 = vpop.permute.xlu1 %6482 }
 0x33b   : > { %20059 = vst [vmem:[#allocation49_spill] sm:$0xff] %v16023_v38 }
 0x33d   : > { %12654 = vmatmul.mubr.msk.bf16.vlgmr.msra.gmra.mrb[48].mxu1 %vm3140_vm0, %v15856_v21  ;;  %5608 = vmatpush1.bf16.msra.mxu0 %v15629_v35 }
 0x33e   : > { %5659 = vmatpush1.bf16.msra.mxu1 %v15575_v11  ;;  %5594 = vmatprep.mubr.bf16.mxu1 %v19994_v32  ;;  %v16025_v22 = vpop.permute.xlu1 %6678  ;;  %v16027_v11 = vpop.permute.xlu0 %5850 }
 0x33f   : > { %5660 = vmatprep.subr.bf16.mxu1 %v15615_v51  ;;  %20060 = vst [vmem:[#allocation32_spill] sm:$0xff] %v16025_v22  ;;  %20061 = vst [vmem:[#allocation37_spill] sm:$0xff] %v16027_v11 }
 0x340   : > { %12653 = vmatmul.mubr.msk.bf16.gmra.mrb[52].mxu0 %vm3140_vm0, %v15872_v20 }
 0x341   : > { %5637 = vmatprep.mubr.bf16.mxu0 %v19994_v32 }
 0x342   : > { %5661 = vmatpush1.bf16.msra.mxu1 %v15635_v10  ;;  %v16029_v50 = vpop.permute.xlu1 %7070 }
 0x343   : > { %20062 = vst [vmem:[#allocation33_spill] sm:$0xff] %v16029_v50 }
 0x345   : > { %12655 = vmatmul.mubr.msk.bf16.gmra.mrb[52].mxu1 %vm3140_vm0, %v15872_v20 }
 0x346   : > { %5690 = vmatprep.mubr.bf16.mxu1 %v19994_v32  ;;  %v16033_v51 = vpop.permute.xlu1 %7266 }
 0x347   : > { %20064 = vst [vmem:[#allocation38_spill] sm:$0xff] %v16033_v51 }
 0x348   : > { %12656 = vmatmul.mubr.msk.bf16.vlgmr.msra.gmra.mrb[56].mxu0 %vm3140_vm0, %v15856_v21 }
 0x349   : > { %5647 = vmatprep.mubr.bf16.mxu0 %v19994_v32 }
 0x34a   : > { %v16037_v10 = vpop.permute.xlu1 %7658 }
 0x34b   : > { %20066 = vst [vmem:[#allocation22_spill] sm:$0xff] %v16037_v10 }
 0x34d   : > { %12658 = vmatmul.mubr.msk.bf16.vlgmr.msra.gmra.mrb[56].mxu1 %vm3140_vm0, %v15856_v21 }
 0x34e   : > { %5700 = vmatprep.mubr.bf16.mxu1 %v19994_v32  ;;  %v16031_v32 = vpop.permute.xlu0 %5860  ;;  %v16043_v23 = vpop.permute.xlu1 %7854 }
 0x34f   : > { %20063 = vst [vmem:[#allocation34_spill] sm:$0xff] %v16031_v32  ;;  %20068 = vst [vmem:[#allocation59_spill] sm:$0xff] %v16043_v23 }
 0x350   : > { %12657 = vmatmul.mubr.msk.bf16.gmra.mrb[60].mxu0 %vm3140_vm0, %v15872_v20 }
 0x352   : > { %v16035_v35 = vpop.permute.xlu0 %6286  ;;  %v16079_v16 = vpop.permute.xlu1 %8246 }
 0x353   : > { %20065 = vst [vmem:[#allocation39_spill] sm:$0xff] %v16035_v35  ;;  %20078 = vst [vmem:[#allocation40_spill] sm:$0xff] %v16079_v16 }
 0x355   : > { %12659 = vmatmul.mubr.msk.bf16.gmra.mrb[60].mxu1 %vm3140_vm0, %v15872_v20 }
 0x356   : > { %v16039_v18 = vpop.permute.xlu0 %6874 }
 0x357   : > { %20067 = vst [vmem:[#allocation25_spill] sm:$0xff] %v16039_v18 }
 0x35a   : > { %v16061_v34 = vpop.permute.xlu0 %7462 }
 0x35b   : > { %20077 = vst [vmem:[#allocation24_spill] sm:$0xff] %v16061_v34 }
 0x3ab   : > { %v4897_v7 = vpop.f32.mrb[0].mxu0 }
 0x3ac   : > { %v5863_v19 = vadd.f32 %v16017_v36, %v4897_v7  ;;  %v4899_v42 = vpop.f32.mrb[1].mxu0 }
 0x3ad   : > { %v5864_v26 = vadd.f32 %v16017_v36, %v4899_v42  ;;  %v4901_v49 = vpop.f32.mrb[2].mxu0 }
 0x3ae   : > { %v5991_v45 = vmax.f32 %v5863_v19, 0.0  ;;  %v4903_v54 = vpop.f32.mrb[3].mxu0  ;;  %v16048_v13 = vadd.f32 %v16027_v11, %v4901_v49 }
 0x3af   : > { %v16045_v5 = vmax.f32 %v5864_v26, 0.0  ;;  %v16051_v43 = vadd.f32 %v16027_v11, %v4903_v54 }
 0x3b0   : > { %v6128_v33 = vrot.slane %v5991_v45, %v20069_v44  ;;  %v6292_v52 = vrot.slane %v5991_v45, %v20070_v27  ;;  %v6488_v63 = vrot.slane %v5991_v45, %v20071_v31  ;;  %v6684_v58 = vrot.slane %v5991_v45, %v20072_v30  ;;  %v4950_v4 = vpop.f32.mrb[0].mxu1 }
 0x3b1   : > { %v6880_v8 = vrot.slane %v5991_v45, %v20073_v29  ;;  %v7076_v39 = vrot.slane %v5991_v45, %v20074_v60  ;;  %v7272_v14 = vrot.slane %v5991_v45, %v20075_v59  ;;  %v7468_v56 = vrot.slane %v5991_v45, %v20076_v46  ;;  %v4952_v0 = vpop.f32.mrb[1].mxu1 }
 0x3b2   : > { %v6253_v61 = vmul.f32 %v6128_v33, %v16021_v17  ;;  %v6417_v28 = vmul.f32 %v6292_v52, %v16035_v35  ;;  %v6613_v9 = vmul.f32 %v6488_v63, %v16023_v38  ;;  %v6809_v48 = vmul.f32 %v6684_v58, %v16025_v22  ;;  %v16067_v62 = vpop.f32.mrb[2].mxu1 }
 0x3b3   : > { %v7005_v55 = vmul.f32 %v6880_v8, %v16039_v18  ;;  %v7201_v24 = vmul.f32 %v7076_v39, %v16029_v50  ;;  %v7397_v12 = vmul.f32 %v7272_v14, %v16033_v51  ;;  %v16073_v41 = vmul.f32 %v7468_v56, %v16061_v34  ;;  %v16075_v25 = vpop.f32.mrb[3].mxu1  ;;  %v16077_v15 = vpop.f32.mrb[4].mxu0 }
 0x3b4   : > { %v6449_v21 = vadd.f32 %v6417_v28, %v6253_v61  ;;  %v5865_v57 = vadd.f32 %v16017_v36, %v4950_v4  ;;  %v6132_v20 = vrot.slane %v16045_v5, %v20069_v44  ;;  %v6296_v2 = vrot.slane %v16045_v5, %v20070_v27  ;;  %v16086_v1 = vpop.f32.mrb[5].mxu0 }
 0x3b5   : > { %v6492_v53 = vrot.slane %v16045_v5, %v20071_v31  ;;  %v6688_v37 = vrot.slane %v16045_v5, %v20072_v30  ;;  %v6884_v3 = vrot.slane %v16045_v5, %v20073_v29  ;;  %v7080_v47 = vrot.slane %v16045_v5, %v20074_v60  ;;  %v16096_v6 = vpop.f32.mrb[6].mxu0 }
 0x3b6   : > { %v6645_v7 = vadd.f32 %v6613_v9, %v6449_v21  ;;  %v5993_v19 = vmax.f32 %v5865_v57, 0.0  ;;  %v6254_v42 = vmul.f32 %v6132_v20, %v16021_v17  ;;  %v6418_v26 = vmul.f32 %v6296_v2, %v16035_v35  ;;  %v16100_v49 = vpop.f32.mrb[7].mxu0  ;;  %v16119_v21 = vpop.permute.xlu1 %8442 }
 0x3b7   : > { %20079 = vst [vmem:[#allocation17_spill] sm:$0xff] %v16100_v49  ;;  %v6614_v45 = vmul.f32 %v6492_v53, %v16023_v38  ;;  %v6810_v54 = vmul.f32 %v6688_v37, %v16025_v22  ;;  %v7006_v33 = vmul.f32 %v6884_v3, %v16039_v18  ;;  %v16106_v52 = vmul.f32 %v7080_v47, %v16029_v50 }
 0x3b8   : > { %v6841_v63 = vadd.f32 %v6809_v48, %v6645_v7  ;;  %v6136_v58 = vrot.slane %v5993_v19, %v20069_v44  ;;  %v6300_v4 = vrot.slane %v5993_v19, %v20070_v27  ;;  %v6496_v8 = vrot.slane %v5993_v19, %v20071_v31  ;;  %v16111_v39 = vpop.f32.mrb[4].mxu1  ;;  %20080 = vst [vmem:[#allocation71_spill] sm:$0xff] %v16119_v21 }
 0x3b9   : > { %v6692_v14 = vrot.slane %v5993_v19, %v20072_v30  ;;  %v6888_v56 = vrot.slane %v5993_v19, %v20073_v29  ;;  %v7084_v61 = vrot.slane %v5993_v19, %v20074_v60  ;;  %v7280_v28 = vrot.slane %v5993_v19, %v20075_v59  ;;  %v16117_v9 = vpop.f32.mrb[5].mxu1 }
 0x3ba   : > { %v7037_v48 = vadd.f32 %v7005_v55, %v6841_v63  ;;  %v6255_v57 = vmul.f32 %v6136_v58, %v16021_v17  ;;  %v6419_v20 = vmul.f32 %v6300_v4, %v16035_v35  ;;  %v6615_v2 = vmul.f32 %v6496_v8, %v16023_v38  ;;  %v16124_v53 = vpop.f32.mrb[6].mxu1 }
 0x3bb   : > { %v6811_v37 = vmul.f32 %v6692_v14, %v16025_v22  ;;  %v7007_v3 = vmul.f32 %v6888_v56, %v16039_v18  ;;  %v7203_v47 = vmul.f32 %v7084_v61, %v16029_v50  ;;  %v7399_v7 = vmul.f32 %v7280_v28, %v16033_v51  ;;  %v16130_v49 = vpop.f32.mrb[7].mxu1  ;;  %v16132_v32 = vpop.f32.mrb[8].mxu0 }
 0x3bc   : > { %20081 = vst [vmem:[#allocation58_spill] sm:$0xff] %v16130_v49  ;;  %v7233_v55 = vadd.f32 %v7201_v24, %v7037_v48  ;;  %v6451_v63 = vadd.f32 %v6419_v20, %v6255_v57  ;;  %v7476_v58 = vrot.slane %v5993_v19, %v20076_v46  ;;  %v6450_v4 = vadd.f32 %v6418_v26, %v6254_v42  ;;  %v16135_v8 = vpop.f32.mrb[9].mxu0 }
 0x3bd   : > { %20082 = vst [vmem:[#allocation50_spill] sm:$0xff] %v16135_v8  ;;  %v7276_v14 = vrot.slane %v16045_v5, %v20075_v59  ;;  %v7472_v56 = vrot.slane %v16045_v5, %v20076_v46  ;;  %v5866_v61 = vadd.f32 %v16017_v36, %v4952_v0  ;;  %v16143_v28 = vmax.f32 %v16048_v13, 0.0  ;;  %v16145_v49 = vpop.f32.mrb[10].mxu0  ;;  %v16154_v0 = vpop.permute.xlu1 %8834 }
 0x3be   : > { %20083 = vst [vmem:[#allocation64_spill] sm:$0xff] %v16145_v49  ;;  %v7429_v24 = vadd.f32 %v7397_v12, %v7233_v55  ;;  %v6647_v48 = vadd.f32 %v6615_v2, %v6451_v63  ;;  %v7595_v19 = vmul.f32 %v7476_v58, %v16061_v34  ;;  %v6646_v42 = vadd.f32 %v6614_v45, %v6450_v4  ;;  %v16152_v8 = vpop.f32.mrb[11].mxu0 }
 0x3bf   : > { %v7398_v26 = vmul.f32 %v7276_v14, %v16033_v51  ;;  %v7594_v57 = vmul.f32 %v7472_v56, %v16061_v34  ;;  %v5994_v20 = vmax.f32 %v5866_v61, 0.0  ;;  %v7664_v5 = vrot.slane %v16143_v28, %v20069_v44  ;;  %20084 = vst [vmem:[#allocation41_spill] sm:$0xff] %v16152_v8  ;;  %20085 = vst [vmem:[#allocation51_spill] sm:$0xff] %v16154_v0 }
 0x3c0   : > { %v7625_v13 = vadd.f32 %v16073_v41, %v7429_v24  ;;  %v6843_v49 = vadd.f32 %v6811_v37, %v6647_v48  ;;  %v6842_v12 = vadd.f32 %v6810_v54, %v6646_v42  ;;  %v7860_v2 = vrot.slane %v16143_v28, %v20070_v27  ;;  %v16159_v45 = vpop.f32.mrb[8].mxu1 }
 0x3c1   : > { %20086 = vst [vmem:[#allocation52_spill] sm:$0xff] %v16159_v45  ;;  %v6140_v55 = vrot.slane %v5994_v20, %v20069_v44  ;;  %v6304_v63 = vrot.slane %v5994_v20, %v20070_v27  ;;  %v6500_v58 = vrot.slane %v5994_v20, %v20071_v31  ;;  %v6696_v4 = vrot.slane %v5994_v20, %v20072_v30  ;;  %v16165_v14 = vpop.f32.mrb[9].mxu1  ;;  %v16175_v45 = vpop.permute.xlu0 %8050 }
 0x3c2   : > { %v7039_v56 = vadd.f32 %v7007_v3, %v6843_v49  ;;  %v7038_v61 = vadd.f32 %v7006_v33, %v6842_v12  ;;  %v6892_v41 = vrot.slane %v5994_v20, %v20073_v29  ;;  %v7088_v54 = vrot.slane %v5994_v20, %v20074_v60  ;;  %v16169_v37 = vpop.f32.mrb[10].mxu1 }
 0x3c3   : > { %20087 = vst [vmem:[#allocation65_spill] sm:$0xff] %v16169_v37  ;;  %v6256_v24 = vmul.f32 %v6140_v55, %v16021_v17  ;;  %v6420_v48 = vmul.f32 %v6304_v63, %v16035_v35  ;;  %v6616_v42 = vmul.f32 %v6500_v58, %v16023_v38  ;;  %v6812_v8 = vmul.f32 %v6696_v4, %v16025_v22  ;;  %v16180_v12 = vpop.f32.mrb[11].mxu1  ;;  %v16185_v38 = vpop.permute.xlu1 %9030 }
 0x3c4   : > { %v7235_v36 = vadd.f32 %v7203_v47, %v7039_v56  ;;  %v7234_v49 = vadd.f32 %v16106_v52, %v7038_v61  ;;  %v7008_v33 = vmul.f32 %v6892_v41, %v16039_v18  ;;  %v7204_v3 = vmul.f32 %v7088_v54, %v16029_v50  ;;  %20088 = vst [vmem:[#allocation53_spill] sm:$0xff] %v16180_v12 }
 0x3c5   : > { %v6452_v37 = vadd.f32 %v6420_v48, %v6256_v24  ;;  %v7284_v55 = vrot.slane %v5994_v20, %v20075_v59  ;;  %v7480_v63 = vrot.slane %v5994_v20, %v20076_v46  ;;  %v7789_v58 = vmul.f32 %v7664_v5, %v16037_v10  ;;  %20089 = vst [vmem:[#allocation42_spill] sm:$0xff] %v16185_v38 }
 0x3c6   : > { %v7431_v4 = vadd.f32 %v7399_v7, %v7235_v36  ;;  %v7430_v22 = vadd.f32 %v7398_v26, %v7234_v49  ;;  %v7985_v47 = vmul.f32 %v7860_v2, %v16043_v23  ;;  %v8056_v52 = vrot.slane %v16143_v28, %v20071_v31 }
 0x3c7   : > { %v6648_v56 = vadd.f32 %v6616_v42, %v6452_v37  ;;  %v7400_v61 = vmul.f32 %v7284_v55, %v16033_v51  ;;  %v7596_v41 = vmul.f32 %v7480_v63, %v16061_v34  ;;  %v7821_v54 = vadd.f32 %v7789_v58, %v7625_v13  ;;  %v16199_v37 = vpop.permute.xlu0 %8638  ;;  %v16210_v63 = vpop.f32.mrb[12].mxu0 }
 0x3c8   : > { %v7627_v24 = vadd.f32 %v7595_v19, %v7431_v4  ;;  %v7626_v48 = vadd.f32 %v7594_v57, %v7430_v22  ;;  %v8181_v20 = vmul.f32 %v8056_v52, %v16175_v45  ;;  %v8252_v5 = vrot.slane %v16143_v28, %v20072_v30  ;;  %20090 = vst [vmem:[#allocation16_spill] sm:$0xff] %v16199_v37  ;;  %v16212_v58 = vpop.permute.xlu1 %9422 }
 0x3c9   : > { %v6844_v36 = vadd.f32 %v6812_v8, %v6648_v56  ;;  %v8017_v7 = vadd.f32 %v7985_v47, %v7821_v54  ;;  %v8448_v26 = vrot.slane %v16143_v28, %v20073_v29  ;;  %v8644_v2 = vrot.slane %v16143_v28, %v20074_v60  ;;  %20091 = vst [vmem:[#allocation66_spill] sm:$0xff] %v16210_v63 }
 0x3ca   : > { %v8377_v42 = vmul.f32 %v8252_v5, %v16079_v16  ;;  %v8840_v22 = vrot.slane %v16143_v28, %v20075_v59  ;;  %v9036_v19 = vrot.slane %v16143_v28, %v20076_v46  ;;  %v5897_v8 = vadd.f32 %v16027_v11, %v16067_v62  ;;  %20092 = vst [vmem:[#allocation43_spill] sm:$0xff] %v16212_v58 }
 0x3cb   : > { %v7040_v57 = vadd.f32 %v7008_v33, %v6844_v36  ;;  %v8213_v13 = vadd.f32 %v8181_v20, %v8017_v7  ;;  %v8573_v49 = vmul.f32 %v8448_v26, %v16119_v21  ;;  %v8769_v55 = vmul.f32 %v8644_v2, %v16199_v37 }
 0x3cc   : > { %v8965_v4 = vmul.f32 %v8840_v22, %v16154_v0  ;;  %v9161_v47 = vmul.f32 %v9036_v19, %v16185_v38  ;;  %v6025_v52 = vmax.f32 %v5897_v8, 0.0  ;;  %v6024_v28 = vmax.f32 %v16051_v43, 0.0 }
 0x3cd   : > { %v7236_v56 = vadd.f32 %v7204_v3, %v7040_v57  ;;  %v8409_v54 = vadd.f32 %v8377_v42, %v8213_v13  ;;  %v5898_v62 = vadd.f32 %v16027_v11, %v16075_v25  ;;  %v5927_v33 = vadd.f32 %v16019_v40, %v16077_v15 }
 0x3ce   : > { %v7672_v20 = vrot.slane %v6025_v52, %v20069_v44  ;;  %v7868_v5 = vrot.slane %v6025_v52, %v20070_v27  ;;  %v8064_v36 = vrot.slane %v6025_v52, %v20071_v31  ;;  %v8260_v7 = vrot.slane %v6025_v52, %v20072_v30 }
 0x3cf   : > { %v7432_v26 = vadd.f32 %v7400_v61, %v7236_v56  ;;  %v8605_v2 = vadd.f32 %v8573_v49, %v8409_v54  ;;  %v8456_v43 = vrot.slane %v6025_v52, %v20073_v29  ;;  %v8652_v3 = vrot.slane %v6025_v52, %v20074_v60  ;;  %v16233_v61 = vpop.permute.xlu1 %9618 }
 0x3d0   : > { %v7791_v42 = vmul.f32 %v7672_v20, %v16037_v10  ;;  %v7987_v25 = vmul.f32 %v7868_v5, %v16043_v23  ;;  %v8183_v15 = vmul.f32 %v8064_v36, %v16175_v45  ;;  %v8379_v22 = vmul.f32 %v8260_v7, %v16079_v16  ;;  %20093 = vst [vmem:[#allocation45_spill] sm:$0xff] %v16233_v61 }
 0x3d1   : > { %v7628_v19 = vadd.f32 %v7596_v41, %v7432_v26  ;;  %v8801_v8 = vadd.f32 %v8769_v55, %v8605_v2  ;;  %v8575_v57 = vmul.f32 %v8456_v43, %v16119_v21  ;;  %v8771_v13 = vmul.f32 %v8652_v3, %v16199_v37  ;;  %v16244_v43 = vpop.f32.mrb[12].mxu1 }
 0x3d2   : > { %v7823_v49 = vadd.f32 %v7791_v42, %v7627_v24  ;;  %v8848_v56 = vrot.slane %v6025_v52, %v20075_v59  ;;  %v9044_v54 = vrot.slane %v6025_v52, %v20076_v46  ;;  %v7668_v20 = vrot.slane %v6024_v28, %v20069_v44  ;;  %20094 = vst [vmem:[#allocation55_spill] sm:$0xff] %v16244_v43 }
 0x3d3   : > { %v8997_v5 = vadd.f32 %v8965_v4, %v8801_v8  ;;  %v7864_v36 = vrot.slane %v6024_v28, %v20070_v27  ;;  %v8060_v7 = vrot.slane %v6024_v28, %v20071_v31  ;;  %v8256_v41 = vrot.slane %v6024_v28, %v20072_v30 }
 0x3d4   : > { %v8019_v55 = vadd.f32 %v7987_v25, %v7823_v49  ;;  %v8967_v26 = vmul.f32 %v8848_v56, %v16154_v0  ;;  %v9163_v2 = vmul.f32 %v9044_v54, %v16185_v38  ;;  %v7790_v24 = vmul.f32 %v7668_v20, %v16037_v10  ;;  %v16251_v49 = vpop.f32.mrb[13].mxu0  ;;  %v16253_v56 = vpop.f32.mrb[13].mxu1 }
 0x3d5   : > { %v9193_v3 = vadd.f32 %v9161_v47, %v8997_v5  ;;  %v7986_v52 = vmul.f32 %v7864_v36, %v16043_v23  ;;  %v8182_v4 = vmul.f32 %v8060_v7, %v16175_v45  ;;  %v8378_v42 = vmul.f32 %v8256_v41, %v16079_v16  ;;  %20095 = vst [vmem:[#allocation80_spill] sm:$0xff] %v16251_v49  ;;  %v16259_v36 = vpop.f32.mrb[14].mxu0  ;;  %v16261_v7 = vpop.permute.xlu1 %10010 }
 0x3d6   : > { %v8215_v8 = vadd.f32 %v8183_v15, %v8019_v55  ;;  %v7822_v63 = vadd.f32 %v7790_v24, %v7626_v48  ;;  %v8452_v12 = vrot.slane %v6024_v28, %v20073_v29  ;;  %v8648_v25 = vrot.slane %v6024_v28, %v20074_v60  ;;  %20096 = vst [vmem:[#allocation46_spill] sm:$0xff] %v16253_v56  ;;  %v16263_v48 = vpop.permute.xlu0 %9226 }
 0x3d7   : > { %v8844_v54 = vrot.slane %v6024_v28, %v20075_v59  ;;  %v9040_v47 = vrot.slane %v6024_v28, %v20076_v46  ;;  %v6026_v20 = vmax.f32 %v5898_v62, 0.0  ;;  %v16257_v5 = vmax.f32 %v5927_v33, 0.0  ;;  %20097 = vst [vmem:[#allocation54_spill] sm:$0xff] %v16259_v36  ;;  %20098 = vst [vmem:[#allocation67_spill] sm:$0xff] %v16261_v7  ;;  %v16271_v33 = vpop.f32.mrb[14].mxu1 }
 0x3d8   : > { %20099 = vst [vmem:[#allocation81_spill] sm:$0xff] %v16263_v48  ;;  %v8411_v15 = vadd.f32 %v8379_v22, %v8215_v8  ;;  %v8018_v41 = vadd.f32 %v7986_v52, %v7822_v63  ;;  %v8574_v55 = vmul.f32 %v8452_v12, %v16119_v21  ;;  %v8770_v24 = vmul.f32 %v8648_v25, %v16199_v37 }
 0x3d9   : > { %v8966_v56 = vmul.f32 %v8844_v54, %v16154_v0  ;;  %v9162_v49 = vmul.f32 %v9040_v47, %v16185_v38  ;;  %v7676_v28 = vrot.slane %v6026_v20, %v20069_v44  ;;  %v7872_v62 = vrot.slane %v6026_v20, %v20070_v27  ;;  %20100 = vst [vmem:[#allocation47_spill] sm:$0xff] %v16271_v33 }
 0x3da   : > { %v8607_v36 = vadd.f32 %v8575_v57, %v8411_v15  ;;  %v8214_v43 = vadd.f32 %v8182_v4, %v8018_v41  ;;  %v8068_v34 = vrot.slane %v6026_v20, %v20071_v31  ;;  %v8264_v63 = vrot.slane %v6026_v20, %v20072_v30 }
 0x3db   : > { %v7792_v12 = vmul.f32 %v7676_v28, %v16037_v10  ;;  %v7988_v22 = vmul.f32 %v7872_v62, %v16043_v23  ;;  %v8460_v52 = vrot.slane %v6026_v20, %v20073_v29  ;;  %v8656_v8 = vrot.slane %v6026_v20, %v20074_v60  ;;  %v16284_v28 = vpop.permute.xlu1 %10206  ;;  %v16286_v62 = vpop.permute.xlu0 %9814 }
 0x3dc   : > { %v8803_v25 = vadd.f32 %v8771_v13, %v8607_v36  ;;  %v8410_v54 = vadd.f32 %v8378_v42, %v8214_v43  ;;  %v8184_v47 = vmul.f32 %v8068_v34, %v16175_v45  ;;  %v8380_v33 = vmul.f32 %v8264_v63, %v16079_v16  ;;  %20101 = vst [vmem:[#allocation57_spill] sm:$0xff] %v16284_v28 }
 0x3dd   : > { %v7824_v57 = vadd.f32 %v7792_v12, %v7628_v19  ;;  %v8576_v4 = vmul.f32 %v8460_v52, %v16119_v21  ;;  %v8772_v15 = vmul.f32 %v8656_v8, %v16199_v37  ;;  %v8852_v41 = vrot.slane %v6026_v20, %v20075_v59  ;;  %20102 = vst [vmem:[#allocation21_spill] sm:$0xff] %v16286_v62 }
 0x3de   : > { %v8999_v23 = vadd.f32 %v8967_v26, %v8803_v25  ;;  %v8606_v10 = vadd.f32 %v8574_v55, %v8410_v54  ;;  %v9048_v13 = vrot.slane %v6026_v20, %v20076_v46  ;;  %v9232_v34 = vrot.slane %v16257_v5, %v20069_v44  ;;  %v16302_v25 = vpop.f32.mrb[15].mxu0 }
 0x3df   : > { %v8020_v43 = vadd.f32 %v7988_v22, %v7824_v57  ;;  %v8968_v19 = vmul.f32 %v8852_v41, %v16154_v0  ;;  %v9428_v42 = vrot.slane %v16257_v5, %v20070_v27  ;;  %v9624_v36 = vrot.slane %v16257_v5, %v20071_v31  ;;  %20103 = vst [vmem:[#allocation56_spill] sm:$0xff] %v16302_v25 }
 0x3e0   : > { %v9195_v63 = vadd.f32 %v9163_v2, %v8999_v23  ;;  %v8802_v12 = vadd.f32 %v8770_v24, %v8606_v10  ;;  %v9164_v52 = vmul.f32 %v9048_v13, %v16185_v38  ;;  %v9357_v26 = vmul.f32 %v9232_v34, %v16263_v48  ;;  %v16313_v13 = vpop.permute.xlu1 %10598 }
 0x3e1   : > { %v8216_v55 = vadd.f32 %v8184_v47, %v8020_v43  ;;  %v9553_v20 = vmul.f32 %v9428_v42, %v16212_v58  ;;  %v9749_v8 = vmul.f32 %v9624_v36, %v16233_v61  ;;  %v9820_v22 = vrot.slane %v16257_v5, %v20072_v30  ;;  %20104 = vst [vmem:[#allocation74_spill] sm:$0xff] %v16313_v13 }
 0x3e2   : > { %v8998_v54 = vadd.f32 %v8966_v56, %v8802_v12  ;;  %v9389_v57 = vadd.f32 %v9357_v26, %v9193_v3  ;;  %v10016_v23 = vrot.slane %v16257_v5, %v20073_v29  ;;  %v10212_v10 = vrot.slane %v16257_v5, %v20074_v60  ;;  %v16315_v56 = vpop.permute.xlu0 %10402 }
 0x3e3   : > { %v8412_v2 = vadd.f32 %v8380_v33, %v8216_v55  ;;  %v9945_v24 = vmul.f32 %v9820_v22, %v16286_v62  ;;  %v10408_v47 = vrot.slane %v16257_v5, %v20075_v59  ;;  %v10604_v41 = vrot.slane %v16257_v5, %v20076_v46  ;;  %20105 = vst [vmem:[#allocation68_spill] sm:$0xff] %v16315_v56 }
 0x3e4   : > { %v9194_v34 = vadd.f32 %v9162_v49, %v8998_v54  ;;  %v9585_v3 = vadd.f32 %v9553_v20, %v9389_v57  ;;  %v10141_v43 = vmul.f32 %v10016_v23, %v16261_v7  ;;  %v10337_v42 = vmul.f32 %v10212_v10, %v16284_v28  ;;  %v20106_v20 = vld [vmem:[#allocation34_spill] sm:$0xff]  ;;  %v20107_v23 = vld [vmem:[#allocation17_spill] sm:$0xff] }
 0x3e5   : > { %v8608_v36 = vadd.f32 %v8576_v4, %v8412_v2  ;;  %v10533_v33 = vmul.f32 %v10408_v47, %v16315_v56  ;;  %v10729_v12 = vmul.f32 %v10604_v41, %v16313_v13  ;;  %v5929_v26 = vadd.f32 %v16019_v40, %v16111_v39 }
 0x3e6   : > { %v9781_v55 = vadd.f32 %v9749_v8, %v9585_v3  ;;  %v5928_v5 = vadd.f32 %v16019_v40, %v16086_v1  ;;  %v5930_v49 = vadd.f32 %v16019_v40, %v16117_v9  ;;  %v5959_v22 = vadd.f32 %v20106_v20, %v16096_v6  ;;  %v16341_v9 = vpop.f32.mrb[15].mxu1 }
 0x3e7   : > { %v8804_v54 = vadd.f32 %v8772_v15, %v8608_v36  ;;  %v6057_v57 = vmax.f32 %v5929_v26, 0.0  ;;  %v16331_v4 = vadd.f32 %v20106_v20, %v16124_v53  ;;  %v16335_v10 = vadd.f32 %v20106_v20, %v20107_v23  ;;  %20109 = vst [vmem:[#allocation10_spill] sm:$0xff] %v16341_v9 }
 0x3e8   : > { %v9977_v39 = vadd.f32 %v9945_v24, %v9781_v55  ;;  %v6056_v8 = vmax.f32 %v5928_v5, 0.0  ;;  %v16337_v2 = vmax.f32 %v5930_v49, 0.0  ;;  %v16339_v1 = vmax.f32 %v5959_v22, 0.0 }
 0x3e9   : > { %v9000_v47 = vadd.f32 %v8968_v19, %v8804_v54  ;;  %v9240_v6 = vrot.slane %v6057_v57, %v20069_v44  ;;  %v9436_v15 = vrot.slane %v6057_v57, %v20070_v27  ;;  %v9632_v53 = vrot.slane %v6057_v57, %v20071_v31 }
 0x3ea   : > { %20108 = vst [vmem:[#allocation48_spill] sm:$0xff] %v16339_v1  ;;  %v10173_v41 = vadd.f32 %v10141_v43, %v9977_v39  ;;  %v9828_v3 = vrot.slane %v6057_v57, %v20072_v30  ;;  %v10024_v36 = vrot.slane %v6057_v57, %v20073_v29  ;;  %v10220_v24 = vrot.slane %v6057_v57, %v20074_v60 }
 0x3eb   : > { %v9196_v26 = vadd.f32 %v9164_v52, %v9000_v47  ;;  %v9359_v55 = vmul.f32 %v9240_v6, %v16263_v48  ;;  %v9555_v5 = vmul.f32 %v9436_v15, %v16212_v58  ;;  %v9751_v19 = vmul.f32 %v9632_v53, %v16233_v61  ;;  %v16361_v53 = vpop.permute.xlu1 %10794 }
 0x3ec   : > { %v10369_v49 = vadd.f32 %v10337_v42, %v10173_v41  ;;  %v9947_v22 = vmul.f32 %v9828_v3, %v16286_v62  ;;  %v10143_v54 = vmul.f32 %v10024_v36, %v16261_v7  ;;  %v10339_v43 = vmul.f32 %v10220_v24, %v16284_v28 }
 0x3ed   : > { %v9391_v23 = vadd.f32 %v9359_v55, %v9195_v63  ;;  %v10416_v39 = vrot.slane %v6057_v57, %v20075_v59  ;;  %v10612_v9 = vrot.slane %v6057_v57, %v20076_v46  ;;  %v9236_v52 = vrot.slane %v6056_v8, %v20069_v44 }
 0x3ee   : > { %v10565_v47 = vadd.f32 %v10533_v33, %v10369_v49  ;;  %v9432_v6 = vrot.slane %v6056_v8, %v20070_v27  ;;  %v9628_v15 = vrot.slane %v6056_v8, %v20071_v31  ;;  %v9824_v42 = vrot.slane %v6056_v8, %v20072_v30 }
 0x3ef   : > { %v9587_v41 = vadd.f32 %v9555_v5, %v9391_v23  ;;  %v10535_v3 = vmul.f32 %v10416_v39, %v16315_v56  ;;  %v10731_v63 = vmul.f32 %v10612_v9, %v16313_v13  ;;  %v9358_v36 = vmul.f32 %v9236_v52, %v16263_v48  ;;  %v16377_v39 = vpop.f32.mrb[16].mxu0 }
 0x3f0   : > { %v10761_v24 = vadd.f32 %v10729_v12, %v10565_v47  ;;  %v9554_v57 = vmul.f32 %v9432_v6, %v16212_v58  ;;  %v9750_v33 = vmul.f32 %v9628_v15, %v16233_v61  ;;  %v9946_v55 = vmul.f32 %v9824_v42, %v16286_v62  ;;  %20110 = vst [vmem:[#allocation13_spill] sm:$0xff] %v16377_v39  ;;  %v16381_v6 = vpop.f32.mrb[16].mxu1 }
 0x3f1   : > { %v9783_v49 = vadd.f32 %v9751_v19, %v9587_v41  ;;  %v9390_v25 = vadd.f32 %v9358_v36, %v9194_v34  ;;  %v10020_v40 = vrot.slane %v6056_v8, %v20073_v29  ;;  %v10216_v38 = vrot.slane %v6056_v8, %v20074_v60  ;;  %20111 = vst [vmem:[#allocation14_spill] sm:$0xff] %v16381_v6  ;;  %v16387_v36 = vpop.permute.xlu1 %11186 }
 0x3f2   : > { %v10412_v5 = vrot.slane %v6056_v8, %v20075_v59  ;;  %v10608_v23 = vrot.slane %v6056_v8, %v20076_v46  ;;  %v9244_v9 = vrot.slane %v16337_v2, %v20069_v44  ;;  %v9440_v12 = vrot.slane %v16337_v2, %v20070_v27  ;;  %20112 = vst [vmem:[#allocation70_spill] sm:$0xff] %v16387_v36 }
 0x3f3   : > { %v9979_v52 = vadd.f32 %v9947_v22, %v9783_v49  ;;  %v9586_v47 = vadd.f32 %v9554_v57, %v9390_v25  ;;  %v10142_v34 = vmul.f32 %v10020_v40, %v16261_v7  ;;  %v10338_v19 = vmul.f32 %v10216_v38, %v16284_v28 }
 0x3f4   : > { %v10534_v15 = vmul.f32 %v10412_v5, %v16315_v56  ;;  %v10730_v8 = vmul.f32 %v10608_v23, %v16313_v13  ;;  %v9360_v42 = vmul.f32 %v9244_v9, %v16263_v48  ;;  %v9556_v41 = vmul.f32 %v9440_v12, %v16212_v58 }
 0x3f5   : > { %v10175_v0 = vadd.f32 %v10143_v54, %v9979_v52  ;;  %v9782_v39 = vadd.f32 %v9750_v33, %v9586_v47  ;;  %v9636_v25 = vrot.slane %v16337_v2, %v20071_v31  ;;  %v9832_v40 = vrot.slane %v16337_v2, %v20072_v30  ;;  %v16404_v47 = vpop.permute.xlu0 %10990 }
 0x3f6   : > { %v9392_v38 = vadd.f32 %v9360_v42, %v9196_v26  ;;  %v10028_v22 = vrot.slane %v16337_v2, %v20073_v29  ;;  %v10224_v57 = vrot.slane %v16337_v2, %v20074_v60  ;;  %v10420_v49 = vrot.slane %v16337_v2, %v20075_v59  ;;  %20113 = vst [vmem:[#allocation11_spill] sm:$0xff] %v16404_v47 }
 0x3f7   : > { %v10371_v5 = vadd.f32 %v10339_v43, %v10175_v0  ;;  %v9978_v23 = vadd.f32 %v9946_v55, %v9782_v39  ;;  %v9752_v54 = vmul.f32 %v9636_v25, %v16233_v61  ;;  %v9948_v33 = vmul.f32 %v9832_v40, %v16286_v62  ;;  %v16416_v25 = vpop.permute.xlu1 %11382 }
 0x3f8   : > { %v9588_v9 = vadd.f32 %v9556_v41, %v9392_v38  ;;  %v10144_v12 = vmul.f32 %v10028_v22, %v16261_v7  ;;  %v10340_v26 = vmul.f32 %v10224_v57, %v16284_v28  ;;  %v10536_v52 = vmul.f32 %v10420_v49, %v16315_v56  ;;  %20114 = vst [vmem:[#allocation18_spill] sm:$0xff] %v16416_v25 }
 0x3f9   : > { %v10567_v42 = vadd.f32 %v10535_v3, %v10371_v5  ;;  %v10174_v6 = vadd.f32 %v10142_v34, %v9978_v23  ;;  %v10616_v58 = vrot.slane %v16337_v2, %v20076_v46  ;;  %v10800_v0 = vrot.slane %v16339_v1, %v20069_v44  ;;  %v16423_v5 = vpop.f32.mrb[17].mxu0 }
 0x3fa   : > { %v9784_v43 = vadd.f32 %v9752_v54, %v9588_v9  ;;  %v10996_v55 = vrot.slane %v16339_v1, %v20070_v27  ;;  %v11192_v39 = vrot.slane %v16339_v1, %v20071_v31  ;;  %v11388_v41 = vrot.slane %v16339_v1, %v20072_v30  ;;  %20115 = vst [vmem:[#allocation69_spill] sm:$0xff] %v16423_v5 }
 0x3fb   : > { %v10763_v3 = vadd.f32 %v10731_v63, %v10567_v42  ;;  %v10370_v34 = vadd.f32 %v10338_v19, %v10174_v6  ;;  %v10732_v40 = vmul.f32 %v10616_v58, %v16313_v13  ;;  %v10925_v2 = vmul.f32 %v10800_v0, %v16361_v53 }
 0x3fc   : > { %v9980_v38 = vadd.f32 %v9948_v33, %v9784_v43  ;;  %v11121_v22 = vmul.f32 %v10996_v55, %v16404_v47  ;;  %v11317_v57 = vmul.f32 %v11192_v39, %v16387_v36  ;;  %v11513_v49 = vmul.f32 %v11388_v41, %v16416_v25  ;;  %v16441_v55 = vpop.permute.xlu0 %11578 }
 0x3fd   : > { %v10566_v23 = vadd.f32 %v10534_v15, %v10370_v34  ;;  %v10957_v54 = vadd.f32 %v10925_v2, %v10761_v24  ;;  %v12172_v6 = vrot.slane %v16339_v1, %v20076_v46  ;;  %v16434_v33 = vmax.f32 %v16331_v4, 0.0  ;;  %v20118_v15 = vld [vmem:[#allocation58_spill] sm:$0xff]  ;;  %20119 = vst [vmem:[#allocation15_spill] sm:$0xff] %v16441_v55 }
 0x3fe   : > { %v10176_v58 = vadd.f32 %v10144_v12, %v9980_v38  ;;  %v16437_v24 = vmax.f32 %v16335_v10, 0.0  ;;  %v5962_v43 = vadd.f32 %v20106_v20, %v20118_v15 }
 0x3ff   : > { %20116 = vst [vmem:[#allocation12_spill] sm:$0xff] %v16434_v33  ;;  %v10762_v42 = vadd.f32 %v10730_v8, %v10566_v23  ;;  %v11153_v0 = vadd.f32 %v11121_v22, %v10957_v54  ;;  %v10808_v39 = vrot.slane %v16434_v33, %v20069_v44  ;;  %v11004_v41 = vrot.slane %v16434_v33, %v20070_v27  ;;  %v16449_v8 = vpop.f32.mrb[17].mxu1 }
 0x400   : > { %20117 = vst [vmem:[#allocation19_spill] sm:$0xff] %v16437_v24  ;;  %v10372_v12 = vadd.f32 %v10340_v26, %v10176_v58  ;;  %v11200_v4 = vrot.slane %v16434_v33, %v20071_v31  ;;  %20120 = vst [vmem:[#allocation72_spill] sm:$0xff] %v16449_v8  ;;  %v11396_v10 = vrot.slane %v16434_v33, %v20072_v30  ;;  %v16489_v2 = vmax.f32 %v5962_v43, 0.0 }
 0x401   : > { %v11349_v34 = vadd.f32 %v11317_v57, %v11153_v0  ;;  %v10927_v22 = vmul.f32 %v10808_v39, %v16361_v53  ;;  %v11123_v23 = vmul.f32 %v11004_v41, %v16404_v47  ;;  %v12180_v15 = vrot.slane %v16434_v33, %v20076_v46 }
 0x402   : > { %v10568_v38 = vadd.f32 %v10536_v52, %v10372_v12  ;;  %v11319_v54 = vmul.f32 %v11200_v4, %v16387_v36  ;;  %v11515_v57 = vmul.f32 %v11396_v10, %v16416_v25  ;;  %v10804_v52 = vrot.slane %v16437_v24, %v20069_v44  ;;  %20123 = vst [vmem:[#allocation28_spill] sm:$0xff] %v16489_v2  ;;  %v16491_v4 = vpop.f32.mrb[18].mxu0 }
 0x403   : > { %v16460_v58 = vadd.f32 %v11513_v49, %v11349_v34  ;;  %v10959_v63 = vadd.f32 %v10927_v22, %v10763_v3  ;;  %v11000_v12 = vrot.slane %v16437_v24, %v20070_v27  ;;  %v11196_v49 = vrot.slane %v16437_v24, %v20071_v31  ;;  %20124 = vst [vmem:[#allocation73_spill] sm:$0xff] %v16491_v4 }
 0x404   : > { %v10764_v19 = vadd.f32 %v10732_v40, %v10568_v38  ;;  %v11392_v39 = vrot.slane %v16437_v24, %v20072_v30  ;;  %v16479_v40 = vpop.permute.xlu0 %12166  ;;  %v10926_v34 = vmul.f32 %v10804_v52, %v16361_v53  ;;  %v12176_v26 = vrot.slane %v16437_v24, %v20076_v46 }
 0x405   : > { %20121 = vst [vmem:[#allocation23_spill] sm:$0xff] %v16460_v58  ;;  %20122 = vst [vmem:[#allocation20_spill] sm:$0xff] %v16479_v40  ;;  %v11155_v3 = vadd.f32 %v11123_v23, %v10959_v63  ;;  %v11122_v10 = vmul.f32 %v11000_v12, %v16404_v47  ;;  %v11318_v22 = vmul.f32 %v11196_v49, %v16387_v36 }
 0x406   : > { %v11514_v0 = vmul.f32 %v11392_v39, %v16416_v25  ;;  %v10958_v63 = vadd.f32 %v10926_v34, %v10762_v42  ;;  %v16494_v23 = vmul.f32 %v12172_v6, %v16479_v40  ;;  %v16497_v52 = vmul.f32 %v12180_v15, %v16479_v40  ;;  %v20131_v6 = vld [vmem:[#allocation52_spill] sm:$0xff] }
 0x407   : > { %v11351_v41 = vadd.f32 %v11319_v54, %v11155_v3  ;;  %v10812_v12 = vrot.slane %v16489_v2, %v20069_v44  ;;  %v11008_v49 = vrot.slane %v16489_v2, %v20070_v27  ;;  %v11204_v43 = vrot.slane %v16489_v2, %v20071_v31 }
 0x408   : > { %20125 = vst [vmem:[#allocation79_spill] sm:$0xff] %v16494_v23  ;;  %20126 = vst [vmem:[#allocation29_spill] sm:$0xff] %v16497_v52  ;;  %v11400_v39 = vrot.slane %v16489_v2, %v20072_v30  ;;  %v11154_v42 = vadd.f32 %v11122_v10, %v10958_v63  ;;  %v16522_v10 = vmul.f32 %v12176_v26, %v16479_v40  ;;  %v16524_v63 = vpop.f32.mrb[18].mxu1 }
 0x409   : > { %v16507_v54 = vadd.f32 %v11515_v57, %v11351_v41  ;;  %v10928_v3 = vmul.f32 %v10812_v12, %v16361_v53  ;;  %v11124_v34 = vmul.f32 %v11008_v49, %v16404_v47  ;;  %v11320_v38 = vmul.f32 %v11204_v43, %v16387_v36  ;;  %20129 = vst [vmem:[#allocation78_spill] sm:$0xff] %v16524_v63  ;;  %v20130_v12 = vld [vmem:[#allocation35_spill] sm:$0xff] }
 0x40a   : > { %v11516_v9 = vmul.f32 %v11400_v39, %v16416_v25  ;;  %v11350_v52 = vadd.f32 %v11318_v22, %v11154_v42  ;;  %v12184_v41 = vrot.slane %v16489_v2, %v20076_v46  ;;  %20128 = vst [vmem:[#allocation26_spill] sm:$0xff] %v16522_v10  ;;  %v5867_v49 = vadd.f32 %v20130_v12, %v16132_v32  ;;  %v20132_v39 = vld [vmem:[#allocation50_spill] sm:$0xff]  ;;  %v20135_v10 = vld [vmem:[#allocation64_spill] sm:$0xff] }
 0x40b   : > { %20127 = vst [vmem:[#allocation75_spill] sm:$0xff] %v16507_v54  ;;  %v10960_v15 = vadd.f32 %v10928_v3, %v10764_v19  ;;  %v5869_v43 = vadd.f32 %v20130_v12, %v20131_v6  ;;  %v5868_v22 = vadd.f32 %v20130_v12, %v20132_v39  ;;  %v5870_v26 = vadd.f32 %v20130_v12, %v16165_v14 }
 0x40c   : > { %v16532_v42 = vadd.f32 %v11514_v0, %v11350_v52  ;;  %v16535_v57 = vmul.f32 %v12184_v41, %v16479_v40  ;;  %v5899_v19 = vadd.f32 %v16027_v11, %v20135_v10  ;;  %v5995_v23 = vmax.f32 %v5867_v49, 0.0  ;;  %v20136_v0 = vld [vmem:[#allocation65_spill] sm:$0xff] }
 0x40d   : > { %v11156_v3 = vadd.f32 %v11124_v34, %v10960_v15  ;;  %v5997_v32 = vmax.f32 %v5869_v43, 0.0  ;;  %v16541_v54 = vmax.f32 %v5868_v22, 0.0  ;;  %v16543_v6 = vmax.f32 %v5870_v26, 0.0  ;;  %v20137_v41 = vld [vmem:[#allocation41_spill] sm:$0xff] }
 0x40e   : > { %20133 = vst [vmem:[#allocation31_spill] sm:$0xff] %v16532_v42  ;;  %20134 = vst [vmem:[#allocation30_spill] sm:$0xff] %v16535_v57  ;;  %v16545_v58 = vmax.f32 %v5899_v19, 0.0  ;;  %v16549_v52 = vadd.f32 %v16027_v11, %v20136_v0  ;;  %v16553_v39 = vadd.f32 %v16027_v11, %v20137_v41  ;;  %v6144_v10 = vrot.slane %v5995_v23, %v20069_v44  ;;  %v20140_v57 = vld [vmem:[#allocation32_spill] sm:$0xff] }
 0x40f   : > { %v11352_v14 = vadd.f32 %v11320_v38, %v11156_v3  ;;  %v6308_v15 = vrot.slane %v5995_v23, %v20070_v27  ;;  %v6504_v34 = vrot.slane %v5995_v23, %v20071_v31  ;;  %v6700_v49 = vrot.slane %v5995_v23, %v20072_v30  ;;  %v20139_v3 = vld [vmem:[#allocation49_spill] sm:$0xff] }
 0x410   : > { %v6896_v43 = vrot.slane %v5995_v23, %v20073_v29  ;;  %v7092_v22 = vrot.slane %v5995_v23, %v20074_v60  ;;  %v7288_v26 = vrot.slane %v5995_v23, %v20075_v59  ;;  %v6257_v0 = vmul.f32 %v6144_v10, %v16021_v17 }
 0x411   : > { %v16562_v19 = vadd.f32 %v11516_v9, %v11352_v14  ;;  %v6421_v38 = vmul.f32 %v6308_v15, %v16035_v35  ;;  %v6617_v41 = vmul.f32 %v6504_v34, %v20139_v3  ;;  %v6813_v42 = vmul.f32 %v6700_v49, %v20140_v57 }
 0x412   : > { %v7009_v2 = vmul.f32 %v6896_v43, %v16039_v18  ;;  %v7205_v33 = vmul.f32 %v7092_v22, %v16029_v50  ;;  %v7401_v24 = vmul.f32 %v7288_v26, %v16033_v51  ;;  %v7484_v63 = vrot.slane %v5995_v23, %v20076_v46  ;;  %v16578_v43 = vpop.f32.mrb[19].mxu0 }
 0x413   : > { %20138 = vst [vmem:[#allocation60_spill] sm:$0xff] %v16562_v19  ;;  %v6453_v1 = vadd.f32 %v6421_v38, %v6257_v0  ;;  %v6152_v9 = vrot.slane %v5997_v32, %v20069_v44  ;;  %v6316_v14 = vrot.slane %v5997_v32, %v20070_v27  ;;  %v6512_v10 = vrot.slane %v5997_v32, %v20071_v31  ;;  %v20142_v19 = vld [vmem:[#allocation24_spill] sm:$0xff] }
 0x414   : > { %v6708_v15 = vrot.slane %v5997_v32, %v20072_v30  ;;  %v6904_v34 = vrot.slane %v5997_v32, %v20073_v29  ;;  %v7100_v49 = vrot.slane %v5997_v32, %v20074_v60  ;;  %20141 = vst [vmem:[#allocation76_spill] sm:$0xff] %v16578_v43  ;;  %v7597_v26 = vmul.f32 %v7484_v63, %v20142_v19 }
 0x415   : > { %v6649_v22 = vadd.f32 %v6617_v41, %v6453_v1  ;;  %v6259_v0 = vmul.f32 %v6152_v9, %v16021_v17  ;;  %v6423_v23 = vmul.f32 %v6316_v14, %v16035_v35  ;;  %v6619_v38 = vmul.f32 %v6512_v10, %v20139_v3  ;;  %v16597_v10 = vpop.f32.mrb[19].mxu1 }
 0x416   : > { %v6815_v4 = vmul.f32 %v6708_v15, %v20140_v57  ;;  %v7011_v8 = vmul.f32 %v6904_v34, %v16039_v18  ;;  %v7207_v5 = vmul.f32 %v7100_v49, %v16029_v50  ;;  %v7296_v55 = vrot.slane %v5997_v32, %v20075_v59  ;;  %20143 = vst [vmem:[#allocation61_spill] sm:$0xff] %v16597_v10 }
 0x417   : > { %v6845_v12 = vadd.f32 %v6813_v42, %v6649_v22  ;;  %v6455_v40 = vadd.f32 %v6423_v23, %v6259_v0  ;;  %v7492_v1 = vrot.slane %v5997_v32, %v20076_v46  ;;  %v6148_v63 = vrot.slane %v16541_v54, %v20069_v44 }
 0x418   : > { %v6312_v41 = vrot.slane %v16541_v54, %v20070_v27  ;;  %v6508_v9 = vrot.slane %v16541_v54, %v20071_v31  ;;  %v6704_v14 = vrot.slane %v16541_v54, %v20072_v30  ;;  %v7403_v34 = vmul.f32 %v7296_v55, %v16033_v51 }
 0x419   : > { %v7041_v42 = vadd.f32 %v7009_v2, %v6845_v12  ;;  %v6651_v15 = vadd.f32 %v6619_v38, %v6455_v40  ;;  %v7599_v32 = vmul.f32 %v7492_v1, %v20142_v19  ;;  %v6258_v49 = vmul.f32 %v6148_v63, %v16021_v17 }
 0x41a   : > { %v6422_v22 = vmul.f32 %v6312_v41, %v16035_v35  ;;  %v6618_v0 = vmul.f32 %v6508_v9, %v20139_v3  ;;  %v6814_v23 = vmul.f32 %v6704_v14, %v20140_v57  ;;  %v6900_v36 = vrot.slane %v16541_v54, %v20073_v29 }
 0x41b   : > { %v7237_v43 = vadd.f32 %v7205_v33, %v7041_v42  ;;  %v6847_v25 = vadd.f32 %v6815_v4, %v6651_v15  ;;  %v7096_v2 = vrot.slane %v16541_v54, %v20074_v60  ;;  %v7292_v55 = vrot.slane %v16541_v54, %v20075_v59 }
 0x41c   : > { %v6454_v40 = vadd.f32 %v6422_v22, %v6258_v49  ;;  %v7488_v12 = vrot.slane %v16541_v54, %v20076_v46  ;;  %v6156_v38 = vrot.slane %v16543_v6, %v20069_v44  ;;  %v7010_v33 = vmul.f32 %v6900_v36, %v16039_v18 }
 0x41d   : > { %v7433_v1 = vadd.f32 %v7401_v24, %v7237_v43  ;;  %v7043_v63 = vadd.f32 %v7011_v8, %v6847_v25  ;;  %v7206_v4 = vmul.f32 %v7096_v2, %v16029_v50  ;;  %v7402_v9 = vmul.f32 %v7292_v55, %v16033_v51 }
 0x41e   : > { %v6650_v41 = vadd.f32 %v6618_v0, %v6454_v40  ;;  %v7598_v14 = vmul.f32 %v7488_v12, %v20142_v19  ;;  %v6260_v42 = vmul.f32 %v6156_v38, %v16021_v17  ;;  %v6320_v54 = vrot.slane %v16543_v6, %v20070_v27 }
 0x41f   : > { %v7629_v15 = vadd.f32 %v7597_v26, %v7433_v1  ;;  %v7239_v49 = vadd.f32 %v7207_v5, %v7043_v63  ;;  %v6516_v24 = vrot.slane %v16543_v6, %v20071_v31  ;;  %v6712_v36 = vrot.slane %v16543_v6, %v20072_v30  ;;  %v16640_v63 = vpop.f32.mrb[20].mxu0 }
 0x420   : > { %v6846_v25 = vadd.f32 %v6814_v23, %v6650_v41  ;;  %v6908_v8 = vrot.slane %v16543_v6, %v20073_v29  ;;  %v7104_v43 = vrot.slane %v16543_v6, %v20074_v60  ;;  %v6424_v26 = vmul.f32 %v6320_v54, %v16035_v35  ;;  %20144 = vst [vmem:[#allocation62_spill] sm:$0xff] %v16640_v63 }
 0x421   : > { %v7435_v22 = vadd.f32 %v7403_v34, %v7239_v49  ;;  %v6620_v5 = vmul.f32 %v6516_v24, %v20139_v3  ;;  %v7300_v0 = vrot.slane %v16543_v6, %v20075_v59  ;;  %v6816_v23 = vmul.f32 %v6712_v36, %v20140_v57  ;;  %v16648_v24 = vpop.f32.mrb[20].mxu1  ;;  %v20146_v36 = vld [vmem:[#allocation22_spill] sm:$0xff] }
 0x422   : > { %v7042_v2 = vadd.f32 %v7010_v33, %v6846_v25  ;;  %v7012_v40 = vmul.f32 %v6908_v8, %v16039_v18  ;;  %v7208_v55 = vmul.f32 %v7104_v43, %v16029_v50  ;;  %v6456_v38 = vadd.f32 %v6424_v26, %v6260_v42  ;;  %20145 = vst [vmem:[#allocation77_spill] sm:$0xff] %v16648_v24  ;;  %v20147_v43 = vld [vmem:[#allocation59_spill] sm:$0xff] }
 0x423   : > { %v7631_v12 = vadd.f32 %v7599_v32, %v7435_v22  ;;  %v7404_v1 = vmul.f32 %v7300_v0, %v16033_v51  ;;  %v7496_v34 = vrot.slane %v16543_v6, %v20076_v46  ;;  %v7680_v49 = vrot.slane %v16545_v58, %v20069_v44 }
 0x424   : > { %v7238_v41 = vadd.f32 %v7206_v4, %v7042_v2  ;;  %v7876_v33 = vrot.slane %v16545_v58, %v20070_v27  ;;  %v8072_v54 = vrot.slane %v16545_v58, %v20071_v31  ;;  %v6652_v32 = vadd.f32 %v6620_v5, %v6456_v38 }
 0x425   : > { %v7600_v42 = vmul.f32 %v7496_v34, %v20142_v19  ;;  %v8268_v6 = vrot.slane %v16545_v58, %v20072_v30  ;;  %v8464_v4 = vrot.slane %v16545_v58, %v20073_v29  ;;  %v7793_v8 = vmul.f32 %v7680_v49, %v20146_v36 }
 0x426   : > { %v7434_v25 = vadd.f32 %v7402_v9, %v7238_v41  ;;  %v7989_v22 = vmul.f32 %v7876_v33, %v20147_v43  ;;  %v8185_v26 = vmul.f32 %v8072_v54, %v16175_v45  ;;  %v6848_v0 = vadd.f32 %v6816_v23, %v6652_v32  ;;  %v20148_v32 = vld [vmem:[#allocation51_spill] sm:$0xff] }
 0x427   : > { %v8381_v2 = vmul.f32 %v8268_v6, %v16079_v16  ;;  %v8577_v5 = vmul.f32 %v8464_v4, %v16119_v21  ;;  %v8660_v38 = vrot.slane %v16545_v58, %v20074_v60  ;;  %v7825_v24 = vadd.f32 %v7793_v8, %v7629_v15  ;;  %v20149_v4 = vld [vmem:[#allocation42_spill] sm:$0xff] }
 0x428   : > { %v7630_v34 = vadd.f32 %v7598_v14, %v7434_v25  ;;  %v8856_v63 = vrot.slane %v16545_v58, %v20075_v59  ;;  %v9052_v9 = vrot.slane %v16545_v58, %v20076_v46  ;;  %v7044_v41 = vadd.f32 %v7012_v40, %v6848_v0  ;;  %v20150_v14 = vld [vmem:[#allocation53_spill] sm:$0xff] }
 0x429   : > { %v8773_v49 = vmul.f32 %v8660_v38, %v16199_v37  ;;  %v6029_v23 = vmax.f32 %v16549_v52, 0.0  ;;  %v6028_v33 = vmax.f32 %v16553_v39, 0.0  ;;  %v8021_v54 = vadd.f32 %v7989_v22, %v7825_v24 }
 0x42a   : > { %v8969_v6 = vmul.f32 %v8856_v63, %v20148_v32  ;;  %v9165_v10 = vmul.f32 %v9052_v9, %v20149_v4  ;;  %v5902_v15 = vadd.f32 %v16027_v11, %v20150_v14  ;;  %v7240_v25 = vadd.f32 %v7208_v55, %v7044_v41  ;;  %v16679_v63 = vpop.f32.mrb[21].mxu0 }
 0x42b   : > { %v7688_v8 = vrot.slane %v6029_v23, %v20069_v44  ;;  %v7884_v58 = vrot.slane %v6029_v23, %v20070_v27  ;;  %v8080_v40 = vrot.slane %v6029_v23, %v20071_v31  ;;  %v8217_v0 = vadd.f32 %v8185_v26, %v8021_v54  ;;  %20151 = vst [vmem:[#allocation63_spill] sm:$0xff] %v16679_v63 }
 0x42c   : > { %v8276_v52 = vrot.slane %v6029_v23, %v20072_v30  ;;  %v8472_v39 = vrot.slane %v6029_v23, %v20073_v29  ;;  %v8668_v24 = vrot.slane %v6029_v23, %v20074_v60  ;;  %v7436_v22 = vadd.f32 %v7404_v1, %v7240_v25 }
 0x42d   : > { %v7795_v38 = vmul.f32 %v7688_v8, %v20146_v36  ;;  %v7991_v55 = vmul.f32 %v7884_v58, %v20147_v43  ;;  %v8187_v9 = vmul.f32 %v8080_v40, %v16175_v45  ;;  %v8413_v41 = vadd.f32 %v8381_v2, %v8217_v0  ;;  %v16692_v2 = vpop.f32.mrb[21].mxu1 }
 0x42e   : > { %v8383_v14 = vmul.f32 %v8276_v52, %v16079_v16  ;;  %v8579_v26 = vmul.f32 %v8472_v39, %v16119_v21  ;;  %v8775_v54 = vmul.f32 %v8668_v24, %v16199_v37  ;;  %v7632_v11 = vadd.f32 %v7600_v42, %v7436_v22  ;;  %20152 = vst [vmem:[#allocation36_spill] sm:$0xff] %v16692_v2 }
 0x42f   : > { %v7827_v19 = vadd.f32 %v7795_v38, %v7631_v12  ;;  %v8864_v51 = vrot.slane %v6029_v23, %v20075_v59  ;;  %v9060_v63 = vrot.slane %v6029_v23, %v20076_v46  ;;  %v8609_v1 = vadd.f32 %v8577_v5, %v8413_v41 }
 0x430   : > { %v7684_v25 = vrot.slane %v6028_v33, %v20069_v44  ;;  %v7880_v8 = vrot.slane %v6028_v33, %v20070_v27  ;;  %v8076_v58 = vrot.slane %v6028_v33, %v20071_v31  ;;  %v8272_v12 = vrot.slane %v6028_v33, %v20072_v30 }
 0x431   : > { %v8023_v40 = vadd.f32 %v7991_v55, %v7827_v19  ;;  %v8971_v0 = vmul.f32 %v8864_v51, %v20148_v32  ;;  %v9167_v52 = vmul.f32 %v9060_v63, %v20149_v4  ;;  %v8805_v42 = vadd.f32 %v8773_v49, %v8609_v1 }
 0x432   : > { %v7794_v39 = vmul.f32 %v7684_v25, %v20146_v36  ;;  %v7990_v5 = vmul.f32 %v7880_v8, %v20147_v43  ;;  %v8186_v23 = vmul.f32 %v8076_v58, %v16175_v45  ;;  %v8382_v22 = vmul.f32 %v8272_v12, %v16079_v16 }
 0x433   : > { %v8219_v24 = vadd.f32 %v8187_v9, %v8023_v40  ;;  %v8468_v38 = vrot.slane %v6028_v33, %v20073_v29  ;;  %v8664_v19 = vrot.slane %v6028_v33, %v20074_v60  ;;  %v9001_v55 = vadd.f32 %v8969_v6, %v8805_v42 }
 0x434   : > { %v7826_v51 = vadd.f32 %v7794_v39, %v7630_v34  ;;  %v8860_v63 = vrot.slane %v6028_v33, %v20075_v59  ;;  %v9056_v41 = vrot.slane %v6028_v33, %v20076_v46  ;;  %v6030_v8 = vmax.f32 %v5902_v15, 0.0 }
 0x435   : > { %v8415_v49 = vadd.f32 %v8383_v14, %v8219_v24  ;;  %v8578_v1 = vmul.f32 %v8468_v38, %v16119_v21  ;;  %v8774_v25 = vmul.f32 %v8664_v19, %v16199_v37  ;;  %v9197_v58 = vadd.f32 %v9165_v10, %v9001_v55  ;;  %v16718_v38 = vpop.f32.mrb[22].mxu0 }
 0x436   : > { %v8022_v9 = vadd.f32 %v7990_v5, %v7826_v51  ;;  %v8970_v40 = vmul.f32 %v8860_v63, %v20148_v32  ;;  %v9166_v12 = vmul.f32 %v9056_v41, %v20149_v4  ;;  %v7692_v6 = vrot.slane %v6030_v8, %v20069_v44  ;;  %20153 = vst [vmem:[#allocation6_spill] sm:$0xff] %v16718_v38 }
 0x437   : > { %v8611_v2 = vadd.f32 %v8579_v26, %v8415_v49  ;;  %v7888_v34 = vrot.slane %v6030_v8, %v20070_v27  ;;  %v8084_v42 = vrot.slane %v6030_v8, %v20071_v31  ;;  %v8280_v14 = vrot.slane %v6030_v8, %v20072_v30 }
 0x438   : > { %v8218_v33 = vadd.f32 %v8186_v23, %v8022_v9  ;;  %v8476_v39 = vrot.slane %v6030_v8, %v20073_v29  ;;  %v8672_v15 = vrot.slane %v6030_v8, %v20074_v60  ;;  %v7796_v5 = vmul.f32 %v7692_v6, %v20146_v36  ;;  %v20154_v9 = vld [vmem:[#allocation66_spill] sm:$0xff]  ;;  %v20155_v6 = vld [vmem:[#allocation27_spill] sm:$0xff] }
 0x439   : > { %v8807_v10 = vadd.f32 %v8775_v54, %v8611_v2  ;;  %v7992_v24 = vmul.f32 %v7888_v34, %v20147_v43  ;;  %v8188_v26 = vmul.f32 %v8084_v42, %v16175_v45  ;;  %v8384_v55 = vmul.f32 %v8280_v14, %v16079_v16  ;;  %v20156_v42 = vld [vmem:[#allocation55_spill] sm:$0xff] }
 0x43a   : > { %v8414_v19 = vadd.f32 %v8382_v22, %v8218_v33  ;;  %v8580_v23 = vmul.f32 %v8476_v39, %v16119_v21  ;;  %v8776_v51 = vmul.f32 %v8672_v15, %v16199_v37  ;;  %v7828_v41 = vadd.f32 %v7796_v5, %v7632_v11  ;;  %v20157_v22 = vld [vmem:[#allocation80_spill] sm:$0xff] }
 0x43b   : > { %v9003_v63 = vadd.f32 %v8971_v0, %v8807_v10  ;;  %v8868_v49 = vrot.slane %v6030_v8, %v20075_v59  ;;  %v9064_v54 = vrot.slane %v6030_v8, %v20076_v46  ;;  %v5931_v34 = vadd.f32 %v20155_v6, %v20154_v9 }
 0x43c   : > { %v8610_v2 = vadd.f32 %v8578_v1, %v8414_v19  ;;  %v5933_v38 = vadd.f32 %v20155_v6, %v20156_v42  ;;  %v5932_v33 = vadd.f32 %v20155_v6, %v20157_v22  ;;  %v8024_v39 = vadd.f32 %v7992_v24, %v7828_v41  ;;  %v20158_v19 = vld [vmem:[#allocation46_spill] sm:$0xff] }
 0x43d   : > { %v9199_v14 = vadd.f32 %v9167_v52, %v9003_v63  ;;  %v8972_v15 = vmul.f32 %v8868_v49, %v20148_v32  ;;  %v9168_v11 = vmul.f32 %v9064_v54, %v20149_v4  ;;  %v6059_v10 = vmax.f32 %v5931_v34, 0.0  ;;  %v20159_v42 = vld [vmem:[#allocation54_spill] sm:$0xff]  ;;  %v20160_v52 = vld [vmem:[#allocation47_spill] sm:$0xff]  ;;  %v16747_v63 = vpop.f32.mrb[22].mxu1 }
 0x43e   : > { %v8806_v0 = vadd.f32 %v8774_v25, %v8610_v2  ;;  %v6061_v5 = vmax.f32 %v5933_v38, 0.0  ;;  %v16733_v8 = vmax.f32 %v5932_v33, 0.0  ;;  %v8220_v1 = vadd.f32 %v8188_v26, %v8024_v39  ;;  %20161 = vst [vmem:[#allocation4_spill] sm:$0xff] %v16747_v63  ;;  %v20162_v39 = vld [vmem:[#allocation43_spill] sm:$0xff] }
 0x43f   : > { %v16737_v9 = vadd.f32 %v20155_v6, %v20158_v19  ;;  %v16741_v37 = vadd.f32 %v20106_v20, %v20159_v42  ;;  %v16745_v24 = vadd.f32 %v20106_v20, %v20160_v52  ;;  %v9248_v38 = vrot.slane %v6059_v10, %v20069_v44 }
 0x440   : > { %v9002_v25 = vadd.f32 %v8970_v40, %v8806_v0  ;;  %v9444_v41 = vrot.slane %v6059_v10, %v20070_v27  ;;  %v9640_v26 = vrot.slane %v6059_v10, %v20071_v31  ;;  %v8416_v49 = vadd.f32 %v8384_v55, %v8220_v1 }
 0x441   : > { %v9836_v54 = vrot.slane %v6059_v10, %v20072_v30  ;;  %v10032_v2 = vrot.slane %v6059_v10, %v20073_v29  ;;  %v10228_v34 = vrot.slane %v6059_v10, %v20074_v60  ;;  %v9361_v33 = vmul.f32 %v9248_v38, %v16263_v48 }
 0x442   : > { %v9198_v22 = vadd.f32 %v9166_v12, %v9002_v25  ;;  %v9557_v19 = vmul.f32 %v9444_v41, %v20162_v39  ;;  %v9753_v40 = vmul.f32 %v9640_v26, %v16233_v61  ;;  %v8612_v0 = vadd.f32 %v8580_v23, %v8416_v49  ;;  %v16767_v26 = vpop.f32.mrb[23].mxu0 }
 0x443   : > { %v9949_v42 = vmul.f32 %v9836_v54, %v16286_v62  ;;  %v10145_v52 = vmul.f32 %v10032_v2, %v16261_v7  ;;  %v10341_v55 = vmul.f32 %v10228_v34, %v16284_v28  ;;  %v9393_v1 = vadd.f32 %v9361_v33, %v9197_v58  ;;  %20163 = vst [vmem:[#allocation5_spill] sm:$0xff] %v16767_v26 }
 0x444   : > { %v10424_v63 = vrot.slane %v6059_v10, %v20075_v59  ;;  %v10620_v6 = vrot.slane %v6059_v10, %v20076_v46  ;;  %v9256_v12 = vrot.slane %v6061_v5, %v20069_v44  ;;  %v8808_v25 = vadd.f32 %v8776_v51, %v8612_v0 }
 0x445   : > { %v9452_v38 = vrot.slane %v6061_v5, %v20070_v27  ;;  %v9648_v41 = vrot.slane %v6061_v5, %v20071_v31  ;;  %v9844_v23 = vrot.slane %v6061_v5, %v20072_v30  ;;  %v9589_v49 = vadd.f32 %v9557_v19, %v9393_v1 }
 0x446   : > { %v10537_v54 = vmul.f32 %v10424_v63, %v16315_v56  ;;  %v10733_v58 = vmul.f32 %v10620_v6, %v16313_v13  ;;  %v9363_v2 = vmul.f32 %v9256_v12, %v16263_v48  ;;  %v9004_v34 = vadd.f32 %v8972_v15, %v8808_v25 }
 0x447   : > { %v9559_v10 = vmul.f32 %v9452_v38, %v20162_v39  ;;  %v9755_v51 = vmul.f32 %v9648_v41, %v16233_v61  ;;  %v9951_v33 = vmul.f32 %v9844_v23, %v16286_v62  ;;  %v9785_v0 = vadd.f32 %v9753_v40, %v9589_v49  ;;  %v16788_v23 = vpop.f32.mrb[23].mxu1 }
 0x448   : > { %v9395_v4 = vadd.f32 %v9363_v2, %v9199_v14  ;;  %v10040_v32 = vrot.slane %v6061_v5, %v20073_v29  ;;  %v10236_v26 = vrot.slane %v6061_v5, %v20074_v60  ;;  %v9200_v19 = vadd.f32 %v9168_v11, %v9004_v34  ;;  %20164 = vst [vmem:[#allocation9_spill] sm:$0xff] %v16788_v23 }
 0x449   : > { %v10432_v63 = vrot.slane %v6061_v5, %v20075_v59  ;;  %v10628_v6 = vrot.slane %v6061_v5, %v20076_v46  ;;  %v9252_v15 = vrot.slane %v16733_v8, %v20069_v44  ;;  %v9981_v1 = vadd.f32 %v9949_v42, %v9785_v0 }
 0x44a   : > { %v9591_v12 = vadd.f32 %v9559_v10, %v9395_v4  ;;  %v10147_v25 = vmul.f32 %v10040_v32, %v16261_v7  ;;  %v10343_v38 = vmul.f32 %v10236_v26, %v16284_v28  ;;  %v9448_v11 = vrot.slane %v16733_v8, %v20070_v27 }
 0x44b   : > { %v10539_v14 = vmul.f32 %v10432_v63, %v16315_v56  ;;  %v10735_v40 = vmul.f32 %v10628_v6, %v16313_v13  ;;  %v9362_v41 = vmul.f32 %v9252_v15, %v16263_v48  ;;  %v10177_v5 = vadd.f32 %v10145_v52, %v9981_v1 }
 0x44c   : > { %v9787_v49 = vadd.f32 %v9755_v51, %v9591_v12  ;;  %v9644_v4 = vrot.slane %v16733_v8, %v20071_v31  ;;  %v9840_v32 = vrot.slane %v16733_v8, %v20072_v30  ;;  %v9558_v26 = vmul.f32 %v9448_v11, %v20162_v39 }
 0x44d   : > { %v9394_v42 = vadd.f32 %v9362_v41, %v9198_v22  ;;  %v10036_v2 = vrot.slane %v16733_v8, %v20073_v29  ;;  %v10232_v34 = vrot.slane %v16733_v8, %v20074_v60  ;;  %v10373_v10 = vadd.f32 %v10341_v55, %v10177_v5 }
 0x44e   : > { %v9983_v0 = vadd.f32 %v9951_v33, %v9787_v49  ;;  %v9754_v52 = vmul.f32 %v9644_v4, %v16233_v61  ;;  %v9950_v51 = vmul.f32 %v9840_v32, %v16286_v62  ;;  %v10428_v22 = vrot.slane %v16733_v8, %v20075_v59 }
 0x44f   : > { %v9590_v63 = vadd.f32 %v9558_v26, %v9394_v42  ;;  %v10146_v6 = vmul.f32 %v10036_v2, %v16261_v7  ;;  %v10342_v15 = vmul.f32 %v10232_v34, %v16284_v28  ;;  %v10569_v1 = vadd.f32 %v10537_v54, %v10373_v10 }
 0x450   : > { %v10179_v12 = vadd.f32 %v10147_v25, %v9983_v0  ;;  %v10624_v41 = vrot.slane %v16733_v8, %v20076_v46  ;;  %v6062_v55 = vmax.f32 %v16737_v9, 0.0  ;;  %v10538_v11 = vmul.f32 %v10428_v22, %v16315_v56 }
 0x451   : > { %v9786_v33 = vadd.f32 %v9754_v52, %v9590_v63  ;;  %v6091_v5 = vmax.f32 %v16741_v37, 0.0  ;;  %v16811_v49 = vmax.f32 %v16745_v24, 0.0  ;;  %v10765_v4 = vadd.f32 %v10733_v58, %v10569_v1 }
 0x452   : > { %v10375_v32 = vadd.f32 %v10343_v38, %v10179_v12  ;;  %v10734_v42 = vmul.f32 %v10624_v41, %v16313_v13  ;;  %v9260_v54 = vrot.slane %v6062_v55, %v20069_v44  ;;  %v9456_v26 = vrot.slane %v6062_v55, %v20070_v27 }
 0x453   : > { %v9982_v25 = vadd.f32 %v9950_v51, %v9786_v33  ;;  %v9652_v8 = vrot.slane %v6062_v55, %v20071_v31  ;;  %v9848_v9 = vrot.slane %v6062_v55, %v20072_v30  ;;  %v10044_v37 = vrot.slane %v6062_v55, %v20073_v29 }
 0x454   : > { %v10571_v2 = vadd.f32 %v10539_v14, %v10375_v32  ;;  %v9364_v34 = vmul.f32 %v9260_v54, %v16263_v48  ;;  %v10240_v24 = vrot.slane %v6062_v55, %v20074_v60  ;;  %v9560_v38 = vmul.f32 %v9456_v26, %v20162_v39  ;;  %v16826_v14 = vpop.permute.xlu1 %11774 }
 0x455   : > { %v10178_v58 = vadd.f32 %v10146_v6, %v9982_v25  ;;  %v9756_v10 = vmul.f32 %v9652_v8, %v16233_v61  ;;  %v9952_v0 = vmul.f32 %v9848_v9, %v16286_v62  ;;  %v10148_v63 = vmul.f32 %v10044_v37, %v16261_v7  ;;  %20165 = vst [vmem:[#allocation7_spill] sm:$0xff] %v16826_v14  ;;  %v16837_v8 = vpop.f32.mrb[24].mxu0  ;;  %v16839_v9 = vpop.f32.mrb[24].mxu1 }
 0x456   : > { %v10767_v52 = vadd.f32 %v10735_v40, %v10571_v2  ;;  %v9396_v51 = vadd.f32 %v9364_v34, %v9200_v19  ;;  %v10344_v22 = vmul.f32 %v10240_v24, %v16284_v28  ;;  %v10436_v12 = vrot.slane %v6062_v55, %v20075_v59  ;;  %20166 = vst [vmem:[#allocation2_spill] sm:$0xff] %v16837_v8  ;;  %v20168_v34 = vld [vmem:[#allocation70_spill] sm:$0xff] }
 0x457   : > { %v10374_v1 = vadd.f32 %v10342_v15, %v10178_v58  ;;  %v10632_v41 = vrot.slane %v6062_v55, %v20076_v46  ;;  %v10816_v6 = vrot.slane %v6091_v5, %v20069_v44  ;;  %v11012_v32 = vrot.slane %v6091_v5, %v20070_v27  ;;  %20167 = vst [vmem:[#allocation3_spill] sm:$0xff] %v16839_v9  ;;  %v20169_v24 = vld [vmem:[#allocation18_spill] sm:$0xff] }
 0x458   : > { %v9592_v33 = vadd.f32 %v9560_v38, %v9396_v51  ;;  %v11208_v54 = vrot.slane %v6091_v5, %v20071_v31  ;;  %v11404_v19 = vrot.slane %v6091_v5, %v20072_v30  ;;  %v10540_v25 = vmul.f32 %v10436_v12, %v16315_v56 }
 0x459   : > { %v10570_v40 = vadd.f32 %v10538_v11, %v10374_v1  ;;  %v10736_v26 = vmul.f32 %v10632_v41, %v16313_v13  ;;  %v10929_v15 = vmul.f32 %v10816_v6, %v16361_v53  ;;  %v11125_v2 = vmul.f32 %v11012_v32, %v16404_v47  ;;  %v20175_v13 = vld [vmem:[#allocation10_spill] sm:$0xff] }
 0x45a   : > { %v9788_v55 = vadd.f32 %v9756_v10, %v9592_v33  ;;  %v11321_v37 = vmul.f32 %v11208_v54, %v20168_v34  ;;  %v11517_v58 = vmul.f32 %v11404_v19, %v20169_v24  ;;  %v11600_v51 = vrot.slane %v6091_v5, %v20073_v29  ;;  %v16852_v33 = vpop.permute.xlu1 %11970  ;;  %v20171_v54 = vld [vmem:[#allocation15_spill] sm:$0xff] }
 0x45b   : > { %v16844_v38 = vadd.f32 %v10734_v42, %v10570_v40  ;;  %v10961_v11 = vadd.f32 %v10929_v15, %v10765_v4  ;;  %v11796_v1 = vrot.slane %v6091_v5, %v20074_v60  ;;  %v11992_v41 = vrot.slane %v6091_v5, %v20075_v59  ;;  %20170 = vst [vmem:[#allocation8_spill] sm:$0xff] %v16852_v33  ;;  %v20172_v15 = vld [vmem:[#allocation20_spill] sm:$0xff] }
 0x45c   : > { %v9984_v12 = vadd.f32 %v9952_v0, %v9788_v55  ;;  %v12188_v6 = vrot.slane %v6091_v5, %v20076_v46  ;;  %v10824_v10 = vrot.slane %v16811_v49, %v20069_v44  ;;  %v11713_v19 = vmul.f32 %v11600_v51, %v20171_v54 }
 0x45d   : > { %v11157_v32 = vadd.f32 %v11125_v2, %v10961_v11  ;;  %v11909_v42 = vmul.f32 %v11796_v1, %v16826_v14  ;;  %v11020_v4 = vrot.slane %v16811_v49, %v20070_v27  ;;  %v12105_v0 = vmul.f32 %v11992_v41, %v16852_v33  ;;  %v16870_v41 = vpop.f32.mrb[25].mxu0 }
 0x45e   : > { %v10180_v40 = vadd.f32 %v10148_v63, %v9984_v12  ;;  %v12301_v55 = vmul.f32 %v12188_v6, %v20172_v15  ;;  %v10931_v5 = vmul.f32 %v10824_v10, %v16361_v53  ;;  %v11216_v2 = vrot.slane %v16811_v49, %v20071_v31  ;;  %20173 = vst [vmem:[#allocation17_spill] sm:$0xff] %v16870_v41 }
 0x45f   : > { %v11353_v9 = vadd.f32 %v11321_v37, %v11157_v32  ;;  %v11127_v8 = vmul.f32 %v11020_v4, %v16404_v47  ;;  %v11412_v11 = vrot.slane %v16811_v49, %v20072_v30  ;;  %v11608_v63 = vrot.slane %v16811_v49, %v20073_v29 }
 0x460   : > { %v10376_v51 = vadd.f32 %v10344_v22, %v10180_v40  ;;  %v10963_v1 = vadd.f32 %v10931_v5, %v10767_v52  ;;  %v11804_v12 = vrot.slane %v16811_v49, %v20074_v60  ;;  %v11323_v37 = vmul.f32 %v11216_v2, %v20168_v34 }
 0x461   : > { %v11549_v6 = vadd.f32 %v11517_v58, %v11353_v9  ;;  %v11519_v10 = vmul.f32 %v11412_v11, %v20169_v24  ;;  %v12000_v32 = vrot.slane %v16811_v49, %v20075_v59  ;;  %v11715_v52 = vmul.f32 %v11608_v63, %v20171_v54  ;;  %v20174_v9 = vld [vmem:[#allocation56_spill] sm:$0xff] }
 0x462   : > { %v10572_v4 = vadd.f32 %v10540_v25, %v10376_v51  ;;  %v11159_v23 = vadd.f32 %v11127_v8, %v10963_v1  ;;  %v11911_v22 = vmul.f32 %v11804_v12, %v16826_v14  ;;  %v12196_v41 = vrot.slane %v16811_v49, %v20076_v46  ;;  %v20176_v25 = vld [vmem:[#allocation13_spill] sm:$0xff]  ;;  %v20177_v8 = vld [vmem:[#allocation35_spill] sm:$0xff]  ;;  %v20178_v12 = vld [vmem:[#allocation14_spill] sm:$0xff] }
 0x463   : > { %v11745_v40 = vadd.f32 %v11713_v19, %v11549_v6  ;;  %v12107_v5 = vmul.f32 %v12000_v32, %v16852_v33  ;;  %v5964_v58 = vadd.f32 %v20106_v20, %v20174_v9  ;;  %v5966_v56 = vadd.f32 %v20106_v20, %v20175_v13  ;;  %v16898_v13 = vpop.f32.mrb[25].mxu1 }
 0x464   : > { %v10768_v2 = vadd.f32 %v10736_v26, %v10572_v4  ;;  %v11355_v11 = vadd.f32 %v11323_v37, %v11159_v23  ;;  %v5871_v51 = vadd.f32 %v20177_v8, %v20176_v25  ;;  %v12303_v63 = vmul.f32 %v12196_v41, %v20172_v15  ;;  %v20179_v26 = vld [vmem:[#allocation69_spill] sm:$0xff]  ;;  %20180 = vst [vmem:[#allocation58_spill] sm:$0xff] %v16898_v13 }
 0x465   : > { %v11941_v1 = vadd.f32 %v11909_v42, %v11745_v40  ;;  %v6092_v19 = vmax.f32 %v5964_v58, 0.0  ;;  %v16890_v6 = vadd.f32 %v20177_v8, %v20178_v12  ;;  %v6094_v32 = vmax.f32 %v5966_v56, 0.0 }
 0x466   : > { %v11551_v49 = vadd.f32 %v11519_v10, %v11355_v11  ;;  %v16892_v28 = vmax.f32 %v5871_v51, 0.0  ;;  %v16896_v23 = vadd.f32 %v20177_v8, %v20179_v26 }
 0x467   : > { %v12137_v37 = vadd.f32 %v12105_v0, %v11941_v1  ;;  %v10820_v42 = vrot.slane %v6092_v19, %v20069_v44  ;;  %v11016_v41 = vrot.slane %v6092_v19, %v20070_v27  ;;  %v11212_v4 = vrot.slane %v6092_v19, %v20071_v31 }
 0x468   : > { %v11747_v40 = vadd.f32 %v11715_v52, %v11551_v49  ;;  %v11408_v9 = vrot.slane %v6092_v19, %v20072_v30  ;;  %v11604_v56 = vrot.slane %v6092_v19, %v20073_v29  ;;  %v11800_v10 = vrot.slane %v6092_v19, %v20074_v60 }
 0x469   : > { %v16906_v58 = vadd.f32 %v12301_v55, %v12137_v37  ;;  %v10930_v11 = vmul.f32 %v10820_v42, %v16361_v53  ;;  %v11126_v25 = vmul.f32 %v11016_v41, %v16404_v47  ;;  %v11322_v0 = vmul.f32 %v11212_v4, %v20168_v34 }
 0x46a   : > { %v11943_v51 = vadd.f32 %v11911_v22, %v11747_v40  ;;  %v11518_v1 = vmul.f32 %v11408_v9, %v20169_v24  ;;  %v11714_v12 = vmul.f32 %v11604_v56, %v20171_v54  ;;  %v11910_v52 = vmul.f32 %v11800_v10, %v16826_v14  ;;  %v16921_v40 = vpop.f32.mrb[26].mxu0 }
 0x46b   : > { %20181 = vst [vmem:[#allocation52_spill] sm:$0xff] %v16906_v58  ;;  %v10962_v49 = vadd.f32 %v10930_v11, %v16844_v38  ;;  %v11996_v26 = vrot.slane %v6092_v19, %v20075_v59  ;;  %v12192_v55 = vrot.slane %v6092_v19, %v20076_v46  ;;  %v10828_v37 = vrot.slane %v6094_v32, %v20069_v44 }
 0x46c   : > { %v12139_v42 = vadd.f32 %v12107_v5, %v11943_v51  ;;  %v11024_v41 = vrot.slane %v6094_v32, %v20070_v27  ;;  %v11220_v4 = vrot.slane %v6094_v32, %v20071_v31  ;;  %v11416_v22 = vrot.slane %v6094_v32, %v20072_v30  ;;  %20182 = vst [vmem:[#allocation50_spill] sm:$0xff] %v16921_v40 }
 0x46d   : > { %v11158_v9 = vadd.f32 %v11126_v25, %v10962_v49  ;;  %v12106_v56 = vmul.f32 %v11996_v26, %v16852_v33  ;;  %v12302_v38 = vmul.f32 %v12192_v55, %v20172_v15  ;;  %v10932_v10 = vmul.f32 %v10828_v37, %v16361_v53 }
 0x46e   : > { %v16926_v11 = vadd.f32 %v12303_v63, %v12139_v42  ;;  %v11128_v19 = vmul.f32 %v11024_v41, %v16404_v47  ;;  %v11324_v5 = vmul.f32 %v11220_v4, %v20168_v34  ;;  %v11520_v51 = vmul.f32 %v11416_v22, %v20169_v24 }
 0x46f   : > { %v11354_v58 = vadd.f32 %v11322_v0, %v11158_v9  ;;  %v10964_v13 = vadd.f32 %v10932_v10, %v10768_v2  ;;  %v11612_v20 = vrot.slane %v6094_v32, %v20073_v29  ;;  %v11808_v25 = vrot.slane %v6094_v32, %v20074_v60  ;;  %v16945_v9 = vpop.f32.mrb[26].mxu1 }
 0x470   : > { %20183 = vst [vmem:[#allocation64_spill] sm:$0xff] %v16926_v11  ;;  %v12004_v49 = vrot.slane %v6094_v32, %v20075_v59  ;;  %v12200_v26 = vrot.slane %v6094_v32, %v20076_v46  ;;  %v6160_v63 = vrot.slane %v16892_v28, %v20069_v44  ;;  %v6324_v55 = vrot.slane %v16892_v28, %v20070_v27 }
 0x471   : > { %v11550_v37 = vadd.f32 %v11518_v1, %v11354_v58  ;;  %v11160_v42 = vadd.f32 %v11128_v19, %v10964_v13  ;;  %v11716_v41 = vmul.f32 %v11612_v20, %v20171_v54  ;;  %v11912_v2 = vmul.f32 %v11808_v25, %v16826_v14  ;;  %20184 = vst [vmem:[#allocation65_spill] sm:$0xff] %v16945_v9 }
 0x472   : > { %v12108_v0 = vmul.f32 %v12004_v49, %v16852_v33  ;;  %v12304_v4 = vmul.f32 %v12200_v26, %v20172_v15  ;;  %v6261_v22 = vmul.f32 %v6160_v63, %v16021_v17  ;;  %v6425_v32 = vmul.f32 %v6324_v55, %v16035_v35 }
 0x473   : > { %v11746_v10 = vadd.f32 %v11714_v12, %v11550_v37  ;;  %v11356_v11 = vadd.f32 %v11324_v5, %v11160_v42  ;;  %v6520_v58 = vrot.slane %v16892_v28, %v20071_v31  ;;  %v6716_v20 = vrot.slane %v16892_v28, %v20072_v30  ;;  %v20185_v37 = vld [vmem:[#allocation38_spill] sm:$0xff] }
 0x474   : > { %v6457_v13 = vadd.f32 %v6425_v32, %v6261_v22  ;;  %v6912_v1 = vrot.slane %v16892_v28, %v20073_v29  ;;  %v7108_v19 = vrot.slane %v16892_v28, %v20074_v60  ;;  %v7304_v25 = vrot.slane %v16892_v28, %v20075_v59 }
 0x475   : > { %v11942_v49 = vadd.f32 %v11910_v52, %v11746_v10  ;;  %v11552_v26 = vadd.f32 %v11520_v51, %v11356_v11  ;;  %v6621_v12 = vmul.f32 %v6520_v58, %v20139_v3  ;;  %v6817_v5 = vmul.f32 %v6716_v20, %v20140_v57  ;;  %v20186_v52 = vld [vmem:[#allocation24_spill] sm:$0xff]  ;;  %v20188_v20 = vld [vmem:[#allocation73_spill] sm:$0xff] }
 0x476   : > { %v7013_v63 = vmul.f32 %v6912_v1, %v16039_v18  ;;  %v7209_v55 = vmul.f32 %v7108_v19, %v16029_v50  ;;  %v7405_v42 = vmul.f32 %v7304_v25, %v20185_v37  ;;  %v7500_v22 = vrot.slane %v16892_v28, %v20076_v46  ;;  %v20187_v10 = vld [vmem:[#allocation72_spill] sm:$0xff]  ;;  %v20189_v1 = vld [vmem:[#allocation37_spill] sm:$0xff] }
 0x477   : > { %v12138_v32 = vadd.f32 %v12106_v56, %v11942_v49  ;;  %v11748_v9 = vadd.f32 %v11716_v41, %v11552_v26  ;;  %v6653_v40 = vadd.f32 %v6621_v12, %v6457_v13  ;;  %v6001_v15 = vmax.f32 %v16890_v6, 0.0  ;;  %v16974_v56 = vpop.f32.mrb[27].mxu0 }
 0x478   : > { %v7601_v11 = vmul.f32 %v7500_v22, %v20186_v52  ;;  %v6000_v51 = vmax.f32 %v16896_v23, 0.0  ;;  %v5874_v58 = vadd.f32 %v20177_v8, %v20187_v10  ;;  %v5903_v19 = vadd.f32 %v20189_v1, %v20188_v20  ;;  %20191 = vst [vmem:[#allocation22_spill] sm:$0xff] %v16974_v56  ;;  %v20199_v56 = vld [vmem:[#allocation76_spill] sm:$0xff] }
 0x479   : > { %v16971_v33 = vadd.f32 %v12302_v38, %v12138_v32  ;;  %v11944_v25 = vadd.f32 %v11912_v2, %v11748_v9  ;;  %v6849_v14 = vadd.f32 %v6817_v5, %v6653_v40  ;;  %v6168_v28 = vrot.slane %v6001_v15, %v20069_v44 }
 0x47a   : > { %v6332_v6 = vrot.slane %v6001_v15, %v20070_v27  ;;  %v6528_v41 = vrot.slane %v6001_v15, %v20071_v31  ;;  %v6724_v23 = vrot.slane %v6001_v15, %v20072_v30  ;;  %v6920_v13 = vrot.slane %v6001_v15, %v20073_v29 }
 0x47b   : > { %20190 = vst [vmem:[#allocation41_spill] sm:$0xff] %v16971_v33  ;;  %v12140_v49 = vadd.f32 %v12108_v0, %v11944_v25  ;;  %v7045_v26 = vadd.f32 %v7013_v63, %v6849_v14  ;;  %v6263_v12 = vmul.f32 %v6168_v28, %v16021_v17  ;;  %v7116_v38 = vrot.slane %v6001_v15, %v20074_v60 }
 0x47c   : > { %v6427_v40 = vmul.f32 %v6332_v6, %v16035_v35  ;;  %v6623_v2 = vmul.f32 %v6528_v41, %v20139_v3  ;;  %v6819_v9 = vmul.f32 %v6724_v23, %v20140_v57  ;;  %v7015_v5 = vmul.f32 %v6920_v13, %v16039_v18  ;;  %v16996_v23 = vpop.f32.mrb[27].mxu1 }
 0x47d   : > { %v16986_v22 = vadd.f32 %v12304_v4, %v12140_v49  ;;  %v7241_v32 = vadd.f32 %v7209_v55, %v7045_v26  ;;  %v7211_v10 = vmul.f32 %v7116_v38, %v16029_v50  ;;  %v7312_v0 = vrot.slane %v6001_v15, %v20075_v59  ;;  %20193 = vst [vmem:[#allocation53_spill] sm:$0xff] %v16996_v23 }
 0x47e   : > { %v6459_v14 = vadd.f32 %v6427_v40, %v6263_v12  ;;  %v7508_v63 = vrot.slane %v6001_v15, %v20076_v46  ;;  %v6164_v20 = vrot.slane %v6000_v51, %v20069_v44  ;;  %v6328_v25 = vrot.slane %v6000_v51, %v20070_v27 }
 0x47f   : > { %20192 = vst [vmem:[#allocation59_spill] sm:$0xff] %v16986_v22  ;;  %v7437_v28 = vadd.f32 %v7405_v42, %v7241_v32  ;;  %v7407_v6 = vmul.f32 %v7312_v0, %v20185_v37  ;;  %v6524_v41 = vrot.slane %v6000_v51, %v20071_v31  ;;  %v6720_v4 = vrot.slane %v6000_v51, %v20072_v30 }
 0x480   : > { %v6655_v55 = vadd.f32 %v6623_v2, %v6459_v14  ;;  %v7603_v13 = vmul.f32 %v7508_v63, %v20186_v52  ;;  %v6262_v49 = vmul.f32 %v6164_v20, %v16021_v17  ;;  %v6426_v15 = vmul.f32 %v6328_v25, %v16035_v35 }
 0x481   : > { %v7633_v26 = vadd.f32 %v7601_v11, %v7437_v28  ;;  %v6622_v12 = vmul.f32 %v6524_v41, %v20139_v3  ;;  %v6818_v42 = vmul.f32 %v6720_v4, %v20140_v57  ;;  %v6916_v38 = vrot.slane %v6000_v51, %v20073_v29 }
 0x482   : > { %v6851_v40 = vadd.f32 %v6819_v9, %v6655_v55  ;;  %v6458_v32 = vadd.f32 %v6426_v15, %v6262_v49  ;;  %v7112_v0 = vrot.slane %v6000_v51, %v20074_v60  ;;  %v7308_v22 = vrot.slane %v6000_v51, %v20075_v59 }
 0x483   : > { %v7014_v2 = vmul.f32 %v6916_v38, %v16039_v18  ;;  %v7504_v14 = vrot.slane %v6000_v51, %v20076_v46  ;;  %v6002_v63 = vmax.f32 %v5874_v58, 0.0  ;;  %v6031_v20 = vmax.f32 %v5903_v19, 0.0 }
 0x484   : > { %v7047_v25 = vadd.f32 %v7015_v5, %v6851_v40  ;;  %v6654_v11 = vadd.f32 %v6622_v12, %v6458_v32  ;;  %v7210_v28 = vmul.f32 %v7112_v0, %v16029_v50  ;;  %v7406_v41 = vmul.f32 %v7308_v22, %v20185_v37 }
 0x485   : > { %v7602_v4 = vmul.f32 %v7504_v14, %v20186_v52  ;;  %v6172_v9 = vrot.slane %v6002_v63, %v20069_v44  ;;  %v6336_v55 = vrot.slane %v6002_v63, %v20070_v27  ;;  %v6532_v49 = vrot.slane %v6002_v63, %v20071_v31 }
 0x486   : > { %v7243_v15 = vadd.f32 %v7211_v10, %v7047_v25  ;;  %v6850_v38 = vadd.f32 %v6818_v42, %v6654_v11  ;;  %v6728_v51 = vrot.slane %v6002_v63, %v20072_v30  ;;  %v6924_v58 = vrot.slane %v6002_v63, %v20073_v29 }
 0x487   : > { %v6264_v19 = vmul.f32 %v6172_v9, %v16021_v17  ;;  %v6428_v5 = vmul.f32 %v6336_v55, %v16035_v35  ;;  %v6624_v22 = vmul.f32 %v6532_v49, %v20139_v3  ;;  %v7120_v12 = vrot.slane %v6002_v63, %v20074_v60  ;;  %v17025_v9 = vpop.f32.mrb[28].mxu0 }
 0x488   : > { %v7439_v40 = vadd.f32 %v7407_v6, %v7243_v15  ;;  %v7046_v32 = vadd.f32 %v7014_v2, %v6850_v38  ;;  %v6820_v0 = vmul.f32 %v6728_v51, %v20140_v57  ;;  %v7016_v14 = vmul.f32 %v6924_v58, %v16039_v18  ;;  %20194 = vst [vmem:[#allocation66_spill] sm:$0xff] %v17025_v9  ;;  %v17032_v58 = vpop.f32.mrb[28].mxu1  ;;  %v20198_v9 = vld [vmem:[#allocation78_spill] sm:$0xff] }
 0x489   : > { %v6460_v10 = vadd.f32 %v6428_v5, %v6264_v19  ;;  %v7212_v42 = vmul.f32 %v7120_v12, %v16029_v50  ;;  %v7316_v25 = vrot.slane %v6002_v63, %v20075_v59  ;;  %v7512_v11 = vrot.slane %v6002_v63, %v20076_v46  ;;  %20195 = vst [vmem:[#allocation55_spill] sm:$0xff] %v17032_v58 }
 0x48a   : > { %v7635_v55 = vadd.f32 %v7603_v13, %v7439_v40  ;;  %v7242_v33 = vadd.f32 %v7210_v28, %v7046_v32  ;;  %v7696_v49 = vrot.slane %v6031_v20, %v20069_v44  ;;  %v7892_v6 = vrot.slane %v6031_v20, %v20070_v27 }
 0x48b   : > { %v6656_v2 = vadd.f32 %v6624_v22, %v6460_v10  ;;  %v7408_v15 = vmul.f32 %v7316_v25, %v20185_v37  ;;  %v7604_v38 = vmul.f32 %v7512_v11, %v20186_v52  ;;  %v8088_v51 = vrot.slane %v6031_v20, %v20071_v31 }
 0x48c   : > { %v7438_v19 = vadd.f32 %v7406_v41, %v7242_v33  ;;  %v7797_v63 = vmul.f32 %v7696_v49, %v20146_v36  ;;  %v7993_v5 = vmul.f32 %v7892_v6, %v20147_v43  ;;  %v8284_v13 = vrot.slane %v6031_v20, %v20072_v30  ;;  %v20196_v49 = vld [vmem:[#allocation16_spill] sm:$0xff] }
 0x48d   : > { %v6852_v28 = vadd.f32 %v6820_v0, %v6656_v2  ;;  %v8189_v12 = vmul.f32 %v8088_v51, %v16175_v45  ;;  %v8480_v22 = vrot.slane %v6031_v20, %v20073_v29  ;;  %v8676_v40 = vrot.slane %v6031_v20, %v20074_v60  ;;  %v20197_v2 = vld [vmem:[#allocation51_spill] sm:$0xff] }
 0x48e   : > { %v7634_v32 = vadd.f32 %v7602_v4, %v7438_v19  ;;  %v7829_v10 = vadd.f32 %v7797_v63, %v7633_v26  ;;  %v8385_v25 = vmul.f32 %v8284_v13, %v16079_v16  ;;  %v8872_v11 = vrot.slane %v6031_v20, %v20075_v59  ;;  %v20200_v19 = vld [vmem:[#allocation42_spill] sm:$0xff]  ;;  %v20201_v13 = vld [vmem:[#allocation61_spill] sm:$0xff] }
 0x48f   : > { %v7048_v33 = vadd.f32 %v7016_v14, %v6852_v28  ;;  %v8581_v41 = vmul.f32 %v8480_v22, %v16119_v21  ;;  %v8777_v6 = vmul.f32 %v8676_v40, %v20196_v49  ;;  %v9068_v58 = vrot.slane %v6031_v20, %v20076_v46  ;;  %v20202_v28 = vld [vmem:[#allocation62_spill] sm:$0xff]  ;;  %v20203_v22 = vld [vmem:[#allocation27_spill] sm:$0xff] }
 0x490   : > { %v8025_v0 = vadd.f32 %v7993_v5, %v7829_v10  ;;  %v8973_v51 = vmul.f32 %v8872_v11, %v20197_v2  ;;  %v5905_v23 = vadd.f32 %v20189_v1, %v20198_v9  ;;  %v5904_v26 = vadd.f32 %v20189_v1, %v20199_v56  ;;  %v20204_v10 = vld [vmem:[#allocation77_spill] sm:$0xff] }
 0x491   : > { %v7244_v4 = vadd.f32 %v7212_v42, %v7048_v33  ;;  %v9169_v63 = vmul.f32 %v9068_v58, %v20200_v19  ;;  %v5906_v14 = vadd.f32 %v20189_v1, %v20201_v13  ;;  %v5935_v40 = vadd.f32 %v20203_v22, %v20202_v28  ;;  %v20205_v42 = vld [vmem:[#allocation63_spill] sm:$0xff]  ;;  %v17067_v33 = vpop.f32.mrb[29].mxu0 }
 0x492   : > { %v8221_v52 = vadd.f32 %v8189_v12, %v8025_v0  ;;  %v6033_v20 = vmax.f32 %v5905_v23, 0.0  ;;  %v6032_v5 = vmax.f32 %v5904_v26, 0.0  ;;  %v17057_v11 = vadd.f32 %v20203_v22, %v20204_v10  ;;  %20206 = vst [vmem:[#allocation80_spill] sm:$0xff] %v17067_v33 }
 0x493   : > { %v7440_v9 = vadd.f32 %v7408_v15, %v7244_v4  ;;  %v17059_v37 = vmax.f32 %v5906_v14, 0.0  ;;  %v17061_v56 = vmax.f32 %v5935_v40, 0.0  ;;  %v17065_v58 = vadd.f32 %v20203_v22, %v20205_v42 }
 0x494   : > { %v8417_v13 = vadd.f32 %v8385_v25, %v8221_v52  ;;  %v7704_v12 = vrot.slane %v6033_v20, %v20069_v44  ;;  %v7900_v23 = vrot.slane %v6033_v20, %v20070_v27  ;;  %v8096_v0 = vrot.slane %v6033_v20, %v20071_v31 }
 0x495   : > { %v7636_v26 = vadd.f32 %v7604_v38, %v7440_v9  ;;  %v8292_v15 = vrot.slane %v6033_v20, %v20072_v30  ;;  %v8488_v4 = vrot.slane %v6033_v20, %v20073_v29  ;;  %v8684_v14 = vrot.slane %v6033_v20, %v20074_v60 }
 0x496   : > { %v8613_v28 = vadd.f32 %v8581_v41, %v8417_v13  ;;  %v7799_v40 = vmul.f32 %v7704_v12, %v20146_v36  ;;  %v7995_v10 = vmul.f32 %v7900_v23, %v20147_v43  ;;  %v8191_v52 = vmul.f32 %v8096_v0, %v16175_v45 }
 0x497   : > { %v8387_v25 = vmul.f32 %v8292_v15, %v16079_v16  ;;  %v8583_v42 = vmul.f32 %v8488_v4, %v16119_v21  ;;  %v8779_v33 = vmul.f32 %v8684_v14, %v20196_v49  ;;  %v8880_v38 = vrot.slane %v6033_v20, %v20075_v59  ;;  %v17088_v15 = vpop.f32.mrb[29].mxu1 }
 0x498   : > { %v8809_v9 = vadd.f32 %v8777_v6, %v8613_v28  ;;  %v7831_v50 = vadd.f32 %v7799_v40, %v7635_v55  ;;  %v9076_v18 = vrot.slane %v6033_v20, %v20076_v46  ;;  %v7700_v41 = vrot.slane %v6032_v5, %v20069_v44  ;;  %20207 = vst [vmem:[#allocation46_spill] sm:$0xff] %v17088_v15 }
 0x499   : > { %v8975_v13 = vmul.f32 %v8880_v38, %v20197_v2  ;;  %v7896_v12 = vrot.slane %v6032_v5, %v20070_v27  ;;  %v8092_v23 = vrot.slane %v6032_v5, %v20071_v31  ;;  %v8288_v0 = vrot.slane %v6032_v5, %v20072_v30 }
 0x49a   : > { %v9005_v4 = vadd.f32 %v8973_v51, %v8809_v9  ;;  %v8027_v14 = vadd.f32 %v7995_v10, %v7831_v50  ;;  %v9171_v57 = vmul.f32 %v9076_v18, %v20200_v19  ;;  %v7798_v55 = vmul.f32 %v7700_v41, %v20146_v36 }
 0x49b   : > { %v7994_v6 = vmul.f32 %v7896_v12, %v20147_v43  ;;  %v8190_v20 = vmul.f32 %v8092_v23, %v16175_v45  ;;  %v8386_v28 = vmul.f32 %v8288_v0, %v16079_v16  ;;  %v8484_v40 = vrot.slane %v6032_v5, %v20073_v29 }
 0x49c   : > { %v9201_v38 = vadd.f32 %v9169_v63, %v9005_v4  ;;  %v8223_v3 = vadd.f32 %v8191_v52, %v8027_v14  ;;  %v7830_v35 = vadd.f32 %v7798_v55, %v7634_v32  ;;  %v8680_v17 = vrot.slane %v6032_v5, %v20074_v60 }
 0x49d   : > { %v8582_v51 = vmul.f32 %v8484_v40, %v16119_v21  ;;  %v8876_v50 = vrot.slane %v6032_v5, %v20075_v59  ;;  %v9072_v18 = vrot.slane %v6032_v5, %v20076_v46  ;;  %v7708_v10 = vrot.slane %v17059_v37, %v20069_v44  ;;  %v17110_v5 = vpop.f32.mrb[30].mxu0 }
 0x49e   : > { %v8419_v9 = vadd.f32 %v8387_v25, %v8223_v3  ;;  %v8026_v41 = vadd.f32 %v7994_v6, %v7830_v35  ;;  %v8778_v12 = vmul.f32 %v8680_v17, %v20196_v49  ;;  %v7904_v63 = vrot.slane %v17059_v37, %v20070_v27  ;;  %20208 = vst [vmem:[#allocation54_spill] sm:$0xff] %v17110_v5 }
 0x49f   : > { %v8974_v32 = vmul.f32 %v8876_v50, %v20197_v2  ;;  %v9170_v52 = vmul.f32 %v9072_v18, %v20200_v19  ;;  %v7800_v23 = vmul.f32 %v7708_v10, %v20146_v36  ;;  %v8100_v0 = vrot.slane %v17059_v37, %v20071_v31 }
 0x4a0   : > { %v8615_v4 = vadd.f32 %v8583_v42, %v8419_v9  ;;  %v8222_v14 = vadd.f32 %v8190_v20, %v8026_v41  ;;  %v7996_v35 = vmul.f32 %v7904_v63, %v20147_v43  ;;  %v8296_v17 = vrot.slane %v17059_v37, %v20072_v30 }
 0x4a1   : > { %v7832_v3 = vadd.f32 %v7800_v23, %v7636_v26  ;;  %v8192_v25 = vmul.f32 %v8100_v0, %v16175_v45  ;;  %v8492_v55 = vrot.slane %v17059_v37, %v20073_v29  ;;  %v8688_v6 = vrot.slane %v17059_v37, %v20074_v60 }
 0x4a2   : > { %v8811_v40 = vadd.f32 %v8779_v33, %v8615_v4  ;;  %v8418_v50 = vadd.f32 %v8386_v28, %v8222_v14  ;;  %v8388_v18 = vmul.f32 %v8296_v17, %v16079_v16  ;;  %v8884_v42 = vrot.slane %v17059_v37, %v20075_v59 }
 0x4a3   : > { %v8028_v20 = vadd.f32 %v7996_v35, %v7832_v3  ;;  %v8584_v10 = vmul.f32 %v8492_v55, %v16119_v21  ;;  %v8780_v26 = vmul.f32 %v8688_v6, %v20196_v49  ;;  %v9080_v9 = vrot.slane %v17059_v37, %v20076_v46  ;;  %v17135_v35 = vpop.f32.mrb[30].mxu1 }
 0x4a4   : > { %v9007_v41 = vadd.f32 %v8975_v13, %v8811_v40  ;;  %v8614_v63 = vadd.f32 %v8582_v51, %v8418_v50  ;;  %v8976_v23 = vmul.f32 %v8884_v42, %v20197_v2  ;;  %v9264_v33 = vrot.slane %v17061_v56, %v20069_v44  ;;  %20209 = vst [vmem:[#allocation47_spill] sm:$0xff] %v17135_v35 }
 0x4a5   : > { %v8224_v28 = vadd.f32 %v8192_v25, %v8028_v20  ;;  %v9172_v0 = vmul.f32 %v9080_v9, %v20200_v19  ;;  %v9460_v4 = vrot.slane %v17061_v56, %v20070_v27  ;;  %v9656_v14 = vrot.slane %v17061_v56, %v20071_v31 }
 0x4a6   : > { %v9203_v17 = vadd.f32 %v9171_v57, %v9007_v41  ;;  %v8810_v37 = vadd.f32 %v8778_v12, %v8614_v63  ;;  %v9365_v13 = vmul.f32 %v9264_v33, %v16263_v48  ;;  %v9852_v51 = vrot.slane %v17061_v56, %v20072_v30  ;;  %v20210_v33 = vld [vmem:[#allocation57_spill] sm:$0xff] }
 0x4a7   : > { %v8420_v3 = vadd.f32 %v8388_v18, %v8224_v28  ;;  %v9561_v25 = vmul.f32 %v9460_v4, %v20162_v39  ;;  %v9757_v55 = vmul.f32 %v9656_v14, %v16233_v61  ;;  %v10048_v6 = vrot.slane %v17061_v56, %v20073_v29  ;;  %v20211_v4 = vld [vmem:[#allocation68_spill] sm:$0xff] }
 0x4a8   : > { %v9006_v40 = vadd.f32 %v8974_v32, %v8810_v37  ;;  %v9397_v50 = vadd.f32 %v9365_v13, %v9201_v38  ;;  %v9953_v42 = vmul.f32 %v9852_v51, %v16286_v62  ;;  %v10244_v57 = vrot.slane %v17061_v56, %v20074_v60  ;;  %v20212_v37 = vld [vmem:[#allocation74_spill] sm:$0xff] }
 0x4a9   : > { %v8616_v12 = vadd.f32 %v8584_v10, %v8420_v3  ;;  %v10149_v20 = vmul.f32 %v10048_v6, %v16261_v7  ;;  %v10440_v18 = vrot.slane %v17061_v56, %v20075_v59  ;;  %v10636_v9 = vrot.slane %v17061_v56, %v20076_v46 }
 0x4aa   : > { %v9202_v41 = vadd.f32 %v9170_v52, %v9006_v40  ;;  %v9593_v63 = vadd.f32 %v9561_v25, %v9397_v50  ;;  %v10345_v28 = vmul.f32 %v10244_v57, %v20210_v33  ;;  %v6065_v38 = vmax.f32 %v17057_v11, 0.0 }
 0x4ab   : > { %v8812_v32 = vadd.f32 %v8780_v26, %v8616_v12  ;;  %v10541_v14 = vmul.f32 %v10440_v18, %v20211_v4  ;;  %v10737_v13 = vmul.f32 %v10636_v9, %v20212_v37  ;;  %v6064_v10 = vmax.f32 %v17065_v58, 0.0  ;;  %v17163_v26 = vpop.f32.mrb[31].mxu0 }
 0x4ac   : > { %v9789_v51 = vadd.f32 %v9757_v55, %v9593_v63  ;;  %v9272_v3 = vrot.slane %v6065_v38, %v20069_v44  ;;  %v9468_v6 = vrot.slane %v6065_v38, %v20070_v27  ;;  %v9664_v56 = vrot.slane %v6065_v38, %v20071_v31  ;;  %20213 = vst [vmem:[#allocation56_spill] sm:$0xff] %v17163_v26 }
 0x4ad   : > { %v9008_v52 = vadd.f32 %v8976_v23, %v8812_v32  ;;  %v9860_v25 = vrot.slane %v6065_v38, %v20072_v30  ;;  %v10056_v40 = vrot.slane %v6065_v38, %v20073_v29  ;;  %v10252_v11 = vrot.slane %v6065_v38, %v20074_v60 }
 0x4ae   : > { %v9985_v50 = vadd.f32 %v9953_v42, %v9789_v51  ;;  %v9367_v57 = vmul.f32 %v9272_v3, %v16263_v48  ;;  %v9563_v58 = vmul.f32 %v9468_v6, %v20162_v39  ;;  %v9759_v55 = vmul.f32 %v9664_v56, %v16233_v61 }
 0x4af   : > { %v9204_v12 = vadd.f32 %v9172_v0, %v9008_v52  ;;  %v9955_v18 = vmul.f32 %v9860_v25, %v16286_v62  ;;  %v10151_v23 = vmul.f32 %v10056_v40, %v16261_v7  ;;  %v10347_v9 = vmul.f32 %v10252_v11, %v20210_v33  ;;  %v17183_v11 = vpop.f32.mrb[31].mxu1 }
 0x4b0   : > { %v10181_v63 = vadd.f32 %v10149_v20, %v9985_v50  ;;  %v9399_v32 = vadd.f32 %v9367_v57, %v9203_v17  ;;  %v10448_v35 = vrot.slane %v6065_v38, %v20075_v59  ;;  %v10644_v26 = vrot.slane %v6065_v38, %v20076_v46  ;;  %20214 = vst [vmem:[#allocation10_spill] sm:$0xff] %v17183_v11  ;;  %v20217_v11 = vld [vmem:[#allocation34_spill] sm:$0xff] }
 0x4b1   : > { %v9268_v42 = vrot.slane %v6064_v10, %v20069_v44  ;;  %v9464_v51 = vrot.slane %v6064_v10, %v20070_v27  ;;  %v9660_v3 = vrot.slane %v6064_v10, %v20071_v31  ;;  %v9856_v0 = vrot.slane %v6064_v10, %v20072_v30 }
 0x4b2   : > { %v10377_v6 = vadd.f32 %v10345_v28, %v10181_v63  ;;  %v9595_v56 = vadd.f32 %v9563_v58, %v9399_v32  ;;  %v10543_v52 = vmul.f32 %v10448_v35, %v20211_v4  ;;  %v10739_v25 = vmul.f32 %v10644_v26, %v20212_v37  ;;  %v20215_v63 = vld [vmem:[#allocation36_spill] sm:$0xff] }
 0x4b3   : > { %v9366_v17 = vmul.f32 %v9268_v42, %v16263_v48  ;;  %v9562_v20 = vmul.f32 %v9464_v51, %v20162_v39  ;;  %v9758_v38 = vmul.f32 %v9660_v3, %v16233_v61  ;;  %v9954_v40 = vmul.f32 %v9856_v0, %v16286_v62 }
 0x4b4   : > { %v10573_v50 = vadd.f32 %v10541_v14, %v10377_v6  ;;  %v9791_v57 = vadd.f32 %v9759_v55, %v9595_v56  ;;  %v10052_v5 = vrot.slane %v6064_v10, %v20073_v29  ;;  %v10248_v28 = vrot.slane %v6064_v10, %v20074_v60 }
 0x4b5   : > { %v9398_v58 = vadd.f32 %v9366_v17, %v9202_v41  ;;  %v10444_v35 = vrot.slane %v6064_v10, %v20075_v59  ;;  %v10640_v26 = vrot.slane %v6064_v10, %v20076_v46  ;;  %v5938_v32 = vadd.f32 %v20203_v22, %v20215_v63  ;;  %v20216_v17 = vld [vmem:[#allocation6_spill] sm:$0xff]  ;;  %v20218_v10 = vld [vmem:[#allocation4_spill] sm:$0xff]  ;;  %v20219_v63 = vld [vmem:[#allocation5_spill] sm:$0xff] }
 0x4b6   : > { %v10769_v42 = vadd.f32 %v10737_v13, %v10573_v50  ;;  %v9987_v51 = vadd.f32 %v9955_v18, %v9791_v57  ;;  %v10150_v3 = vmul.f32 %v10052_v5, %v16261_v7  ;;  %v10346_v0 = vmul.f32 %v10248_v28, %v20210_v33 }
 0x4b7   : > { %v9594_v14 = vadd.f32 %v9562_v20, %v9398_v58  ;;  %v10542_v55 = vmul.f32 %v10444_v35, %v20211_v4  ;;  %v10738_v6 = vmul.f32 %v10640_v26, %v20212_v37  ;;  %v6066_v56 = vmax.f32 %v5938_v32, 0.0 }
 0x4b8   : > { %v10183_v41 = vadd.f32 %v10151_v23, %v9987_v51  ;;  %v5967_v15 = vadd.f32 %v20217_v11, %v20216_v17  ;;  %v5969_v19 = vadd.f32 %v20217_v11, %v20218_v10  ;;  %v5968_v13 = vadd.f32 %v20217_v11, %v20219_v63 }
 0x4b9   : > { %v9790_v18 = vadd.f32 %v9758_v38, %v9594_v14  ;;  %v9276_v5 = vrot.slane %v6066_v56, %v20069_v44  ;;  %v9472_v20 = vrot.slane %v6066_v56, %v20070_v27  ;;  %v9668_v50 = vrot.slane %v6066_v56, %v20071_v31 }
 0x4ba   : > { %v10379_v57 = vadd.f32 %v10347_v9, %v10183_v41  ;;  %v9864_v28 = vrot.slane %v6066_v56, %v20072_v30  ;;  %v10060_v23 = vrot.slane %v6066_v56, %v20073_v29  ;;  %v10256_v58 = vrot.slane %v6066_v56, %v20074_v60 }
 0x4bb   : > { %v9986_v35 = vadd.f32 %v9954_v40, %v9790_v18  ;;  %v9368_v26 = vmul.f32 %v9276_v5, %v16263_v48  ;;  %v9564_v32 = vmul.f32 %v9472_v20, %v20162_v39  ;;  %v9760_v38 = vmul.f32 %v9668_v50, %v16233_v61  ;;  %v17215_v40 = vpop.f32.mrb[32].mxu0 }
 0x4bc   : > { %v10575_v51 = vadd.f32 %v10543_v52, %v10379_v57  ;;  %v9956_v14 = vmul.f32 %v9864_v28, %v16286_v62  ;;  %v10152_v17 = vmul.f32 %v10060_v23, %v16261_v7  ;;  %v10348_v9 = vmul.f32 %v10256_v58, %v20210_v33  ;;  %20220 = vst [vmem:[#allocation13_spill] sm:$0xff] %v17215_v40  ;;  %v17221_v23 = vpop.f32.mrb[32].mxu1 }
 0x4bd   : > { %v10182_v41 = vadd.f32 %v10150_v3, %v9986_v35  ;;  %v9400_v10 = vadd.f32 %v9368_v26, %v9204_v12  ;;  %v10452_v63 = vrot.slane %v6066_v56, %v20075_v59  ;;  %v10648_v22 = vrot.slane %v6066_v56, %v20076_v46  ;;  %20221 = vst [vmem:[#allocation14_spill] sm:$0xff] %v17221_v23 }
 0x4be   : > { %v10771_v18 = vadd.f32 %v10739_v25, %v10575_v51  ;;  %v6095_v5 = vmax.f32 %v5967_v15, 0.0  ;;  %v6097_v20 = vmax.f32 %v5969_v19, 0.0  ;;  %v17217_v39 = vmax.f32 %v5968_v13, 0.0 }
 0x4bf   : > { %v10378_v52 = vadd.f32 %v10346_v0, %v10182_v41  ;;  %v9596_v50 = vadd.f32 %v9564_v32, %v9400_v10  ;;  %v10544_v57 = vmul.f32 %v10452_v63, %v20211_v4  ;;  %v10740_v28 = vmul.f32 %v10648_v22, %v20212_v37  ;;  %v20222_v10 = vld [vmem:[#allocation7_spill] sm:$0xff] }
 0x4c0   : > { %v10832_v12 = vrot.slane %v6095_v5, %v20069_v44  ;;  %v11028_v3 = vrot.slane %v6095_v5, %v20070_v27  ;;  %v11224_v56 = vrot.slane %v6095_v5, %v20071_v31  ;;  %v11420_v25 = vrot.slane %v6095_v5, %v20072_v30 }
 0x4c1   : > { %v10574_v15 = vadd.f32 %v10542_v55, %v10378_v52  ;;  %v9792_v19 = vadd.f32 %v9760_v38, %v9596_v50  ;;  %v11616_v13 = vrot.slane %v6095_v5, %v20073_v29  ;;  %v11812_v0 = vrot.slane %v6095_v5, %v20074_v60 }
 0x4c2   : > { %v10933_v58 = vmul.f32 %v10832_v12, %v16361_v53  ;;  %v11129_v22 = vmul.f32 %v11028_v3, %v16404_v47  ;;  %v11325_v35 = vmul.f32 %v11224_v56, %v20168_v34  ;;  %v11521_v26 = vmul.f32 %v11420_v25, %v20169_v24 }
 0x4c3   : > { %v10770_v32 = vadd.f32 %v10738_v6, %v10574_v15  ;;  %v9988_v51 = vadd.f32 %v9956_v14, %v9792_v19  ;;  %v11717_v41 = vmul.f32 %v11616_v13, %v20171_v54  ;;  %v11913_v63 = vmul.f32 %v11812_v0, %v20222_v10  ;;  %v20223_v14 = vld [vmem:[#allocation8_spill] sm:$0xff] }
 0x4c4   : > { %v10965_v55 = vadd.f32 %v10933_v58, %v10769_v42  ;;  %v12008_v38 = vrot.slane %v6095_v5, %v20075_v59  ;;  %v12204_v52 = vrot.slane %v6095_v5, %v20076_v46  ;;  %v10840_v50 = vrot.slane %v6097_v20, %v20069_v44  ;;  %v20224_v19 = vld [vmem:[#allocation20_spill] sm:$0xff] }
 0x4c5   : > { %v10184_v12 = vadd.f32 %v10152_v17, %v9988_v51  ;;  %v11036_v3 = vrot.slane %v6097_v20, %v20070_v27  ;;  %v11232_v56 = vrot.slane %v6097_v20, %v20071_v31  ;;  %v11428_v25 = vrot.slane %v6097_v20, %v20072_v30  ;;  %v17247_v51 = vpop.f32.mrb[33].mxu0 }
 0x4c6   : > { %v11161_v6 = vadd.f32 %v11129_v22, %v10965_v55  ;;  %v12109_v15 = vmul.f32 %v12008_v38, %v20223_v14  ;;  %v12305_v13 = vmul.f32 %v12204_v52, %v20224_v19  ;;  %v10935_v42 = vmul.f32 %v10840_v50, %v16361_v53  ;;  %20225 = vst [vmem:[#allocation69_spill] sm:$0xff] %v17247_v51  ;;  %v20241_v51 = vld [vmem:[#allocation32_spill] sm:$0xff] }
 0x4c7   : > { %v10380_v0 = vadd.f32 %v10348_v9, %v10184_v12  ;;  %v11131_v58 = vmul.f32 %v11036_v3, %v16404_v47  ;;  %v11327_v5 = vmul.f32 %v11232_v56, %v20168_v34  ;;  %v11523_v17 = vmul.f32 %v11428_v25, %v20169_v24 }
 0x4c8   : > { %v11357_v23 = vadd.f32 %v11325_v35, %v11161_v6  ;;  %v10967_v40 = vadd.f32 %v10935_v42, %v10771_v18  ;;  %v11624_v37 = vrot.slane %v6097_v20, %v20073_v29  ;;  %v11820_v22 = vrot.slane %v6097_v20, %v20074_v60 }
 0x4c9   : > { %v10576_v55 = vadd.f32 %v10544_v57, %v10380_v0  ;;  %v12016_v38 = vrot.slane %v6097_v20, %v20075_v59  ;;  %v12212_v52 = vrot.slane %v6097_v20, %v20076_v46  ;;  %v10836_v9 = vrot.slane %v17217_v39, %v20069_v44  ;;  %v17270_v0 = vpop.f32.mrb[33].mxu1 }
 0x4ca   : > { %v11553_v50 = vadd.f32 %v11521_v26, %v11357_v23  ;;  %v11163_v12 = vadd.f32 %v11131_v58, %v10967_v40  ;;  %v11719_v3 = vmul.f32 %v11624_v37, %v20171_v54  ;;  %v11915_v56 = vmul.f32 %v11820_v22, %v20222_v10  ;;  %20226 = vst [vmem:[#allocation72_spill] sm:$0xff] %v17270_v0  ;;  %v20233_v0 = vld [vmem:[#allocation58_spill] sm:$0xff] }
 0x4cb   : > { %v10772_v35 = vadd.f32 %v10740_v28, %v10576_v55  ;;  %v12111_v18 = vmul.f32 %v12016_v38, %v20223_v14  ;;  %v12307_v25 = vmul.f32 %v12212_v52, %v20224_v19  ;;  %v10934_v57 = vmul.f32 %v10836_v9, %v16361_v53 }
 0x4cc   : > { %v11749_v6 = vadd.f32 %v11717_v41, %v11553_v50  ;;  %v11359_v42 = vadd.f32 %v11327_v5, %v11163_v12  ;;  %v11032_v20 = vrot.slane %v17217_v39, %v20070_v27  ;;  %v11228_v23 = vrot.slane %v17217_v39, %v20071_v31 }
 0x4cd   : > { %v10966_v40 = vadd.f32 %v10934_v57, %v10770_v32  ;;  %v11424_v37 = vrot.slane %v17217_v39, %v20072_v30  ;;  %v11620_v28 = vrot.slane %v17217_v39, %v20073_v29  ;;  %v11816_v26 = vrot.slane %v17217_v39, %v20074_v60  ;;  %v20227_v57 = vld [vmem:[#allocation9_spill] sm:$0xff] }
 0x4ce   : > { %v11945_v41 = vadd.f32 %v11913_v63, %v11749_v6  ;;  %v11555_v58 = vadd.f32 %v11523_v17, %v11359_v42  ;;  %v11130_v5 = vmul.f32 %v11032_v20, %v16404_v47  ;;  %v11326_v22 = vmul.f32 %v11228_v23, %v20168_v34  ;;  %v20228_v42 = vld [vmem:[#allocation2_spill] sm:$0xff]  ;;  %v20229_v23 = vld [vmem:[#allocation3_spill] sm:$0xff] }
 0x4cf   : > { %v11522_v55 = vmul.f32 %v11424_v37, %v20169_v24  ;;  %v11718_v32 = vmul.f32 %v11620_v28, %v20171_v54  ;;  %v11914_v38 = vmul.f32 %v11816_v26, %v20222_v10  ;;  %v12012_v52 = vrot.slane %v17217_v39, %v20075_v59 }
 0x4d0   : > { %v12141_v9 = vadd.f32 %v12109_v15, %v11945_v41  ;;  %v11751_v50 = vadd.f32 %v11719_v3, %v11555_v58  ;;  %v11162_v12 = vadd.f32 %v11130_v5, %v10966_v40  ;;  %v12208_v63 = vrot.slane %v17217_v39, %v20076_v46  ;;  %v20231_v58 = vld [vmem:[#allocation17_spill] sm:$0xff] }
 0x4d1   : > { %v12110_v17 = vmul.f32 %v12012_v52, %v20223_v14  ;;  %v5970_v6 = vadd.f32 %v20217_v11, %v20227_v57  ;;  %v5875_v20 = vadd.f32 %v20177_v8, %v20228_v42  ;;  %v5877_v37 = vadd.f32 %v20177_v8, %v20229_v23  ;;  %v17297_v52 = vpop.f32.mrb[34].mxu0 }
 0x4d2   : > { %v17288_v28 = vadd.f32 %v12305_v13, %v12141_v9  ;;  %v11947_v26 = vadd.f32 %v11915_v56, %v11751_v50  ;;  %v11358_v15 = vadd.f32 %v11326_v22, %v11162_v12  ;;  %v12306_v3 = vmul.f32 %v12208_v63, %v20224_v19  ;;  %20232 = vst [vmem:[#allocation78_spill] sm:$0xff] %v17297_v52  ;;  %v20234_v56 = vld [vmem:[#allocation50_spill] sm:$0xff] }
 0x4d3   : > { %v6098_v40 = vmax.f32 %v5970_v6, 0.0  ;;  %v6003_v41 = vmax.f32 %v5875_v20, 0.0  ;;  %v17291_v39 = vmax.f32 %v5877_v37, 0.0  ;;  %v17295_v5 = vadd.f32 %v20177_v8, %v20231_v58 }
 0x4d4   : > { %20230 = vst [vmem:[#allocation73_spill] sm:$0xff] %v17288_v28  ;;  %v12143_v57 = vadd.f32 %v12111_v18, %v11947_v26  ;;  %v11554_v42 = vadd.f32 %v11522_v55, %v11358_v15  ;;  %v17301_v13 = vadd.f32 %v20177_v8, %v20233_v0  ;;  %v17305_v22 = vadd.f32 %v20189_v1, %v20234_v56 }
 0x4d5   : > { %v10844_v9 = vrot.slane %v6098_v40, %v20069_v44  ;;  %v11040_v50 = vrot.slane %v6098_v40, %v20070_v27  ;;  %v11236_v12 = vrot.slane %v6098_v40, %v20071_v31  ;;  %v11432_v63 = vrot.slane %v6098_v40, %v20072_v30 }
 0x4d6   : > { %v17311_v6 = vadd.f32 %v12307_v25, %v12143_v57  ;;  %v11750_v18 = vadd.f32 %v11718_v32, %v11554_v42  ;;  %v11628_v55 = vrot.slane %v6098_v40, %v20073_v29  ;;  %v11824_v0 = vrot.slane %v6098_v40, %v20074_v60  ;;  %v17322_v32 = vpop.f32.mrb[34].mxu1 }
 0x4d7   : > { %v10936_v20 = vmul.f32 %v10844_v9, %v16361_v53  ;;  %v11132_v23 = vmul.f32 %v11040_v50, %v16404_v47  ;;  %v11328_v37 = vmul.f32 %v11236_v12, %v20168_v34  ;;  %v11524_v26 = vmul.f32 %v11432_v63, %v20169_v24  ;;  %20236 = vst [vmem:[#allocation61_spill] sm:$0xff] %v17322_v32  ;;  %v20238_v32 = vld [vmem:[#allocation39_spill] sm:$0xff] }
 0x4d8   : > { %20235 = vst [vmem:[#allocation76_spill] sm:$0xff] %v17311_v6  ;;  %v11946_v15 = vadd.f32 %v11914_v38, %v11750_v18  ;;  %v11720_v58 = vmul.f32 %v11628_v55, %v20171_v54  ;;  %v11916_v56 = vmul.f32 %v11824_v0, %v20222_v10  ;;  %v12020_v25 = vrot.slane %v6098_v40, %v20075_v59  ;;  %v20237_v0 = vld [vmem:[#allocation44_spill] sm:$0xff]  ;;  %v17353_v10 = vpop.f32.mrb[35].mxu0 }
 0x4d9   : > { %v10968_v57 = vadd.f32 %v10936_v20, %v10772_v35  ;;  %v12216_v42 = vrot.slane %v6098_v40, %v20076_v46  ;;  %v6176_v9 = vrot.slane %v6003_v41, %v20069_v44  ;;  %v6340_v50 = vrot.slane %v6003_v41, %v20070_v27  ;;  %v20240_v40 = vld [vmem:[#allocation49_spill] sm:$0xff]  ;;  %20246 = vst [vmem:[#allocation77_spill] sm:$0xff] %v17353_v10 }
 0x4da   : > { %v12142_v6 = vadd.f32 %v12110_v17, %v11946_v15  ;;  %v12112_v12 = vmul.f32 %v12020_v25, %v20223_v14  ;;  %v6536_v38 = vrot.slane %v6003_v41, %v20071_v31  ;;  %v6732_v63 = vrot.slane %v6003_v41, %v20072_v30 }
 0x4db   : > { %v11164_v18 = vadd.f32 %v11132_v23, %v10968_v57  ;;  %v12308_v55 = vmul.f32 %v12216_v42, %v20224_v19  ;;  %v6265_v28 = vmul.f32 %v6176_v9, %v20237_v0  ;;  %v6429_v35 = vmul.f32 %v6340_v50, %v20238_v32  ;;  %v20242_v57 = vld [vmem:[#allocation25_spill] sm:$0xff] }
 0x4dc   : > { %v17333_v20 = vadd.f32 %v12306_v3, %v12142_v6  ;;  %v6625_v52 = vmul.f32 %v6536_v38, %v20240_v40  ;;  %v6821_v8 = vmul.f32 %v6732_v63, %v20241_v51  ;;  %v6928_v17 = vrot.slane %v6003_v41, %v20073_v29  ;;  %v20243_v63 = vld [vmem:[#allocation33_spill] sm:$0xff] }
 0x4dd   : > { %v11360_v15 = vadd.f32 %v11328_v37, %v11164_v18  ;;  %v6461_v25 = vadd.f32 %v6429_v35, %v6265_v28  ;;  %v7124_v14 = vrot.slane %v6003_v41, %v20074_v60  ;;  %v7320_v23 = vrot.slane %v6003_v41, %v20075_v59  ;;  %v20244_v37 = vld [vmem:[#allocation38_spill] sm:$0xff]  ;;  %v20245_v18 = vld [vmem:[#allocation24_spill] sm:$0xff] }
 0x4de   : > { %20239 = vst [vmem:[#allocation62_spill] sm:$0xff] %v17333_v20  ;;  %v7017_v42 = vmul.f32 %v6928_v17, %v20242_v57  ;;  %v7516_v9 = vrot.slane %v6003_v41, %v20076_v46  ;;  %v6184_v3 = vrot.slane %v17291_v39, %v20069_v44  ;;  %v6348_v6 = vrot.slane %v17291_v39, %v20070_v27 }
 0x4df   : > { %v11556_v50 = vadd.f32 %v11524_v26, %v11360_v15  ;;  %v6657_v38 = vadd.f32 %v6625_v52, %v6461_v25  ;;  %v7213_v20 = vmul.f32 %v7124_v14, %v20243_v63  ;;  %v7409_v28 = vmul.f32 %v7320_v23, %v20244_v37 }
 0x4e0   : > { %v7605_v35 = vmul.f32 %v7516_v9, %v20245_v18  ;;  %v6267_v19 = vmul.f32 %v6184_v3, %v20237_v0  ;;  %v6431_v17 = vmul.f32 %v6348_v6, %v20238_v32  ;;  %v6544_v41 = vrot.slane %v17291_v39, %v20071_v31 }
 0x4e1   : > { %v11752_v54 = vadd.f32 %v11720_v58, %v11556_v50  ;;  %v6853_v24 = vadd.f32 %v6821_v8, %v6657_v38  ;;  %v6740_v52 = vrot.slane %v17291_v39, %v20072_v30  ;;  %v6936_v14 = vrot.slane %v17291_v39, %v20073_v29 }
 0x4e2   : > { %v6463_v26 = vadd.f32 %v6431_v17, %v6267_v19  ;;  %v6627_v15 = vmul.f32 %v6544_v41, %v20240_v40  ;;  %v7132_v25 = vrot.slane %v17291_v39, %v20074_v60  ;;  %v7328_v23 = vrot.slane %v17291_v39, %v20075_v59 }
 0x4e3   : > { %v11948_v9 = vadd.f32 %v11916_v56, %v11752_v54  ;;  %v7049_v3 = vadd.f32 %v7017_v42, %v6853_v24  ;;  %v6823_v58 = vmul.f32 %v6740_v52, %v20241_v51  ;;  %v7019_v8 = vmul.f32 %v6936_v14, %v20242_v57  ;;  %v20247_v42 = vld [vmem:[#allocation65_spill] sm:$0xff]  ;;  %v17380_v14 = vpop.f32.mrb[35].mxu1 }
 0x4e4   : > { %v6659_v6 = vadd.f32 %v6627_v15, %v6463_v26  ;;  %v7215_v50 = vmul.f32 %v7132_v25, %v20243_v63  ;;  %v7411_v38 = vmul.f32 %v7328_v23, %v20244_v37  ;;  %v7524_v19 = vrot.slane %v17291_v39, %v20076_v46  ;;  %20248 = vst [vmem:[#allocation63_spill] sm:$0xff] %v17380_v14 }
 0x4e5   : > { %v12144_v17 = vadd.f32 %v12112_v12, %v11948_v9  ;;  %v7245_v41 = vadd.f32 %v7213_v20, %v7049_v3  ;;  %v6004_v10 = vmax.f32 %v17295_v5, 0.0  ;;  %v6006_v34 = vmax.f32 %v17301_v13, 0.0 }
 0x4e6   : > { %v6855_v54 = vadd.f32 %v6823_v58, %v6659_v6  ;;  %v7607_v24 = vmul.f32 %v7524_v19, %v20245_v18  ;;  %v17374_v56 = vmax.f32 %v17305_v22, 0.0  ;;  %v17378_v52 = vadd.f32 %v20189_v1, %v20247_v42 }
 0x4e7   : > { %v17382_v26 = vadd.f32 %v12308_v55, %v12144_v17  ;;  %v7441_v39 = vadd.f32 %v7409_v28, %v7245_v41  ;;  %v6180_v12 = vrot.slane %v6004_v10, %v20069_v44  ;;  %v6344_v5 = vrot.slane %v6004_v10, %v20070_v27 }
 0x4e8   : > { %v7051_v13 = vadd.f32 %v7019_v8, %v6855_v54  ;;  %v6540_v20 = vrot.slane %v6004_v10, %v20071_v31  ;;  %v6736_v15 = vrot.slane %v6004_v10, %v20072_v30  ;;  %v6932_v22 = vrot.slane %v6004_v10, %v20073_v29 }
 0x4e9   : > { %20249 = vst [vmem:[#allocation36_spill] sm:$0xff] %v17382_v26  ;;  %v7637_v25 = vadd.f32 %v7605_v35, %v7441_v39  ;;  %v6266_v23 = vmul.f32 %v6180_v12, %v20237_v0  ;;  %v6430_v9 = vmul.f32 %v6344_v5, %v20238_v32  ;;  %v7128_v55 = vrot.slane %v6004_v10, %v20074_v60  ;;  %v20251_v26 = vld [vmem:[#allocation53_spill] sm:$0xff] }
 0x4ea   : > { %v7247_v3 = vadd.f32 %v7215_v50, %v7051_v13  ;;  %v6626_v28 = vmul.f32 %v6540_v20, %v20240_v40  ;;  %v6822_v58 = vmul.f32 %v6736_v15, %v20241_v51  ;;  %v7018_v8 = vmul.f32 %v6932_v22, %v20242_v57 }
 0x4eb   : > { %v6462_v6 = vadd.f32 %v6430_v9, %v6266_v23  ;;  %v7214_v19 = vmul.f32 %v7128_v55, %v20243_v63  ;;  %v7324_v17 = vrot.slane %v6004_v10, %v20075_v59  ;;  %v7520_v35 = vrot.slane %v6004_v10, %v20076_v46 }
 0x4ec   : > { %v7443_v41 = vadd.f32 %v7411_v38, %v7247_v3  ;;  %v6188_v54 = vrot.slane %v6006_v34, %v20069_v44  ;;  %v6352_v42 = vrot.slane %v6006_v34, %v20070_v27  ;;  %v6548_v50 = vrot.slane %v6006_v34, %v20071_v31 }
 0x4ed   : > { %v6658_v39 = vadd.f32 %v6626_v28, %v6462_v6  ;;  %v7410_v12 = vmul.f32 %v7324_v17, %v20244_v37  ;;  %v7606_v5 = vmul.f32 %v7520_v35, %v20245_v18  ;;  %v6744_v13 = vrot.slane %v6006_v34, %v20072_v30 }
 0x4ee   : > { %v7639_v20 = vadd.f32 %v7607_v24, %v7443_v41  ;;  %v6268_v15 = vmul.f32 %v6188_v54, %v20237_v0  ;;  %v6432_v22 = vmul.f32 %v6352_v42, %v20238_v32  ;;  %v6628_v10 = vmul.f32 %v6548_v50, %v20240_v40 }
 0x4ef   : > { %v6854_v38 = vadd.f32 %v6822_v58, %v6658_v39  ;;  %v6824_v23 = vmul.f32 %v6744_v13, %v20241_v51  ;;  %v6940_v9 = vrot.slane %v6006_v34, %v20073_v29  ;;  %v7136_v55 = vrot.slane %v6006_v34, %v20074_v60 }
 0x4f0   : > { %v6464_v3 = vadd.f32 %v6432_v22, %v6268_v15  ;;  %v7332_v28 = vrot.slane %v6006_v34, %v20075_v59  ;;  %v7528_v6 = vrot.slane %v6006_v34, %v20076_v46  ;;  %v7712_v24 = vrot.slane %v17374_v56, %v20069_v44 }
 0x4f1   : > { %v7050_v17 = vadd.f32 %v7018_v8, %v6854_v38  ;;  %v7020_v35 = vmul.f32 %v6940_v9, %v20242_v57  ;;  %v7216_v41 = vmul.f32 %v7136_v55, %v20243_v63  ;;  %v7908_v58 = vrot.slane %v17374_v56, %v20070_v27 }
 0x4f2   : > { %v6660_v54 = vadd.f32 %v6628_v10, %v6464_v3  ;;  %v7412_v42 = vmul.f32 %v7332_v28, %v20244_v37  ;;  %v7608_v50 = vmul.f32 %v7528_v6, %v20245_v18  ;;  %v7801_v39 = vmul.f32 %v7712_v24, %v20146_v36 }
 0x4f3   : > { %v7246_v13 = vadd.f32 %v7214_v19, %v7050_v17  ;;  %v7997_v34 = vmul.f32 %v7908_v58, %v20147_v43  ;;  %v8104_v8 = vrot.slane %v17374_v56, %v20071_v31  ;;  %v8300_v15 = vrot.slane %v17374_v56, %v20072_v30 }
 0x4f4   : > { %v6856_v22 = vadd.f32 %v6824_v23, %v6660_v54  ;;  %v7833_v38 = vadd.f32 %v7801_v39, %v7637_v25  ;;  %v8496_v10 = vrot.slane %v17374_v56, %v20073_v29  ;;  %v8692_v9 = vrot.slane %v17374_v56, %v20074_v60 }
 0x4f5   : > { %v7442_v55 = vadd.f32 %v7410_v12, %v7246_v13  ;;  %v8193_v3 = vmul.f32 %v8104_v8, %v16175_v45  ;;  %v8389_v19 = vmul.f32 %v8300_v15, %v16079_v16  ;;  %v8888_v28 = vrot.slane %v17374_v56, %v20075_v59  ;;  %v20250_v8 = vld [vmem:[#allocation22_spill] sm:$0xff] }
 0x4f6   : > { %v7052_v6 = vadd.f32 %v7020_v35, %v6856_v22  ;;  %v8029_v24 = vadd.f32 %v7997_v34, %v7833_v38  ;;  %v8585_v17 = vmul.f32 %v8496_v10, %v16119_v21  ;;  %v8781_v25 = vmul.f32 %v8692_v9, %v20196_v49  ;;  %v20252_v34 = vld [vmem:[#allocation42_spill] sm:$0xff] }
 0x4f7   : > { %v7638_v23 = vadd.f32 %v7606_v5, %v7442_v55  ;;  %v8977_v58 = vmul.f32 %v8888_v28, %v20197_v2  ;;  %v9084_v54 = vrot.slane %v17374_v56, %v20076_v46  ;;  %v6037_v12 = vmax.f32 %v17378_v52, 0.0 }
 0x4f8   : > { %v7248_v39 = vadd.f32 %v7216_v41, %v7052_v6  ;;  %v8225_v13 = vadd.f32 %v8193_v3, %v8029_v24  ;;  %v5908_v15 = vadd.f32 %v20189_v1, %v20250_v8  ;;  %v5910_v35 = vadd.f32 %v20189_v1, %v20251_v26  ;;  %v20253_v1 = vld [vmem:[#allocation66_spill] sm:$0xff] }
 0x4f9   : > { %v9173_v22 = vmul.f32 %v9084_v54, %v20252_v34  ;;  %v7720_v38 = vrot.slane %v6037_v12, %v20069_v44  ;;  %v7916_v5 = vrot.slane %v6037_v12, %v20070_v27  ;;  %v8112_v10 = vrot.slane %v6037_v12, %v20071_v31 }
 0x4fa   : > { %v7444_v9 = vadd.f32 %v7412_v42, %v7248_v39  ;;  %v8421_v56 = vadd.f32 %v8389_v19, %v8225_v13  ;;  %v8308_v52 = vrot.slane %v6037_v12, %v20072_v30  ;;  %v8504_v41 = vrot.slane %v6037_v12, %v20073_v29 }
 0x4fb   : > { %v7803_v55 = vmul.f32 %v7720_v38, %v20146_v36  ;;  %v7999_v3 = vmul.f32 %v7916_v5, %v20147_v43  ;;  %v8195_v26 = vmul.f32 %v8112_v10, %v16175_v45  ;;  %v8700_v28 = vrot.slane %v6037_v12, %v20074_v60  ;;  %v20254_v10 = vld [vmem:[#allocation27_spill] sm:$0xff] }
 0x4fc   : > { %v7640_v6 = vadd.f32 %v7608_v50, %v7444_v9  ;;  %v8617_v24 = vadd.f32 %v8585_v17, %v8421_v56  ;;  %v8391_v54 = vmul.f32 %v8308_v52, %v16079_v16  ;;  %v8587_v8 = vmul.f32 %v8504_v41, %v16119_v21  ;;  %v20255_v9 = vld [vmem:[#allocation55_spill] sm:$0xff] }
 0x4fd   : > { %v7835_v42 = vadd.f32 %v7803_v55, %v7639_v20  ;;  %v8783_v19 = vmul.f32 %v8700_v28, %v20196_v49  ;;  %v8896_v39 = vrot.slane %v6037_v12, %v20075_v59  ;;  %v9092_v13 = vrot.slane %v6037_v12, %v20076_v46 }
 0x4fe   : > { %v8813_v38 = vadd.f32 %v8781_v25, %v8617_v24  ;;  %v6036_v14 = vmax.f32 %v5908_v15, 0.0  ;;  %v6038_v5 = vmax.f32 %v5910_v35, 0.0  ;;  %v5939_v18 = vadd.f32 %v20254_v10, %v20253_v1 }
 0x4ff   : > { %v8031_v37 = vadd.f32 %v7999_v3, %v7835_v42  ;;  %v8979_v50 = vmul.f32 %v8896_v39, %v20197_v2  ;;  %v9175_v17 = vmul.f32 %v9092_v13, %v20252_v34  ;;  %v17465_v20 = vadd.f32 %v20254_v10, %v20255_v9 }
 0x500   : > { %v9009_v56 = vadd.f32 %v8977_v58, %v8813_v38  ;;  %v7716_v52 = vrot.slane %v6036_v14, %v20069_v44  ;;  %v7912_v12 = vrot.slane %v6036_v14, %v20070_v27  ;;  %v8108_v25 = vrot.slane %v6036_v14, %v20071_v31 }
 0x501   : > { %v8227_v15 = vadd.f32 %v8195_v26, %v8031_v37  ;;  %v8304_v35 = vrot.slane %v6036_v14, %v20072_v30  ;;  %v8500_v1 = vrot.slane %v6036_v14, %v20073_v29  ;;  %v8696_v41 = vrot.slane %v6036_v14, %v20074_v60 }
 0x502   : > { %v9205_v55 = vadd.f32 %v9173_v22, %v9009_v56  ;;  %v7802_v3 = vmul.f32 %v7716_v52, %v20146_v36  ;;  %v7998_v28 = vmul.f32 %v7912_v12, %v20147_v43  ;;  %v8194_v58 = vmul.f32 %v8108_v25, %v16175_v45  ;;  %v17485_v12 = vpop.f32.mrb[36].mxu0 }
 0x503   : > { %v8423_v24 = vadd.f32 %v8391_v54, %v8227_v15  ;;  %v8390_v42 = vmul.f32 %v8304_v35, %v16079_v16  ;;  %v8586_v39 = vmul.f32 %v8500_v1, %v16119_v21  ;;  %v8782_v37 = vmul.f32 %v8696_v41, %v20196_v49  ;;  %20256 = vst [vmem:[#allocation6_spill] sm:$0xff] %v17485_v12 }
 0x504   : > { %v7834_v26 = vadd.f32 %v7802_v3, %v7638_v23  ;;  %v8892_v13 = vrot.slane %v6036_v14, %v20075_v59  ;;  %v9088_v38 = vrot.slane %v6036_v14, %v20076_v46  ;;  %v7724_v22 = vrot.slane %v6038_v5, %v20069_v44 }
 0x505   : > { %v8619_v9 = vadd.f32 %v8587_v8, %v8423_v24  ;;  %v7920_v56 = vrot.slane %v6038_v5, %v20070_v27  ;;  %v8116_v52 = vrot.slane %v6038_v5, %v20071_v31  ;;  %v8312_v54 = vrot.slane %v6038_v5, %v20072_v30 }
 0x506   : > { %v8030_v25 = vadd.f32 %v7998_v28, %v7834_v26  ;;  %v8978_v15 = vmul.f32 %v8892_v13, %v20197_v2  ;;  %v9174_v23 = vmul.f32 %v9088_v38, %v20252_v34  ;;  %v7804_v35 = vmul.f32 %v7724_v22, %v20146_v36 }
 0x507   : > { %v8815_v1 = vadd.f32 %v8783_v19, %v8619_v9  ;;  %v8000_v14 = vmul.f32 %v7920_v56, %v20147_v43  ;;  %v8196_v8 = vmul.f32 %v8116_v52, %v16175_v45  ;;  %v8392_v41 = vmul.f32 %v8312_v54, %v16079_v16 }
 0x508   : > { %v8226_v3 = vadd.f32 %v8194_v58, %v8030_v25  ;;  %v7836_v24 = vadd.f32 %v7804_v35, %v7640_v6  ;;  %v8508_v63 = vrot.slane %v6038_v5, %v20073_v29  ;;  %v8704_v12 = vrot.slane %v6038_v5, %v20074_v60 }
 0x509   : > { %v9011_v28 = vadd.f32 %v8979_v50, %v8815_v1  ;;  %v8900_v26 = vrot.slane %v6038_v5, %v20075_v59  ;;  %v9096_v13 = vrot.slane %v6038_v5, %v20076_v46  ;;  %v6067_v38 = vmax.f32 %v5939_v18, 0.0 }
 0x50a   : > { %v8422_v22 = vadd.f32 %v8390_v42, %v8226_v3  ;;  %v8032_v19 = vadd.f32 %v8000_v14, %v7836_v24  ;;  %v8588_v9 = vmul.f32 %v8508_v63, %v16119_v21  ;;  %v8784_v56 = vmul.f32 %v8704_v12, %v20196_v49  ;;  %v20257_v14 = vld [vmem:[#allocation43_spill] sm:$0xff] }
 0x50b   : > { %v9207_v52 = vadd.f32 %v9175_v17, %v9011_v28  ;;  %v8980_v58 = vmul.f32 %v8900_v26, %v20197_v2  ;;  %v9176_v6 = vmul.f32 %v9096_v13, %v20252_v34  ;;  %v9280_v54 = vrot.slane %v6067_v38, %v20069_v44 }
 0x50c   : > { %v8618_v25 = vadd.f32 %v8586_v39, %v8422_v22  ;;  %v8228_v50 = vadd.f32 %v8196_v8, %v8032_v19  ;;  %v9476_v35 = vrot.slane %v6067_v38, %v20070_v27  ;;  %v9672_v5 = vrot.slane %v6067_v38, %v20071_v31 }
 0x50d   : > { %v9369_v18 = vmul.f32 %v9280_v54, %v16263_v48  ;;  %v9868_v42 = vrot.slane %v6067_v38, %v20072_v30  ;;  %v10064_v63 = vrot.slane %v6067_v38, %v20073_v29  ;;  %v10260_v17 = vrot.slane %v6067_v38, %v20074_v60 }
 0x50e   : > { %v8814_v12 = vadd.f32 %v8782_v37, %v8618_v25  ;;  %v8424_v1 = vadd.f32 %v8392_v41, %v8228_v50  ;;  %v9565_v3 = vmul.f32 %v9476_v35, %v20257_v14  ;;  %v9761_v24 = vmul.f32 %v9672_v5, %v16233_v61  ;;  %v20258_v41 = vld [vmem:[#allocation80_spill] sm:$0xff]  ;;  %v20259_v50 = vld [vmem:[#allocation46_spill] sm:$0xff] }
 0x50f   : > { %v9401_v39 = vadd.f32 %v9369_v18, %v9205_v55  ;;  %v9957_v8 = vmul.f32 %v9868_v42, %v16286_v62  ;;  %v10153_v28 = vmul.f32 %v10064_v63, %v16261_v7  ;;  %v10349_v26 = vmul.f32 %v10260_v17, %v20210_v33  ;;  %v20260_v42 = vld [vmem:[#allocation74_spill] sm:$0xff] }
 0x510   : > { %v9010_v13 = vadd.f32 %v8978_v15, %v8814_v12  ;;  %v8620_v22 = vadd.f32 %v8588_v9, %v8424_v1  ;;  %v10456_v19 = vrot.slane %v6067_v38, %v20075_v59  ;;  %v10652_v54 = vrot.slane %v6067_v38, %v20076_v46 }
 0x511   : > { %v9597_v34 = vadd.f32 %v9565_v3, %v9401_v39  ;;  %v6069_v37 = vmax.f32 %v17465_v20, 0.0  ;;  %v5940_v25 = vadd.f32 %v20254_v10, %v20258_v41  ;;  %v5942_v55 = vadd.f32 %v20254_v10, %v20259_v50 }
 0x512   : > { %v9206_v35 = vadd.f32 %v9174_v23, %v9010_v13  ;;  %v8816_v5 = vadd.f32 %v8784_v56, %v8620_v22  ;;  %v10545_v18 = vmul.f32 %v10456_v19, %v20211_v4  ;;  %v10741_v15 = vmul.f32 %v10652_v54, %v20260_v42 }
 0x513   : > { %v9793_v9 = vadd.f32 %v9761_v24, %v9597_v34  ;;  %v9288_v63 = vrot.slane %v6069_v37, %v20069_v44  ;;  %v9484_v38 = vrot.slane %v6069_v37, %v20070_v27  ;;  %v9680_v17 = vrot.slane %v6069_v37, %v20071_v31 }
 0x514   : > { %v9012_v20 = vadd.f32 %v8980_v58, %v8816_v5  ;;  %v9876_v12 = vrot.slane %v6069_v37, %v20072_v30  ;;  %v10072_v1 = vrot.slane %v6069_v37, %v20073_v29  ;;  %v10268_v3 = vrot.slane %v6069_v37, %v20074_v60 }
 0x515   : > { %v9989_v23 = vadd.f32 %v9957_v8, %v9793_v9  ;;  %v9371_v56 = vmul.f32 %v9288_v63, %v16263_v48  ;;  %v9567_v39 = vmul.f32 %v9484_v38, %v20257_v14  ;;  %v9763_v34 = vmul.f32 %v9680_v17, %v16233_v61  ;;  %v20261_v9 = vld [vmem:[#allocation54_spill] sm:$0xff]  ;;  %v20262_v38 = vld [vmem:[#allocation47_spill] sm:$0xff] }
 0x516   : > { %v9208_v24 = vadd.f32 %v9176_v6, %v9012_v20  ;;  %v9959_v13 = vmul.f32 %v9876_v12, %v16286_v62  ;;  %v10155_v22 = vmul.f32 %v10072_v1, %v16261_v7  ;;  %v10351_v58 = vmul.f32 %v10268_v3, %v20210_v33 }
 0x517   : > { %v10185_v19 = vadd.f32 %v10153_v28, %v9989_v23  ;;  %v9403_v54 = vadd.f32 %v9371_v56, %v9207_v52  ;;  %v10464_v41 = vrot.slane %v6069_v37, %v20075_v59  ;;  %v10660_v50 = vrot.slane %v6069_v37, %v20076_v46  ;;  %v17544_v52 = vpop.f32.mrb[36].mxu1 }
 0x518   : > { %v6068_v8 = vmax.f32 %v5940_v25, 0.0  ;;  %v6070_v5 = vmax.f32 %v5942_v55, 0.0  ;;  %v5971_v63 = vadd.f32 %v20217_v11, %v20261_v9  ;;  %v17540_v6 = vadd.f32 %v20217_v11, %v20262_v38  ;;  %20263 = vst [vmem:[#allocation4_spill] sm:$0xff] %v17544_v52 }
 0x519   : > { %v10381_v17 = vadd.f32 %v10349_v26, %v10185_v19  ;;  %v9599_v20 = vadd.f32 %v9567_v39, %v9403_v54  ;;  %v10547_v12 = vmul.f32 %v10464_v41, %v20211_v4  ;;  %v10743_v28 = vmul.f32 %v10660_v50, %v20260_v42 }
 0x51a   : > { %v9284_v1 = vrot.slane %v6068_v8, %v20069_v44  ;;  %v9480_v37 = vrot.slane %v6068_v8, %v20070_v27  ;;  %v9676_v25 = vrot.slane %v6068_v8, %v20071_v31  ;;  %v9872_v55 = vrot.slane %v6068_v8, %v20072_v30 }
 0x51b   : > { %v10577_v3 = vadd.f32 %v10545_v18, %v10381_v17  ;;  %v9795_v23 = vadd.f32 %v9763_v34, %v9599_v20  ;;  %v10068_v56 = vrot.slane %v6068_v8, %v20073_v29  ;;  %v10264_v26 = vrot.slane %v6068_v8, %v20074_v60  ;;  %v17558_v18 = vpop.f32.mrb[37].mxu0 }
 0x51c   : > { %v9370_v39 = vmul.f32 %v9284_v1, %v16263_v48  ;;  %v9566_v19 = vmul.f32 %v9480_v37, %v20257_v14  ;;  %v9762_v54 = vmul.f32 %v9676_v25, %v16233_v61  ;;  %v9958_v41 = vmul.f32 %v9872_v55, %v16286_v62  ;;  %20264 = vst [vmem:[#allocation5_spill] sm:$0xff] %v17558_v18 }
 0x51d   : > { %v10773_v50 = vadd.f32 %v10741_v15, %v10577_v3  ;;  %v9991_v9 = vadd.f32 %v9959_v13, %v9795_v23  ;;  %v10154_v38 = vmul.f32 %v10068_v56, %v16261_v7  ;;  %v10350_v52 = vmul.f32 %v10264_v26, %v20210_v33 }
 0x51e   : > { %v9402_v34 = vadd.f32 %v9370_v39, %v9206_v35  ;;  %v10460_v17 = vrot.slane %v6068_v8, %v20075_v59  ;;  %v10656_v20 = vrot.slane %v6068_v8, %v20076_v46  ;;  %v9292_v1 = vrot.slane %v6070_v5, %v20069_v44  ;;  %v17572_v39 = vpop.f32.mrb[37].mxu1 }
 0x51f   : > { %v10187_v37 = vadd.f32 %v10155_v22, %v9991_v9  ;;  %v9488_v25 = vrot.slane %v6070_v5, %v20070_v27  ;;  %v9684_v55 = vrot.slane %v6070_v5, %v20071_v31  ;;  %v9880_v15 = vrot.slane %v6070_v5, %v20072_v30 }
 0x520   : > { %v9598_v13 = vadd.f32 %v9566_v19, %v9402_v34  ;;  %v10546_v3 = vmul.f32 %v10460_v17, %v20211_v4  ;;  %v10742_v23 = vmul.f32 %v10656_v20, %v20260_v42  ;;  %v9372_v35 = vmul.f32 %v9292_v1, %v16263_v48 }
 0x521   : > { %v10383_v56 = vadd.f32 %v10351_v58, %v10187_v37  ;;  %v9568_v26 = vmul.f32 %v9488_v25, %v20257_v14  ;;  %v9764_v8 = vmul.f32 %v9684_v55, %v16233_v61  ;;  %v9960_v22 = vmul.f32 %v9880_v15, %v16286_v62  ;;  %v20275_v14 = vld [vmem:[#allocation35_spill] sm:$0xff] }
 0x522   : > { %v9794_v9 = vadd.f32 %v9762_v54, %v9598_v13  ;;  %v9404_v18 = vadd.f32 %v9372_v35, %v9208_v24  ;;  %v10076_v10 = vrot.slane %v6070_v5, %v20073_v29  ;;  %v10272_v19 = vrot.slane %v6070_v5, %v20074_v60 }
 0x523   : > { %v10579_v34 = vadd.f32 %v10547_v12, %v10383_v56  ;;  %v10468_v17 = vrot.slane %v6070_v5, %v20075_v59  ;;  %v10664_v20 = vrot.slane %v6070_v5, %v20076_v46  ;;  %v6099_v58 = vmax.f32 %v5971_v63, 0.0  ;;  %v17585_v63 = vpop.f32.mrb[38].mxu0 }
 0x524   : > { %v9990_v1 = vadd.f32 %v9958_v41, %v9794_v9  ;;  %v9600_v37 = vadd.f32 %v9568_v26, %v9404_v18  ;;  %v10156_v25 = vmul.f32 %v10076_v10, %v16261_v7  ;;  %v10352_v55 = vmul.f32 %v10272_v19, %v20210_v33 }
 0x525   : > { %v10775_v15 = vadd.f32 %v10743_v28, %v10579_v34  ;;  %v10548_v54 = vmul.f32 %v10468_v17, %v20211_v4  ;;  %v10744_v24 = vmul.f32 %v10664_v20, %v20260_v42  ;;  %v10848_v13 = vrot.slane %v6099_v58, %v20069_v44  ;;  %v20266_v17 = vld [vmem:[#allocation18_spill] sm:$0xff]  ;;  %v20268_v42 = vld [vmem:[#allocation7_spill] sm:$0xff] }
 0x526   : > { %v10186_v35 = vadd.f32 %v10154_v38, %v9990_v1  ;;  %v9796_v12 = vadd.f32 %v9764_v8, %v9600_v37  ;;  %v11044_v56 = vrot.slane %v6099_v58, %v20070_v27  ;;  %v11240_v5 = vrot.slane %v6099_v58, %v20071_v31  ;;  %v20265_v38 = vld [vmem:[#allocation70_spill] sm:$0xff]  ;;  %v20267_v1 = vld [vmem:[#allocation15_spill] sm:$0xff] }
 0x527   : > { %v10937_v41 = vmul.f32 %v10848_v13, %v16361_v53  ;;  %v11436_v10 = vrot.slane %v6099_v58, %v20072_v30  ;;  %v11632_v28 = vrot.slane %v6099_v58, %v20073_v29  ;;  %v11828_v18 = vrot.slane %v6099_v58, %v20074_v60 }
 0x528   : > { %v10382_v26 = vadd.f32 %v10350_v52, %v10186_v35  ;;  %v9992_v9 = vadd.f32 %v9960_v22, %v9796_v12  ;;  %v11133_v19 = vmul.f32 %v11044_v56, %v16404_v47  ;;  %v11329_v8 = vmul.f32 %v11240_v5, %v20265_v38  ;;  %v20269_v22 = vld [vmem:[#allocation56_spill] sm:$0xff]  ;;  %v20270_v12 = vld [vmem:[#allocation10_spill] sm:$0xff] }
 0x529   : > { %v10969_v34 = vadd.f32 %v10937_v41, %v10773_v50  ;;  %v11525_v20 = vmul.f32 %v11436_v10, %v20266_v17  ;;  %v11721_v37 = vmul.f32 %v11632_v28, %v20267_v1  ;;  %v11917_v4 = vmul.f32 %v11828_v18, %v20268_v42  ;;  %v20271_v41 = vld [vmem:[#allocation8_spill] sm:$0xff] }
 0x52a   : > { %v10578_v13 = vadd.f32 %v10546_v3, %v10382_v26  ;;  %v10188_v33 = vadd.f32 %v10156_v25, %v9992_v9  ;;  %v12024_v7 = vrot.slane %v6099_v58, %v20075_v59  ;;  %v12220_v62 = vrot.slane %v6099_v58, %v20076_v46  ;;  %v20272_v28 = vld [vmem:[#allocation20_spill] sm:$0xff] }
 0x52b   : > { %v11165_v61 = vadd.f32 %v11133_v19, %v10969_v34  ;;  %v6101_v52 = vmax.f32 %v17540_v6, 0.0  ;;  %v5972_v35 = vadd.f32 %v20217_v11, %v20269_v22  ;;  %v5974_v50 = vadd.f32 %v20217_v11, %v20270_v12 }
 0x52c   : > { %v10774_v56 = vadd.f32 %v10742_v23, %v10578_v13  ;;  %v10384_v5 = vadd.f32 %v10352_v55, %v10188_v33  ;;  %v12113_v10 = vmul.f32 %v12024_v7, %v20271_v41  ;;  %v12309_v3 = vmul.f32 %v12220_v62, %v20272_v28  ;;  %v17617_v13 = vpop.f32.mrb[38].mxu1 }
 0x52d   : > { %v11361_v25 = vadd.f32 %v11329_v8, %v11165_v61  ;;  %v10856_v18 = vrot.slane %v6101_v52, %v20069_v44  ;;  %v11052_v58 = vrot.slane %v6101_v52, %v20070_v27  ;;  %v11248_v26 = vrot.slane %v6101_v52, %v20071_v31  ;;  %20273 = vst [vmem:[#allocation9_spill] sm:$0xff] %v17617_v13 }
 0x52e   : > { %v10580_v6 = vadd.f32 %v10548_v54, %v10384_v5  ;;  %v11444_v9 = vrot.slane %v6101_v52, %v20072_v30  ;;  %v11640_v19 = vrot.slane %v6101_v52, %v20073_v29  ;;  %v11836_v34 = vrot.slane %v6101_v52, %v20074_v60 }
 0x52f   : > { %v11557_v23 = vadd.f32 %v11525_v20, %v11361_v25  ;;  %v10939_v33 = vmul.f32 %v10856_v18, %v16361_v53  ;;  %v11135_v7 = vmul.f32 %v11052_v58, %v16404_v47  ;;  %v11331_v61 = vmul.f32 %v11248_v26, %v20265_v38  ;;  %v20274_v58 = vld [vmem:[#allocation13_spill] sm:$0xff] }
 0x530   : > { %v10776_v62 = vadd.f32 %v10744_v24, %v10580_v6  ;;  %v11527_v55 = vmul.f32 %v11444_v9, %v20266_v17  ;;  %v11723_v8 = vmul.f32 %v11640_v19, %v20267_v1  ;;  %v11919_v54 = vmul.f32 %v11836_v34, %v20268_v42  ;;  %v20276_v24 = vld [vmem:[#allocation14_spill] sm:$0xff]  ;;  %v17627_v9 = vpop.f32.mrb[39].mxu0  ;;  %v17629_v19 = vpop.f32.mrb[39].mxu1 }
 0x531   : > { %v11753_v22 = vadd.f32 %v11721_v37, %v11557_v23  ;;  %v10971_v12 = vadd.f32 %v10939_v33, %v10775_v15  ;;  %v12032_v5 = vrot.slane %v6101_v52, %v20075_v59  ;;  %v12228_v20 = vrot.slane %v6101_v52, %v20076_v46  ;;  %20277 = vst [vmem:[#allocation2_spill] sm:$0xff] %v17627_v9 }
 0x532   : > { %v6100_v25 = vmax.f32 %v5972_v35, 0.0  ;;  %v6102_v18 = vmax.f32 %v5974_v50, 0.0  ;;  %v5879_v26 = vadd.f32 %v20275_v14, %v20274_v58  ;;  %v17625_v6 = vadd.f32 %v20275_v14, %v20276_v24  ;;  %20278 = vst [vmem:[#allocation3_spill] sm:$0xff] %v17629_v19 }
 0x533   : > { %v11949_v34 = vadd.f32 %v11917_v4, %v11753_v22  ;;  %v11167_v37 = vadd.f32 %v11135_v7, %v10971_v12  ;;  %v12115_v15 = vmul.f32 %v12032_v5, %v20271_v41  ;;  %v12311_v23 = vmul.f32 %v12228_v20, %v20272_v28 }
 0x534   : > { %v10852_v52 = vrot.slane %v6100_v25, %v20069_v44  ;;  %v11048_v35 = vrot.slane %v6100_v25, %v20070_v27  ;;  %v11244_v50 = vrot.slane %v6100_v25, %v20071_v31  ;;  %v11440_v33 = vrot.slane %v6100_v25, %v20072_v30 }
 0x535   : > { %v12145_v58 = vadd.f32 %v12113_v10, %v11949_v34  ;;  %v11363_v24 = vadd.f32 %v11331_v61, %v11167_v37  ;;  %v11636_v48 = vrot.slane %v6100_v25, %v20073_v29  ;;  %v11832_v19 = vrot.slane %v6100_v25, %v20074_v60  ;;  %v17647_v61 = vpop.f32.mrb[40].mxu0  ;;  %v17649_v34 = vpop.f32.mrb[40].mxu1 }
 0x536   : > { %v10938_v4 = vmul.f32 %v10852_v52, %v16361_v53  ;;  %v11134_v7 = vmul.f32 %v11048_v35, %v16404_v47  ;;  %v11330_v22 = vmul.f32 %v11244_v50, %v20265_v38  ;;  %v11526_v12 = vmul.f32 %v11440_v33, %v20266_v17  ;;  %20279 = vst [vmem:[#allocation17_spill] sm:$0xff] %v17647_v61 }
 0x537   : > { %v17643_v5 = vadd.f32 %v12309_v3, %v12145_v58  ;;  %v11559_v20 = vadd.f32 %v11527_v55, %v11363_v24  ;;  %v11722_v9 = vmul.f32 %v11636_v48, %v20267_v1  ;;  %v11918_v10 = vmul.f32 %v11832_v19, %v20268_v42  ;;  %20280 = vst [vmem:[#allocation58_spill] sm:$0xff] %v17649_v34 }
 0x538   : > { %v10970_v37 = vadd.f32 %v10938_v4, %v10774_v56  ;;  %v12028_v52 = vrot.slane %v6100_v25, %v20075_v59  ;;  %v12224_v35 = vrot.slane %v6100_v25, %v20076_v46  ;;  %v10860_v50 = vrot.slane %v6102_v18, %v20069_v44 }
 0x539   : > { %v11755_v13 = vadd.f32 %v11723_v8, %v11559_v20  ;;  %v11056_v3 = vrot.slane %v6102_v18, %v20070_v27  ;;  %v11252_v55 = vrot.slane %v6102_v18, %v20071_v31  ;;  %v11448_v48 = vrot.slane %v6102_v18, %v20072_v30 }
 0x53a   : > { %v11166_v33 = vadd.f32 %v11134_v7, %v10970_v37  ;;  %v12114_v19 = vmul.f32 %v12028_v52, %v20271_v41  ;;  %v12310_v58 = vmul.f32 %v12224_v35, %v20272_v28  ;;  %v10940_v56 = vmul.f32 %v10860_v50, %v16361_v53 }
 0x53b   : > { %v11951_v24 = vadd.f32 %v11919_v54, %v11755_v13  ;;  %v11136_v4 = vmul.f32 %v11056_v3, %v16404_v47  ;;  %v11332_v25 = vmul.f32 %v11252_v55, %v20265_v38  ;;  %v11528_v8 = vmul.f32 %v11448_v48, %v20266_v17  ;;  %v20290_v17 = vld [vmem:[#allocation37_spill] sm:$0xff] }
 0x53c   : > { %v11362_v20 = vadd.f32 %v11330_v22, %v11166_v33  ;;  %v10972_v34 = vadd.f32 %v10940_v56, %v10776_v62  ;;  %v11644_v61 = vrot.slane %v6102_v18, %v20073_v29  ;;  %v11840_v11 = vrot.slane %v6102_v18, %v20074_v60 }
 0x53d   : > { %v12147_v7 = vadd.f32 %v12115_v15, %v11951_v24  ;;  %v12036_v37 = vrot.slane %v6102_v18, %v20075_v59  ;;  %v12232_v52 = vrot.slane %v6102_v18, %v20076_v46  ;;  %v6007_v35 = vmax.f32 %v5879_v26, 0.0  ;;  %v17674_v15 = vpop.f32.mrb[41].mxu0 }
 0x53e   : > { %v11558_v50 = vadd.f32 %v11526_v12, %v11362_v20  ;;  %v11168_v54 = vadd.f32 %v11136_v4, %v10972_v34  ;;  %v11724_v13 = vmul.f32 %v11644_v61, %v20267_v1  ;;  %v11920_v3 = vmul.f32 %v11840_v11, %v20268_v42  ;;  %20281 = vst [vmem:[#allocation50_spill] sm:$0xff] %v17674_v15 }
 0x53f   : > { %v17669_v55 = vadd.f32 %v12311_v23, %v12147_v7  ;;  %v12116_v62 = vmul.f32 %v12036_v37, %v20271_v41  ;;  %v12312_v22 = vmul.f32 %v12232_v52, %v20272_v28  ;;  %v6192_v48 = vrot.slane %v6007_v35, %v20069_v44  ;;  %v20282_v7 = vld [vmem:[#allocation33_spill] sm:$0xff]  ;;  %v20283_v28 = vld [vmem:[#allocation38_spill] sm:$0xff] }
 0x540   : > { %v11754_v33 = vadd.f32 %v11722_v9, %v11558_v50  ;;  %v11364_v56 = vadd.f32 %v11332_v25, %v11168_v54  ;;  %v6356_v18 = vrot.slane %v6007_v35, %v20070_v27  ;;  %v6552_v26 = vrot.slane %v6007_v35, %v20071_v31 }
 0x541   : > { %v6269_v12 = vmul.f32 %v6192_v48, %v20237_v0  ;;  %v6748_v11 = vrot.slane %v6007_v35, %v20072_v30  ;;  %v6944_v23 = vrot.slane %v6007_v35, %v20073_v29  ;;  %v7140_v61 = vrot.slane %v6007_v35, %v20074_v60 }
 0x542   : > { %v11950_v34 = vadd.f32 %v11918_v10, %v11754_v33  ;;  %v11560_v24 = vadd.f32 %v11528_v8, %v11364_v56  ;;  %v6433_v4 = vmul.f32 %v6356_v18, %v20238_v32  ;;  %v6629_v20 = vmul.f32 %v6552_v26, %v20240_v40  ;;  %v20284_v33 = vld [vmem:[#allocation69_spill] sm:$0xff]  ;;  %v20285_v18 = vld [vmem:[#allocation72_spill] sm:$0xff] }
 0x543   : > { %v6825_v9 = vmul.f32 %v6748_v11, %v20241_v51  ;;  %v7021_v25 = vmul.f32 %v6944_v23, %v20242_v57  ;;  %v7217_v37 = vmul.f32 %v7140_v61, %v20282_v7  ;;  %v7336_v52 = vrot.slane %v6007_v35, %v20075_v59  ;;  %v17695_v11 = vpop.f32.mrb[41].mxu1 }
 0x544   : > { %v12146_v50 = vadd.f32 %v12114_v19, %v11950_v34  ;;  %v11756_v54 = vadd.f32 %v11724_v13, %v11560_v24  ;;  %v6465_v48 = vadd.f32 %v6433_v4, %v6269_v12  ;;  %v7532_v15 = vrot.slane %v6007_v35, %v20076_v46  ;;  %20286 = vst [vmem:[#allocation65_spill] sm:$0xff] %v17695_v11  ;;  %v20287_v13 = vld [vmem:[#allocation24_spill] sm:$0xff] }
 0x545   : > { %v7413_v10 = vmul.f32 %v7336_v52, %v20283_v28  ;;  %v6009_v8 = vmax.f32 %v17625_v6, 0.0  ;;  %v5880_v56 = vadd.f32 %v20275_v14, %v20284_v33  ;;  %v5882_v26 = vadd.f32 %v20275_v14, %v20285_v18 }
 0x546   : > { %v17697_v23 = vadd.f32 %v12310_v58, %v12146_v50  ;;  %v11952_v61 = vadd.f32 %v11920_v3, %v11756_v54  ;;  %v6661_v19 = vadd.f32 %v6629_v20, %v6465_v48  ;;  %v7609_v12 = vmul.f32 %v7532_v15, %v20287_v13 }
 0x547   : > { %v6200_v35 = vrot.slane %v6009_v8, %v20069_v44  ;;  %v6364_v34 = vrot.slane %v6009_v8, %v20070_v27  ;;  %v6560_v6 = vrot.slane %v6009_v8, %v20071_v31  ;;  %v6756_v24 = vrot.slane %v6009_v8, %v20072_v30 }
 0x548   : > { %v12148_v4 = vadd.f32 %v12116_v62, %v11952_v61  ;;  %v6857_v52 = vadd.f32 %v6825_v9, %v6661_v19  ;;  %v6952_v33 = vrot.slane %v6009_v8, %v20073_v29  ;;  %v7148_v18 = vrot.slane %v6009_v8, %v20074_v60 }
 0x549   : > { %v6271_v58 = vmul.f32 %v6200_v35, %v20237_v0  ;;  %v6435_v3 = vmul.f32 %v6364_v34, %v20238_v32  ;;  %v6631_v15 = vmul.f32 %v6560_v6, %v20240_v40  ;;  %v6827_v20 = vmul.f32 %v6756_v24, %v20241_v51  ;;  %v17716_v35 = vpop.f32.mrb[42].mxu0  ;;  %v20289_v6 = vld [vmem:[#allocation78_spill] sm:$0xff] }
 0x54a   : > { %v17710_v50 = vadd.f32 %v12312_v22, %v12148_v4  ;;  %v7053_v54 = vadd.f32 %v7021_v25, %v6857_v52  ;;  %v7023_v48 = vmul.f32 %v6952_v33, %v20242_v57  ;;  %v7219_v62 = vmul.f32 %v7148_v18, %v20282_v7  ;;  %20288 = vst [vmem:[#allocation22_spill] sm:$0xff] %v17716_v35  ;;  %v20291_v22 = vld [vmem:[#allocation61_spill] sm:$0xff] }
 0x54b   : > { %v6467_v9 = vadd.f32 %v6435_v3, %v6271_v58  ;;  %v7344_v61 = vrot.slane %v6009_v8, %v20075_v59  ;;  %v7540_v19 = vrot.slane %v6009_v8, %v20076_v46  ;;  %v6008_v11 = vmax.f32 %v5880_v56, 0.0 }
 0x54c   : > { %v7249_v34 = vadd.f32 %v7217_v37, %v7053_v54  ;;  %v6010_v14 = vmax.f32 %v5882_v26, 0.0  ;;  %v5911_v24 = vadd.f32 %v20290_v17, %v20289_v6  ;;  %v17722_v25 = vadd.f32 %v20290_v17, %v20291_v22 }
 0x54d   : > { %v6663_v4 = vadd.f32 %v6631_v15, %v6467_v9  ;;  %v7415_v52 = vmul.f32 %v7344_v61, %v20283_v28  ;;  %v7611_v33 = vmul.f32 %v7540_v19, %v20287_v13  ;;  %v6196_v18 = vrot.slane %v6008_v11, %v20069_v44 }
 0x54e   : > { %v7445_v8 = vadd.f32 %v7413_v10, %v7249_v34  ;;  %v6360_v56 = vrot.slane %v6008_v11, %v20070_v27  ;;  %v6556_v37 = vrot.slane %v6008_v11, %v20071_v31  ;;  %v6752_v26 = vrot.slane %v6008_v11, %v20072_v30 }
 0x54f   : > { %v6859_v58 = vadd.f32 %v6827_v20, %v6663_v4  ;;  %v6270_v3 = vmul.f32 %v6196_v18, %v20237_v0  ;;  %v6948_v54 = vrot.slane %v6008_v11, %v20073_v29  ;;  %v7144_v15 = vrot.slane %v6008_v11, %v20074_v60  ;;  %v17739_v4 = vpop.f32.mrb[42].mxu1 }
 0x550   : > { %v7641_v9 = vadd.f32 %v7609_v12, %v7445_v8  ;;  %v6434_v61 = vmul.f32 %v6360_v56, %v20238_v32  ;;  %v6630_v19 = vmul.f32 %v6556_v37, %v20240_v40  ;;  %v6826_v10 = vmul.f32 %v6752_v26, %v20241_v51  ;;  %20292 = vst [vmem:[#allocation53_spill] sm:$0xff] %v17739_v4 }
 0x551   : > { %v7055_v34 = vadd.f32 %v7023_v48, %v6859_v58  ;;  %v7022_v6 = vmul.f32 %v6948_v54, %v20242_v57  ;;  %v7218_v22 = vmul.f32 %v7144_v15, %v20282_v7  ;;  %v7340_v20 = vrot.slane %v6008_v11, %v20075_v59 }
 0x552   : > { %v6466_v18 = vadd.f32 %v6434_v61, %v6270_v3  ;;  %v7536_v35 = vrot.slane %v6008_v11, %v20076_v46  ;;  %v6204_v12 = vrot.slane %v6010_v14, %v20069_v44  ;;  %v6368_v8 = vrot.slane %v6010_v14, %v20070_v27 }
 0x553   : > { %v7251_v56 = vadd.f32 %v7219_v62, %v7055_v34  ;;  %v7414_v37 = vmul.f32 %v7340_v20, %v20283_v28  ;;  %v6564_v48 = vrot.slane %v6010_v14, %v20071_v31  ;;  %v6760_v26 = vrot.slane %v6010_v14, %v20072_v30 }
 0x554   : > { %v6662_v58 = vadd.f32 %v6630_v19, %v6466_v18  ;;  %v7610_v54 = vmul.f32 %v7536_v35, %v20287_v13  ;;  %v6272_v15 = vmul.f32 %v6204_v12, %v20237_v0  ;;  %v6436_v3 = vmul.f32 %v6368_v8, %v20238_v32 }
 0x555   : > { %v7447_v61 = vadd.f32 %v7415_v52, %v7251_v56  ;;  %v6632_v11 = vmul.f32 %v6564_v48, %v20240_v40  ;;  %v6828_v4 = vmul.f32 %v6760_v26, %v20241_v51  ;;  %v6956_v62 = vrot.slane %v6010_v14, %v20073_v29  ;;  %v17759_v26 = vpop.f32.mrb[43].mxu0 }
 0x556   : > { %v6858_v34 = vadd.f32 %v6826_v10, %v6662_v58  ;;  %v6468_v20 = vadd.f32 %v6436_v3, %v6272_v15  ;;  %v7152_v38 = vrot.slane %v6010_v14, %v20074_v60  ;;  %v7348_v47 = vrot.slane %v6010_v14, %v20075_v59  ;;  %20293 = vst [vmem:[#allocation66_spill] sm:$0xff] %v17759_v26 }
 0x557   : > { %v7643_v19 = vadd.f32 %v7611_v33, %v7447_v61  ;;  %v7024_v35 = vmul.f32 %v6956_v62, %v20242_v57  ;;  %v7544_v18 = vrot.slane %v6010_v14, %v20076_v46  ;;  %v6039_v12 = vmax.f32 %v5911_v24, 0.0 }
 0x558   : > { %v7054_v8 = vadd.f32 %v7022_v6, %v6858_v34  ;;  %v6664_v52 = vadd.f32 %v6632_v11, %v6468_v20  ;;  %v7220_v56 = vmul.f32 %v7152_v38, %v20282_v7  ;;  %v7416_v48 = vmul.f32 %v7348_v47, %v20283_v28 }
 0x559   : > { %v7612_v10 = vmul.f32 %v7544_v18, %v20287_v13  ;;  %v7728_v58 = vrot.slane %v6039_v12, %v20069_v44  ;;  %v7924_v15 = vrot.slane %v6039_v12, %v20070_v27  ;;  %v8120_v33 = vrot.slane %v6039_v12, %v20071_v31 }
 0x55a   : > { %v7250_v3 = vadd.f32 %v7218_v22, %v7054_v8  ;;  %v6860_v61 = vadd.f32 %v6828_v4, %v6664_v52  ;;  %v8316_v14 = vrot.slane %v6039_v12, %v20072_v30  ;;  %v8512_v24 = vrot.slane %v6039_v12, %v20073_v29 }
 0x55b   : > { %v7805_v38 = vmul.f32 %v7728_v58, %v20146_v36  ;;  %v8001_v47 = vmul.f32 %v7924_v15, %v20147_v43  ;;  %v8197_v6 = vmul.f32 %v8120_v33, %v16175_v45  ;;  %v8708_v11 = vrot.slane %v6039_v12, %v20074_v60  ;;  %v20294_v33 = vld [vmem:[#allocation77_spill] sm:$0xff] }
 0x55c   : > { %v7446_v62 = vadd.f32 %v7414_v37, %v7250_v3  ;;  %v7056_v34 = vadd.f32 %v7024_v35, %v6860_v61  ;;  %v8393_v20 = vmul.f32 %v8316_v14, %v16079_v16  ;;  %v8589_v18 = vmul.f32 %v8512_v24, %v16119_v21  ;;  %v17779_v37 = vpop.f32.mrb[43].mxu1  ;;  %v20296_v61 = vld [vmem:[#allocation42_spill] sm:$0xff]  ;;  %v20297_v14 = vld [vmem:[#allocation63_spill] sm:$0xff] }
 0x55d   : > { %v7837_v22 = vadd.f32 %v7805_v38, %v7641_v9  ;;  %v8785_v4 = vmul.f32 %v8708_v11, %v20196_v49  ;;  %v8904_v8 = vrot.slane %v6039_v12, %v20075_v59  ;;  %v9100_v52 = vrot.slane %v6039_v12, %v20076_v46  ;;  %20295 = vst [vmem:[#allocation55_spill] sm:$0xff] %v17779_v37 }
 0x55e   : > { %v7642_v58 = vadd.f32 %v7610_v54, %v7446_v62  ;;  %v7252_v26 = vadd.f32 %v7220_v56, %v7056_v34  ;;  %v6041_v15 = vmax.f32 %v17722_v25, 0.0  ;;  %v5912_v13 = vadd.f32 %v20290_v17, %v20294_v33 }
 0x55f   : > { %v8033_v35 = vadd.f32 %v8001_v47, %v7837_v22  ;;  %v8981_v3 = vmul.f32 %v8904_v8, %v20197_v2  ;;  %v9177_v9 = vmul.f32 %v9100_v52, %v20296_v61  ;;  %v5914_v24 = vadd.f32 %v20290_v17, %v20297_v14 }
 0x560   : > { %v7448_v38 = vadd.f32 %v7416_v48, %v7252_v26  ;;  %v7736_v12 = vrot.slane %v6041_v15, %v20069_v44  ;;  %v7932_v54 = vrot.slane %v6041_v15, %v20070_v27  ;;  %v8128_v25 = vrot.slane %v6041_v15, %v20071_v31 }
 0x561   : > { %v8229_v56 = vadd.f32 %v8197_v6, %v8033_v35  ;;  %v8324_v11 = vrot.slane %v6041_v15, %v20072_v30  ;;  %v8520_v62 = vrot.slane %v6041_v15, %v20073_v29  ;;  %v8716_v47 = vrot.slane %v6041_v15, %v20074_v60 }
 0x562   : > { %v7644_v34 = vadd.f32 %v7612_v10, %v7448_v38  ;;  %v7807_v22 = vmul.f32 %v7736_v12, %v20146_v36  ;;  %v8003_v8 = vmul.f32 %v7932_v54, %v20147_v43  ;;  %v8199_v48 = vmul.f32 %v8128_v25, %v16175_v45  ;;  %v20298_v12 = vld [vmem:[#allocation48_spill] sm:$0xff] }
 0x563   : > { %v8425_v26 = vadd.f32 %v8393_v20, %v8229_v56  ;;  %v8395_v52 = vmul.f32 %v8324_v11, %v16079_v16  ;;  %v8591_v33 = vmul.f32 %v8520_v62, %v16119_v21  ;;  %v8787_v6 = vmul.f32 %v8716_v47, %v20196_v49  ;;  %v20300_v20 = vld [vmem:[#allocation19_spill] sm:$0xff] }
 0x564   : > { %v7839_v35 = vadd.f32 %v7807_v22, %v7643_v19  ;;  %v8912_v14 = vrot.slane %v6041_v15, %v20075_v59  ;;  %v9108_v37 = vrot.slane %v6041_v15, %v20076_v46  ;;  %v6040_v28 = vmax.f32 %v5912_v13, 0.0 }
 0x565   : > { %v8621_v10 = vadd.f32 %v8589_v18, %v8425_v26  ;;  %v6042_v38 = vmax.f32 %v5914_v24, 0.0  ;;  %v20299_v54 = vrot.slane %v20298_v12, %v20073_v29  ;;  %v20301_v56 = vrot.slane %v20300_v20, %v20073_v29 }
 0x566   : > { %v8035_v62 = vadd.f32 %v8003_v8, %v7839_v35  ;;  %v8983_v19 = vmul.f32 %v8912_v14, %v20197_v2  ;;  %v9179_v47 = vmul.f32 %v9108_v37, %v20296_v61  ;;  %v7732_v15 = vrot.slane %v6040_v28, %v20069_v44  ;;  %v17816_v35 = vpop.f32.mrb[44].mxu0 }
 0x567   : > { %v11709_v25 = vmul.f32 %v20299_v54, %v20267_v1  ;;  %v11710_v11 = vmul.f32 %v20301_v56, %v20267_v1  ;;  %v8817_v13 = vadd.f32 %v8785_v4, %v8621_v10  ;;  %v7928_v18 = vrot.slane %v6040_v28, %v20070_v27  ;;  %20302 = vst [vmem:[#allocation80_spill] sm:$0xff] %v17816_v35 }
 0x568   : > { %v8124_v24 = vrot.slane %v6040_v28, %v20071_v31  ;;  %v8320_v22 = vrot.slane %v6040_v28, %v20072_v30  ;;  %v8231_v26 = vadd.f32 %v8199_v48, %v8035_v62  ;;  %v7806_v54 = vmul.f32 %v7732_v15, %v20146_v36  ;;  %v17823_v62 = vpop.f32.mrb[44].mxu1 }
 0x569   : > { %v8516_v17 = vrot.slane %v6040_v28, %v20073_v29  ;;  %v8712_v8 = vrot.slane %v6040_v28, %v20074_v60  ;;  %v9013_v14 = vadd.f32 %v8981_v3, %v8817_v13  ;;  %v8002_v37 = vmul.f32 %v7928_v18, %v20147_v43  ;;  %20303 = vst [vmem:[#allocation46_spill] sm:$0xff] %v17823_v62 }
 0x56a   : > { %v8198_v4 = vmul.f32 %v8124_v24, %v16175_v45  ;;  %v8394_v10 = vmul.f32 %v8320_v22, %v16079_v16  ;;  %v8427_v56 = vadd.f32 %v8395_v52, %v8231_v26  ;;  %v7838_v7 = vadd.f32 %v7806_v54, %v7642_v58 }
 0x56b   : > { %v8590_v57 = vmul.f32 %v8516_v17, %v16119_v21  ;;  %v8786_v48 = vmul.f32 %v8712_v8, %v20196_v49  ;;  %v17825_v15 = vadd.f32 %v9177_v9, %v9013_v14  ;;  %v8908_v51 = vrot.slane %v6040_v28, %v20075_v59 }
 0x56c   : > { %v9104_v3 = vrot.slane %v6040_v28, %v20076_v46  ;;  %v7740_v13 = vrot.slane %v6042_v38, %v20069_v44  ;;  %v8623_v18 = vadd.f32 %v8591_v33, %v8427_v56  ;;  %v8034_v24 = vadd.f32 %v8002_v37, %v7838_v7 }
 0x56d   : > { %v7936_v22 = vrot.slane %v6042_v38, %v20070_v27  ;;  %v8132_v58 = vrot.slane %v6042_v38, %v20071_v31  ;;  %v8982_v17 = vmul.f32 %v8908_v51, %v20197_v2  ;;  %v8328_v9 = vrot.slane %v6042_v38, %v20072_v30 }
 0x56e   : > { %v9178_v52 = vmul.f32 %v9104_v3, %v20296_v61  ;;  %v7808_v26 = vmul.f32 %v7740_v13, %v20146_v36  ;;  %v8819_v54 = vadd.f32 %v8787_v6, %v8623_v18  ;;  %v8230_v8 = vadd.f32 %v8198_v4, %v8034_v24  ;;  %v20304_v18 = vld [vmem:[#allocation12_spill] sm:$0xff] }
 0x56f   : > { %v8004_v28 = vmul.f32 %v7936_v22, %v20147_v43  ;;  %v8200_v14 = vmul.f32 %v8132_v58, %v16175_v45  ;;  %v8396_v7 = vmul.f32 %v8328_v9, %v16079_v16  ;;  %v8524_v37 = vrot.slane %v6042_v38, %v20073_v29  ;;  %v20307_v9 = vld [vmem:[#allocation28_spill] sm:$0xff] }
 0x570   : > { %v7840_v33 = vadd.f32 %v7808_v26, %v7644_v34  ;;  %v8720_v56 = vrot.slane %v6042_v38, %v20074_v60  ;;  %v9015_v51 = vadd.f32 %v8983_v19, %v8819_v54  ;;  %v8426_v62 = vadd.f32 %v8394_v10, %v8230_v8  ;;  %v17853_v26 = vpop.f32.mrb[45].mxu0 }
 0x571   : > { %v8916_v3 = vrot.slane %v6042_v38, %v20075_v59  ;;  %v9112_v13 = vrot.slane %v6042_v38, %v20076_v46  ;;  %v8592_v6 = vmul.f32 %v8524_v37, %v16119_v21  ;;  %v20305_v34 = vrot.slane %v20304_v18, %v20073_v29  ;;  %20306 = vst [vmem:[#allocation54_spill] sm:$0xff] %v17853_v26  ;;  %v20310_v37 = vld [vmem:[#allocation31_spill] sm:$0xff]  ;;  %v17889_v26 = vpop.permute.xlu1 %12364 }
 0x572   : > { %v8036_v35 = vadd.f32 %v8004_v28, %v7840_v33  ;;  %v8788_v4 = vmul.f32 %v8720_v56, %v20196_v49  ;;  %v17849_v22 = vadd.f32 %v9179_v47, %v9015_v51  ;;  %v8622_v58 = vadd.f32 %v8590_v57, %v8426_v62  ;;  %v20309_v28 = vld [vmem:[#allocation23_spill] sm:$0xff]  ;;  %20319 = vst [vmem:[#allocation47_spill] sm:$0xff] %v17889_v26 }
 0x573   : > { %v11711_v24 = vmul.f32 %v20305_v34, %v20267_v1  ;;  %v8984_v19 = vmul.f32 %v8916_v3, %v20197_v2  ;;  %v9180_v10 = vmul.f32 %v9112_v13, %v20296_v61  ;;  %v20308_v54 = vrot.slane %v20307_v9, %v20073_v29  ;;  %v20311_v47 = vld [vmem:[#allocation75_spill] sm:$0xff]  ;;  %v20314_v13 = vld [vmem:[#allocation60_spill] sm:$0xff] }
 0x574   : > { %v8232_v38 = vadd.f32 %v8200_v14, %v8036_v35  ;;  %v11741_v33 = vadd.f32 %v11709_v25, %v20309_v28  ;;  %v11742_v56 = vadd.f32 %v11710_v11, %v20310_v37  ;;  %v8818_v34 = vadd.f32 %v8786_v48, %v8622_v58 }
 0x575   : > { %v11712_v8 = vmul.f32 %v20308_v54, %v20267_v1  ;;  %v11743_v51 = vadd.f32 %v11711_v24, %v20311_v47  ;;  %v20312_v57 = vrot.slane %v20298_v12, %v20074_v60  ;;  %v20313_v35 = vrot.slane %v20300_v20, %v20074_v60 }
 0x576   : > { %v8428_v3 = vadd.f32 %v8396_v7, %v8232_v38  ;;  %v20315_v25 = vrot.slane %v20304_v18, %v20074_v60  ;;  %v20316_v48 = vrot.slane %v20307_v9, %v20074_v60  ;;  %v9014_v58 = vadd.f32 %v8982_v17, %v8818_v34  ;;  %v17899_v34 = vpop.f32.mrb[45].mxu1 }
 0x577   : > { %v11905_v62 = vmul.f32 %v20312_v57, %v20268_v42  ;;  %v11906_v14 = vmul.f32 %v20313_v35, %v20268_v42  ;;  %v11744_v54 = vadd.f32 %v11712_v8, %v20314_v13  ;;  %v20317_v47 = vrot.slane %v20298_v12, %v20075_v59  ;;  %20322 = vst [vmem:[#allocation56_spill] sm:$0xff] %v17899_v34 }
 0x578   : > { %v11907_v11 = vmul.f32 %v20315_v25, %v20268_v42  ;;  %v11908_v24 = vmul.f32 %v20316_v48, %v20268_v42  ;;  %v8624_v38 = vadd.f32 %v8592_v6, %v8428_v3  ;;  %v20318_v35 = vrot.slane %v20300_v20, %v20075_v59 }
 0x579   : > { %v11937_v28 = vadd.f32 %v11905_v62, %v11741_v33  ;;  %v11938_v37 = vadd.f32 %v11906_v14, %v11742_v56  ;;  %v12101_v7 = vmul.f32 %v20317_v47, %v20271_v41  ;;  %v17887_v25 = vadd.f32 %v9178_v52, %v9014_v58  ;;  %v20323_v62 = vld [vmem:[#allocation52_spill] sm:$0xff]  ;;  %v20324_v14 = vld [vmem:[#allocation41_spill] sm:$0xff]  ;;  %v20327_v47 = vld [vmem:[#allocation26_spill] sm:$0xff] }
 0x57a   : > { %v11939_v8 = vadd.f32 %v11907_v11, %v11743_v51  ;;  %v11940_v57 = vadd.f32 %v11908_v24, %v11744_v54  ;;  %v12102_v13 = vmul.f32 %v20318_v35, %v20271_v41  ;;  %v20320_v17 = vrot.slane %v20304_v18, %v20075_v59  ;;  %v20325_v18 = vld [vmem:[#allocation79_spill] sm:$0xff]  ;;  %v20326_v24 = vld [vmem:[#allocation64_spill] sm:$0xff]  ;;  %v20330_v35 = vld [vmem:[#allocation29_spill] sm:$0xff] }
 0x57b   : > { %v20321_v12 = vrot.slane %v20307_v9, %v20075_v59  ;;  %v12133_v56 = vadd.f32 %v12101_v7, %v11937_v28  ;;  %v8820_v51 = vadd.f32 %v8788_v4, %v8624_v38  ;;  %v12371_v52 = vadd.f32 %v17889_v26, %v20323_v62  ;;  %v20328_v7 = vld [vmem:[#allocation59_spill] sm:$0xff] }
 0x57c   : > { %v12103_v33 = vmul.f32 %v20320_v17, %v20271_v41  ;;  %v12134_v20 = vadd.f32 %v12102_v13, %v11938_v37  ;;  %v12372_v3 = vadd.f32 %v17889_v26, %v20324_v14  ;;  %v12373_v58 = vadd.f32 %v17889_v26, %v20326_v24  ;;  %v20329_v37 = vld [vmem:[#allocation73_spill] sm:$0xff]  ;;  %v20331_v17 = vld [vmem:[#allocation30_spill] sm:$0xff] }
 0x57d   : > { %v12104_v6 = vmul.f32 %v20321_v12, %v20271_v41  ;;  %v12329_v48 = vadd.f32 %v20325_v18, %v12133_v56  ;;  %v9016_v9 = vadd.f32 %v8984_v19, %v8820_v51  ;;  %v12374_v4 = vadd.f32 %v17889_v26, %v20328_v7  ;;  %v20333_v56 = vld [vmem:[#allocation76_spill] sm:$0xff]  ;;  %v17931_v18 = vpop.f32.mrb[46].mxu0 }
 0x57e   : > { %v12135_v54 = vadd.f32 %v12103_v33, %v11939_v8  ;;  %v12330_v28 = vadd.f32 %v20327_v47, %v12134_v20  ;;  %v12375_v38 = vadd.f32 %v17889_v26, %v20329_v37  ;;  %v12377_v51 = vadd.f32 %v17889_v26, %v20333_v56  ;;  %v20334_v20 = vld [vmem:[#allocation36_spill] sm:$0xff]  ;;  %20335 = vst [vmem:[#allocation10_spill] sm:$0xff] %v17931_v18  ;;  %v13019_v56 = vld [vmem:[%s13175_s17 + $0x38] sm:$0xff]  ;;  %v20353_v18 = vld [vmem:[#allocation74_spill] sm:$0xff] }
 0x57f   : > { %v12136_v11 = vadd.f32 %v12104_v6, %v11940_v57  ;;  %v12367_v8 = vadd.f32 %v17889_v26, %v12329_v48  ;;  %v20332_v57 = vld [vmem:[#allocation62_spill] sm:$0xff]  ;;  %v17918_v6 = vadd.f32 %v9180_v10, %v9016_v9  ;;  %v12378_v62 = vadd.f32 %v17889_v26, %v20334_v20 }
 0x580   : > { %v12331_v13 = vadd.f32 %v20330_v35, %v12135_v54  ;;  %v12376_v33 = vadd.f32 %v17889_v26, %v20332_v57  ;;  %v12368_v19 = vadd.f32 %v17889_v26, %v12330_v28  ;;  %v12380_v10 = vadd.f32 %v17889_v26, %v17697_v23  ;;  %v20336_v20 = vld [vmem:[#allocation6_spill] sm:$0xff] }
 0x581   : > { %v12332_v12 = vadd.f32 %v20331_v17, %v12136_v11  ;;  %v12379_v11 = vadd.f32 %v17889_v26, %v17643_v5  ;;  %v12381_v48 = vadd.f32 %v17889_v26, %v17669_v55  ;;  %v12382_v24 = vadd.f32 %v17889_v26, %v17710_v50  ;;  %v13012_v50 = vld [vmem:[%s13175_s17] sm:$0xff] }
 0x582   : > { %v12369_v14 = vadd.f32 %v17889_v26, %v12331_v13  ;;  %v12431_v9 = vcombine.low %v12367_v8, %v12368_v19  ;;  %v12433_v47 = vcombine.low %v12371_v52, %v12372_v3  ;;  %v12434_v23 = vcombine.low %v12373_v58, %v12374_v4  ;;  %v13013_v52 = vld [vmem:[%s13175_s17 + $0x10] sm:$0xff]  ;;  %v13014_v13 = vld [vmem:[%s13175_s17 + $0x8] sm:$0xff]  ;;  %v13016_v58 = vld [vmem:[%s13175_s17 + $0x20] sm:$0xff] }
 0x583   : > { %v12370_v54 = vadd.f32 %v17889_v26, %v12332_v12  ;;  %v12435_v28 = vcombine.low %v12375_v38, %v12376_v33  ;;  %v12436_v7 = vcombine.low %v12377_v51, %v12378_v62  ;;  %v12437_v55 = vcombine.low %v12379_v11, %v12380_v10  ;;  %v13015_v12 = vld [vmem:[%s13175_s17 + $0x18] sm:$0xff]  ;;  %v13017_v38 = vld [vmem:[%s13175_s17 + $0x28] sm:$0xff]  ;;  %v13018_v33 = vld [vmem:[%s13175_s17 + $0x30] sm:$0xff] }
 0x584   : > { %v12438_v37 = vcombine.low %v12381_v48, %v12382_v24  ;;  %v12463_v35 = vsub.f32 %v13012_v50, %v12431_v9  ;;  %v12465_v3 = vsub.f32 %v13013_v52, %v12433_v47  ;;  %v12466_v8 = vsub.f32 %v13015_v12, %v12434_v23  ;;  %v20337_v62 = vld [vmem:[#allocation27_spill] sm:$0xff]  ;;  %v20339_v10 = vld [vmem:[#allocation5_spill] sm:$0xff]  ;;  %v17964_v24 = vpop.f32.mrb[46].mxu1 }
 0x585   : > { %v12432_v5 = vcombine.low %v12369_v14, %v12370_v54  ;;  %v12467_v4 = vsub.f32 %v13016_v58, %v12435_v28  ;;  %v12468_v57 = vsub.f32 %v13017_v38, %v12436_v7  ;;  %v12469_v19 = vsub.f32 %v13018_v33, %v12437_v55  ;;  %v20338_v54 = vld [vmem:[#allocation4_spill] sm:$0xff]  ;;  %20340 = vst [vmem:[#allocation13_spill] sm:$0xff] %v17964_v24  ;;  %v20342_v7 = vld [vmem:[#allocation9_spill] sm:$0xff]  ;;  %v18009_v24 = vpop.f32.mrb[47].mxu0 }
 0x586   : > { %v12470_v51 = vsub.f32 %v13019_v56, %v12438_v37  ;;  %12479 = vst [vmem:[%s17942_s21] sm:$0x77] %v12463_v35  ;;  %12481 = vst [vmem:[%s17942_s21 + $0x10] sm:$0x77] %v12465_v3  ;;  %v5943_v14 = vadd.f32 %v20337_v62, %v20336_v20  ;;  %v5945_v11 = vadd.f32 %v20337_v62, %v20338_v54  ;;  %v20343_v37 = vld [vmem:[#allocation2_spill] sm:$0xff]  ;;  %v20345_v58 = vld [vmem:[#allocation81_spill] sm:$0xff] }
 0x587   : > { %v12464_v17 = vsub.f32 %v13014_v13, %v12432_v5  ;;  %12482 = vst [vmem:[%s17942_s21 + $0x18] sm:$0x77] %v12466_v8  ;;  %12483 = vst [vmem:[%s17942_s21 + $0x20] sm:$0x77] %v12467_v4  ;;  %v5944_v48 = vadd.f32 %v20337_v62, %v20339_v10  ;;  %v5946_v47 = vadd.f32 %v20337_v62, %v17572_v39  ;;  %v20341_v5 = vld [vmem:[#allocation34_spill] sm:$0xff]  ;;  %v20344_v13 = vld [vmem:[#allocation3_spill] sm:$0xff] }
 0x588   : > { %12484 = vst [vmem:[%s17942_s21 + $0x28] sm:$0x77] %v12468_v57  ;;  %12485 = vst [vmem:[%s17942_s21 + $0x30] sm:$0x77] %v12469_v19  ;;  %v6071_v9 = vmax.f32 %v5943_v14, 0.0  ;;  %v5975_v23 = vadd.f32 %v20341_v5, %v17585_v63  ;;  %v6073_v28 = vmax.f32 %v5945_v11, 0.0  ;;  %v5977_v55 = vadd.f32 %v20341_v5, %v20342_v7 }
 0x589   : > { %12480 = vst [vmem:[%s17942_s21 + $0x8] sm:$0x77] %v12464_v17  ;;  %12486 = vst [vmem:[%s17942_s21 + $0x38] sm:$0x77] %v12470_v51  ;;  %v17976_v50 = vadd.f32 %v20341_v5, %v20343_v37  ;;  %v17983_v39 = vadd.f32 %v20341_v5, %v20344_v13  ;;  %v17988_v8 = vmax.f32 %v5944_v48, 0.0  ;;  %v17992_v57 = vmax.f32 %v5946_v47, 0.0 }
 0x58a   : > { %v9296_v35 = vrot.slane %v6071_v9, %v20069_v44  ;;  %v9492_v52 = vrot.slane %v6071_v9, %v20070_v27  ;;  %v9688_v3 = vrot.slane %v6071_v9, %v20071_v31  ;;  %v9884_v63 = vrot.slane %v6071_v9, %v20072_v30  ;;  %v20346_v19 = vld [vmem:[#allocation43_spill] sm:$0xff]  ;;  %v20347_v51 = vld [vmem:[#allocation45_spill] sm:$0xff]  ;;  %20351 = vst [vmem:[#allocation14_spill] sm:$0xff] %v18009_v24 }
 0x58b   : > { %v10080_v17 = vrot.slane %v6071_v9, %v20073_v29  ;;  %v10276_v12 = vrot.slane %v6071_v9, %v20074_v60  ;;  %v10472_v38 = vrot.slane %v6071_v9, %v20075_v59  ;;  %v17994_v33 = vmax.f32 %v5975_v23, 0.0  ;;  %v20348_v47 = vld [vmem:[#allocation21_spill] sm:$0xff]  ;;  %v20349_v23 = vld [vmem:[#allocation67_spill] sm:$0xff] }
 0x58c   : > { %v9373_v4 = vmul.f32 %v9296_v35, %v20345_v58  ;;  %v9569_v56 = vmul.f32 %v9492_v52, %v20346_v19  ;;  %v9765_v20 = vmul.f32 %v9688_v3, %v20347_v51  ;;  %v10668_v14 = vrot.slane %v6071_v9, %v20076_v46  ;;  %v20350_v13 = vld [vmem:[#allocation57_spill] sm:$0xff] }
 0x58d   : > { %v17999_v54 = vmax.f32 %v5977_v55, 0.0  ;;  %v9304_v10 = vrot.slane %v6073_v28, %v20069_v44  ;;  %v9500_v48 = vrot.slane %v6073_v28, %v20070_v27  ;;  %v9696_v7 = vrot.slane %v6073_v28, %v20071_v31  ;;  %v20352_v55 = vld [vmem:[#allocation68_spill] sm:$0xff] }
 0x58e   : > { %v9405_v11 = vadd.f32 %v9373_v4, %v17825_v15  ;;  %v9961_v37 = vmul.f32 %v9884_v63, %v20348_v47  ;;  %v10157_v35 = vmul.f32 %v10080_v17, %v20349_v23  ;;  %v10353_v52 = vmul.f32 %v10276_v12, %v20350_v13 }
 0x58f   : > { %v9892_v3 = vrot.slane %v6073_v28, %v20072_v30  ;;  %v10549_v5 = vmul.f32 %v10472_v38, %v20352_v55  ;;  %v9375_v15 = vmul.f32 %v9304_v10, %v20345_v58  ;;  %v10088_v4 = vrot.slane %v6073_v28, %v20073_v29 }
 0x590   : > { %v9601_v9 = vadd.f32 %v9569_v56, %v9405_v11  ;;  %v10745_v34 = vmul.f32 %v10668_v14, %v20353_v18  ;;  %v9571_v62 = vmul.f32 %v9500_v48, %v20346_v19  ;;  %v10284_v63 = vrot.slane %v6073_v28, %v20074_v60 }
 0x591   : > { %v10480_v17 = vrot.slane %v6073_v28, %v20075_v59  ;;  %v9407_v61 = vadd.f32 %v9375_v15, %v17849_v22  ;;  %v9767_v24 = vmul.f32 %v9696_v7, %v20347_v51  ;;  %v9300_v38 = vrot.slane %v17988_v8, %v20069_v44  ;;  %v18036_v15 = vpop.f32.mrb[47].mxu1 }
 0x592   : > { %v9797_v12 = vadd.f32 %v9765_v20, %v9601_v9  ;;  %v9963_v56 = vmul.f32 %v9892_v3, %v20348_v47  ;;  %v10676_v11 = vrot.slane %v6073_v28, %v20076_v46  ;;  %v9496_v14 = vrot.slane %v17988_v8, %v20070_v27  ;;  %20354 = vst [vmem:[#allocation69_spill] sm:$0xff] %v18036_v15 }
 0x593   : > { %v9692_v10 = vrot.slane %v17988_v8, %v20071_v31  ;;  %v9603_v2 = vadd.f32 %v9571_v62, %v9407_v61  ;;  %v10159_v20 = vmul.f32 %v10088_v4, %v20349_v23  ;;  %v9374_v22 = vmul.f32 %v9300_v38, %v20345_v58 }
 0x594   : > { %v9993_v48 = vadd.f32 %v9961_v37, %v9797_v12  ;;  %v10355_v7 = vmul.f32 %v10284_v63, %v20350_v13  ;;  %v10551_v9 = vmul.f32 %v10480_v17, %v20352_v55  ;;  %v9888_v3 = vrot.slane %v17988_v8, %v20072_v30 }
 0x595   : > { %v10084_v28 = vrot.slane %v17988_v8, %v20073_v29  ;;  %v9799_v21 = vadd.f32 %v9767_v24, %v9603_v2  ;;  %v9406_v61 = vadd.f32 %v9374_v22, %v17887_v25  ;;  %v9570_v62 = vmul.f32 %v9496_v14, %v20346_v19 }
 0x596   : > { %v10189_v49 = vadd.f32 %v10157_v35, %v9993_v48  ;;  %v10747_v37 = vmul.f32 %v10676_v11, %v20353_v18  ;;  %v9766_v4 = vmul.f32 %v9692_v10, %v20347_v51  ;;  %v9308_v63 = vrot.slane %v17992_v57, %v20069_v44 }
 0x597   : > { %v9504_v17 = vrot.slane %v17992_v57, %v20070_v27  ;;  %v9995_v38 = vadd.f32 %v9963_v56, %v9799_v21  ;;  %v9602_v16 = vadd.f32 %v9570_v62, %v9406_v61  ;;  %v10280_v2 = vrot.slane %v17988_v8, %v20074_v60 }
 0x598   : > { %v10385_v12 = vadd.f32 %v10353_v52, %v10189_v49  ;;  %v9962_v25 = vmul.f32 %v9888_v3, %v20348_v47  ;;  %v10158_v24 = vmul.f32 %v10084_v28, %v20349_v23  ;;  %v10476_v35 = vrot.slane %v17988_v8, %v20075_v59 }
 0x599   : > { %v9376_v11 = vmul.f32 %v9308_v63, %v20345_v58  ;;  %v10191_v10 = vadd.f32 %v10159_v20, %v9995_v38  ;;  %v9798_v48 = vadd.f32 %v9766_v4, %v9602_v16  ;;  %v9700_v49 = vrot.slane %v17992_v57, %v20071_v31 }
 0x59a   : > { %v10581_v14 = vadd.f32 %v10549_v5, %v10385_v12  ;;  %v10672_v21 = vrot.slane %v17988_v8, %v20076_v46  ;;  %v9572_v56 = vmul.f32 %v9504_v17, %v20346_v19  ;;  %v9896_v22 = vrot.slane %v17992_v57, %v20072_v30 }
 0x59b   : > { %v9408_v52 = vadd.f32 %v9376_v11, %v17918_v6  ;;  %v10387_v28 = vadd.f32 %v10355_v7, %v10191_v10  ;;  %v9994_v61 = vadd.f32 %v9962_v25, %v9798_v48  ;;  %v10354_v5 = vmul.f32 %v10280_v2, %v20350_v13  ;;  %v18076_v2 = vpop.f32.mrb[48].mxu0 }
 0x59c   : > { %v10777_v3 = vadd.f32 %v10745_v34, %v10581_v14  ;;  %v9768_v16 = vmul.f32 %v9700_v49, %v20347_v51  ;;  %v10092_v62 = vrot.slane %v17992_v57, %v20073_v29  ;;  %v10288_v8 = vrot.slane %v17992_v57, %v20074_v60  ;;  %20355 = vst [vmem:[#allocation72_spill] sm:$0xff] %v18076_v2 }
 0x59d   : > { %v9604_v20 = vadd.f32 %v9572_v56, %v9408_v52  ;;  %v10583_v6 = vadd.f32 %v10551_v9, %v10387_v28  ;;  %v10190_v4 = vadd.f32 %v10158_v24, %v9994_v61  ;;  %v9964_v63 = vmul.f32 %v9896_v22, %v20348_v47  ;;  %v18088_v22 = vpop.f32.mrb[48].mxu1 }
 0x59e   : > { %v10484_v34 = vrot.slane %v17992_v57, %v20075_v59  ;;  %v10680_v17 = vrot.slane %v17992_v57, %v20076_v46  ;;  %v10864_v12 = vrot.slane %v17994_v33, %v20069_v44  ;;  %v11060_v38 = vrot.slane %v17994_v33, %v20070_v27  ;;  %20356 = vst [vmem:[#allocation78_spill] sm:$0xff] %v18088_v22 }
 0x59f   : > { %v9800_v7 = vadd.f32 %v9768_v16, %v9604_v20  ;;  %v10779_v25 = vadd.f32 %v10747_v37, %v10583_v6  ;;  %v10386_v9 = vadd.f32 %v10354_v5, %v10190_v4  ;;  %v10550_v24 = vmul.f32 %v10476_v35, %v20352_v55  ;;  %v20358_v16 = vld [vmem:[#allocation70_spill] sm:$0xff] }
 0x5a0   : > { %v11256_v11 = vrot.slane %v17994_v33, %v20071_v31  ;;  %v10746_v14 = vmul.f32 %v10672_v21, %v20353_v18  ;;  %v10160_v57 = vmul.f32 %v10092_v62, %v20349_v23  ;;  %v10941_v48 = vmul.f32 %v10864_v12, %v16361_v53  ;;  %v20357_v21 = vld [vmem:[#allocation11_spill] sm:$0xff] }
 0x5a1   : > { %v9996_v10 = vadd.f32 %v9964_v63, %v9800_v7  ;;  %v10582_v49 = vadd.f32 %v10550_v24, %v10386_v9  ;;  %v10356_v52 = vmul.f32 %v10288_v8, %v20350_v13  ;;  %v10552_v56 = vmul.f32 %v10484_v34, %v20352_v55 }
 0x5a2   : > { %v11452_v37 = vrot.slane %v17994_v33, %v20072_v30  ;;  %v10748_v28 = vmul.f32 %v10680_v17, %v20353_v18  ;;  %v10973_v61 = vadd.f32 %v10941_v48, %v10777_v3  ;;  %v11137_v5 = vmul.f32 %v11060_v38, %v20357_v21  ;;  %v20359_v3 = vld [vmem:[#allocation18_spill] sm:$0xff] }
 0x5a3   : > { %v10192_v35 = vadd.f32 %v10160_v57, %v9996_v10  ;;  %v10778_v20 = vadd.f32 %v10746_v14, %v10582_v49  ;;  %v11333_v62 = vmul.f32 %v11256_v11, %v20358_v16  ;;  %v11648_v6 = vrot.slane %v17994_v33, %v20073_v29 }
 0x5a4   : > { %v11844_v8 = vrot.slane %v17994_v33, %v20074_v60  ;;  %v11169_v63 = vadd.f32 %v11137_v5, %v10973_v61  ;;  %v12040_v34 = vrot.slane %v17994_v33, %v20075_v59  ;;  %v12236_v7 = vrot.slane %v17994_v33, %v20076_v46 }
 0x5a5   : > { %v10388_v4 = vadd.f32 %v10356_v52, %v10192_v35  ;;  %v11529_v17 = vmul.f32 %v11452_v37, %v20359_v3  ;;  %v10872_v12 = vrot.slane %v17999_v54, %v20069_v44  ;;  %v11068_v38 = vrot.slane %v17999_v54, %v20070_v27  ;;  %v20360_v35 = vld [vmem:[#allocation20_spill] sm:$0xff] }
 0x5a6   : > { %v11264_v9 = vrot.slane %v17999_v54, %v20071_v31  ;;  %v11365_v11 = vadd.f32 %v11333_v62, %v11169_v63  ;;  %v11460_v14 = vrot.slane %v17999_v54, %v20072_v30  ;;  %v11656_v10 = vrot.slane %v17999_v54, %v20073_v29 }
 0x5a7   : > { %v10584_v24 = vadd.f32 %v10552_v56, %v10388_v4  ;;  %v11725_v33 = vmul.f32 %v11648_v6, %v20267_v1  ;;  %v11921_v57 = vmul.f32 %v11844_v8, %v20268_v42  ;;  %v10943_v48 = vmul.f32 %v10872_v12, %v16361_v53 }
 0x5a8   : > { %v11852_v49 = vrot.slane %v17999_v54, %v20074_v60  ;;  %v11561_v37 = vadd.f32 %v11529_v17, %v11365_v11  ;;  %v12117_v56 = vmul.f32 %v12040_v34, %v20271_v41  ;;  %v12313_v61 = vmul.f32 %v12236_v7, %v20360_v35  ;;  %v18126_v17 = vpop.f32.mrb[49].mxu0 }
 0x5a9   : > { %v10780_v52 = vadd.f32 %v10748_v28, %v10584_v24  ;;  %v10975_v5 = vadd.f32 %v10943_v48, %v10779_v25  ;;  %v11139_v62 = vmul.f32 %v11068_v38, %v20357_v21  ;;  %v11335_v4 = vmul.f32 %v11264_v9, %v20358_v16  ;;  %20361 = vst [vmem:[#allocation61_spill] sm:$0xff] %v18126_v17  ;;  %v20362_v48 = vld [vmem:[#allocation17_spill] sm:$0xff] }
 0x5aa   : > { %v6104_v6 = vmax.f32 %v17976_v50, 0.0  ;;  %v11757_v63 = vadd.f32 %v11725_v33, %v11561_v37  ;;  %v11531_v8 = vmul.f32 %v11460_v14, %v20359_v3  ;;  %v11727_v12 = vmul.f32 %v11656_v10, %v20267_v1  ;;  %v20363_v37 = vld [vmem:[#allocation35_spill] sm:$0xff] }
 0x5ab   : > { %v12048_v28 = vrot.slane %v17999_v54, %v20075_v59  ;;  %v11171_v34 = vadd.f32 %v11139_v62, %v10975_v5  ;;  %v11923_v7 = vmul.f32 %v11852_v49, %v20268_v42  ;;  %v12244_v25 = vrot.slane %v17999_v54, %v20076_v46 }
 0x5ac   : > { %v10868_v38 = vrot.slane %v6104_v6, %v20069_v44  ;;  %v11953_v9 = vadd.f32 %v11921_v57, %v11757_v63  ;;  %v11064_v50 = vrot.slane %v6104_v6, %v20070_v27  ;;  %v11260_v24 = vrot.slane %v6104_v6, %v20071_v31  ;;  %v20364_v57 = vld [vmem:[#allocation58_spill] sm:$0xff] }
 0x5ad   : > { %v6106_v11 = vmax.f32 %v17983_v39, 0.0  ;;  %v11367_v14 = vadd.f32 %v11335_v4, %v11171_v34  ;;  %v11456_v33 = vrot.slane %v6104_v6, %v20072_v30  ;;  %v5883_v49 = vadd.f32 %v20363_v37, %v20362_v48  ;;  %v18145_v34 = vpop.f32.mrb[49].mxu1 }
 0x5ae   : > { %v10942_v10 = vmul.f32 %v10868_v38, %v16361_v53  ;;  %v12149_v5 = vadd.f32 %v12117_v56, %v11953_v9  ;;  %v12119_v54 = vmul.f32 %v12048_v28, %v20271_v41  ;;  %v11652_v62 = vrot.slane %v6104_v6, %v20073_v29  ;;  %20365 = vst [vmem:[#allocation77_spill] sm:$0xff] %v18145_v34  ;;  %v18168_v34 = vpop.f32.mrb[50].mxu0 }
 0x5af   : > { %v5885_v63 = vadd.f32 %v20363_v37, %v20364_v57  ;;  %v11563_v17 = vadd.f32 %v11531_v8, %v11367_v14  ;;  %v12315_v22 = vmul.f32 %v12244_v25, %v20360_v35  ;;  %v11138_v4 = vmul.f32 %v11064_v50, %v20357_v21  ;;  %20366 = vst [vmem:[#allocation63_spill] sm:$0xff] %v18168_v34 }
 0x5b0   : > { %v10974_v39 = vadd.f32 %v10942_v10, %v10778_v20  ;;  %v12345_v38 = vadd.f32 %v12313_v61, %v12149_v5  ;;  %v11334_v2 = vmul.f32 %v11260_v24, %v20358_v16  ;;  %v11848_v56 = vrot.slane %v6104_v6, %v20074_v60 }
 0x5b1   : > { %v10876_v28 = vrot.slane %v6106_v11, %v20069_v44  ;;  %v11759_v9 = vadd.f32 %v11727_v12, %v11563_v17  ;;  %v11530_v15 = vmul.f32 %v11456_v33, %v20359_v3  ;;  %v11072_v8 = vrot.slane %v6106_v11, %v20070_v27 }
 0x5b2   : > { %v11170_v48 = vadd.f32 %v11138_v4, %v10974_v39  ;;  %v11726_v25 = vmul.f32 %v11652_v62, %v20267_v1  ;;  %v12044_v20 = vrot.slane %v6104_v6, %v20075_v59  ;;  %v11268_v61 = vrot.slane %v6106_v11, %v20071_v31 }
 0x5b3   : > { %v10944_v50 = vmul.f32 %v10876_v28, %v16361_v53  ;;  %v11955_v14 = vadd.f32 %v11923_v7, %v11759_v9  ;;  %v12240_v10 = vrot.slane %v6104_v6, %v20076_v46  ;;  %v11140_v5 = vmul.f32 %v11072_v8, %v20357_v21 }
 0x5b4   : > { %v11366_v24 = vadd.f32 %v11334_v2, %v11170_v48  ;;  %v11464_v17 = vrot.slane %v6106_v11, %v20072_v30  ;;  %v11660_v33 = vrot.slane %v6106_v11, %v20073_v29  ;;  %v11856_v57 = vrot.slane %v6106_v11, %v20074_v60 }
 0x5b5   : > { %v10976_v12 = vadd.f32 %v10944_v50, %v10780_v52  ;;  %v12151_v62 = vadd.f32 %v12119_v54, %v11955_v14  ;;  %v12052_v4 = vrot.slane %v6106_v11, %v20075_v59  ;;  %v12248_v28 = vrot.slane %v6106_v11, %v20076_v46 }
 0x5b6   : > { %v11562_v39 = vadd.f32 %v11530_v15, %v11366_v24  ;;  %v12383_v7 = vadd.f32 %v17889_v26, %v12345_v38  ;;  %v11922_v2 = vmul.f32 %v11848_v56, %v20268_v42  ;;  %v11336_v9 = vmul.f32 %v11268_v61, %v20358_v16 }
 0x5b7   : > { %v11172_v6 = vadd.f32 %v11140_v5, %v10976_v12  ;;  %v12347_v52 = vadd.f32 %v12315_v22, %v12151_v62  ;;  %v12118_v8 = vmul.f32 %v12044_v20, %v20271_v41  ;;  %v12314_v50 = vmul.f32 %v12240_v10, %v20360_v35  ;;  %v18181_v62 = vpop.f32.mrb[50].mxu1 }
 0x5b8   : > { %v11758_v48 = vadd.f32 %v11726_v25, %v11562_v39  ;;  %v11532_v54 = vmul.f32 %v11464_v17, %v20359_v3  ;;  %v11728_v11 = vmul.f32 %v11660_v33, %v20267_v1  ;;  %v6011_v14 = vmax.f32 %v5883_v49, 0.0  ;;  %v20367_v33 = vld [vmem:[#allocation50_spill] sm:$0xff]  ;;  %20368 = vst [vmem:[#allocation48_spill] sm:$0xff] %v18181_v62 }
 0x5b9   : > { %v11368_v15 = vadd.f32 %v11336_v9, %v11172_v6  ;;  %v11924_v56 = vmul.f32 %v11856_v57, %v20268_v42  ;;  %v12120_v24 = vmul.f32 %v12052_v4, %v20271_v41  ;;  %v12316_v22 = vmul.f32 %v12248_v28, %v20360_v35 }
 0x5ba   : > { %v11954_v38 = vadd.f32 %v11922_v2, %v11758_v48  ;;  %v6208_v20 = vrot.slane %v6011_v14, %v20069_v44  ;;  %v6372_v61 = vrot.slane %v6011_v14, %v20070_v27  ;;  %v6568_v10 = vrot.slane %v6011_v14, %v20071_v31  ;;  %v20369_v48 = vld [vmem:[#allocation65_spill] sm:$0xff] }
 0x5bb   : > { %v11564_v25 = vadd.f32 %v11532_v54, %v11368_v15  ;;  %v6764_v12 = vrot.slane %v6011_v14, %v20072_v30  ;;  %v6013_v17 = vmax.f32 %v5885_v63, 0.0  ;;  %v5884_v49 = vadd.f32 %v20363_v37, %v20367_v33  ;;  %v20371_v33 = vld [vmem:[#allocation25_spill] sm:$0xff] }
 0x5bc   : > { %v12150_v5 = vadd.f32 %v12118_v8, %v11954_v38  ;;  %v6273_v39 = vmul.f32 %v6208_v20, %v20237_v0  ;;  %v6437_v4 = vmul.f32 %v6372_v61, %v20238_v32  ;;  %v6960_v28 = vrot.slane %v6011_v14, %v20073_v29  ;;  %v20370_v38 = vld [vmem:[#allocation32_spill] sm:$0xff] }
 0x5bd   : > { %v11760_v57 = vadd.f32 %v11728_v11, %v11564_v25  ;;  %v12385_v2 = vadd.f32 %v17889_v26, %v12347_v52  ;;  %v7156_v9 = vrot.slane %v6011_v14, %v20074_v60  ;;  %v5886_v63 = vadd.f32 %v20363_v37, %v20369_v48 }
 0x5be   : > { %v12346_v6 = vadd.f32 %v12314_v50, %v12150_v5  ;;  %v6469_v15 = vadd.f32 %v6437_v4, %v6273_v39  ;;  %v6633_v54 = vmul.f32 %v6568_v10, %v20240_v40  ;;  %v6829_v11 = vmul.f32 %v6764_v12, %v20370_v38 }
 0x5bf   : > { %v11956_v8 = vadd.f32 %v11924_v56, %v11760_v57  ;;  %v6216_v20 = vrot.slane %v6013_v17, %v20069_v44  ;;  %v6380_v61 = vrot.slane %v6013_v17, %v20070_v27  ;;  %v6576_v52 = vrot.slane %v6013_v17, %v20071_v31 }
 0x5c0   : > { %v12384_v25 = vadd.f32 %v17889_v26, %v12346_v6  ;;  %v6665_v5 = vadd.f32 %v6633_v54, %v6469_v15  ;;  %v7025_v62 = vmul.f32 %v6960_v28, %v20371_v33  ;;  %v7352_v56 = vrot.slane %v6011_v14, %v20075_v59  ;;  %v18206_v54 = vpop.f32.mrb[51].mxu0 }
 0x5c1   : > { %v12152_v50 = vadd.f32 %v12120_v24, %v11956_v8  ;;  %v7548_v10 = vrot.slane %v6011_v14, %v20076_v46  ;;  %v6275_v12 = vmul.f32 %v6216_v20, %v20237_v0  ;;  %v6439_v39 = vmul.f32 %v6380_v61, %v20238_v32  ;;  %v13020_v24 = vld [vmem:[%s13175_s17 + $0x40] sm:$0xff]  ;;  %20372 = vst [vmem:[#allocation19_spill] sm:$0xff] %v18206_v54  ;;  %v20373_v20 = vld [vmem:[#allocation33_spill] sm:$0xff] }
 0x5c2   : > { %v12439_v57 = vcombine.low %v12383_v7, %v12384_v25  ;;  %v6861_v6 = vadd.f32 %v6829_v11, %v6665_v5  ;;  %v6635_v48 = vmul.f32 %v6576_v52, %v20240_v40  ;;  %v6772_v34 = vrot.slane %v6013_v17, %v20072_v30  ;;  %v20374_v5 = vld [vmem:[#allocation22_spill] sm:$0xff] }
 0x5c3   : > { %v12348_v4 = vadd.f32 %v12316_v22, %v12152_v50  ;;  %v6471_v15 = vadd.f32 %v6439_v39, %v6275_v12  ;;  %v6968_v28 = vrot.slane %v6013_v17, %v20073_v29  ;;  %v7164_v7 = vrot.slane %v6013_v17, %v20074_v60  ;;  %v20376_v54 = vld [vmem:[#allocation38_spill] sm:$0xff] }
 0x5c4   : > { %v12471_v8 = vsub.f32 %v13020_v24, %v12439_v57  ;;  %v7057_v25 = vadd.f32 %v7025_v62, %v6861_v6  ;;  %v7221_v22 = vmul.f32 %v7156_v9, %v20373_v20  ;;  %v7360_v11 = vrot.slane %v6013_v17, %v20075_v59  ;;  %v20375_v57 = vld [vmem:[#allocation37_spill] sm:$0xff] }
 0x5c5   : > { %v12386_v14 = vadd.f32 %v17889_v26, %v12348_v4  ;;  %v6667_v61 = vadd.f32 %v6635_v48, %v6471_v15  ;;  %v6831_v52 = vmul.f32 %v6772_v34, %v20370_v38  ;;  %v7556_v50 = vrot.slane %v6013_v17, %v20076_v46  ;;  %v20377_v4 = vld [vmem:[#allocation24_spill] sm:$0xff] }
 0x5c6   : > { %12487 = vst [vmem:[%s17942_s21 + $0x40] sm:$0x77] %v12471_v8  ;;  %v5915_v12 = vadd.f32 %v20375_v57, %v20374_v5  ;;  %v7253_v24 = vadd.f32 %v7221_v22, %v7057_v25  ;;  %v7417_v37 = vmul.f32 %v7352_v56, %v20376_v54  ;;  %v6012_v62 = vmax.f32 %v5884_v49, 0.0  ;;  %v13021_v8 = vld [vmem:[%s13175_s17 + $0x48] sm:$0xff] }
 0x5c7   : > { %v12440_v39 = vcombine.low %v12385_v2, %v12386_v14  ;;  %v7613_v6 = vmul.f32 %v7548_v10, %v20377_v4  ;;  %v6863_v9 = vadd.f32 %v6831_v52, %v6667_v61  ;;  %v7027_v26 = vmul.f32 %v6968_v28, %v20371_v33  ;;  %v18226_v10 = vpop.f32.mrb[51].mxu1 }
 0x5c8   : > { %v7223_v48 = vmul.f32 %v7164_v7, %v20373_v20  ;;  %v7419_v17 = vmul.f32 %v7360_v11, %v20376_v54  ;;  %v6212_v15 = vrot.slane %v6012_v62, %v20069_v44  ;;  %v6376_v2 = vrot.slane %v6012_v62, %v20070_v27  ;;  %20378 = vst [vmem:[#allocation12_spill] sm:$0xff] %v18226_v10 }
 0x5c9   : > { %v12472_v34 = vsub.f32 %v13021_v8, %v12440_v39  ;;  %v7059_v14 = vadd.f32 %v7027_v26, %v6863_v9  ;;  %v7615_v56 = vmul.f32 %v7556_v50, %v20377_v4  ;;  %v6572_v49 = vrot.slane %v6012_v62, %v20071_v31  ;;  %v20379_v50 = vld [vmem:[#allocation53_spill] sm:$0xff] }
 0x5ca   : > { %v6014_v25 = vmax.f32 %v5886_v63, 0.0  ;;  %v7449_v28 = vadd.f32 %v7417_v37, %v7253_v24  ;;  %v6274_v7 = vmul.f32 %v6212_v15, %v20237_v0  ;;  %v6438_v22 = vmul.f32 %v6376_v2, %v20238_v32 }
 0x5cb   : > { %12488 = vst [vmem:[%s17942_s21 + $0x48] sm:$0x77] %v12472_v34  ;;  %v6768_v11 = vrot.slane %v6012_v62, %v20072_v30  ;;  %v6964_v61 = vrot.slane %v6012_v62, %v20073_v29  ;;  %v7160_v52 = vrot.slane %v6012_v62, %v20074_v60  ;;  %v18234_v26 = vmax.f32 %v5915_v12, 0.0 }
 0x5cc   : > { %v5917_v5 = vadd.f32 %v20375_v57, %v20379_v50  ;;  %v7255_v63 = vadd.f32 %v7223_v48, %v7059_v14  ;;  %v6470_v39 = vadd.f32 %v6438_v22, %v6274_v7  ;;  %v6634_v9 = vmul.f32 %v6572_v49, %v20240_v40 }
 0x5cd   : > { %v7356_v37 = vrot.slane %v6012_v62, %v20075_v59  ;;  %v7552_v24 = vrot.slane %v6012_v62, %v20076_v46  ;;  %v6220_v8 = vrot.slane %v6014_v25, %v20069_v44  ;;  %v6384_v34 = vrot.slane %v6014_v25, %v20070_v27 }
 0x5ce   : > { %v6580_v15 = vrot.slane %v6014_v25, %v20071_v31  ;;  %v7645_v2 = vadd.f32 %v7613_v6, %v7449_v28  ;;  %v6666_v12 = vadd.f32 %v6634_v9, %v6470_v39  ;;  %v6830_v10 = vmul.f32 %v6768_v11, %v20370_v38 }
 0x5cf   : > { %v6776_v50 = vrot.slane %v6014_v25, %v20072_v30  ;;  %v7026_v48 = vmul.f32 %v6964_v61, %v20371_v33  ;;  %v7222_v14 = vmul.f32 %v7160_v52, %v20373_v20  ;;  %v6276_v49 = vmul.f32 %v6220_v8, %v20237_v0 }
 0x5d0   : > { %v6440_v62 = vmul.f32 %v6384_v34, %v20238_v32  ;;  %v7451_v7 = vadd.f32 %v7419_v17, %v7255_v63  ;;  %v6862_v22 = vadd.f32 %v6830_v10, %v6666_v12  ;;  %v7418_v35 = vmul.f32 %v7356_v37, %v20376_v54 }
 0x5d1   : > { %v6972_v41 = vrot.slane %v6014_v25, %v20073_v29  ;;  %v7614_v6 = vmul.f32 %v7552_v24, %v20377_v4  ;;  %v6636_v11 = vmul.f32 %v6580_v15, %v20240_v40  ;;  %v7744_v61 = vrot.slane %v18234_v26, %v20069_v44 }
 0x5d2   : > { %v6472_v28 = vadd.f32 %v6440_v62, %v6276_v49  ;;  %v7058_v39 = vadd.f32 %v7026_v48, %v6862_v22  ;;  %v6832_v52 = vmul.f32 %v6776_v50, %v20370_v38  ;;  %v7168_v9 = vrot.slane %v6014_v25, %v20074_v60  ;;  %v18271_v22 = vpop.f32.mrb[52].mxu0 }
 0x5d3   : > { %v7940_v17 = vrot.slane %v18234_v26, %v20070_v27  ;;  %v7364_v63 = vrot.slane %v6014_v25, %v20075_v59  ;;  %v7560_v37 = vrot.slane %v6014_v25, %v20076_v46  ;;  %v7809_v24 = vmul.f32 %v7744_v61, %v20146_v36  ;;  %20380 = vst [vmem:[#allocation28_spill] sm:$0xff] %v18271_v22  ;;  %v18273_v25 = vpop.f32.mrb[52].mxu1 }
 0x5d4   : > { %v6668_v10 = vadd.f32 %v6636_v11, %v6472_v28  ;;  %v7254_v8 = vadd.f32 %v7222_v14, %v7058_v39  ;;  %v7028_v34 = vmul.f32 %v6972_v41, %v20371_v33  ;;  %v8136_v15 = vrot.slane %v18234_v26, %v20071_v31  ;;  %20381 = vst [vmem:[#allocation23_spill] sm:$0xff] %v18273_v25 }
 0x5d5   : > { %v8332_v12 = vrot.slane %v18234_v26, %v20072_v30  ;;  %v7841_v48 = vadd.f32 %v7809_v24, %v7645_v2  ;;  %v8005_v49 = vmul.f32 %v7940_v17, %v20147_v43  ;;  %v8528_v62 = vrot.slane %v18234_v26, %v20073_v29 }
 0x5d6   : > { %v6864_v50 = vadd.f32 %v6832_v52, %v6668_v10  ;;  %v7647_v14 = vadd.f32 %v7615_v56, %v7451_v7  ;;  %v7450_v28 = vadd.f32 %v7418_v35, %v7254_v8  ;;  %v7224_v41 = vmul.f32 %v7168_v9, %v20373_v20  ;;  %v20382_v10 = vld [vmem:[#allocation40_spill] sm:$0xff]  ;;  %v20383_v9 = vld [vmem:[#allocation71_spill] sm:$0xff] }
 0x5d7   : > { %v8724_v11 = vrot.slane %v18234_v26, %v20074_v60  ;;  %v7420_v39 = vmul.f32 %v7364_v63, %v20376_v54  ;;  %v8037_v2 = vadd.f32 %v8005_v49, %v7841_v48  ;;  %v8201_v52 = vmul.f32 %v8136_v15, %v16175_v45  ;;  %v20384_v63 = vld [vmem:[#allocation16_spill] sm:$0xff] }
 0x5d8   : > { %v7060_v61 = vadd.f32 %v7028_v34, %v6864_v50  ;;  %v7616_v17 = vmul.f32 %v7560_v37, %v20377_v4  ;;  %v8397_v24 = vmul.f32 %v8332_v12, %v20382_v10  ;;  %v8920_v25 = vrot.slane %v18234_v26, %v20075_v59  ;;  %v20385_v4 = vld [vmem:[#allocation66_spill] sm:$0xff] }
 0x5d9   : > { %v6045_v56 = vmax.f32 %v5917_v5, 0.0  ;;  %v8233_v7 = vadd.f32 %v8201_v52, %v8037_v2  ;;  %v8593_v8 = vmul.f32 %v8528_v62, %v20383_v9  ;;  %v9116_v34 = vrot.slane %v18234_v26, %v20076_v46  ;;  %v20387_v2 = vld [vmem:[#allocation42_spill] sm:$0xff] }
 0x5da   : > { %v7256_v35 = vadd.f32 %v7224_v41, %v7060_v61  ;;  %v7646_v50 = vadd.f32 %v7614_v6, %v7450_v28  ;;  %v8789_v48 = vmul.f32 %v8724_v11, %v20384_v63  ;;  %v5916_v5 = vadd.f32 %v20375_v57, %v20385_v4  ;;  %v20386_v11 = vld [vmem:[#allocation51_spill] sm:$0xff] }
 0x5db   : > { %v7752_v15 = vrot.slane %v6045_v56, %v20069_v44  ;;  %v7948_v37 = vrot.slane %v6045_v56, %v20070_v27  ;;  %v8429_v12 = vadd.f32 %v8397_v24, %v8233_v7  ;;  %v8144_v22 = vrot.slane %v6045_v56, %v20071_v31 }
 0x5dc   : > { %v7452_v49 = vadd.f32 %v7420_v39, %v7256_v35  ;;  %v8340_v62 = vrot.slane %v6045_v56, %v20072_v30  ;;  %v8536_v26 = vrot.slane %v6045_v56, %v20073_v29  ;;  %v8732_v6 = vrot.slane %v6045_v56, %v20074_v60  ;;  %v20388_v39 = vld [vmem:[#allocation55_spill] sm:$0xff]  ;;  %v18301_v35 = vpop.f32.mrb[53].mxu0 }
 0x5dd   : > { %v7811_v41 = vmul.f32 %v7752_v15, %v20146_v36  ;;  %v8625_v28 = vadd.f32 %v8593_v8, %v8429_v12  ;;  %v8985_v61 = vmul.f32 %v8920_v25, %v20386_v11  ;;  %v9181_v52 = vmul.f32 %v9116_v34, %v20387_v2  ;;  %20389 = vst [vmem:[#allocation31_spill] sm:$0xff] %v18301_v35 }
 0x5de   : > { %v5918_v24 = vadd.f32 %v20375_v57, %v20388_v39  ;;  %v8007_v4 = vmul.f32 %v7948_v37, %v20147_v43  ;;  %v8928_v15 = vrot.slane %v6045_v56, %v20075_v59  ;;  %v9124_v54 = vrot.slane %v6045_v56, %v20076_v46 }
 0x5df   : > { %v7843_v7 = vadd.f32 %v7811_v41, %v7647_v14  ;;  %v7648_v20 = vadd.f32 %v7616_v17, %v7452_v49  ;;  %v8821_v33 = vadd.f32 %v8789_v48, %v8625_v28  ;;  %v8203_v8 = vmul.f32 %v8144_v22, %v16175_v45  ;;  %v20390_v48 = vld [vmem:[#allocation80_spill] sm:$0xff]  ;;  %v20391_v49 = vld [vmem:[#allocation27_spill] sm:$0xff]  ;;  %v18321_v28 = vpop.f32.mrb[53].mxu1 }
 0x5e0   : > { %v6044_v12 = vmax.f32 %v5916_v5, 0.0  ;;  %v8399_v34 = vmul.f32 %v8340_v62, %v20382_v10  ;;  %v8595_v38 = vmul.f32 %v8536_v26, %v20383_v9  ;;  %v8791_v39 = vmul.f32 %v8732_v6, %v20384_v63  ;;  %20392 = vst [vmem:[#allocation75_spill] sm:$0xff] %v18321_v28 }
 0x5e1   : > { %v8039_v25 = vadd.f32 %v8007_v4, %v7843_v7  ;;  %v9017_v35 = vadd.f32 %v8985_v61, %v8821_v33  ;;  %v18312_v41 = vmax.f32 %v5918_v24, 0.0  ;;  %v8987_v17 = vmul.f32 %v8928_v15, %v20386_v11  ;;  %v20393_v4 = vld [vmem:[#allocation46_spill] sm:$0xff] }
 0x5e2   : > { %v7748_v14 = vrot.slane %v6044_v12, %v20069_v44  ;;  %v7944_v37 = vrot.slane %v6044_v12, %v20070_v27  ;;  %v9183_v22 = vmul.f32 %v9124_v54, %v20387_v2  ;;  %v5947_v5 = vadd.f32 %v20391_v49, %v20390_v48 }
 0x5e3   : > { %v8235_v56 = vadd.f32 %v8203_v8, %v8039_v25  ;;  %v9213_v62 = vadd.f32 %v9181_v52, %v9017_v35  ;;  %v8140_v6 = vrot.slane %v6044_v12, %v20071_v31  ;;  %v8336_v33 = vrot.slane %v6044_v12, %v20072_v30 }
 0x5e4   : > { %v7810_v26 = vmul.f32 %v7748_v14, %v20146_v36  ;;  %v8532_v24 = vrot.slane %v6044_v12, %v20073_v29  ;;  %v8728_v7 = vrot.slane %v6044_v12, %v20074_v60  ;;  %v5949_v54 = vadd.f32 %v20391_v49, %v20393_v4 }
 0x5e5   : > { %v8431_v61 = vadd.f32 %v8399_v34, %v8235_v56  ;;  %v8006_v8 = vmul.f32 %v7944_v37, %v20147_v43  ;;  %v8924_v52 = vrot.slane %v6044_v12, %v20075_v59  ;;  %v7756_v35 = vrot.slane %v18312_v41, %v20069_v44 }
 0x5e6   : > { %v7842_v15 = vadd.f32 %v7810_v26, %v7646_v50  ;;  %v7952_v14 = vrot.slane %v18312_v41, %v20070_v27  ;;  %v8148_v34 = vrot.slane %v18312_v41, %v20071_v31  ;;  %v8344_v56 = vrot.slane %v18312_v41, %v20072_v30 }
 0x5e7   : > { %v8627_v25 = vadd.f32 %v8595_v38, %v8431_v61  ;;  %v8202_v50 = vmul.f32 %v8140_v6, %v16175_v45  ;;  %v8398_v37 = vmul.f32 %v8336_v33, %v20382_v10  ;;  %v7812_v26 = vmul.f32 %v7756_v35, %v20146_v36 }
 0x5e8   : > { %v8038_v48 = vadd.f32 %v8006_v8, %v7842_v15  ;;  %v8594_v28 = vmul.f32 %v8532_v24, %v20383_v9  ;;  %v8790_v38 = vmul.f32 %v8728_v7, %v20384_v63  ;;  %v9120_v61 = vrot.slane %v6044_v12, %v20076_v46  ;;  %v18351_v7 = vpop.f32.mrb[54].mxu0 }
 0x5e9   : > { %v8823_v4 = vadd.f32 %v8791_v39, %v8627_v25  ;;  %v8986_v40 = vmul.f32 %v8924_v52, %v20386_v11  ;;  %v7844_v32 = vadd.f32 %v7812_v26, %v7648_v20  ;;  %v8008_v0 = vmul.f32 %v7952_v14, %v20147_v43  ;;  %20394 = vst [vmem:[#allocation60_spill] sm:$0xff] %v18351_v7 }
 0x5ea   : > { %v8234_v57 = vadd.f32 %v8202_v50, %v8038_v48  ;;  %v8204_v6 = vmul.f32 %v8148_v34, %v16175_v45  ;;  %v8400_v33 = vmul.f32 %v8344_v56, %v20382_v10  ;;  %v6075_v8 = vmax.f32 %v5947_v5, 0.0 }
 0x5eb   : > { %v9019_v15 = vadd.f32 %v8987_v17, %v8823_v4  ;;  %v8040_v39 = vadd.f32 %v8008_v0, %v7844_v32  ;;  %v8540_v24 = vrot.slane %v18312_v41, %v20073_v29  ;;  %v8736_v12 = vrot.slane %v18312_v41, %v20074_v60 }
 0x5ec   : > { %v8430_v35 = vadd.f32 %v8398_v37, %v8234_v57  ;;  %v8932_v20 = vrot.slane %v18312_v41, %v20075_v59  ;;  %v9128_v17 = vrot.slane %v18312_v41, %v20076_v46  ;;  %v9312_v25 = vrot.slane %v6075_v8, %v20069_v44 }
 0x5ed   : > { %v9215_v52 = vadd.f32 %v9183_v22, %v9019_v15  ;;  %v8236_v57 = vadd.f32 %v8204_v6, %v8040_v39  ;;  %v9508_v32 = vrot.slane %v6075_v8, %v20070_v27  ;;  %v9704_v0 = vrot.slane %v6075_v8, %v20071_v31 }
 0x5ee   : > { %v8626_v5 = vadd.f32 %v8594_v28, %v8430_v35  ;;  %v9182_v14 = vmul.f32 %v9120_v61, %v20387_v2  ;;  %v9377_v34 = vmul.f32 %v9312_v25, %v20345_v58  ;;  %v9900_v22 = vrot.slane %v6075_v8, %v20072_v30  ;;  %v18366_v28 = vpop.f32.mrb[54].mxu1 }
 0x5ef   : > { %v10096_v56 = vrot.slane %v6075_v8, %v20073_v29  ;;  %v8432_v50 = vadd.f32 %v8400_v33, %v8236_v57  ;;  %v8596_v41 = vmul.f32 %v8540_v24, %v20383_v9  ;;  %v8792_v37 = vmul.f32 %v8736_v12, %v20384_v63  ;;  %20395 = vst [vmem:[#allocation52_spill] sm:$0xff] %v18366_v28 }
 0x5f0   : > { %v8822_v48 = vadd.f32 %v8790_v38, %v8626_v5  ;;  %v8988_v26 = vmul.f32 %v8932_v20, %v20386_v11  ;;  %v9409_v4 = vadd.f32 %v9377_v34, %v9213_v62  ;;  %v9573_v15 = vmul.f32 %v9508_v32, %v20346_v19 }
 0x5f1   : > { %v10292_v61 = vrot.slane %v6075_v8, %v20074_v60  ;;  %v8628_v35 = vadd.f32 %v8596_v41, %v8432_v50  ;;  %v9184_v39 = vmul.f32 %v9128_v17, %v20387_v2  ;;  %v9769_v38 = vmul.f32 %v9704_v0, %v20347_v51 }
 0x5f2   : > { %v9018_v6 = vadd.f32 %v8986_v40, %v8822_v48  ;;  %v9605_v33 = vadd.f32 %v9573_v15, %v9409_v4  ;;  %v9965_v24 = vmul.f32 %v9900_v22, %v20348_v47  ;;  %v10161_v12 = vmul.f32 %v10096_v56, %v20349_v23  ;;  %v20396_v56 = vld [vmem:[#allocation54_spill] sm:$0xff] }
 0x5f3   : > { %v6077_v25 = vmax.f32 %v5949_v54, 0.0  ;;  %v8824_v57 = vadd.f32 %v8792_v37, %v8628_v35  ;;  %v10488_v62 = vrot.slane %v6075_v8, %v20075_v59  ;;  %v10684_v20 = vrot.slane %v6075_v8, %v20076_v46 }
 0x5f4   : > { %v9214_v5 = vadd.f32 %v9182_v14, %v9018_v6  ;;  %v9801_v32 = vadd.f32 %v9769_v38, %v9605_v33  ;;  %v10357_v40 = vmul.f32 %v10292_v61, %v20350_v13  ;;  %v5948_v54 = vadd.f32 %v20391_v49, %v20396_v56  ;;  %v18391_v6 = vpop.f32.mrb[55].mxu0 }
 0x5f5   : > { %v9320_v34 = vrot.slane %v6077_v25, %v20069_v44  ;;  %v9516_v17 = vrot.slane %v6077_v25, %v20070_v27  ;;  %v9020_v0 = vadd.f32 %v8988_v26, %v8824_v57  ;;  %v9712_v48 = vrot.slane %v6077_v25, %v20071_v31  ;;  %v20397_v26 = vld [vmem:[#allocation56_spill] sm:$0xff]  ;;  %20398 = vst [vmem:[#allocation41_spill] sm:$0xff] %v18391_v6 }
 0x5f6   : > { %v9908_v22 = vrot.slane %v6077_v25, %v20072_v30  ;;  %v9997_v14 = vadd.f32 %v9965_v24, %v9801_v32  ;;  %v10104_v8 = vrot.slane %v6077_v25, %v20073_v29  ;;  %v10300_v41 = vrot.slane %v6077_v25, %v20074_v60 }
 0x5f7   : > { %v9379_v50 = vmul.f32 %v9320_v34, %v20345_v58  ;;  %v9216_v37 = vadd.f32 %v9184_v39, %v9020_v0  ;;  %v10553_v4 = vmul.f32 %v10488_v62, %v20352_v55  ;;  %v10749_v15 = vmul.f32 %v10684_v20, %v20353_v18 }
 0x5f8   : > { %v5950_v61 = vadd.f32 %v20391_v49, %v20397_v26  ;;  %v10193_v35 = vadd.f32 %v10161_v12, %v9997_v14  ;;  %v9575_v33 = vmul.f32 %v9516_v17, %v20346_v19  ;;  %v10496_v24 = vrot.slane %v6077_v25, %v20075_v59  ;;  %v20399_v14 = vld [vmem:[#allocation10_spill] sm:$0xff] }
 0x5f9   : > { %v9411_v38 = vadd.f32 %v9379_v50, %v9215_v52  ;;  %v9771_v57 = vmul.f32 %v9712_v48, %v20347_v51  ;;  %v9967_v32 = vmul.f32 %v9908_v22, %v20348_v47  ;;  %v10692_v39 = vrot.slane %v6077_v25, %v20076_v46  ;;  %v20400_v50 = vld [vmem:[#allocation34_spill] sm:$0xff] }
 0x5fa   : > { %v6076_v62 = vmax.f32 %v5948_v54, 0.0  ;;  %v10389_v34 = vadd.f32 %v10357_v40, %v10193_v35  ;;  %v10163_v0 = vmul.f32 %v10104_v8, %v20349_v23  ;;  %v10359_v56 = vmul.f32 %v10300_v41, %v20350_v13  ;;  %v20401_v54 = vld [vmem:[#allocation13_spill] sm:$0xff] }
 0x5fb   : > { %v9607_v20 = vadd.f32 %v9575_v33, %v9411_v38  ;;  %v18402_v17 = vmax.f32 %v5950_v61, 0.0  ;;  %v5979_v48 = vadd.f32 %v20400_v50, %v20399_v14  ;;  %v10555_v25 = vmul.f32 %v10496_v24, %v20352_v55  ;;  %v18415_v38 = vpop.f32.mrb[55].mxu1 }
 0x5fc   : > { %v9316_v12 = vrot.slane %v6076_v62, %v20069_v44  ;;  %v9512_v52 = vrot.slane %v6076_v62, %v20070_v27  ;;  %v10585_v26 = vadd.f32 %v10553_v4, %v10389_v34  ;;  %v18409_v40 = vadd.f32 %v20400_v50, %v20401_v54  ;;  %20402 = vst [vmem:[#allocation79_spill] sm:$0xff] %v18415_v38 }
 0x5fd   : > { %v9803_v22 = vadd.f32 %v9771_v57, %v9607_v20  ;;  %v10751_v8 = vmul.f32 %v10692_v39, %v20353_v18  ;;  %v9708_v35 = vrot.slane %v6076_v62, %v20071_v31  ;;  %v9904_v61 = vrot.slane %v6076_v62, %v20072_v30 }
 0x5fe   : > { %v9378_v41 = vmul.f32 %v9316_v12, %v20345_v58  ;;  %v10781_v33 = vadd.f32 %v10749_v15, %v10585_v26  ;;  %v10100_v4 = vrot.slane %v6076_v62, %v20073_v29  ;;  %v10296_v24 = vrot.slane %v6076_v62, %v20074_v60 }
 0x5ff   : > { %v9999_v14 = vadd.f32 %v9967_v32, %v9803_v22  ;;  %v9574_v34 = vmul.f32 %v9512_v52, %v20346_v19  ;;  %v10492_v20 = vrot.slane %v6076_v62, %v20075_v59  ;;  %v9324_v39 = vrot.slane %v18402_v17, %v20069_v44 }
 0x600   : > { %v9410_v57 = vadd.f32 %v9378_v41, %v9214_v5  ;;  %v9520_v54 = vrot.slane %v18402_v17, %v20070_v27  ;;  %v9716_v15 = vrot.slane %v18402_v17, %v20071_v31  ;;  %v9912_v32 = vrot.slane %v18402_v17, %v20072_v30 }
 0x601   : > { %v10195_v12 = vadd.f32 %v10163_v0, %v9999_v14  ;;  %v9770_v5 = vmul.f32 %v9708_v35, %v20347_v51  ;;  %v9966_v52 = vmul.f32 %v9904_v61, %v20348_v47  ;;  %v9380_v22 = vmul.f32 %v9324_v39, %v20345_v58 }
 0x602   : > { %v9606_v26 = vadd.f32 %v9574_v34, %v9410_v57  ;;  %v10162_v38 = vmul.f32 %v10100_v4, %v20349_v23  ;;  %v10358_v0 = vmul.f32 %v10296_v24, %v20350_v13  ;;  %v10688_v14 = vrot.slane %v6076_v62, %v20076_v46 }
 0x603   : > { %v10391_v41 = vadd.f32 %v10359_v56, %v10195_v12  ;;  %v10554_v28 = vmul.f32 %v10492_v20, %v20352_v55  ;;  %v9412_v7 = vadd.f32 %v9380_v22, %v9216_v37  ;;  %v9576_v49 = vmul.f32 %v9520_v54, %v20346_v19 }
 0x604   : > { %v9802_v6 = vadd.f32 %v9770_v5, %v9606_v26  ;;  %v9772_v35 = vmul.f32 %v9716_v15, %v20347_v51  ;;  %v9968_v61 = vmul.f32 %v9912_v32, %v20348_v47  ;;  %v6107_v34 = vmax.f32 %v5979_v48, 0.0 }
 0x605   : > { %v10587_v57 = vadd.f32 %v10555_v25, %v10391_v41  ;;  %v9608_v56 = vadd.f32 %v9576_v49, %v9412_v7  ;;  %v10108_v4 = vrot.slane %v18402_v17, %v20073_v29  ;;  %v10304_v62 = vrot.slane %v18402_v17, %v20074_v60 }
 0x606   : > { %v9998_v39 = vadd.f32 %v9966_v52, %v9802_v6  ;;  %v10500_v37 = vrot.slane %v18402_v17, %v20075_v59  ;;  %v10696_v25 = vrot.slane %v18402_v17, %v20076_v46  ;;  %v10880_v20 = vrot.slane %v6107_v34, %v20069_v44  ;;  %v18458_v52 = vpop.f32.mrb[56].mxu1 }
 0x607   : > { %v10783_v24 = vadd.f32 %v10751_v8, %v10587_v57  ;;  %v9804_v54 = vadd.f32 %v9772_v35, %v9608_v56  ;;  %v11076_v6 = vrot.slane %v6107_v34, %v20070_v27  ;;  %v11272_v49 = vrot.slane %v6107_v34, %v20071_v31  ;;  %20404 = vst [vmem:[#allocation26_spill] sm:$0xff] %v18458_v52 }
 0x608   : > { %v10194_v12 = vadd.f32 %v10162_v38, %v9998_v39  ;;  %v10750_v7 = vmul.f32 %v10688_v14, %v20353_v18  ;;  %v10945_v48 = vmul.f32 %v10880_v20, %v16361_v53  ;;  %v11468_v8 = vrot.slane %v6107_v34, %v20072_v30  ;;  %v18456_v38 = vpop.f32.mrb[56].mxu0 }
 0x609   : > { %v11664_v15 = vrot.slane %v6107_v34, %v20073_v29  ;;  %v10000_v26 = vadd.f32 %v9968_v61, %v9804_v54  ;;  %v10164_v17 = vmul.f32 %v10108_v4, %v20349_v23  ;;  %v10360_v5 = vmul.f32 %v10304_v62, %v20350_v13  ;;  %20403 = vst [vmem:[#allocation64_spill] sm:$0xff] %v18456_v38 }
 0x60a   : > { %v10390_v32 = vadd.f32 %v10358_v0, %v10194_v12  ;;  %v10556_v22 = vmul.f32 %v10500_v37, %v20352_v55  ;;  %v10752_v41 = vmul.f32 %v10696_v25, %v20353_v18  ;;  %v10977_v14 = vadd.f32 %v10945_v48, %v10781_v33 }
 0x60b   : > { %v11141_v57 = vmul.f32 %v11076_v6, %v20357_v21  ;;  %v10196_v39 = vadd.f32 %v10164_v17, %v10000_v26  ;;  %v11337_v0 = vmul.f32 %v11272_v49, %v20358_v16  ;;  %v11860_v61 = vrot.slane %v6107_v34, %v20074_v60 }
 0x60c   : > { %v10586_v35 = vadd.f32 %v10554_v28, %v10390_v32  ;;  %v11533_v4 = vmul.f32 %v11468_v8, %v20359_v3  ;;  %v11729_v62 = vmul.f32 %v11664_v15, %v20267_v1  ;;  %v6109_v20 = vmax.f32 %v18409_v40, 0.0  ;;  %v20405_v32 = vld [vmem:[#allocation14_spill] sm:$0xff] }
 0x60d   : > { %v11173_v56 = vadd.f32 %v11141_v57, %v10977_v14  ;;  %v10392_v37 = vadd.f32 %v10360_v5, %v10196_v39  ;;  %v12056_v25 = vrot.slane %v6107_v34, %v20075_v59  ;;  %v12252_v33 = vrot.slane %v6107_v34, %v20076_v46  ;;  %v20406_v14 = vld [vmem:[#allocation8_spill] sm:$0xff] }
 0x60e   : > { %v10782_v12 = vadd.f32 %v10750_v7, %v10586_v35  ;;  %v10888_v28 = vrot.slane %v6109_v20, %v20069_v44  ;;  %v11084_v6 = vrot.slane %v6109_v20, %v20070_v27  ;;  %v11280_v49 = vrot.slane %v6109_v20, %v20071_v31  ;;  %v20407_v35 = vld [vmem:[#allocation20_spill] sm:$0xff] }
 0x60f   : > { %v11369_v54 = vadd.f32 %v11337_v0, %v11173_v56  ;;  %v10588_v48 = vadd.f32 %v10556_v22, %v10392_v37  ;;  %v11476_v8 = vrot.slane %v6109_v20, %v20072_v30  ;;  %v11672_v15 = vrot.slane %v6109_v20, %v20073_v29  ;;  %v20408_v22 = vld [vmem:[#allocation69_spill] sm:$0xff] }
 0x610   : > { %v5980_v40 = vadd.f32 %v20400_v50, %v20405_v32  ;;  %v11925_v26 = vmul.f32 %v11860_v61, %v20268_v42  ;;  %v10947_v34 = vmul.f32 %v10888_v28, %v16361_v53  ;;  %v11868_v17 = vrot.slane %v6109_v20, %v20074_v60 }
 0x611   : > { %v11565_v7 = vadd.f32 %v11533_v4, %v11369_v54  ;;  %v10784_v5 = vadd.f32 %v10752_v41, %v10588_v48  ;;  %v12121_v57 = vmul.f32 %v12056_v25, %v20406_v14  ;;  %v12317_v39 = vmul.f32 %v12252_v33, %v20407_v35  ;;  %v18489_v48 = vpop.f32.mrb[57].mxu0 }
 0x612   : > { %v5982_v0 = vadd.f32 %v20400_v50, %v20408_v22  ;;  %v10979_v37 = vadd.f32 %v10947_v34, %v10783_v24  ;;  %v11143_v52 = vmul.f32 %v11084_v6, %v20357_v21  ;;  %v11339_v4 = vmul.f32 %v11280_v49, %v20358_v16  ;;  %20409 = vst [vmem:[#allocation59_spill] sm:$0xff] %v18489_v48  ;;  %v20410_v34 = vld [vmem:[#allocation72_spill] sm:$0xff]  ;;  %v20411_v22 = vld [vmem:[#allocation35_spill] sm:$0xff] }
 0x613   : > { %v11761_v56 = vadd.f32 %v11729_v62, %v11565_v7  ;;  %v11535_v61 = vmul.f32 %v11476_v8, %v20359_v3  ;;  %v11731_v54 = vmul.f32 %v11672_v15, %v20267_v1  ;;  %v12064_v28 = vrot.slane %v6109_v20, %v20075_v59 }
 0x614   : > { %v6108_v41 = vmax.f32 %v5980_v40, 0.0  ;;  %v11175_v33 = vadd.f32 %v11143_v52, %v10979_v37  ;;  %v11927_v32 = vmul.f32 %v11868_v17, %v20268_v42  ;;  %v12260_v62 = vrot.slane %v6109_v20, %v20076_v46 }
 0x615   : > { %v11957_v25 = vadd.f32 %v11925_v26, %v11761_v56  ;;  %v18496_v8 = vmax.f32 %v5982_v0, 0.0  ;;  %v5887_v26 = vadd.f32 %v20411_v22, %v20410_v34  ;;  %v12123_v52 = vmul.f32 %v12064_v28, %v20406_v14  ;;  %v20412_v56 = vld [vmem:[#allocation78_spill] sm:$0xff] }
 0x616   : > { %v10884_v24 = vrot.slane %v6108_v41, %v20069_v44  ;;  %v11080_v6 = vrot.slane %v6108_v41, %v20070_v27  ;;  %v11276_v49 = vrot.slane %v6108_v41, %v20071_v31  ;;  %v11371_v7 = vadd.f32 %v11339_v4, %v11175_v33 }
 0x617   : > { %v12153_v15 = vadd.f32 %v12121_v57, %v11957_v25  ;;  %v11472_v40 = vrot.slane %v6108_v41, %v20072_v30  ;;  %v11668_v20 = vrot.slane %v6108_v41, %v20073_v29  ;;  %v5889_v37 = vadd.f32 %v20411_v22, %v20412_v56 }
 0x618   : > { %v10946_v17 = vmul.f32 %v10884_v24, %v16361_v53  ;;  %v11567_v38 = vadd.f32 %v11535_v61, %v11371_v7  ;;  %v12319_v0 = vmul.f32 %v12260_v62, %v20407_v35  ;;  %v11864_v57 = vrot.slane %v6108_v41, %v20074_v60  ;;  %v18512_v24 = vpop.f32.mrb[57].mxu1 }
 0x619   : > { %v12349_v48 = vadd.f32 %v12317_v39, %v12153_v15  ;;  %v11142_v25 = vmul.f32 %v11080_v6, %v20357_v21  ;;  %v11338_v33 = vmul.f32 %v11276_v49, %v20358_v16  ;;  %v10892_v28 = vrot.slane %v18496_v8, %v20069_v44  ;;  %20413 = vst [vmem:[#allocation73_spill] sm:$0xff] %v18512_v24 }
 0x61a   : > { %v10978_v4 = vadd.f32 %v10946_v17, %v10782_v12  ;;  %v11763_v34 = vadd.f32 %v11731_v54, %v11567_v38  ;;  %v11534_v50 = vmul.f32 %v11472_v40, %v20359_v3  ;;  %v12060_v39 = vrot.slane %v6108_v41, %v20075_v59 }
 0x61b   : > { %v11088_v61 = vrot.slane %v18496_v8, %v20070_v27  ;;  %v11730_v12 = vmul.f32 %v11668_v20, %v20267_v1  ;;  %v10948_v6 = vmul.f32 %v10892_v28, %v16361_v53  ;;  %v11284_v49 = vrot.slane %v18496_v8, %v20071_v31 }
 0x61c   : > { %v11174_v62 = vadd.f32 %v11142_v25, %v10978_v4  ;;  %v11959_v15 = vadd.f32 %v11927_v32, %v11763_v34  ;;  %v11926_v7 = vmul.f32 %v11864_v57, %v20268_v42  ;;  %v12256_v38 = vrot.slane %v6108_v41, %v20076_v46  ;;  %v20414_v4 = vld [vmem:[#allocation47_spill] sm:$0xff] }
 0x61d   : > { %v11480_v54 = vrot.slane %v18496_v8, %v20072_v30  ;;  %v10980_v17 = vadd.f32 %v10948_v6, %v10784_v5  ;;  %v11144_v56 = vmul.f32 %v11088_v61, %v20357_v21  ;;  %v11676_v20 = vrot.slane %v18496_v8, %v20073_v29 }
 0x61e   : > { %v11370_v40 = vadd.f32 %v11338_v33, %v11174_v62  ;;  %v18530_v25 = vadd.f32 %v20414_v4, %v12349_v48  ;;  %v12155_v28 = vadd.f32 %v12123_v52, %v11959_v15  ;;  %v12122_v32 = vmul.f32 %v12060_v39, %v20406_v14  ;;  %v18538_v33 = vpop.f32.mrb[58].mxu0 }
 0x61f   : > { %v11872_v57 = vrot.slane %v18496_v8, %v20074_v60  ;;  %v11176_v34 = vadd.f32 %v11144_v56, %v10980_v17  ;;  %v11340_v24 = vmul.f32 %v11284_v49, %v20358_v16  ;;  %v12068_v5 = vrot.slane %v18496_v8, %v20075_v59  ;;  %20415 = vst [vmem:[#allocation29_spill] sm:$0xff] %v18538_v33  ;;  %v20416_v17 = vld [vmem:[#allocation44_spill] sm:$0xff] }
 0x620   : > { %v11566_v41 = vadd.f32 %v11534_v50, %v11370_v40  ;;  %v12351_v61 = vadd.f32 %v12319_v0, %v12155_v28  ;;  %v12318_v62 = vmul.f32 %v12256_v38, %v20407_v35  ;;  %v11536_v48 = vmul.f32 %v11480_v54, %v20359_v3 }
 0x621   : > { %v18542_v52 = vmax.f32 %v5887_v26, 0.0  ;;  %v11372_v6 = vadd.f32 %v11340_v24, %v11176_v34  ;;  %v11732_v15 = vmul.f32 %v11676_v20, %v20267_v1  ;;  %v12264_v50 = vrot.slane %v18496_v8, %v20076_v46  ;;  %v20417_v8 = vld [vmem:[#allocation39_spill] sm:$0xff] }
 0x622   : > { %v11762_v39 = vadd.f32 %v11730_v12, %v11566_v41  ;;  %v11928_v49 = vmul.f32 %v11872_v57, %v20268_v42  ;;  %v12124_v24 = vmul.f32 %v12068_v5, %v20406_v14  ;;  %v18555_v12 = vmax.f32 %v5889_v37, 0.0  ;;  %v18566_v5 = vpop.f32.mrb[58].mxu1 }
 0x623   : > { %v6224_v40 = vrot.slane %v18542_v52, %v20069_v44  ;;  %v6388_v0 = vrot.slane %v18542_v52, %v20070_v27  ;;  %v6584_v38 = vrot.slane %v18542_v52, %v20071_v31  ;;  %v11568_v54 = vadd.f32 %v11536_v48, %v11372_v6  ;;  %20419 = vst [vmem:[#allocation30_spill] sm:$0xff] %v18566_v5  ;;  %v20420_v6 = vld [vmem:[#allocation49_spill] sm:$0xff] }
 0x624   : > { %v11958_v26 = vadd.f32 %v11926_v7, %v11762_v39  ;;  %v6780_v28 = vrot.slane %v18542_v52, %v20072_v30  ;;  %v6976_v57 = vrot.slane %v18542_v52, %v20073_v29  ;;  %v12320_v33 = vmul.f32 %v12264_v50, %v20407_v35  ;;  %v20418_v7 = vld [vmem:[#allocation61_spill] sm:$0xff] }
 0x625   : > { %v6277_v56 = vmul.f32 %v6224_v40, %v20416_v17  ;;  %v6441_v20 = vmul.f32 %v6388_v0, %v20417_v8  ;;  %v11764_v34 = vadd.f32 %v11732_v15, %v11568_v54  ;;  %v5888_v48 = vadd.f32 %v20411_v22, %v20418_v7  ;;  %v20422_v7 = vld [vmem:[#allocation25_spill] sm:$0xff] }
 0x626   : > { %v12154_v41 = vadd.f32 %v12122_v32, %v11958_v26  ;;  %v12389_v37 = vadd.f32 %v20414_v4, %v12351_v61  ;;  %v6637_v40 = vmul.f32 %v6584_v38, %v20420_v6  ;;  %v7172_v0 = vrot.slane %v18542_v52, %v20074_v60  ;;  %v20421_v26 = vld [vmem:[#allocation32_spill] sm:$0xff] }
 0x627   : > { %v6473_v39 = vadd.f32 %v6441_v20, %v6277_v56  ;;  %v11960_v42 = vadd.f32 %v11928_v49, %v11764_v34  ;;  %v6232_v32 = vrot.slane %v18555_v12, %v20069_v44  ;;  %v6396_v15 = vrot.slane %v18555_v12, %v20070_v27 }
 0x628   : > { %v12350_v14 = vadd.f32 %v12318_v62, %v12154_v41  ;;  %v6833_v54 = vmul.f32 %v6780_v28, %v20421_v26  ;;  %v7029_v5 = vmul.f32 %v6976_v57, %v20422_v7  ;;  %v6592_v61 = vrot.slane %v18555_v12, %v20071_v31 }
 0x629   : > { %v6669_v50 = vadd.f32 %v6637_v40, %v6473_v39  ;;  %v12156_v56 = vadd.f32 %v12124_v24, %v11960_v42  ;;  %v6279_v62 = vmul.f32 %v6232_v32, %v20416_v17  ;;  %v6443_v49 = vmul.f32 %v6396_v15, %v20417_v8  ;;  %v20423_v24 = vld [vmem:[#allocation33_spill] sm:$0xff]  ;;  %v18592_v15 = vpop.f32.mrb[59].mxu0 }
 0x62a   : > { %v12388_v38 = vadd.f32 %v20414_v4, %v12350_v14  ;;  %v7368_v41 = vrot.slane %v18542_v52, %v20075_v59  ;;  %v6639_v34 = vmul.f32 %v6592_v61, %v20420_v6  ;;  %v6788_v28 = vrot.slane %v18555_v12, %v20072_v30  ;;  %20424 = vst [vmem:[#allocation62_spill] sm:$0xff] %v18592_v15 }
 0x62b   : > { %v6865_v20 = vadd.f32 %v6833_v54, %v6669_v50  ;;  %v12352_v39 = vadd.f32 %v12320_v33, %v12156_v56  ;;  %v6475_v40 = vadd.f32 %v6443_v49, %v6279_v62  ;;  %v6984_v42 = vrot.slane %v18555_v12, %v20073_v29  ;;  %v13022_v50 = vld [vmem:[%s13175_s17 + $0x50] sm:$0xff] }
 0x62c   : > { %v12441_v57 = vcombine.low %v18530_v25, %v12388_v38  ;;  %v7225_v32 = vmul.f32 %v7172_v0, %v20423_v24  ;;  %v6835_v1 = vmul.f32 %v6788_v28, %v20421_v26  ;;  %v20425_v38 = vld [vmem:[#allocation38_spill] sm:$0xff]  ;;  %v7564_v56 = vrot.slane %v18542_v52, %v20076_v46 }
 0x62d   : > { %v7061_v14 = vadd.f32 %v7029_v5, %v6865_v20  ;;  %v12390_v61 = vadd.f32 %v20414_v4, %v12352_v39  ;;  %v6671_v35 = vadd.f32 %v6639_v34, %v6475_v40  ;;  %v7421_v33 = vmul.f32 %v7368_v41, %v20425_v38 }
 0x62e   : > { %v12473_v54 = vsub.f32 %v13022_v50, %v12441_v57  ;;  %v18600_v62 = vmax.f32 %v5888_v48, 0.0  ;;  %v7031_v49 = vmul.f32 %v6984_v42, %v20422_v7  ;;  %v7180_v20 = vrot.slane %v18555_v12, %v20074_v60  ;;  %v20426_v57 = vld [vmem:[#allocation77_spill] sm:$0xff]  ;;  %v20428_v50 = vld [vmem:[#allocation24_spill] sm:$0xff] }
 0x62f   : > { %v7257_v25 = vadd.f32 %v7225_v32, %v7061_v14  ;;  %v12442_v5 = vcombine.low %v12389_v37, %v12390_v61  ;;  %v6867_v0 = vadd.f32 %v6835_v1, %v6671_v35  ;;  %v7376_v34 = vrot.slane %v18555_v12, %v20075_v59  ;;  %v13023_v37 = vld [vmem:[%s13175_s17 + $0x58] sm:$0xff]  ;;  %v18623_v32 = vpop.f32.mrb[59].mxu1 }
 0x630   : > { %12489 = vst [vmem:[%s17942_s21 + $0x50] sm:$0x77] %v12473_v54  ;;  %v7572_v41 = vrot.slane %v18555_v12, %v20076_v46  ;;  %v6228_v52 = vrot.slane %v18600_v62, %v20069_v44  ;;  %v6392_v48 = vrot.slane %v18600_v62, %v20070_v27  ;;  %v6588_v28 = vrot.slane %v18600_v62, %v20071_v31 }
 0x631   : > { %v12474_v1 = vsub.f32 %v13023_v37, %v12442_v5  ;;  %v7063_v35 = vadd.f32 %v7031_v49, %v6867_v0  ;;  %v5890_v39 = vadd.f32 %v20411_v22, %v20426_v57  ;;  %v7453_v40 = vadd.f32 %v7421_v33, %v7257_v25  ;;  %20427 = vst [vmem:[#allocation76_spill] sm:$0xff] %v18623_v32  ;;  %v20429_v5 = vld [vmem:[#allocation63_spill] sm:$0xff]  ;;  %v20430_v0 = vld [vmem:[#allocation37_spill] sm:$0xff] }
 0x632   : > { %v6278_v42 = vmul.f32 %v6228_v52, %v20416_v17  ;;  %v6442_v12 = vmul.f32 %v6392_v48, %v20417_v8  ;;  %v6784_v14 = vrot.slane %v18600_v62, %v20072_v30  ;;  %v7617_v54 = vmul.f32 %v7564_v56, %v20428_v50 }
 0x633   : > { %12490 = vst [vmem:[%s17942_s21 + $0x58] sm:$0x77] %v12474_v1  ;;  %v7227_v61 = vmul.f32 %v7180_v20, %v20423_v24  ;;  %v5919_v49 = vadd.f32 %v20430_v0, %v20429_v5  ;;  %v7423_v37 = vmul.f32 %v7376_v34, %v20425_v38  ;;  %v6638_v33 = vmul.f32 %v6588_v28, %v20420_v6 }
 0x634   : > { %v6474_v25 = vadd.f32 %v6442_v12, %v6278_v42  ;;  %v6980_v52 = vrot.slane %v18600_v62, %v20073_v29  ;;  %v7619_v57 = vmul.f32 %v7572_v41, %v20428_v50  ;;  %v7176_v1 = vrot.slane %v18600_v62, %v20074_v60 }
 0x635   : > { %v7259_v48 = vadd.f32 %v7227_v61, %v7063_v35  ;;  %v6018_v56 = vmax.f32 %v5890_v39, 0.0  ;;  %v7649_v32 = vadd.f32 %v7617_v54, %v7453_v40  ;;  %v6834_v15 = vmul.f32 %v6784_v14, %v20421_v26 }
 0x636   : > { %v6670_v20 = vadd.f32 %v6638_v33, %v6474_v25  ;;  %v7372_v34 = vrot.slane %v18600_v62, %v20075_v59  ;;  %v18643_v35 = vmax.f32 %v5919_v49, 0.0  ;;  %v7030_v61 = vmul.f32 %v6980_v52, %v20422_v7 }
 0x637   : > { %v6236_v42 = vrot.slane %v6018_v56, %v20069_v44  ;;  %v6400_v28 = vrot.slane %v6018_v56, %v20070_v27  ;;  %v6596_v12 = vrot.slane %v6018_v56, %v20071_v31  ;;  %v7568_v39 = vrot.slane %v18600_v62, %v20076_v46 }
 0x638   : > { %v6866_v41 = vadd.f32 %v6834_v15, %v6670_v20  ;;  %v6792_v40 = vrot.slane %v6018_v56, %v20072_v30  ;;  %v7455_v14 = vadd.f32 %v7423_v37, %v7259_v48  ;;  %v7226_v54 = vmul.f32 %v7176_v1, %v20423_v24  ;;  %v20431_v15 = vld [vmem:[#allocation48_spill] sm:$0xff] }
 0x639   : > { %v6280_v5 = vmul.f32 %v6236_v42, %v20416_v17  ;;  %v6444_v25 = vmul.f32 %v6400_v28, %v20417_v8  ;;  %v7422_v4 = vmul.f32 %v7372_v34, %v20425_v38  ;;  %v6988_v49 = vrot.slane %v6018_v56, %v20073_v29  ;;  %v18665_v28 = vpop.f32.mrb[60].mxu0 }
 0x63a   : > { %v7062_v33 = vadd.f32 %v7030_v61, %v6866_v41  ;;  %v5921_v52 = vadd.f32 %v20430_v0, %v20431_v15  ;;  %v6640_v62 = vmul.f32 %v6596_v12, %v20420_v6  ;;  %v7184_v22 = vrot.slane %v6018_v56, %v20074_v60  ;;  %20432 = vst [vmem:[#allocation36_spill] sm:$0xff] %v18665_v28 }
 0x63b   : > { %v6476_v20 = vadd.f32 %v6444_v25, %v6280_v5  ;;  %v7760_v37 = vrot.slane %v18643_v35, %v20069_v44  ;;  %v6836_v48 = vmul.f32 %v6792_v40, %v20421_v26  ;;  %v7380_v1 = vrot.slane %v6018_v56, %v20075_v59  ;;  %v18674_v26 = vpop.f32.mrb[60].mxu1 }
 0x63c   : > { %v7576_v42 = vrot.slane %v6018_v56, %v20076_v46  ;;  %v7956_v34 = vrot.slane %v18643_v35, %v20070_v27  ;;  %v7258_v41 = vadd.f32 %v7226_v54, %v7062_v33  ;;  %v8152_v5 = vrot.slane %v18643_v35, %v20071_v31  ;;  %20433 = vst [vmem:[#allocation6_spill] sm:$0xff] %v18674_v26 }
 0x63d   : > { %v6672_v61 = vadd.f32 %v6640_v62, %v6476_v20  ;;  %v7813_v12 = vmul.f32 %v7760_v37, %v20146_v36  ;;  %v7651_v25 = vadd.f32 %v7619_v57, %v7455_v14  ;;  %v7618_v15 = vmul.f32 %v7568_v39, %v20428_v50 }
 0x63e   : > { %v7032_v40 = vmul.f32 %v6988_v49, %v20422_v7  ;;  %v8348_v56 = vrot.slane %v18643_v35, %v20072_v30  ;;  %v7228_v28 = vmul.f32 %v7184_v22, %v20423_v24  ;;  %v8009_v33 = vmul.f32 %v7956_v34, %v20147_v43 }
 0x63f   : > { %v6868_v6 = vadd.f32 %v6836_v48, %v6672_v61  ;;  %v7845_v54 = vadd.f32 %v7813_v12, %v7649_v32  ;;  %v7424_v20 = vmul.f32 %v7380_v1, %v20425_v38  ;;  %v7620_v62 = vmul.f32 %v7576_v42, %v20428_v50 }
 0x640   : > { %v8544_v57 = vrot.slane %v18643_v35, %v20073_v29  ;;  %v6049_v39 = vmax.f32 %v5921_v52, 0.0  ;;  %v7454_v14 = vadd.f32 %v7422_v4, %v7258_v41  ;;  %v8205_v7 = vmul.f32 %v8152_v5, %v16175_v45 }
 0x641   : > { %v7064_v49 = vadd.f32 %v7032_v40, %v6868_v6  ;;  %v8041_v37 = vadd.f32 %v8009_v33, %v7845_v54  ;;  %v8401_v48 = vmul.f32 %v8348_v56, %v20382_v10  ;;  %v8740_v22 = vrot.slane %v18643_v35, %v20074_v60  ;;  %v20434_v6 = vld [vmem:[#allocation19_spill] sm:$0xff] }
 0x642   : > { %v7768_v32 = vrot.slane %v6049_v39, %v20069_v44  ;;  %v7964_v1 = vrot.slane %v6049_v39, %v20070_v27  ;;  %v8936_v42 = vrot.slane %v18643_v35, %v20075_v59  ;;  %v9132_v4 = vrot.slane %v18643_v35, %v20076_v46 }
 0x643   : > { %v8237_v34 = vadd.f32 %v8205_v7, %v8041_v37  ;;  %v5920_v52 = vadd.f32 %v20430_v0, %v20434_v6  ;;  %v7260_v41 = vadd.f32 %v7228_v28, %v7064_v49  ;;  %v8160_v12 = vrot.slane %v6049_v39, %v20071_v31  ;;  %v18702_v28 = vpop.f32.mrb[61].mxu0 }
 0x644   : > { %v7815_v61 = vmul.f32 %v7768_v32, %v20146_v36  ;;  %v8356_v5 = vrot.slane %v6049_v39, %v20072_v30  ;;  %v7650_v40 = vadd.f32 %v7618_v15, %v7454_v14  ;;  %v8597_v7 = vmul.f32 %v8544_v57, %v20383_v9  ;;  %20435 = vst [vmem:[#allocation4_spill] sm:$0xff] %v18702_v28 }
 0x645   : > { %v8433_v56 = vadd.f32 %v8401_v48, %v8237_v34  ;;  %v8552_v54 = vrot.slane %v6049_v39, %v20073_v29  ;;  %v8793_v33 = vmul.f32 %v8740_v22, %v20384_v63  ;;  %v8011_v35 = vmul.f32 %v7964_v1, %v20147_v43 }
 0x646   : > { %v7847_v37 = vadd.f32 %v7815_v61, %v7651_v25  ;;  %v8748_v6 = vrot.slane %v6049_v39, %v20074_v60  ;;  %v8989_v32 = vmul.f32 %v8936_v42, %v20386_v11  ;;  %v9185_v26 = vmul.f32 %v9132_v4, %v20387_v2 }
 0x647   : > { %v8629_v49 = vadd.f32 %v8597_v7, %v8433_v56  ;;  %v18706_v15 = vmax.f32 %v5920_v52, 0.0  ;;  %v7456_v14 = vadd.f32 %v7424_v20, %v7260_v41  ;;  %v8207_v48 = vmul.f32 %v8160_v12, %v16175_v45  ;;  %v20436_v20 = vld [vmem:[#allocation12_spill] sm:$0xff] }
 0x648   : > { %v8043_v57 = vadd.f32 %v8011_v35, %v7847_v37  ;;  %v8403_v22 = vmul.f32 %v8356_v5, %v20382_v10  ;;  %v8599_v1 = vmul.f32 %v8552_v54, %v20383_v9  ;;  %v8795_v4 = vmul.f32 %v8748_v6, %v20384_v63  ;;  %v20437_v35 = vld [vmem:[#allocation28_spill] sm:$0xff]  ;;  %v20438_v6 = vld [vmem:[#allocation27_spill] sm:$0xff] }
 0x649   : > { %v8825_v25 = vadd.f32 %v8793_v33, %v8629_v49  ;;  %v7764_v34 = vrot.slane %v18706_v15, %v20069_v44  ;;  %v7960_v61 = vrot.slane %v18706_v15, %v20070_v27  ;;  %v8944_v52 = vrot.slane %v6049_v39, %v20075_v59 }
 0x64a   : > { %v8239_v42 = vadd.f32 %v8207_v48, %v8043_v57  ;;  %v5922_v41 = vadd.f32 %v20430_v0, %v20436_v20  ;;  %v9140_v5 = vrot.slane %v6049_v39, %v20076_v46  ;;  %v8156_v7 = vrot.slane %v18706_v15, %v20071_v31  ;;  %v18729_v57 = vpop.f32.mrb[61].mxu1 }
 0x64b   : > { %v9021_v12 = vadd.f32 %v8989_v32, %v8825_v25  ;;  %v7814_v56 = vmul.f32 %v7764_v34, %v20146_v36  ;;  %v8352_v33 = vrot.slane %v18706_v15, %v20072_v30  ;;  %v8548_v37 = vrot.slane %v18706_v15, %v20073_v29  ;;  %20439 = vst [vmem:[#allocation5_spill] sm:$0xff] %v18729_v57 }
 0x64c   : > { %v8435_v54 = vadd.f32 %v8403_v22, %v8239_v42  ;;  %v5951_v49 = vadd.f32 %v20438_v6, %v20437_v35  ;;  %v8010_v39 = vmul.f32 %v7960_v61, %v20147_v43  ;;  %v8744_v25 = vrot.slane %v18706_v15, %v20074_v60 }
 0x64d   : > { %v9217_v32 = vadd.f32 %v9185_v26, %v9021_v12  ;;  %v7846_v48 = vadd.f32 %v7814_v56, %v7650_v40  ;;  %v7652_v34 = vadd.f32 %v7620_v62, %v7456_v14  ;;  %v8991_v42 = vmul.f32 %v8944_v52, %v20386_v11 }
 0x64e   : > { %v8631_v22 = vadd.f32 %v8599_v1, %v8435_v54  ;;  %v18735_v20 = vmax.f32 %v5922_v41, 0.0  ;;  %v9187_v28 = vmul.f32 %v9140_v5, %v20387_v2  ;;  %v8206_v35 = vmul.f32 %v8156_v7, %v16175_v45  ;;  %v18755_v54 = vpop.f32.mrb[62].mxu0 }
 0x64f   : > { %v8042_v0 = vadd.f32 %v8010_v39, %v7846_v48  ;;  %v8940_v26 = vrot.slane %v18706_v15, %v20075_v59  ;;  %v8402_v61 = vmul.f32 %v8352_v33, %v20382_v10  ;;  %v8598_v1 = vmul.f32 %v8548_v37, %v20383_v9  ;;  %20440 = vst [vmem:[#allocation9_spill] sm:$0xff] %v18755_v54 }
 0x650   : > { %v8827_v40 = vadd.f32 %v8795_v4, %v8631_v22  ;;  %v7772_v12 = vrot.slane %v18735_v20, %v20069_v44  ;;  %v7968_v62 = vrot.slane %v18735_v20, %v20070_v27  ;;  %v8794_v52 = vmul.f32 %v8744_v25, %v20384_v63 }
 0x651   : > { %v8238_v14 = vadd.f32 %v8206_v35, %v8042_v0  ;;  %v18748_v41 = vmax.f32 %v5951_v49, 0.0  ;;  %v9136_v56 = vrot.slane %v18706_v15, %v20076_v46  ;;  %v8164_v7 = vrot.slane %v18735_v20, %v20071_v31 }
 0x652   : > { %v9023_v5 = vadd.f32 %v8991_v42, %v8827_v40  ;;  %v7816_v4 = vmul.f32 %v7772_v12, %v20146_v36  ;;  %v8990_v0 = vmul.f32 %v8940_v26, %v20386_v11  ;;  %v8360_v37 = vrot.slane %v18735_v20, %v20072_v30  ;;  %v20441_v26 = vld [vmem:[#allocation23_spill] sm:$0xff] }
 0x653   : > { %v8434_v33 = vadd.f32 %v8402_v61, %v8238_v14  ;;  %v8556_v49 = vrot.slane %v18735_v20, %v20073_v29  ;;  %v8012_v15 = vmul.f32 %v7968_v62, %v20147_v43  ;;  %v8752_v25 = vrot.slane %v18735_v20, %v20074_v60 }
 0x654   : > { %v9219_v48 = vadd.f32 %v9187_v28, %v9023_v5  ;;  %v7848_v39 = vadd.f32 %v7816_v4, %v7652_v34  ;;  %v9328_v42 = vrot.slane %v18748_v41, %v20069_v44  ;;  %v9524_v35 = vrot.slane %v18748_v41, %v20070_v27  ;;  %v20442_v34 = vld [vmem:[#allocation31_spill] sm:$0xff] }
 0x655   : > { %v8630_v22 = vadd.f32 %v8598_v1, %v8434_v33  ;;  %v5953_v40 = vadd.f32 %v20438_v6, %v20441_v26  ;;  %v8208_v12 = vmul.f32 %v8164_v7, %v16175_v45  ;;  %v9720_v28 = vrot.slane %v18748_v41, %v20071_v31 }
 0x656   : > { %v8044_v61 = vadd.f32 %v8012_v15, %v7848_v39  ;;  %v5952_v62 = vadd.f32 %v20438_v6, %v20442_v34  ;;  %v9186_v1 = vmul.f32 %v9136_v56, %v20387_v2  ;;  %v8404_v5 = vmul.f32 %v8360_v37, %v20382_v10  ;;  %v18783_v15 = vpop.f32.mrb[62].mxu1 }
 0x657   : > { %v8826_v14 = vadd.f32 %v8794_v52, %v8630_v22  ;;  %v9381_v4 = vmul.f32 %v9328_v42, %v20345_v58  ;;  %v8600_v54 = vmul.f32 %v8556_v49, %v20383_v9  ;;  %v8796_v39 = vmul.f32 %v8752_v25, %v20384_v63  ;;  %20443 = vst [vmem:[#allocation2_spill] sm:$0xff] %v18783_v15 }
 0x658   : > { %v8240_v33 = vadd.f32 %v8208_v12, %v8044_v61  ;;  %v8948_v7 = vrot.slane %v18735_v20, %v20075_v59  ;;  %v9577_v52 = vmul.f32 %v9524_v35, %v20346_v19  ;;  %v9916_v56 = vrot.slane %v18748_v41, %v20072_v30 }
 0x659   : > { %v9022_v26 = vadd.f32 %v8990_v0, %v8826_v14  ;;  %v9413_v57 = vadd.f32 %v9381_v4, %v9217_v32  ;;  %v9144_v22 = vrot.slane %v18735_v20, %v20076_v46  ;;  %v9773_v49 = vmul.f32 %v9720_v28, %v20347_v51 }
 0x65a   : > { %v8436_v37 = vadd.f32 %v8404_v5, %v8240_v33  ;;  %v6081_v42 = vmax.f32 %v5953_v40, 0.0  ;;  %v10112_v12 = vrot.slane %v18748_v41, %v20073_v29  ;;  %v10308_v32 = vrot.slane %v18748_v41, %v20074_v60 }
 0x65b   : > { %v9218_v25 = vadd.f32 %v9186_v1, %v9022_v26  ;;  %v9609_v61 = vadd.f32 %v9577_v52, %v9413_v57  ;;  %v8992_v35 = vmul.f32 %v8948_v7, %v20386_v11  ;;  %v9969_v20 = vmul.f32 %v9916_v56, %v20348_v47 }
 0x65c   : > { %v8632_v0 = vadd.f32 %v8600_v54, %v8436_v37  ;;  %v9336_v34 = vrot.slane %v6081_v42, %v20069_v44  ;;  %v9532_v14 = vrot.slane %v6081_v42, %v20070_v27  ;;  %v10504_v40 = vrot.slane %v18748_v41, %v20075_v59 }
 0x65d   : > { %v9805_v5 = vadd.f32 %v9773_v49, %v9609_v61  ;;  %v10700_v57 = vrot.slane %v18748_v41, %v20076_v46  ;;  %v9188_v1 = vmul.f32 %v9144_v22, %v20387_v2  ;;  %v9728_v4 = vrot.slane %v6081_v42, %v20071_v31 }
 0x65e   : > { %v8828_v28 = vadd.f32 %v8796_v39, %v8632_v0  ;;  %v9383_v54 = vmul.f32 %v9336_v34, %v20345_v58  ;;  %v10165_v7 = vmul.f32 %v10112_v12, %v20349_v23  ;;  %v10361_v26 = vmul.f32 %v10308_v32, %v20350_v13  ;;  %v18811_v39 = vpop.f32.mrb[63].mxu0 }
 0x65f   : > { %v10001_v33 = vadd.f32 %v9969_v20, %v9805_v5  ;;  %v9924_v52 = vrot.slane %v6081_v42, %v20072_v30  ;;  %v9579_v49 = vmul.f32 %v9532_v14, %v20346_v19  ;;  %v10120_v41 = vrot.slane %v6081_v42, %v20073_v29  ;;  %20444 = vst [vmem:[#allocation3_spill] sm:$0xff] %v18811_v39 }
 0x660   : > { %v9024_v56 = vadd.f32 %v8992_v35, %v8828_v28  ;;  %v9415_v37 = vadd.f32 %v9383_v54, %v9219_v48  ;;  %v10557_v61 = vmul.f32 %v10504_v40, %v20352_v55  ;;  %v10753_v0 = vmul.f32 %v10700_v57, %v20353_v18 }
 0x661   : > { %v10197_v22 = vadd.f32 %v10165_v7, %v10001_v33  ;;  %v18815_v34 = vmax.f32 %v5952_v62, 0.0  ;;  %v9775_v32 = vmul.f32 %v9728_v4, %v20347_v51  ;;  %v10316_v35 = vrot.slane %v6081_v42, %v20074_v60 }
 0x662   : > { %v9220_v12 = vadd.f32 %v9188_v1, %v9024_v56  ;;  %v9611_v5 = vadd.f32 %v9579_v49, %v9415_v37  ;;  %v9971_v14 = vmul.f32 %v9924_v52, %v20348_v47  ;;  %v10167_v57 = vmul.f32 %v10120_v41, %v20349_v23  ;;  %v20445_v1 = vld [vmem:[#allocation75_spill] sm:$0xff]  ;;  %v20446_v49 = vld [vmem:[#allocation60_spill] sm:$0xff]  ;;  %v20447_v41 = vld [vmem:[#allocation34_spill] sm:$0xff] }
 0x663   : > { %v10393_v48 = vadd.f32 %v10361_v26, %v10197_v22  ;;  %v9332_v20 = vrot.slane %v18815_v34, %v20069_v44  ;;  %v9528_v28 = vrot.slane %v18815_v34, %v20070_v27  ;;  %v10512_v62 = vrot.slane %v6081_v42, %v20075_v59 }
 0x664   : > { %v9807_v40 = vadd.f32 %v9775_v32, %v9611_v5  ;;  %v5954_v54 = vadd.f32 %v20438_v6, %v20445_v1  ;;  %v10708_v33 = vrot.slane %v6081_v42, %v20076_v46  ;;  %v9724_v26 = vrot.slane %v18815_v34, %v20071_v31  ;;  %v18838_v5 = vpop.f32.mrb[63].mxu1 }
 0x665   : > { %v10589_v4 = vadd.f32 %v10557_v61, %v10393_v48  ;;  %v9382_v7 = vmul.f32 %v9332_v20, %v20345_v58  ;;  %v9920_v56 = vrot.slane %v18815_v34, %v20072_v30  ;;  %v10116_v37 = vrot.slane %v18815_v34, %v20073_v29  ;;  %20448 = vst [vmem:[#allocation81_spill] sm:$0xff] %v18838_v5 }
 0x666   : > { %v10003_v52 = vadd.f32 %v9971_v14, %v9807_v40  ;;  %v5983_v22 = vadd.f32 %v20447_v41, %v20446_v49  ;;  %v9578_v42 = vmul.f32 %v9528_v28, %v20346_v19  ;;  %v10312_v48 = vrot.slane %v18815_v34, %v20074_v60 }
 0x667   : > { %v10785_v61 = vadd.f32 %v10753_v0, %v10589_v4  ;;  %v9414_v32 = vadd.f32 %v9382_v7, %v9218_v25  ;;  %v10363_v14 = vmul.f32 %v10316_v35, %v20350_v13  ;;  %v10559_v40 = vmul.f32 %v10512_v62, %v20352_v55 }
 0x668   : > { %v10199_v20 = vadd.f32 %v10167_v57, %v10003_v52  ;;  %v6082_v1 = vmax.f32 %v5954_v54, 0.0  ;;  %v10755_v39 = vmul.f32 %v10708_v33, %v20353_v18  ;;  %v9774_v49 = vmul.f32 %v9724_v26, %v20347_v51 }
 0x669   : > { %v9610_v15 = vadd.f32 %v9578_v42, %v9414_v32  ;;  %v10508_v0 = vrot.slane %v18815_v34, %v20075_v59  ;;  %v9970_v28 = vmul.f32 %v9920_v56, %v20348_v47  ;;  %v10166_v35 = vmul.f32 %v10116_v37, %v20349_v23 }
 0x66a   : > { %v10395_v25 = vadd.f32 %v10363_v14, %v10199_v20  ;;  %v9340_v4 = vrot.slane %v6082_v1, %v20069_v44  ;;  %v9536_v57 = vrot.slane %v6082_v1, %v20070_v27  ;;  %v10362_v62 = vmul.f32 %v10312_v48, %v20350_v13 }
 0x66b   : > { %v9806_v7 = vadd.f32 %v9774_v49, %v9610_v15  ;;  %v18854_v54 = vmax.f32 %v5983_v22, 0.0  ;;  %v10704_v26 = vrot.slane %v18815_v34, %v20076_v46  ;;  %v9732_v32 = vrot.slane %v6082_v1, %v20071_v31  ;;  %v20449_v15 = vld [vmem:[#allocation52_spill] sm:$0xff] }
 0x66c   : > { %v10591_v33 = vadd.f32 %v10559_v40, %v10395_v25  ;;  %v9384_v52 = vmul.f32 %v9340_v4, %v20345_v58  ;;  %v10558_v42 = vmul.f32 %v10508_v0, %v20352_v55  ;;  %v9928_v20 = vrot.slane %v6082_v1, %v20072_v30 }
 0x66d   : > { %v10002_v56 = vadd.f32 %v9970_v28, %v9806_v7  ;;  %v5985_v37 = vadd.f32 %v20447_v41, %v20449_v15  ;;  %v9580_v22 = vmul.f32 %v9536_v57, %v20346_v19  ;;  %v10124_v40 = vrot.slane %v6082_v1, %v20073_v29  ;;  %v20450_v28 = vld [vmem:[#allocation41_spill] sm:$0xff] }
 0x66e   : > { %v10787_v14 = vadd.f32 %v10755_v39, %v10591_v33  ;;  %v9416_v48 = vadd.f32 %v9384_v52, %v9220_v12  ;;  %v10896_v34 = vrot.slane %v18854_v54, %v20069_v44  ;;  %v11092_v25 = vrot.slane %v18854_v54, %v20070_v27 }
 0x66f   : > { %v10198_v49 = vadd.f32 %v10166_v35, %v10002_v56  ;;  %v5984_v0 = vadd.f32 %v20447_v41, %v20450_v28  ;;  %v9776_v7 = vmul.f32 %v9732_v32, %v20347_v51  ;;  %v10320_v39 = vrot.slane %v6082_v1, %v20074_v60 }
 0x670   : > { %v9612_v4 = vadd.f32 %v9580_v22, %v9416_v48  ;;  %v11288_v12 = vrot.slane %v18854_v54, %v20071_v31  ;;  %v10754_v35 = vmul.f32 %v10704_v26, %v20353_v18  ;;  %v9972_v33 = vmul.f32 %v9928_v20, %v20348_v47 }
 0x671   : > { %v10394_v57 = vadd.f32 %v10362_v62, %v10198_v49  ;;  %v10949_v52 = vmul.f32 %v10896_v34, %v16361_v53  ;;  %v10168_v15 = vmul.f32 %v10124_v40, %v20349_v23  ;;  %v10516_v28 = vrot.slane %v6082_v1, %v20075_v59 }
 0x672   : > { %v9808_v56 = vadd.f32 %v9776_v7, %v9612_v4  ;;  %v10712_v48 = vrot.slane %v6082_v1, %v20076_v46  ;;  %v11145_v5 = vmul.f32 %v11092_v25, %v20357_v21  ;;  %v11484_v62 = vrot.slane %v18854_v54, %v20072_v30 }
 0x673   : > { %v10590_v32 = vadd.f32 %v10558_v42, %v10394_v57  ;;  %v10981_v22 = vadd.f32 %v10949_v52, %v10785_v61  ;;  %v10364_v26 = vmul.f32 %v10320_v39, %v20350_v13  ;;  %v11341_v20 = vmul.f32 %v11288_v12, %v20358_v16 }
 0x674   : > { %v10004_v49 = vadd.f32 %v9972_v33, %v9808_v56  ;;  %v18887_v34 = vmax.f32 %v5985_v37, 0.0  ;;  %v11680_v7 = vrot.slane %v18854_v54, %v20073_v29  ;;  %v11876_v61 = vrot.slane %v18854_v54, %v20074_v60 }
 0x675   : > { %v10786_v4 = vadd.f32 %v10754_v35, %v10590_v32  ;;  %v11177_v40 = vadd.f32 %v11145_v5, %v10981_v22  ;;  %v10560_v42 = vmul.f32 %v10516_v28, %v20352_v55  ;;  %v10756_v37 = vmul.f32 %v10712_v48, %v20353_v18  ;;  %v20451_v28 = vld [vmem:[#allocation15_spill] sm:$0xff]  ;;  %v20454_v18 = vld [vmem:[#allocation20_spill] sm:$0xff] }
 0x676   : > { %v10200_v1 = vadd.f32 %v10168_v15, %v10004_v49  ;;  %v10904_v25 = vrot.slane %v18887_v34, %v20069_v44  ;;  %v11100_v39 = vrot.slane %v18887_v34, %v20070_v27  ;;  %v11537_v5 = vmul.f32 %v11484_v62, %v20359_v3  ;;  %v20452_v22 = vld [vmem:[#allocation7_spill] sm:$0xff] }
 0x677   : > { %v11373_v12 = vadd.f32 %v11341_v20, %v11177_v40  ;;  %v12072_v57 = vrot.slane %v18854_v54, %v20075_v59  ;;  %v12268_v33 = vrot.slane %v18854_v54, %v20076_v46  ;;  %v11296_v56 = vrot.slane %v18887_v34, %v20071_v31 }
 0x678   : > { %v10396_v35 = vadd.f32 %v10364_v26, %v10200_v1  ;;  %v10951_v52 = vmul.f32 %v10904_v25, %v16361_v53  ;;  %v11733_v32 = vmul.f32 %v11680_v7, %v20451_v28  ;;  %v11929_v48 = vmul.f32 %v11876_v61, %v20452_v22  ;;  %v20453_v1 = vld [vmem:[#allocation8_spill] sm:$0xff] }
 0x679   : > { %v11569_v15 = vadd.f32 %v11537_v5, %v11373_v12  ;;  %v11492_v62 = vrot.slane %v18887_v34, %v20072_v30  ;;  %v11147_v26 = vmul.f32 %v11100_v39, %v20357_v21  ;;  %v11688_v54 = vrot.slane %v18887_v34, %v20073_v29 }
 0x67a   : > { %v10592_v49 = vadd.f32 %v10560_v42, %v10396_v35  ;;  %v10983_v20 = vadd.f32 %v10951_v52, %v10787_v14  ;;  %v12125_v25 = vmul.f32 %v12072_v57, %v20453_v1  ;;  %v11884_v12 = vrot.slane %v18887_v34, %v20074_v60 }
 0x67b   : > { %v11765_v40 = vadd.f32 %v11733_v32, %v11569_v15  ;;  %v6112_v5 = vmax.f32 %v5984_v0, 0.0  ;;  %v12321_v61 = vmul.f32 %v12268_v33, %v20454_v18  ;;  %v11343_v13 = vmul.f32 %v11296_v56, %v20358_v16  ;;  %v20455_v0 = vld [vmem:[#allocation79_spill] sm:$0xff] }
 0x67c   : > { %v10788_v7 = vadd.f32 %v10756_v37, %v10592_v49  ;;  %v11179_v55 = vadd.f32 %v11147_v26, %v10983_v20  ;;  %v11539_v14 = vmul.f32 %v11492_v62, %v20359_v3  ;;  %v11735_v57 = vmul.f32 %v11688_v54, %v20451_v28  ;;  %v20457_v20 = vld [vmem:[#allocation35_spill] sm:$0xff] }
 0x67d   : > { %v11961_v42 = vadd.f32 %v11929_v48, %v11765_v40  ;;  %v10900_v39 = vrot.slane %v6112_v5, %v20069_v44  ;;  %v11096_v35 = vrot.slane %v6112_v5, %v20070_v27  ;;  %v12080_v15 = vrot.slane %v18887_v34, %v20075_v59 }
 0x67e   : > { %v11375_v52 = vadd.f32 %v11343_v13, %v11179_v55  ;;  %v5986_v37 = vadd.f32 %v20447_v41, %v20455_v0  ;;  %v11931_v32 = vmul.f32 %v11884_v12, %v20452_v22  ;;  %v11292_v48 = vrot.slane %v6112_v5, %v20071_v31  ;;  %v20456_v55 = vld [vmem:[#allocation64_spill] sm:$0xff] }
 0x67f   : > { %v12157_v33 = vadd.f32 %v12125_v25, %v11961_v42  ;;  %v10950_v56 = vmul.f32 %v10900_v39, %v16361_v53  ;;  %v12276_v49 = vrot.slane %v18887_v34, %v20076_v46  ;;  %v11488_v13 = vrot.slane %v6112_v5, %v20072_v30 }
 0x680   : > { %v11571_v62 = vadd.f32 %v11539_v14, %v11375_v52  ;;  %v5891_v26 = vadd.f32 %v20457_v20, %v20456_v55  ;;  %v11146_v0 = vmul.f32 %v11096_v35, %v20357_v21  ;;  %v11684_v25 = vrot.slane %v6112_v5, %v20073_v29 }
 0x681   : > { %v12353_v54 = vadd.f32 %v12321_v61, %v12157_v33  ;;  %v10982_v40 = vadd.f32 %v10950_v56, %v10786_v4  ;;  %v12127_v42 = vmul.f32 %v12080_v15, %v20453_v1  ;;  %v11880_v39 = vrot.slane %v6112_v5, %v20074_v60 }
 0x682   : > { %v11767_v12 = vadd.f32 %v11735_v57, %v11571_v62  ;;  %v6114_v14 = vmax.f32 %v5986_v37, 0.0  ;;  %v11342_v34 = vmul.f32 %v11292_v48, %v20358_v16  ;;  %v12076_v41 = vrot.slane %v6112_v5, %v20075_v59 }
 0x683   : > { %v11178_v52 = vadd.f32 %v11146_v0, %v10982_v40  ;;  %v12272_v23 = vrot.slane %v6112_v5, %v20076_v46  ;;  %v12323_v4 = vmul.f32 %v12276_v49, %v20454_v18  ;;  %v11538_v15 = vmul.f32 %v11488_v13, %v20359_v3  ;;  %v20458_v0 = vld [vmem:[#allocation26_spill] sm:$0xff] }
 0x684   : > { %v11963_v55 = vadd.f32 %v11931_v32, %v11767_v12  ;;  %v10908_v61 = vrot.slane %v6114_v14, %v20069_v44  ;;  %v11104_v35 = vrot.slane %v6114_v14, %v20070_v27  ;;  %v11734_v33 = vmul.f32 %v11684_v25, %v20451_v28 }
 0x685   : > { %v11374_v57 = vadd.f32 %v11342_v34, %v11178_v52  ;;  %v18947_v37 = vmax.f32 %v5891_v26, 0.0  ;;  %v11930_v48 = vmul.f32 %v11880_v39, %v20452_v22  ;;  %v11300_v5 = vrot.slane %v6114_v14, %v20071_v31 }
 0x686   : > { %v12159_v56 = vadd.f32 %v12127_v42, %v11963_v55  ;;  %v10952_v62 = vmul.f32 %v10908_v61, %v16361_v53  ;;  %v12126_v49 = vmul.f32 %v12076_v41, %v20453_v1  ;;  %v12322_v40 = vmul.f32 %v12272_v23, %v20454_v18 }
 0x687   : > { %v11570_v32 = vadd.f32 %v11538_v15, %v11374_v57  ;;  %v5893_v12 = vadd.f32 %v20457_v20, %v20458_v0  ;;  %v11148_v26 = vmul.f32 %v11104_v35, %v20357_v21  ;;  %v11496_v25 = vrot.slane %v6114_v14, %v20072_v30 }
 0x688   : > { %v12355_v13 = vadd.f32 %v12323_v4, %v12159_v56  ;;  %v10984_v52 = vadd.f32 %v10952_v62, %v10788_v7  ;;  %v11692_v39 = vrot.slane %v6114_v14, %v20073_v29  ;;  %v6240_v34 = vrot.slane %v18947_v37, %v20069_v44 }
 0x689   : > { %v11766_v42 = vadd.f32 %v11734_v33, %v11570_v32  ;;  %v6404_v41 = vrot.slane %v18947_v37, %v20070_v27  ;;  %v11344_v23 = vmul.f32 %v11300_v5, %v20358_v16  ;;  %v11888_v61 = vrot.slane %v6114_v14, %v20074_v60 }
 0x68a   : > { %v11180_v55 = vadd.f32 %v11148_v26, %v10984_v52  ;;  %v6600_v7 = vrot.slane %v18947_v37, %v20071_v31  ;;  %v12084_v35 = vrot.slane %v6114_v14, %v20075_v59  ;;  %v6281_v57 = vmul.f32 %v6240_v34, %v20416_v17  ;;  %v20459_v52 = vld [vmem:[#allocation49_spill] sm:$0xff] }
 0x68b   : > { %v11962_v4 = vadd.f32 %v11930_v48, %v11766_v42  ;;  %v6445_v15 = vmul.f32 %v6404_v41, %v20417_v8  ;;  %v11540_v56 = vmul.f32 %v11496_v25, %v20359_v3  ;;  %v12280_v62 = vrot.slane %v6114_v14, %v20076_v46  ;;  %v20460_v42 = vld [vmem:[#allocation47_spill] sm:$0xff]  ;;  %v20461_v3 = vld [vmem:[#allocation32_spill] sm:$0xff] }
 0x68c   : > { %v11376_v33 = vadd.f32 %v11344_v23, %v11180_v55  ;;  %v6796_v5 = vrot.slane %v18947_v37, %v20072_v30  ;;  %v6641_v26 = vmul.f32 %v6600_v7, %v20459_v52  ;;  %v6992_v48 = vrot.slane %v18947_v37, %v20073_v29 }
 0x68d   : > { %v12158_v32 = vadd.f32 %v12126_v49, %v11962_v4  ;;  %v6477_v0 = vadd.f32 %v6445_v15, %v6281_v57  ;;  %v12391_v16 = vadd.f32 %v20460_v42, %v12353_v54  ;;  %v11736_v41 = vmul.f32 %v11692_v39, %v20451_v28  ;;  %v20462_v39 = vld [vmem:[#allocation25_spill] sm:$0xff] }
 0x68e   : > { %v11572_v34 = vadd.f32 %v11540_v56, %v11376_v33  ;;  %v11932_v55 = vmul.f32 %v11888_v61, %v20452_v22  ;;  %v12128_v14 = vmul.f32 %v12084_v35, %v20453_v1  ;;  %v6837_v21 = vmul.f32 %v6796_v5, %v20461_v3 }
 0x68f   : > { %v12354_v25 = vadd.f32 %v12322_v40, %v12158_v32  ;;  %v6673_v23 = vadd.f32 %v6641_v26, %v6477_v0  ;;  %v12324_v4 = vmul.f32 %v12280_v62, %v20454_v18  ;;  %v7188_v7 = vrot.slane %v18947_v37, %v20074_v60  ;;  %v20463_v32 = vld [vmem:[#allocation59_spill] sm:$0xff] }
 0x690   : > { %v11768_v49 = vadd.f32 %v11736_v41, %v11572_v34  ;;  %v18985_v57 = vmax.f32 %v5893_v12, 0.0  ;;  %v7033_v61 = vmul.f32 %v6992_v48, %v20462_v39  ;;  %v7384_v40 = vrot.slane %v18947_v37, %v20075_v59 }
 0x691   : > { %v12392_v54 = vadd.f32 %v20460_v42, %v12354_v25  ;;  %v6869_v15 = vadd.f32 %v6837_v21, %v6673_v23  ;;  %v7580_v21 = vrot.slane %v18947_v37, %v20076_v46  ;;  %v5892_v0 = vadd.f32 %v20457_v20, %v20463_v32  ;;  %v13024_v25 = vld [vmem:[%s13175_s17 + $0x60] sm:$0xff] }
 0x692   : > { %v11964_v35 = vadd.f32 %v11932_v55, %v11768_v49  ;;  %v6248_v33 = vrot.slane %v18985_v57, %v20069_v44  ;;  %v6412_v56 = vrot.slane %v18985_v57, %v20070_v27  ;;  %v6608_v12 = vrot.slane %v18985_v57, %v20071_v31 }
 0x693   : > { %v12443_v62 = vcombine.low %v12391_v16, %v12392_v54  ;;  %v7065_v5 = vadd.f32 %v7033_v61, %v6869_v15  ;;  %v6804_v41 = vrot.slane %v18985_v57, %v20072_v30  ;;  %v12393_v55 = vadd.f32 %v20460_v42, %v12355_v13  ;;  %v20464_v15 = vld [vmem:[#allocation73_spill] sm:$0xff] }
 0x694   : > { %v12160_v26 = vadd.f32 %v12128_v14, %v11964_v35  ;;  %v6283_v48 = vmul.f32 %v6248_v33, %v20416_v17  ;;  %v6447_v34 = vmul.f32 %v6412_v56, %v20417_v8  ;;  %v7229_v23 = vmul.f32 %v7188_v7, %v20423_v24 }
 0x695   : > { %v12475_v16 = vsub.f32 %v13024_v25, %v12443_v62  ;;  %v7000_v37 = vrot.slane %v18985_v57, %v20073_v29  ;;  %v6643_v14 = vmul.f32 %v6608_v12, %v20459_v52  ;;  %v5894_v61 = vadd.f32 %v20457_v20, %v20464_v15 }
 0x696   : > { %v12356_v49 = vadd.f32 %v12324_v4, %v12160_v26  ;;  %v6479_v54 = vadd.f32 %v6447_v34, %v6283_v48  ;;  %v7425_v35 = vmul.f32 %v7384_v40, %v20425_v38  ;;  %v7621_v33 = vmul.f32 %v7580_v21, %v20428_v50 }
 0x697   : > { %12491 = vst [vmem:[%s17942_s21 + $0x60] sm:$0x77] %v12475_v16  ;;  %v19016_v13 = vmax.f32 %v5892_v0, 0.0  ;;  %v7261_v7 = vadd.f32 %v7229_v23, %v7065_v5  ;;  %v6839_v4 = vmul.f32 %v6804_v41, %v20461_v3  ;;  %v7035_v32 = vmul.f32 %v7000_v37, %v20462_v39  ;;  %v13025_v16 = vld [vmem:[%s13175_s17 + $0x68] sm:$0xff] }
 0x698   : > { %v12394_v56 = vadd.f32 %v20460_v42, %v12356_v49  ;;  %v6675_v62 = vadd.f32 %v6643_v14, %v6479_v54  ;;  %v7196_v12 = vrot.slane %v18985_v57, %v20074_v60  ;;  %v19029_v26 = vmax.f32 %v5894_v61, 0.0  ;;  %v20465_v49 = vld [vmem:[#allocation29_spill] sm:$0xff] }
 0x699   : > { %v6244_v20 = vrot.slane %v19016_v13, %v20069_v44  ;;  %v6408_v40 = vrot.slane %v19016_v13, %v20070_v27  ;;  %v6604_v5 = vrot.slane %v19016_v13, %v20071_v31  ;;  %v7392_v48 = vrot.slane %v18985_v57, %v20075_v59  ;;  %v20466_v54 = vld [vmem:[#allocation37_spill] sm:$0xff] }
 0x69a   : > { %v12444_v21 = vcombine.low %v12393_v55, %v12394_v56  ;;  %v6871_v0 = vadd.f32 %v6839_v4, %v6675_v62  ;;  %v6800_v25 = vrot.slane %v19016_v13, %v20072_v30  ;;  %v7457_v55 = vadd.f32 %v7425_v35, %v7261_v7 }
 0x69b   : > { %v6282_v34 = vmul.f32 %v6244_v20, %v20416_v17  ;;  %v6446_v41 = vmul.f32 %v6408_v40, %v20417_v8  ;;  %v5923_v14 = vadd.f32 %v20466_v54, %v20465_v49  ;;  %v7588_v15 = vrot.slane %v18985_v57, %v20076_v46 }
 0x69c   : > { %v12476_v23 = vsub.f32 %v13025_v16, %v12444_v21  ;;  %v7067_v37 = vadd.f32 %v7035_v32, %v6871_v0  ;;  %v6642_v56 = vmul.f32 %v6604_v5, %v20459_v52  ;;  %v6996_v62 = vrot.slane %v19016_v13, %v20073_v29 }
 0x69d   : > { %v6478_v61 = vadd.f32 %v6446_v41, %v6282_v34  ;;  %v7231_v4 = vmul.f32 %v7196_v12, %v20423_v24  ;;  %v7192_v20 = vrot.slane %v19016_v13, %v20074_v60  ;;  %v6252_v35 = vrot.slane %v19029_v26, %v20069_v44 }
 0x69e   : > { %12492 = vst [vmem:[%s17942_s21 + $0x68] sm:$0x77] %v12476_v23  ;;  %v6416_v7 = vrot.slane %v19029_v26, %v20070_v27  ;;  %v7427_v57 = vmul.f32 %v7392_v48, %v20425_v38  ;;  %v6838_v40 = vmul.f32 %v6800_v25, %v20461_v3  ;;  %v6612_v21 = vrot.slane %v19029_v26, %v20071_v31 }
 0x69f   : > { %v6674_v32 = vadd.f32 %v6642_v56, %v6478_v61  ;;  %v7263_v0 = vadd.f32 %v7231_v4, %v7067_v37  ;;  %v6284_v12 = vmul.f32 %v6252_v35, %v20416_v17  ;;  %v6808_v34 = vrot.slane %v19029_v26, %v20072_v30 }
 0x6a0   : > { %v6448_v5 = vmul.f32 %v6416_v7, %v20417_v8  ;;  %v7653_v41 = vadd.f32 %v7621_v33, %v7457_v55  ;;  %v7623_v16 = vmul.f32 %v7588_v15, %v20428_v50  ;;  %v7034_v48 = vmul.f32 %v6996_v62, %v20462_v39 }
 0x6a1   : > { %v6870_v23 = vadd.f32 %v6838_v40, %v6674_v32  ;;  %v7230_v49 = vmul.f32 %v7192_v20, %v20423_v24  ;;  %v6644_v61 = vmul.f32 %v6612_v21, %v20459_v52  ;;  %v7004_v37 = vrot.slane %v19029_v26, %v20073_v29 }
 0x6a2   : > { %v6480_v25 = vadd.f32 %v6448_v5, %v6284_v12  ;;  %v7388_v8 = vrot.slane %v19016_v13, %v20075_v59  ;;  %v7584_v33 = vrot.slane %v19016_v13, %v20076_v46  ;;  %v6051_v55 = vmax.f32 %v5923_v14, 0.0  ;;  %v20467_v14 = vld [vmem:[#allocation30_spill] sm:$0xff] }
 0x6a3   : > { %v7066_v17 = vadd.f32 %v7034_v48, %v6870_v23  ;;  %v7459_v15 = vadd.f32 %v7427_v57, %v7263_v0  ;;  %v6840_v62 = vmul.f32 %v6808_v34, %v20461_v3  ;;  %v7200_v4 = vrot.slane %v19029_v26, %v20074_v60 }
 0x6a4   : > { %v6676_v56 = vadd.f32 %v6644_v61, %v6480_v25  ;;  %v7396_v52 = vrot.slane %v19029_v26, %v20075_v59  ;;  %v7776_v35 = vrot.slane %v6051_v55, %v20069_v44  ;;  %v7972_v7 = vrot.slane %v6051_v55, %v20070_v27 }
 0x6a5   : > { %v7262_v20 = vadd.f32 %v7230_v49, %v7066_v17  ;;  %v7036_v40 = vmul.f32 %v7004_v37, %v20462_v39  ;;  %v7592_v13 = vrot.slane %v19029_v26, %v20076_v46  ;;  %v5925_v3 = vadd.f32 %v20466_v54, %v20467_v14 }
 0x6a6   : > { %v6872_v32 = vadd.f32 %v6840_v62, %v6676_v56  ;;  %v7426_v57 = vmul.f32 %v7388_v8, %v20425_v38  ;;  %v7622_v21 = vmul.f32 %v7584_v33, %v20428_v50  ;;  %v7817_v0 = vmul.f32 %v7776_v35, %v20146_v36 }
 0x6a7   : > { %v8168_v12 = vrot.slane %v6051_v55, %v20071_v31  ;;  %v7232_v34 = vmul.f32 %v7200_v4, %v20423_v24  ;;  %v8364_v23 = vrot.slane %v6051_v55, %v20072_v30  ;;  %v8560_v39 = vrot.slane %v6051_v55, %v20073_v29 }
 0x6a8   : > { %v7068_v5 = vadd.f32 %v7036_v40, %v6872_v32  ;;  %v7655_v48 = vadd.f32 %v7623_v16, %v7459_v15  ;;  %v7458_v26 = vadd.f32 %v7426_v57, %v7262_v20  ;;  %v7849_v49 = vadd.f32 %v7817_v0, %v7653_v41 }
 0x6a9   : > { %v8013_v25 = vmul.f32 %v7972_v7, %v20147_v43  ;;  %v7428_v37 = vmul.f32 %v7396_v52, %v20425_v38  ;;  %v7624_v17 = vmul.f32 %v7592_v13, %v20428_v50  ;;  %v6053_v8 = vmax.f32 %v5925_v3, 0.0  ;;  %v20468_v52 = vld [vmem:[#allocation62_spill] sm:$0xff] }
 0x6aa   : > { %v7264_v61 = vadd.f32 %v7232_v34, %v7068_v5  ;;  %v8209_v56 = vmul.f32 %v8168_v12, %v16175_v45  ;;  %v8756_v24 = vrot.slane %v6051_v55, %v20074_v60  ;;  %v8952_v62 = vrot.slane %v6051_v55, %v20075_v59  ;;  %v20469_v5 = vld [vmem:[#allocation76_spill] sm:$0xff] }
 0x6ab   : > { %v8045_v33 = vadd.f32 %v8013_v25, %v7849_v49  ;;  %v8405_v4 = vmul.f32 %v8364_v23, %v20382_v10  ;;  %v8601_v16 = vmul.f32 %v8560_v39, %v20383_v9  ;;  %v7784_v41 = vrot.slane %v6053_v8, %v20069_v44  ;;  %v20470_v49 = vld [vmem:[#allocation36_spill] sm:$0xff] }
 0x6ac   : > { %v7980_v15 = vrot.slane %v6053_v8, %v20070_v27  ;;  %v7654_v20 = vadd.f32 %v7622_v21, %v7458_v26  ;;  %v9148_v50 = vrot.slane %v6051_v55, %v20076_v46  ;;  %v5924_v35 = vadd.f32 %v20466_v54, %v20468_v52 }
 0x6ad   : > { %v8241_v38 = vadd.f32 %v8209_v56, %v8045_v33  ;;  %v7460_v7 = vadd.f32 %v7428_v37, %v7264_v61  ;;  %v7819_v32 = vmul.f32 %v7784_v41, %v20146_v36  ;;  %v8176_v40 = vrot.slane %v6053_v8, %v20071_v31 }
 0x6ae   : > { %v8372_v13 = vrot.slane %v6053_v8, %v20072_v30  ;;  %v8797_v3 = vmul.f32 %v8756_v24, %v20384_v63  ;;  %v8993_v57 = vmul.f32 %v8952_v62, %v20386_v11  ;;  %v8568_v21 = vrot.slane %v6053_v8, %v20073_v29 }
 0x6af   : > { %v8437_v14 = vadd.f32 %v8405_v4, %v8241_v38  ;;  %v7851_v0 = vadd.f32 %v7819_v32, %v7655_v48  ;;  %v8015_v55 = vmul.f32 %v7980_v15, %v20147_v43  ;;  %v8764_v12 = vrot.slane %v6053_v8, %v20074_v60 }
 0x6b0   : > { %v5926_v34 = vadd.f32 %v20466_v54, %v20469_v5  ;;  %v9189_v39 = vmul.f32 %v9148_v50, %v20387_v2  ;;  %v19114_v26 = vmax.f32 %v5924_v35, 0.0  ;;  %v5955_v25 = vadd.f32 %v20438_v6, %v20470_v49 }
 0x6b1   : > { %v8633_v23 = vadd.f32 %v8601_v16, %v8437_v14  ;;  %v7656_v61 = vadd.f32 %v7624_v17, %v7460_v7  ;;  %v8047_v37 = vadd.f32 %v8015_v55, %v7851_v0  ;;  %v8211_v33 = vmul.f32 %v8176_v40, %v16175_v45 }
 0x6b2   : > { %v8407_v48 = vmul.f32 %v8372_v13, %v20382_v10  ;;  %v8603_v24 = vmul.f32 %v8568_v21, %v20383_v9  ;;  %v7780_v54 = vrot.slane %v19114_v26, %v20069_v44  ;;  %v7976_v62 = vrot.slane %v19114_v26, %v20070_v27 }
 0x6b3   : > { %v8829_v56 = vadd.f32 %v8797_v3, %v8633_v23  ;;  %v8243_v4 = vadd.f32 %v8211_v33, %v8047_v37  ;;  %v8799_v16 = vmul.f32 %v8764_v12, %v20384_v63  ;;  %v8960_v41 = vrot.slane %v6053_v8, %v20075_v59 }
 0x6b4   : > { %v19127_v17 = vmax.f32 %v5926_v34, 0.0  ;;  %v9156_v38 = vrot.slane %v6053_v8, %v20076_v46  ;;  %v7818_v50 = vmul.f32 %v7780_v54, %v20146_v36  ;;  %v8172_v52 = vrot.slane %v19114_v26, %v20071_v31 }
 0x6b5   : > { %v9025_v15 = vadd.f32 %v8993_v57, %v8829_v56  ;;  %v8439_v35 = vadd.f32 %v8407_v48, %v8243_v4  ;;  %v8368_v7 = vrot.slane %v19114_v26, %v20072_v30  ;;  %v8564_v32 = vrot.slane %v19114_v26, %v20073_v29 }
 0x6b6   : > { %v19137_v40 = vmax.f32 %v5955_v25, 0.0  ;;  %v7850_v14 = vadd.f32 %v7818_v50, %v7654_v20  ;;  %v8014_v3 = vmul.f32 %v7976_v62, %v20147_v43  ;;  %v8760_v8 = vrot.slane %v19114_v26, %v20074_v60  ;;  %v20471_v25 = vld [vmem:[#allocation6_spill] sm:$0xff] }
 0x6b7   : > { %v9221_v13 = vadd.f32 %v9189_v39, %v9025_v15  ;;  %v8635_v57 = vadd.f32 %v8603_v24, %v8439_v35  ;;  %v8995_v21 = vmul.f32 %v8960_v41, %v20386_v11  ;;  %v7788_v0 = vrot.slane %v19127_v17, %v20069_v44 }
 0x6b8   : > { %v7984_v55 = vrot.slane %v19127_v17, %v20070_v27  ;;  %v9191_v12 = vmul.f32 %v9156_v38, %v20387_v2  ;;  %v8046_v5 = vadd.f32 %v8014_v3, %v7850_v14  ;;  %v8210_v34 = vmul.f32 %v8172_v52, %v16175_v45 }
 0x6b9   : > { %v8956_v20 = vrot.slane %v19114_v26, %v20075_v59  ;;  %v8831_v23 = vadd.f32 %v8799_v16, %v8635_v57  ;;  %v7820_v39 = vmul.f32 %v7788_v0, %v20146_v36  ;;  %v8180_v49 = vrot.slane %v19127_v17, %v20071_v31 }
 0x6ba   : > { %v5957_v37 = vadd.f32 %v20438_v6, %v20471_v25  ;;  %v8242_v33 = vadd.f32 %v8210_v34, %v8046_v5  ;;  %v8406_v48 = vmul.f32 %v8368_v7, %v20382_v10  ;;  %v8602_v56 = vmul.f32 %v8564_v32, %v20383_v9 }
 0x6bb   : > { %v8798_v24 = vmul.f32 %v8760_v8, %v20384_v63  ;;  %v9027_v54 = vadd.f32 %v8995_v21, %v8831_v23  ;;  %v7852_v62 = vadd.f32 %v7820_v39, %v7656_v61  ;;  %v8016_v4 = vmul.f32 %v7984_v55, %v20147_v43 }
 0x6bc   : > { %v8376_v36 = vrot.slane %v19127_v17, %v20072_v30  ;;  %v8438_v16 = vadd.f32 %v8406_v48, %v8242_v33  ;;  %v8994_v41 = vmul.f32 %v8956_v20, %v20386_v11  ;;  %v9152_v15 = vrot.slane %v19114_v26, %v20076_v46 }
 0x6bd   : > { %v9344_v38 = vrot.slane %v19137_v40, %v20069_v44  ;;  %v9223_v50 = vadd.f32 %v9191_v12, %v9027_v54  ;;  %v8048_v52 = vadd.f32 %v8016_v4, %v7852_v62  ;;  %v8212_v35 = vmul.f32 %v8180_v49, %v16175_v45 }
 0x6be   : > { %v8572_v61 = vrot.slane %v19127_v17, %v20073_v29  ;;  %v8634_v43 = vadd.f32 %v8602_v56, %v8438_v16  ;;  %v9540_v32 = vrot.slane %v19137_v40, %v20070_v27  ;;  %v9736_v14 = vrot.slane %v19137_v40, %v20071_v31 }
 0x6bf   : > { %v9385_v7 = vmul.f32 %v9344_v38, %v20345_v58  ;;  %v8244_v26 = vadd.f32 %v8212_v35, %v8048_v52  ;;  %v8408_v3 = vmul.f32 %v8376_v36, %v20382_v10  ;;  %v8768_v8 = vrot.slane %v19127_v17, %v20074_v60 }
 0x6c0   : > { %v8964_v45 = vrot.slane %v19127_v17, %v20075_v59  ;;  %v8830_v57 = vadd.f32 %v8798_v24, %v8634_v43  ;;  %v9581_v0 = vmul.f32 %v9540_v32, %v20346_v19  ;;  %v9932_v55 = vrot.slane %v19137_v40, %v20072_v30  ;;  %v20474_v43 = vld [vmem:[#allocation57_spill] sm:$0xff] }
 0x6c1   : > { %v9417_v21 = vadd.f32 %v9385_v7, %v9221_v13  ;;  %v9190_v12 = vmul.f32 %v9152_v15, %v20387_v2  ;;  %v8440_v5 = vadd.f32 %v8408_v3, %v8244_v26  ;;  %v8604_v34 = vmul.f32 %v8572_v61, %v20383_v9 }
 0x6c2   : > { %v9160_v10 = vrot.slane %v19127_v17, %v20076_v46  ;;  %v9026_v20 = vadd.f32 %v8994_v41, %v8830_v57  ;;  %v9777_v39 = vmul.f32 %v9736_v14, %v20347_v51  ;;  %v10128_v13 = vrot.slane %v19137_v40, %v20073_v29  ;;  %v20472_v41 = vld [vmem:[#allocation67_spill] sm:$0xff]  ;;  %v20475_v14 = vld [vmem:[#allocation5_spill] sm:$0xff] }
 0x6c3   : > { %v9613_v23 = vadd.f32 %v9581_v0, %v9417_v21  ;;  %v8636_v49 = vadd.f32 %v8604_v34, %v8440_v5  ;;  %v8800_v25 = vmul.f32 %v8768_v8, %v20384_v63  ;;  %v8996_v33 = vmul.f32 %v8964_v45, %v20386_v11  ;;  %v20477_v5 = vld [vmem:[#allocation74_spill] sm:$0xff] }
 0x6c4   : > { %v6085_v48 = vmax.f32 %v5957_v37, 0.0  ;;  %v9222_v56 = vadd.f32 %v9190_v12, %v9026_v20  ;;  %v9973_v9 = vmul.f32 %v9932_v55, %v20348_v47  ;;  %v10324_v17 = vrot.slane %v19137_v40, %v20074_v60  ;;  %v20473_v37 = vld [vmem:[#allocation4_spill] sm:$0xff] }
 0x6c5   : > { %v9809_v24 = vadd.f32 %v9777_v39, %v9613_v23  ;;  %v8832_v54 = vadd.f32 %v8800_v25, %v8636_v49  ;;  %v9192_v62 = vmul.f32 %v9160_v10, %v20387_v2  ;;  %v10169_v63 = vmul.f32 %v10128_v13, %v20472_v41 }
 0x6c6   : > { %v9352_v4 = vrot.slane %v6085_v48, %v20069_v44  ;;  %v9548_v36 = vrot.slane %v6085_v48, %v20070_v27  ;;  %v10520_v11 = vrot.slane %v19137_v40, %v20075_v59  ;;  %v5956_v15 = vadd.f32 %v20438_v6, %v20473_v37 }
 0x6c7   : > { %v10005_v16 = vadd.f32 %v9973_v9, %v9809_v24  ;;  %v9028_v38 = vadd.f32 %v8996_v33, %v8832_v54  ;;  %v10716_v52 = vrot.slane %v19137_v40, %v20076_v46  ;;  %v9744_v2 = vrot.slane %v6085_v48, %v20071_v31  ;;  %v20476_v40 = vld [vmem:[#allocation68_spill] sm:$0xff] }
 0x6c8   : > { %v9387_v35 = vmul.f32 %v9352_v4, %v20345_v58  ;;  %v10365_v7 = vmul.f32 %v10324_v17, %v20474_v43  ;;  %v9940_v32 = vrot.slane %v6085_v48, %v20072_v30  ;;  %v5958_v26 = vadd.f32 %v20438_v6, %v20475_v14 }
 0x6c9   : > { %v10201_v61 = vadd.f32 %v10169_v63, %v10005_v16  ;;  %v9224_v3 = vadd.f32 %v9192_v62, %v9028_v38  ;;  %v9583_v45 = vmul.f32 %v9548_v36, %v20346_v19  ;;  %v10136_v57 = vrot.slane %v6085_v48, %v20073_v29  ;;  %v20478_v63 = vld [vmem:[#allocation9_spill] sm:$0xff] }
 0x6ca   : > { %v9419_v8 = vadd.f32 %v9387_v35, %v9223_v50  ;;  %v10561_v0 = vmul.f32 %v10520_v11, %v20476_v40  ;;  %v10332_v55 = vrot.slane %v6085_v48, %v20074_v60  ;;  %v6084_v12 = vmax.f32 %v5956_v15, 0.0  ;;  %v20479_v11 = vld [vmem:[#allocation34_spill] sm:$0xff] }
 0x6cb   : > { %v10397_v21 = vadd.f32 %v10365_v7, %v10201_v61  ;;  %v10757_v34 = vmul.f32 %v10716_v52, %v20477_v5  ;;  %v9779_v20 = vmul.f32 %v9744_v2, %v20347_v51  ;;  %v10528_v23 = vrot.slane %v6085_v48, %v20075_v59  ;;  %v20480_v7 = vld [vmem:[#allocation2_spill] sm:$0xff] }
 0x6cc   : > { %v9615_v10 = vadd.f32 %v9583_v45, %v9419_v8  ;;  %v9348_v50 = vrot.slane %v6084_v12, %v20069_v44  ;;  %v9544_v39 = vrot.slane %v6084_v12, %v20070_v27  ;;  %v19220_v13 = vmax.f32 %v5958_v26, 0.0 }
 0x6cd   : > { %v10593_v6 = vadd.f32 %v10561_v0, %v10397_v21  ;;  %v9975_v25 = vmul.f32 %v9940_v32, %v20348_v47  ;;  %v10171_v33 = vmul.f32 %v10136_v57, %v20472_v41  ;;  %v10724_v24 = vrot.slane %v6085_v48, %v20076_v46 }
 0x6ce   : > { %v9811_v49 = vadd.f32 %v9779_v20, %v9615_v10  ;;  %v10367_v17 = vmul.f32 %v10332_v55, %v20474_v43  ;;  %v9386_v54 = vmul.f32 %v9348_v50, %v20345_v58  ;;  %v9740_v62 = vrot.slane %v6084_v12, %v20071_v31 }
 0x6cf   : > { %v10789_v9 = vadd.f32 %v10757_v34, %v10593_v6  ;;  %v10563_v36 = vmul.f32 %v10528_v23, %v20476_v40  ;;  %v9936_v16 = vrot.slane %v6084_v12, %v20072_v30  ;;  %v5987_v37 = vadd.f32 %v20479_v11, %v20478_v63 }
 0x6d0   : > { %v10007_v4 = vadd.f32 %v9975_v25, %v9811_v49  ;;  %v9418_v15 = vadd.f32 %v9386_v54, %v9222_v56  ;;  %v9582_v38 = vmul.f32 %v9544_v39, %v20346_v19  ;;  %v10132_v48 = vrot.slane %v6084_v12, %v20073_v29 }
 0x6d1   : > { %v9356_v52 = vrot.slane %v19220_v13, %v20069_v44  ;;  %v10759_v2 = vmul.f32 %v10724_v24, %v20477_v5  ;;  %v9552_v61 = vrot.slane %v19220_v13, %v20070_v27  ;;  %v5989_v32 = vadd.f32 %v20479_v11, %v20480_v7 }
 0x6d2   : > { %v10203_v35 = vadd.f32 %v10171_v33, %v10007_v4  ;;  %v9614_v14 = vadd.f32 %v9582_v38, %v9418_v15  ;;  %v9778_v26 = vmul.f32 %v9740_v62, %v20347_v51  ;;  %v9748_v8 = vrot.slane %v19220_v13, %v20071_v31 }
 0x6d3   : > { %v9388_v56 = vmul.f32 %v9356_v52, %v20345_v58  ;;  %v9974_v57 = vmul.f32 %v9936_v16, %v20348_v47  ;;  %v10328_v21 = vrot.slane %v6084_v12, %v20074_v60  ;;  %v9944_v0 = vrot.slane %v19220_v13, %v20072_v30 }
 0x6d4   : > { %v10399_v45 = vadd.f32 %v10367_v17, %v10203_v35  ;;  %v9810_v55 = vadd.f32 %v9778_v26, %v9614_v14  ;;  %v10170_v34 = vmul.f32 %v10132_v48, %v20472_v41  ;;  %v9584_v20 = vmul.f32 %v9552_v61, %v20346_v19  ;;  %v20481_v35 = vld [vmem:[#allocation11_spill] sm:$0xff] }
 0x6d5   : > { %v9420_v10 = vadd.f32 %v9388_v56, %v9224_v3  ;;  %v10524_v58 = vrot.slane %v6084_v12, %v20075_v59  ;;  %v10720_v6 = vrot.slane %v6084_v12, %v20076_v46  ;;  %v19253_v50 = vmax.f32 %v5987_v37, 0.0 }
 0x6d6   : > { %v10595_v23 = vadd.f32 %v10563_v36, %v10399_v45  ;;  %v10006_v39 = vadd.f32 %v9974_v57, %v9810_v55  ;;  %v9780_v25 = vmul.f32 %v9748_v8, %v20347_v51  ;;  %v10140_v33 = vrot.slane %v19220_v13, %v20073_v29  ;;  %v20482_v8 = vld [vmem:[#allocation70_spill] sm:$0xff] }
 0x6d7   : > { %v9616_v49 = vadd.f32 %v9584_v20, %v9420_v10  ;;  %v10366_v17 = vmul.f32 %v10328_v21, %v20474_v43  ;;  %v9976_v3 = vmul.f32 %v9944_v0, %v20348_v47  ;;  %v10912_v19 = vrot.slane %v19253_v50, %v20069_v44 }
 0x6d8   : > { %v10791_v24 = vadd.f32 %v10759_v2, %v10595_v23  ;;  %v10202_v54 = vadd.f32 %v10170_v34, %v10006_v39  ;;  %v10336_v12 = vrot.slane %v19220_v13, %v20074_v60  ;;  %v11108_v4 = vrot.slane %v19253_v50, %v20070_v27  ;;  %v20483_v34 = vld [vmem:[#allocation18_spill] sm:$0xff] }
 0x6d9   : > { %v9812_v62 = vadd.f32 %v9780_v25, %v9616_v49  ;;  %v10562_v51 = vmul.f32 %v10524_v58, %v20476_v40  ;;  %v10758_v36 = vmul.f32 %v10720_v6, %v20477_v5  ;;  %v10953_v16 = vmul.f32 %v10912_v19, %v16361_v53  ;;  %v20484_v6 = vld [vmem:[#allocation3_spill] sm:$0xff]  ;;  %v20485_v19 = vld [vmem:[#allocation81_spill] sm:$0xff] }
 0x6da   : > { %v11304_v47 = vrot.slane %v19253_v50, %v20071_v31  ;;  %v10398_v63 = vadd.f32 %v10366_v17, %v10202_v54  ;;  %v10172_v15 = vmul.f32 %v10140_v33, %v20472_v41  ;;  %v10532_v38 = vrot.slane %v19220_v13, %v20075_v59 }
 0x6db   : > { %v10008_v37 = vadd.f32 %v9976_v3, %v9812_v62  ;;  %v10728_v48 = vrot.slane %v19220_v13, %v20076_v46  ;;  %v10985_v52 = vadd.f32 %v10953_v16, %v10789_v9  ;;  %v11149_v2 = vmul.f32 %v11108_v4, %v20481_v35 }
 0x6dc   : > { %v11500_v61 = vrot.slane %v19253_v50, %v20072_v30  ;;  %v10594_v7 = vadd.f32 %v10562_v51, %v10398_v63  ;;  %v10368_v26 = vmul.f32 %v10336_v12, %v20474_v43  ;;  %v11696_v56 = vrot.slane %v19253_v50, %v20073_v29 }
 0x6dd   : > { %v10204_v14 = vadd.f32 %v10172_v15, %v10008_v37  ;;  %v11181_v41 = vadd.f32 %v11149_v2, %v10985_v52  ;;  %v11345_v45 = vmul.f32 %v11304_v47, %v20482_v8  ;;  %v19283_v57 = vmax.f32 %v5989_v32, 0.0 }
 0x6de   : > { %v10790_v21 = vadd.f32 %v10758_v36, %v10594_v7  ;;  %v10564_v9 = vmul.f32 %v10532_v38, %v20476_v40  ;;  %v11892_v0 = vrot.slane %v19253_v50, %v20074_v60  ;;  %v11541_v10 = vmul.f32 %v11500_v61, %v20483_v34 }
 0x6df   : > { %v10400_v13 = vadd.f32 %v10368_v26, %v10204_v14  ;;  %v11377_v55 = vadd.f32 %v11345_v45, %v11181_v41  ;;  %v10920_v43 = vrot.slane %v19283_v57, %v20069_v44  ;;  %v11116_v20 = vrot.slane %v19283_v57, %v20070_v27 }
 0x6e0   : > { %v10760_v32 = vmul.f32 %v10728_v48, %v20477_v5  ;;  %v11737_v58 = vmul.f32 %v11696_v56, %v20451_v28  ;;  %v5988_v40 = vadd.f32 %v20479_v11, %v20484_v6  ;;  %v12088_v49 = vrot.slane %v19253_v50, %v20075_v59 }
 0x6e1   : > { %v10596_v23 = vadd.f32 %v10564_v9, %v10400_v13  ;;  %v11573_v39 = vadd.f32 %v11541_v10, %v11377_v55  ;;  %v10955_v25 = vmul.f32 %v10920_v43, %v16361_v53  ;;  %v11312_v33 = vrot.slane %v19283_v57, %v20071_v31 }
 0x6e2   : > { %v11933_v3 = vmul.f32 %v11892_v0, %v20452_v22  ;;  %v12284_v5 = vrot.slane %v19253_v50, %v20076_v46  ;;  %v5990_v54 = vadd.f32 %v20479_v11, %v20485_v19  ;;  %v11151_v4 = vmul.f32 %v11116_v20, %v20481_v35 }
 0x6e3   : > { %v10792_v17 = vadd.f32 %v10760_v32, %v10596_v23  ;;  %v11769_v62 = vadd.f32 %v11737_v58, %v11573_v39  ;;  %v10987_v12 = vadd.f32 %v10955_v25, %v10791_v24  ;;  %v11508_v51 = vrot.slane %v19283_v57, %v20072_v30 }
 0x6e4   : > { %v11704_v36 = vrot.slane %v19283_v57, %v20073_v29  ;;  %v6116_v16 = vmax.f32 %v5988_v40, 0.0  ;;  %v12129_v63 = vmul.f32 %v12088_v49, %v20453_v1  ;;  %v11347_v50 = vmul.f32 %v11312_v33, %v20482_v8 }
 0x6e5   : > { %v11965_v47 = vadd.f32 %v11933_v3, %v11769_v62  ;;  %v11183_v37 = vadd.f32 %v11151_v4, %v10987_v12  ;;  %v11900_v11 = vrot.slane %v19283_v57, %v20074_v60  ;;  %v19318_v38 = vmax.f32 %v5990_v54, 0.0 }
 0x6e6   : > { %v10916_v24 = vrot.slane %v6116_v16, %v20069_v44  ;;  %v11112_v15 = vrot.slane %v6116_v16, %v20070_v27  ;;  %v12325_v52 = vmul.f32 %v12284_v5, %v20454_v18  ;;  %v11543_v61 = vmul.f32 %v11508_v51, %v20483_v34 }
 0x6e7   : > { %v12161_v48 = vadd.f32 %v12129_v63, %v11965_v47  ;;  %v11379_v2 = vadd.f32 %v11347_v50, %v11183_v37  ;;  %v11739_v7 = vmul.f32 %v11704_v36, %v20451_v28  ;;  %v11308_v26 = vrot.slane %v6116_v16, %v20071_v31 }
 0x6e8   : > { %v10954_v14 = vmul.f32 %v10916_v24, %v16361_v53  ;;  %v12096_v45 = vrot.slane %v19283_v57, %v20075_v59  ;;  %v11504_v13 = vrot.slane %v6116_v16, %v20072_v30  ;;  %v11935_v9 = vmul.f32 %v11900_v11, %v20452_v22 }
 0x6e9   : > { %v12357_v56 = vadd.f32 %v12325_v52, %v12161_v48  ;;  %v11575_v41 = vadd.f32 %v11543_v61, %v11379_v2  ;;  %v11150_v55 = vmul.f32 %v11112_v15, %v20481_v35  ;;  %v10924_v10 = vrot.slane %v19318_v38, %v20069_v44 }
 0x6ea   : > { %v10986_v0 = vadd.f32 %v10954_v14, %v10790_v21  ;;  %v12292_v20 = vrot.slane %v19283_v57, %v20076_v46  ;;  %v11700_v23 = vrot.slane %v6116_v16, %v20073_v29  ;;  %v11120_v32 = vrot.slane %v19318_v38, %v20070_v27 }
 0x6eb   : > { %v11771_v43 = vadd.f32 %v11739_v7, %v11575_v41  ;;  %v11346_v6 = vmul.f32 %v11308_v26, %v20482_v8  ;;  %v10956_v40 = vmul.f32 %v10924_v10, %v16361_v53  ;;  %v11316_v21 = vrot.slane %v19318_v38, %v20071_v31  ;;  %v13026_v41 = vld [vmem:[%s13175_s17 + $0x70] sm:$0xff] }
 0x6ec   : > { %v11182_v58 = vadd.f32 %v11150_v55, %v10986_v0  ;;  %v12131_v44 = vmul.f32 %v12096_v45, %v20453_v1  ;;  %v11542_v49 = vmul.f32 %v11504_v13, %v20483_v34  ;;  %v11896_v57 = vrot.slane %v6116_v16, %v20074_v60 }
 0x6ed   : > { %v11967_v39 = vadd.f32 %v11935_v9, %v11771_v43  ;;  %v10988_v33 = vadd.f32 %v10956_v40, %v10792_v17  ;;  %v11152_v3 = vmul.f32 %v11120_v32, %v20481_v35  ;;  %v11512_v27 = vrot.slane %v19318_v38, %v20072_v30 }
 0x6ee   : > { %v11378_v25 = vadd.f32 %v11346_v6, %v11182_v58  ;;  %v12327_v53 = vmul.f32 %v12292_v20, %v20454_v18  ;;  %v11738_v19 = vmul.f32 %v11700_v23, %v20451_v28  ;;  %v12092_v31 = vrot.slane %v6116_v16, %v20075_v59 }
 0x6ef   : > { %v12163_v5 = vadd.f32 %v12131_v44, %v11967_v39  ;;  %v11184_v62 = vadd.f32 %v11152_v3, %v10988_v33  ;;  %v11348_v12 = vmul.f32 %v11316_v21, %v20482_v8  ;;  %v11708_v4 = vrot.slane %v19318_v38, %v20073_v29 }
 0x6f0   : > { %v11574_v54 = vadd.f32 %v11542_v49, %v11378_v25  ;;  %v11934_v35 = vmul.f32 %v11896_v57, %v20452_v22  ;;  %v12288_v51 = vrot.slane %v6116_v16, %v20076_v46  ;;  %v11544_v47 = vmul.f32 %v11512_v27, %v20483_v34 }
 0x6f1   : > { %v12359_v17 = vadd.f32 %v12327_v53, %v12163_v5  ;;  %v11380_v36 = vadd.f32 %v11348_v12, %v11184_v62  ;;  %v11904_v63 = vrot.slane %v19318_v38, %v20074_v60  ;;  %v12130_v37 = vmul.f32 %v12092_v31, %v20453_v1 }
 0x6f2   : > { %v11770_v30 = vadd.f32 %v11738_v19, %v11574_v54  ;;  %v11740_v8 = vmul.f32 %v11708_v4, %v20451_v28  ;;  %v12100_v29 = vrot.slane %v19318_v38, %v20075_v59  ;;  %v12326_v24 = vmul.f32 %v12288_v51, %v20454_v18 }
 0x6f3   : > { %v11576_v11 = vadd.f32 %v11544_v47, %v11380_v36  ;;  %v11936_v34 = vmul.f32 %v11904_v63, %v20452_v22  ;;  %v12296_v60 = vrot.slane %v19318_v38, %v20076_v46  ;;  %v12395_v48 = vadd.f32 %v20460_v42, %v12357_v56  ;;  %v13027_v56 = vld [vmem:[%s13175_s17 + $0x78] sm:$0xff] }
 0x6f4   : > { %v11966_v50 = vadd.f32 %v11934_v35, %v11770_v30  ;;  %v12132_v2 = vmul.f32 %v12100_v29, %v20453_v1  ;;  %v12397_v14 = vadd.f32 %v20460_v42, %v12359_v17 }
 0x6f5   : > { %v11772_v15 = vadd.f32 %v11740_v8, %v11576_v11  ;;  %v12328_v7 = vmul.f32 %v12296_v60, %v20454_v18 }
 0x6f6   : > { %v12162_v16 = vadd.f32 %v12130_v37, %v11966_v50 }
 0x6f7   : > { %v11968_v28 = vadd.f32 %v11936_v34, %v11772_v15 }
 0x6f8   : > { %v12358_v52 = vadd.f32 %v12326_v24, %v12162_v16 }
 0x6f9   : > { %v12164_v61 = vadd.f32 %v12132_v2, %v11968_v28 }
 0x6fa   : > { %v12396_v59 = vadd.f32 %v20460_v42, %v12358_v52 }
 0x6fb   : > { %v12360_v22 = vadd.f32 %v12328_v7, %v12164_v61 }
 0x6fc   : > { %v12445_v26 = vcombine.low %v12395_v48, %v12396_v59 }
 0x6fd   : > { %v12398_v46 = vadd.f32 %v20460_v42, %v12360_v22 }
 0x6fe   : > { %v12477_v45 = vsub.f32 %v13026_v41, %v12445_v26 }
 0x6ff   : > { %v12446_v38 = vcombine.low %v12397_v14, %v12398_v46 }
 0x700   : > { %12493 = vst [vmem:[%s17942_s21 + $0x70] sm:$0x77] %v12477_v45 }
 0x701   : > { %v12478_v13 = vsub.f32 %v13027_v56, %v12446_v38 }
 0x703   : > { %12494 = vst [vmem:[%s17942_s21 + $0x78] sm:$0x77] %v12478_v13 }
 0x704 PF: > { %s18_s27 = sadd.s32 1, %s13034_s27  }
 0x705   : > { %p15_p4 = scmp.ge.s32.totalorder %s18_s27, 4  }
 0x707   :  { %17 = sbr.rel (!%p15_p4) target bundleno = 1 (0x1), region = 82 }

</bundles_post_ra>
